<compile_context>
chip_gen: v5e
topology: v5e:2x2
jax: 0.10.0
libtpu: 0.0.40
codegen_flags: <defaults>
</compile_context>

<pallas_src>
import functools

import jax
import jax.numpy as jnp
from jax.experimental import pallas as pl
from jax.experimental.pallas import tpu as pltpu

CPAD = 128      # lane-dense channel padding for every GEMM output
MAX_TM = 512    # row-tile cap (amortizes per-step overhead, VMEM friendly)


def _round_up(x, m):
    return ((x + m - 1) // m) * m


# ----------------------------------------------------------------------------
# Pallas kernels
# ----------------------------------------------------------------------------
def _conv_gdn_act_kernel(p_ref, w_ref, g_ref, b_ref, a_ref, o_ref, *,
                         inverse, act):
    """Fused per-tile: y = patches @ W (bf16 MXU, f32 acc);
       u = (y*y) @ gamma + beta;  GDN: y*rsqrt(u) / IGDN: y*sqrt(u);
       then PReLU(alpha) or sigmoid."""
    y = jnp.dot(p_ref[...], w_ref[...], preferred_element_type=jnp.float32)
    y2 = (y * y).astype(jnp.bfloat16)
    u = jnp.dot(y2, g_ref[...], preferred_element_type=jnp.float32) + b_ref[...]
    if inverse:
        y = y * jnp.sqrt(u)
    else:
        y = y * jax.lax.rsqrt(u)
    if act == "prelu":
        a = a_ref[0]
        y = jnp.where(y >= 0.0, y, a * y)
    else:  # sigmoid on the EUP: exp + approximate reciprocal
        y = pl.reciprocal(1.0 + jnp.exp(-y), approx=True)
    o_ref[...] = y


def fused_conv_gdn_act(patches, w_mat, gamma, beta, alpha, *, inverse, act):
    """patches: (M, Kp) bf16; w_mat: (Kp, CPAD) bf16; gamma: (CPAD, CPAD) bf16;
    beta: (1, CPAD) f32; alpha: (1,) f32.  Returns (M, CPAD) f32."""
    M, Kp = patches.shape
    Cp = w_mat.shape[1]
    tm = min(_round_up(M, 8), MAX_TM)
    Mp = _round_up(M, tm)
    if Mp != M:
        patches = jnp.pad(patches, ((0, Mp - M), (0, 0)))
    grid = (Mp // tm,)
    kernel = functools.partial(_conv_gdn_act_kernel, inverse=inverse, act=act)
    out = pl.pallas_call(
        kernel,
        out_shape=jax.ShapeDtypeStruct((Mp, Cp), jnp.float32),
        grid=grid,
        in_specs=[
            pl.BlockSpec((tm, Kp), lambda i: (i, 0)),
            pl.BlockSpec((Kp, Cp), lambda i: (0, 0)),
            pl.BlockSpec((Cp, Cp), lambda i: (0, 0)),
            pl.BlockSpec((1, Cp), lambda i: (0, 0)),
            pl.BlockSpec(memory_space=pltpu.MemorySpace.SMEM),
        ],
        out_specs=pl.BlockSpec((tm, Cp), lambda i: (i, 0)),
        compiler_params=pltpu.CompilerParams(
            dimension_semantics=("parallel",),
            vmem_limit_bytes=32 * 1024 * 1024,
        ),
    )(patches, w_mat, gamma, beta, alpha)
    return out[:M]


def _channel_kernel(z_ref, n_ref, o_ref, *, noise_scale, sqrt_dim):
    z = z_ref[...]
    ss = jnp.sum(z * z, axis=1, keepdims=True)          # padded lanes are zero
    inv = jax.lax.rsqrt(jnp.maximum(ss, 1e-12))          # eps: avoid inf/nan
    o_ref[...] = sqrt_dim * z * inv + noise_scale * n_ref[...]


def channel_awgn(z, noise, snr):
    gamma = 10.0 ** (snr / 10.0)
    scale = float((1.0 / gamma) ** 0.5)
    B, D = z.shape
    Dp = _round_up(D, 128)                               # lane-dense last dim
    if Dp != D:
        z = jnp.pad(z, ((0, 0), (0, Dp - D)))
        noise = jnp.pad(noise, ((0, 0), (0, Dp - D)))
    out = pl.pallas_call(
        functools.partial(_channel_kernel, noise_scale=scale,
                          sqrt_dim=float(D) ** 0.5),
        out_shape=jax.ShapeDtypeStruct((B, Dp), jnp.float32),
        in_specs=[pl.BlockSpec(memory_space=pltpu.MemorySpace.VMEM)] * 2,
        out_specs=pl.BlockSpec(memory_space=pltpu.MemorySpace.VMEM),
    )(z, noise)
    return out[:, :D]


# ----------------------------------------------------------------------------
# JAX glue: im2col (bf16, K padded to 128), transposed-conv dilation, blocks
# ----------------------------------------------------------------------------
def im2col_bf16(x_nhwc, k, stride, padding, k_pad):
    x = x_nhwc.astype(jnp.bfloat16)          # halve patch HBM bytes
    B, H, W, C = x.shape
    if padding:
        x = jnp.pad(x, ((0, 0), (padding, padding), (padding, padding), (0, 0)))
    Ho = (H + 2 * padding - k) // stride + 1
    Wo = (W + 2 * padding - k) // stride + 1
    cols = []
    for kh in range(k):
        for kw in range(k):
            cols.append(x[:, kh:kh + stride * Ho:stride,
                          kw:kw + stride * Wo:stride, :])
    K = k * k * C
    assert k_pad >= K
    patches = jnp.stack(cols, axis=3).reshape(B * Ho * Wo, K)
    if k_pad > K:
        patches = jnp.pad(patches, ((0, 0), (0, k_pad - K)))
    return patches, Ho, Wo


def dilate_pad_for_deconv(x_nhwc, k, stride, padding, output_padding):
    B, H, W, C = x_nhwc.shape
    if stride > 1:
        Hd = (H - 1) * stride + 1
        Wd = (W - 1) * stride + 1
        xd = jnp.zeros((B, Hd, Wd, C), x_nhwc.dtype)
        xd = xd.at[:, ::stride, ::stride, :].set(x_nhwc)
    else:
        xd = x_nhwc
    p = k - 1 - padding
    return jnp.pad(xd, ((0, 0), (p, p + output_padding),
                        (p, p + output_padding), (0, 0)))


def conv_block_fwd(x_nhwc, p, k, stride, padding, cout):
    B = x_nhwc.shape[0]
    patches, Ho, Wo = im2col_bf16(x_nhwc, k, stride, padding, p["w"].shape[0])
    out = fused_conv_gdn_act(patches, p["w"], p["gamma"], p["beta"], p["alpha"],
                             inverse=False, act="prelu")
    return out[:, :cout].reshape(B, Ho, Wo, cout)


def deconv_block_fwd(x_nhwc, p, k, stride, padding, output_padding, cout, act):
    B = x_nhwc.shape[0]
    xd = dilate_pad_for_deconv(x_nhwc, k, stride, padding, output_padding)
    patches, Ho, Wo = im2col_bf16(xd, k, 1, 0, p["w"].shape[0])
    out = fused_conv_gdn_act(patches, p["w"], p["gamma"], p["beta"], p["alpha"],
                             inverse=True, act=act)
    return out[:, :cout].reshape(B, Ho, Wo, cout)


# ----------------------------------------------------------------------------
# Parameters: raw (PyTorch layout) init + one-time matmul-layout preprocessing
# ----------------------------------------------------------------------------
def init_params(key, k, Nc, enc_N):
    def cblock(kk, cin, cout):
        return {"w": 0.05 * jax.random.normal(kk, (cout, cin, k, k), jnp.float32),
                "gamma": 0.1 * jnp.eye(cout, dtype=jnp.float32),
                "beta": jnp.ones((cout,), jnp.float32),
                "alpha": jnp.float32(0.25)}

    def dblock(kk, cin, cout):
        return {"w": 0.05 * jax.random.normal(kk, (cin, cout, k, k), jnp.float32),
                "gamma": 0.1 * jnp.eye(cout, dtype=jnp.float32),
                "beta": jnp.ones((cout,), jnp.float32),
                "alpha": jnp.float32(0.25)}

    keys = jax.random.split(key, 7)
    return {
        "conv1": cblock(keys[0], 3, Nc),
        "conv2": cblock(keys[1], Nc, Nc),
        "conv3": cblock(keys[2], Nc, enc_N),
        "deconv1": dblock(keys[3], enc_N * 2, Nc),
        "deconv2": dblock(keys[4], Nc, Nc),
        "deconv3": dblock(keys[5], Nc * 2, Nc),
        "deconv4": dblock(keys[6], Nc + 3, 3),
    }


def prepare_params(raw, k):
    """One-time weight preprocessing hoisted out of forward():
    transpose/flip to matmul layout, zero-pad K and C to 128 multiples
    (lane-dense), cast MXU operands to bf16."""
    def prep(p, transposed):
        w = p["w"]
        if transposed:                       # ConvTranspose2d (cin, cout, kh, kw)
            cin, cout = w.shape[0], w.shape[1]
            w = jnp.transpose(jnp.flip(w, axis=(2, 3)), (2, 3, 0, 1))
        else:                                # Conv2d (cout, cin, kh, kw)
            cout, cin = w.shape[0], w.shape[1]
            w = jnp.transpose(w, (2, 3, 1, 0))
        K = k * k * cin
        Kp = _round_up(K, 128)
        w_mat = jnp.pad(w.reshape(K, cout),
                        ((0, Kp - K), (0, CPAD - cout))).astype(jnp.bfloat16)
        gamma = jnp.pad(p["gamma"],
                        ((0, CPAD - cout), (0, CPAD - cout))).astype(jnp.bfloat16)
        beta = jnp.pad(p["beta"], (0, CPAD - cout),
                       constant_values=1.0).reshape(1, CPAD).astype(jnp.float32)
        alpha = jnp.reshape(p["alpha"], (1,)).astype(jnp.float32)
        return {"w": w_mat, "gamma": gamma, "beta": beta, "alpha": alpha}

    return {name: prep(p, name.startswith("deconv")) for name, p in raw.items()}


# ----------------------------------------------------------------------------
# Full forward (jitted by the caller)
# ----------------------------------------------------------------------------
def forward(params, x_nchw, y_nchw, noise, *, snr, enc_shape, k, Nc):
    pad = (k - 1) // 2
    x = jnp.transpose(x_nchw, (0, 2, 3, 1))      # NCHW -> NHWC
    y = jnp.transpose(y_nchw, (0, 2, 3, 1))
    B = x.shape[0]
    eN, eH, eW = enc_shape

    # Shared-weight encoder: run encode(x) and encode_sm(y) as one batched pass.
    xy = jnp.concatenate([x, y], axis=0)
    h1 = conv_block_fwd(xy, params["conv1"], k, 2, pad, Nc)
    h2 = conv_block_fwd(h1, params["conv2"], k, 2, pad, Nc)
    h3 = conv_block_fwd(h2, params["conv3"], k, 1, pad, eN)

    z = jnp.transpose(h3[:B], (0, 3, 1, 2)).reshape(B, -1)   # nn.Flatten of NCHW
    s1 = h1[B:]                                              # NHWC skip feature
    s2 = h3[B:]                                              # == s2.view(...) NHWC

    # Channel (power norm + AWGN), Pallas kernel.
    z = channel_awgn(z, noise, snr)

    # decode_sm
    out = jnp.transpose(z.reshape(B, eN, eH, eW), (0, 2, 3, 1))
    out = jnp.concatenate([out, s2], axis=-1)                 # cat on channels
    out = deconv_block_fwd(out, params["deconv1"], k, 1, pad, 0, Nc, "prelu")
    out = deconv_block_fwd(out, params["deconv2"], k, 2, pad, 1, Nc, "prelu")
    out = jnp.concatenate([out, s1], axis=-1)
    out = deconv_block_fwd(out, params["deconv3"], k, 2, pad, 1, Nc, "prelu")
    out = jnp.concatenate([out, y], axis=-1)
    out = deconv_block_fwd(out, params["deconv4"], k, 1, pad, 0, 3, "sigmoid")
    return jnp.transpose(out, (0, 3, 1, 2))                   # back to NCHW


if __name__ == "__main__":
    B, H, W = 2, 16, 16
    kernel_sz, Nc_conv = 3, 8
    enc_shape = (4, H // 4, W // 4)              # (enc_N, 4, 4)
    z_dim = enc_shape[0] * enc_shape[1] * enc_shape[2]
    snr = 10.0

    key = jax.random.PRNGKey(0)
    kp, kx, ky, kn = jax.random.split(key, 4)
    raw_params = init_params(kp, kernel_sz, Nc_conv, enc_shape[0])
    params = prepare_params(raw_params, kernel_sz)   # one-time weight prep
    x = jax.random.uniform(kx, (B, 3, H, W), jnp.float32)
    y = jax.random.uniform(ky, (B, 3, H, W), jnp.float32)
    noise = jax.random.normal(kn, (B, z_dim), jnp.float32)

    fwd = jax.jit(functools.partial(forward, snr=snr, enc_shape=enc_shape,
                                    k=kernel_sz, Nc=Nc_conv))
    out = jax.block_until_ready(fwd(params, x, y, noise))
    assert out.shape == (B, 3, H, W), out.shape
    assert bool(jnp.all(jnp.isfinite(out)))
    print("KERNEL_OK")
</pallas_src>

<mosaic_0001>
module attributes {stable_mosaic.version = 11 : i64} {
  func.func @_conv_gdn_act_kernel(%arg0: i32, %arg1: memref<256x128xbf16, #tpu.memory_space<vmem>>, %arg2: memref<128x128xbf16, #tpu.memory_space<vmem>>, %arg3: memref<128x128xbf16, #tpu.memory_space<vmem>>, %arg4: memref<1x128xf32, #tpu.memory_space<vmem>>, %arg5: memref<1xf32, #tpu.memory_space<smem>>, %arg6: memref<256x128xf32, #tpu.memory_space<vmem>>) attributes {dimension_semantics = [#tpu.dimension_semantics<parallel>], iteration_bounds = array<i64: 1>, scalar_prefetch = 0 : i64, scratch_operands = 0 : i64, tpu.core_type = #tpu.core_type<tc>, window_params = [{transform_indices = @transform_0, window_bounds = array<i64: 256, 128>}, {pipeline_mode = #tpu.pipeline_mode<synchronous>, transform_indices = @transform_1, window_bounds = array<i64: 128, 128>}, {pipeline_mode = #tpu.pipeline_mode<synchronous>, transform_indices = @transform_2, window_bounds = array<i64: 128, 128>}, {pipeline_mode = #tpu.pipeline_mode<synchronous>, transform_indices = @transform_3, window_bounds = array<i64: 1, 128>}, {transform_indices = @transform_4, window_bounds = array<i64: 1>}, {transform_indices = @transform_5, window_bounds = array<i64: 256, 128>}]} {
    %c0 = arith.constant 0 : index
    %c0_0 = arith.constant 0 : index
    %0 = vector.load %arg1[%c0, %c0_0] : memref<256x128xbf16, #tpu.memory_space<vmem>>, vector<256x128xbf16>
    %c0_1 = arith.constant 0 : index
    %c0_2 = arith.constant 0 : index
    %1 = vector.load %arg2[%c0_1, %c0_2] : memref<128x128xbf16, #tpu.memory_space<vmem>>, vector<128x128xbf16>
    %cst = arith.constant dense<0.000000e+00> : vector<256x128xf32>
    %2 = tpu.matmul %0, %1, %cst {dimension_numbers = #tpu.dot_dimension_numbers<[1], [0], [0], [1], [0, 0, 1, 1], [], []>} : vector<256x128xbf16>, vector<128x128xbf16>, vector<256x128xf32> -> vector<256x128xf32>
    %3 = arith.mulf %2, %2 : vector<256x128xf32>
    %4 = arith.truncf %3 : vector<256x128xf32> to vector<256x128xbf16>
    %c0_3 = arith.constant 0 : index
    %c0_4 = arith.constant 0 : index
    %5 = vector.load %arg3[%c0_3, %c0_4] : memref<128x128xbf16, #tpu.memory_space<vmem>>, vector<128x128xbf16>
    %cst_5 = arith.constant dense<0.000000e+00> : vector<256x128xf32>
    %6 = tpu.matmul %4, %5, %cst_5 {dimension_numbers = #tpu.dot_dimension_numbers<[1], [0], [0], [1], [0, 0, 1, 1], [], []>} : vector<256x128xbf16>, vector<128x128xbf16>, vector<256x128xf32> -> vector<256x128xf32>
    %c0_6 = arith.constant 0 : index
    %c0_7 = arith.constant 0 : index
    %7 = vector.load %arg4[%c0_6, %c0_7] : memref<1x128xf32, #tpu.memory_space<vmem>>, vector<1x128xf32>
    %8 = vector.broadcast %7 : vector<1x128xf32> to vector<256x128xf32>
    %9 = arith.addf %6, %8 : vector<256x128xf32>
    %10 = math.rsqrt %9 : vector<256x128xf32>
    %11 = arith.mulf %2, %10 : vector<256x128xf32>
    %c0_8 = arith.constant 0 : index
    %12 = memref.load %arg5[%c0_8] : memref<1xf32, #tpu.memory_space<smem>>
    %cst_9 = arith.constant 0.000000e+00 : f32
    %13 = vector.broadcast %cst_9 : f32 to vector<256x128xf32>
    %14 = arith.cmpf oge, %11, %13 : vector<256x128xf32>
    %15 = vector.broadcast %12 : f32 to vector<256x128xf32>
    %16 = arith.mulf %15, %11 : vector<256x128xf32>
    %17 = arith.select %14, %11, %16 : vector<256x128xi1>, vector<256x128xf32>
    %c0_10 = arith.constant 0 : index
    %c0_11 = arith.constant 0 : index
    %18 = vector.load %arg6[%c0_10, %c0_11] : memref<256x128xf32, #tpu.memory_space<vmem>>, vector<256x128xf32>
    tpu.vector_store %arg6[%c0_10, %c0_11], %17 {strides = array<i32>} : memref<256x128xf32, #tpu.memory_space<vmem>>, vector<256x128xf32>,
    return
  }
  func.func @transform_0(%arg0: i32) -> (i32, i32) {
    %c0_i32 = arith.constant 0 : i32
    %c0_i32_0 = arith.constant 0 : i32
    return %arg0, %c0_i32 : i32, i32
  }
  func.func @transform_1(%arg0: i32) -> (i32, i32) {
    %c0_i32 = arith.constant 0 : i32
    %c0_i32_0 = arith.constant 0 : i32
    %c0_i32_1 = arith.constant 0 : i32
    return %c0_i32, %c0_i32_0 : i32, i32
  }
  func.func @transform_2(%arg0: i32) -> (i32, i32) {
    %c0_i32 = arith.constant 0 : i32
    %c0_i32_0 = arith.constant 0 : i32
    %c0_i32_1 = arith.constant 0 : i32
    return %c0_i32, %c0_i32_0 : i32, i32
  }
  func.func @transform_3(%arg0: i32) -> (i32, i32) {
    %c0_i32 = arith.constant 0 : i32
    %c0_i32_0 = arith.constant 0 : i32
    %c0_i32_1 = arith.constant 0 : i32
    return %c0_i32, %c0_i32_0 : i32, i32
  }
  func.func @transform_4(%arg0: i32) -> i32 {
    %c0_i32 = arith.constant 0 : i32
    %c0_i32_0 = arith.constant 0 : i32
    return %c0_i32 : i32
  }
  func.func @transform_5(%arg0: i32) -> (i32, i32) {
    %c0_i32 = arith.constant 0 : i32
    %c0_i32_0 = arith.constant 0 : i32
    return %arg0, %c0_i32 : i32, i32
  }
}

module attributes {stable_mosaic.version = 11 : i64} {
  func.func @_conv_gdn_act_kernel(%arg0: i32, %arg1: memref<64x128xbf16, #tpu.memory_space<vmem>>, %arg2: memref<128x128xbf16, #tpu.memory_space<vmem>>, %arg3: memref<128x128xbf16, #tpu.memory_space<vmem>>, %arg4: memref<1x128xf32, #tpu.memory_space<vmem>>, %arg5: memref<1xf32, #tpu.memory_space<smem>>, %arg6: memref<64x128xf32, #tpu.memory_space<vmem>>) attributes {dimension_semantics = [#tpu.dimension_semantics<parallel>], iteration_bounds = array<i64: 1>, scalar_prefetch = 0 : i64, scratch_operands = 0 : i64, tpu.core_type = #tpu.core_type<tc>, window_params = [{transform_indices = @transform_0, window_bounds = array<i64: 64, 128>}, {pipeline_mode = #tpu.pipeline_mode<synchronous>, transform_indices = @transform_1, window_bounds = array<i64: 128, 128>}, {pipeline_mode = #tpu.pipeline_mode<synchronous>, transform_indices = @transform_2, window_bounds = array<i64: 128, 128>}, {pipeline_mode = #tpu.pipeline_mode<synchronous>, transform_indices = @transform_3, window_bounds = array<i64: 1, 128>}, {transform_indices = @transform_4, window_bounds = array<i64: 1>}, {transform_indices = @transform_5, window_bounds = array<i64: 64, 128>}]} {
    %c0 = arith.constant 0 : index
    %c0_0 = arith.constant 0 : index
    %0 = vector.load %arg1[%c0, %c0_0] : memref<64x128xbf16, #tpu.memory_space<vmem>>, vector<64x128xbf16>
    %c0_1 = arith.constant 0 : index
    %c0_2 = arith.constant 0 : index
    %1 = vector.load %arg2[%c0_1, %c0_2] : memref<128x128xbf16, #tpu.memory_space<vmem>>, vector<128x128xbf16>
    %cst = arith.constant dense<0.000000e+00> : vector<64x128xf32>
    %2 = tpu.matmul %0, %1, %cst {dimension_numbers = #tpu.dot_dimension_numbers<[1], [0], [0], [1], [0, 0, 1, 1], [], []>} : vector<64x128xbf16>, vector<128x128xbf16>, vector<64x128xf32> -> vector<64x128xf32>
    %3 = arith.mulf %2, %2 : vector<64x128xf32>
    %4 = arith.truncf %3 : vector<64x128xf32> to vector<64x128xbf16>
    %c0_3 = arith.constant 0 : index
    %c0_4 = arith.constant 0 : index
    %5 = vector.load %arg3[%c0_3, %c0_4] : memref<128x128xbf16, #tpu.memory_space<vmem>>, vector<128x128xbf16>
    %cst_5 = arith.constant dense<0.000000e+00> : vector<64x128xf32>
    %6 = tpu.matmul %4, %5, %cst_5 {dimension_numbers = #tpu.dot_dimension_numbers<[1], [0], [0], [1], [0, 0, 1, 1], [], []>} : vector<64x128xbf16>, vector<128x128xbf16>, vector<64x128xf32> -> vector<64x128xf32>
    %c0_6 = arith.constant 0 : index
    %c0_7 = arith.constant 0 : index
    %7 = vector.load %arg4[%c0_6, %c0_7] : memref<1x128xf32, #tpu.memory_space<vmem>>, vector<1x128xf32>
    %8 = vector.broadcast %7 : vector<1x128xf32> to vector<64x128xf32>
    %9 = arith.addf %6, %8 : vector<64x128xf32>
    %10 = math.rsqrt %9 : vector<64x128xf32>
    %11 = arith.mulf %2, %10 : vector<64x128xf32>
    %c0_8 = arith.constant 0 : index
    %12 = memref.load %arg5[%c0_8] : memref<1xf32, #tpu.memory_space<smem>>
    %cst_9 = arith.constant 0.000000e+00 : f32
    %13 = vector.broadcast %cst_9 : f32 to vector<64x128xf32>
    %14 = arith.cmpf oge, %11, %13 : vector<64x128xf32>
    %15 = vector.broadcast %12 : f32 to vector<64x128xf32>
    %16 = arith.mulf %15, %11 : vector<64x128xf32>
    %17 = arith.select %14, %11, %16 : vector<64x128xi1>, vector<64x128xf32>
    %c0_10 = arith.constant 0 : index
    %c0_11 = arith.constant 0 : index
    %18 = vector.load %arg6[%c0_10, %c0_11] : memref<64x128xf32, #tpu.memory_space<vmem>>, vector<64x128xf32>
    tpu.vector_store %arg6[%c0_10, %c0_11], %17 {strides = array<i32>} : memref<64x128xf32, #tpu.memory_space<vmem>>, vector<64x128xf32>,
    return
  }
  func.func @transform_0(%arg0: i32) -> (i32, i32) {
    %c0_i32 = arith.constant 0 : i32
    %c0_i32_0 = arith.constant 0 : i32
    return %arg0, %c0_i32 : i32, i32
  }
  func.func @transform_1(%arg0: i32) -> (i32, i32) {
    %c0_i32 = arith.constant 0 : i32
    %c0_i32_0 = arith.constant 0 : i32
    %c0_i32_1 = arith.constant 0 : i32
    return %c0_i32, %c0_i32_0 : i32, i32
  }
  func.func @transform_2(%arg0: i32) -> (i32, i32) {
    %c0_i32 = arith.constant 0 : i32
    %c0_i32_0 = arith.constant 0 : i32
    %c0_i32_1 = arith.constant 0 : i32
    return %c0_i32, %c0_i32_0 : i32, i32
  }
  func.func @transform_3(%arg0: i32) -> (i32, i32) {
    %c0_i32 = arith.constant 0 : i32
    %c0_i32_0 = arith.constant 0 : i32
    %c0_i32_1 = arith.constant 0 : i32
    return %c0_i32, %c0_i32_0 : i32, i32
  }
  func.func @transform_4(%arg0: i32) -> i32 {
    %c0_i32 = arith.constant 0 : i32
    %c0_i32_0 = arith.constant 0 : i32
    return %c0_i32 : i32
  }
  func.func @transform_5(%arg0: i32) -> (i32, i32) {
    %c0_i32 = arith.constant 0 : i32
    %c0_i32_0 = arith.constant 0 : i32
    return %arg0, %c0_i32 : i32, i32
  }
}

module attributes {stable_mosaic.version = 11 : i64} {
  func.func @_channel_kernel(%arg0: memref<2x128xf32, #tpu.memory_space<vmem>>, %arg1: memref<2x128xf32, #tpu.memory_space<vmem>>, %arg2: memref<2x128xf32, #tpu.memory_space<vmem>>) attributes {dimension_semantics = [], scalar_prefetch = 0 : i64, scratch_operands = 0 : i64, tpu.core_type = #tpu.core_type<tc>} {
    %c0 = arith.constant 0 : index
    %c0_0 = arith.constant 0 : index
    %0 = vector.load %arg0[%c0, %c0_0] : memref<2x128xf32, #tpu.memory_space<vmem>>, vector<2x128xf32>
    %1 = arith.mulf %0, %0 : vector<2x128xf32>
    %cst = arith.constant dense<0.000000e+00> : vector<2xf32>
    %2 = vector.multi_reduction <add>, %1, %cst [1] : vector<2x128xf32> to vector<2xf32>
    %3 = vector.shape_cast %2 : vector<2xf32> to vector<2x1xf32>
    %cst_1 = arith.constant 9.99999996E-13 : f32
    %4 = vector.broadcast %cst_1 : f32 to vector<2x1xf32>
    %5 = arith.maximumf %3, %4 : vector<2x1xf32>
    %6 = math.rsqrt %5 : vector<2x1xf32>
    %cst_2 = arith.constant 8.000000e+00 : f32
    %7 = vector.broadcast %cst_2 : f32 to vector<2x128xf32>
    %8 = arith.mulf %7, %0 : vector<2x128xf32>
    %9 = vector.broadcast %6 : vector<2x1xf32> to vector<2x128xf32>
    %10 = arith.mulf %8, %9 : vector<2x128xf32>
    %c0_3 = arith.constant 0 : index
    %c0_4 = arith.constant 0 : index
    %11 = vector.load %arg1[%c0_3, %c0_4] : memref<2x128xf32, #tpu.memory_space<vmem>>, vector<2x128xf32>
    %cst_5 = arith.constant 0.316227764 : f32
    %12 = vector.broadcast %cst_5 : f32 to vector<2x128xf32>
    %13 = arith.mulf %12, %11 : vector<2x128xf32>
    %14 = arith.addf %10, %13 : vector<2x128xf32>
    %c0_6 = arith.constant 0 : index
    %c0_7 = arith.constant 0 : index
    %15 = vector.load %arg2[%c0_6, %c0_7] : memref<2x128xf32, #tpu.memory_space<vmem>>, vector<2x128xf32>
    tpu.vector_store %arg2[%c0_6, %c0_7], %14 {strides = array<i32>} : memref<2x128xf32, #tpu.memory_space<vmem>>, vector<2x128xf32>,
    return
  }
}

module attributes {stable_mosaic.version = 11 : i64} {
  func.func @_conv_gdn_act_kernel(%arg0: i32, %arg1: memref<32x128xbf16, #tpu.memory_space<vmem>>, %arg2: memref<128x128xbf16, #tpu.memory_space<vmem>>, %arg3: memref<128x128xbf16, #tpu.memory_space<vmem>>, %arg4: memref<1x128xf32, #tpu.memory_space<vmem>>, %arg5: memref<1xf32, #tpu.memory_space<smem>>, %arg6: memref<32x128xf32, #tpu.memory_space<vmem>>) attributes {dimension_semantics = [#tpu.dimension_semantics<parallel>], iteration_bounds = array<i64: 1>, scalar_prefetch = 0 : i64, scratch_operands = 0 : i64, tpu.core_type = #tpu.core_type<tc>, window_params = [{transform_indices = @transform_0, window_bounds = array<i64: 32, 128>}, {pipeline_mode = #tpu.pipeline_mode<synchronous>, transform_indices = @transform_1, window_bounds = array<i64: 128, 128>}, {pipeline_mode = #tpu.pipeline_mode<synchronous>, transform_indices = @transform_2, window_bounds = array<i64: 128, 128>}, {pipeline_mode = #tpu.pipeline_mode<synchronous>, transform_indices = @transform_3, window_bounds = array<i64: 1, 128>}, {transform_indices = @transform_4, window_bounds = array<i64: 1>}, {transform_indices = @transform_5, window_bounds = array<i64: 32, 128>}]} {
    %c0 = arith.constant 0 : index
    %c0_0 = arith.constant 0 : index
    %0 = vector.load %arg1[%c0, %c0_0] : memref<32x128xbf16, #tpu.memory_space<vmem>>, vector<32x128xbf16>
    %c0_1 = arith.constant 0 : index
    %c0_2 = arith.constant 0 : index
    %1 = vector.load %arg2[%c0_1, %c0_2] : memref<128x128xbf16, #tpu.memory_space<vmem>>, vector<128x128xbf16>
    %cst = arith.constant dense<0.000000e+00> : vector<32x128xf32>
    %2 = tpu.matmul %0, %1, %cst {dimension_numbers = #tpu.dot_dimension_numbers<[1], [0], [0], [1], [0, 0, 1, 1], [], []>} : vector<32x128xbf16>, vector<128x128xbf16>, vector<32x128xf32> -> vector<32x128xf32>
    %3 = arith.mulf %2, %2 : vector<32x128xf32>
    %4 = arith.truncf %3 : vector<32x128xf32> to vector<32x128xbf16>
    %c0_3 = arith.constant 0 : index
    %c0_4 = arith.constant 0 : index
    %5 = vector.load %arg3[%c0_3, %c0_4] : memref<128x128xbf16, #tpu.memory_space<vmem>>, vector<128x128xbf16>
    %cst_5 = arith.constant dense<0.000000e+00> : vector<32x128xf32>
    %6 = tpu.matmul %4, %5, %cst_5 {dimension_numbers = #tpu.dot_dimension_numbers<[1], [0], [0], [1], [0, 0, 1, 1], [], []>} : vector<32x128xbf16>, vector<128x128xbf16>, vector<32x128xf32> -> vector<32x128xf32>
    %c0_6 = arith.constant 0 : index
    %c0_7 = arith.constant 0 : index
    %7 = vector.load %arg4[%c0_6, %c0_7] : memref<1x128xf32, #tpu.memory_space<vmem>>, vector<1x128xf32>
    %8 = vector.broadcast %7 : vector<1x128xf32> to vector<32x128xf32>
    %9 = arith.addf %6, %8 : vector<32x128xf32>
    %10 = math.sqrt %9 : vector<32x128xf32>
    %11 = arith.mulf %2, %10 : vector<32x128xf32>
    %c0_8 = arith.constant 0 : index
    %12 = memref.load %arg5[%c0_8] : memref<1xf32, #tpu.memory_space<smem>>
    %cst_9 = arith.constant 0.000000e+00 : f32
    %13 = vector.broadcast %cst_9 : f32 to vector<32x128xf32>
    %14 = arith.cmpf oge, %11, %13 : vector<32x128xf32>
    %15 = vector.broadcast %12 : f32 to vector<32x128xf32>
    %16 = arith.mulf %15, %11 : vector<32x128xf32>
    %17 = arith.select %14, %11, %16 : vector<32x128xi1>, vector<32x128xf32>
    %c0_10 = arith.constant 0 : index
    %c0_11 = arith.constant 0 : index
    %18 = vector.load %arg6[%c0_10, %c0_11] : memref<32x128xf32, #tpu.memory_space<vmem>>, vector<32x128xf32>
    tpu.vector_store %arg6[%c0_10, %c0_11], %17 {strides = array<i32>} : memref<32x128xf32, #tpu.memory_space<vmem>>, vector<32x128xf32>,
    return
  }
  func.func @transform_0(%arg0: i32) -> (i32, i32) {
    %c0_i32 = arith.constant 0 : i32
    %c0_i32_0 = arith.constant 0 : i32
    return %arg0, %c0_i32 : i32, i32
  }
  func.func @transform_1(%arg0: i32) -> (i32, i32) {
    %c0_i32 = arith.constant 0 : i32
    %c0_i32_0 = arith.constant 0 : i32
    %c0_i32_1 = arith.constant 0 : i32
    return %c0_i32, %c0_i32_0 : i32, i32
  }
  func.func @transform_2(%arg0: i32) -> (i32, i32) {
    %c0_i32 = arith.constant 0 : i32
    %c0_i32_0 = arith.constant 0 : i32
    %c0_i32_1 = arith.constant 0 : i32
    return %c0_i32, %c0_i32_0 : i32, i32
  }
  func.func @transform_3(%arg0: i32) -> (i32, i32) {
    %c0_i32 = arith.constant 0 : i32
    %c0_i32_0 = arith.constant 0 : i32
    %c0_i32_1 = arith.constant 0 : i32
    return %c0_i32, %c0_i32_0 : i32, i32
  }
  func.func @transform_4(%arg0: i32) -> i32 {
    %c0_i32 = arith.constant 0 : i32
    %c0_i32_0 = arith.constant 0 : i32
    return %c0_i32 : i32
  }
  func.func @transform_5(%arg0: i32) -> (i32, i32) {
    %c0_i32 = arith.constant 0 : i32
    %c0_i32_0 = arith.constant 0 : i32
    return %arg0, %c0_i32 : i32, i32
  }
}

module attributes {stable_mosaic.version = 11 : i64} {
  func.func @_conv_gdn_act_kernel(%arg0: i32, %arg1: memref<128x128xbf16, #tpu.memory_space<vmem>>, %arg2: memref<128x128xbf16, #tpu.memory_space<vmem>>, %arg3: memref<128x128xbf16, #tpu.memory_space<vmem>>, %arg4: memref<1x128xf32, #tpu.memory_space<vmem>>, %arg5: memref<1xf32, #tpu.memory_space<smem>>, %arg6: memref<128x128xf32, #tpu.memory_space<vmem>>) attributes {dimension_semantics = [#tpu.dimension_semantics<parallel>], iteration_bounds = array<i64: 1>, scalar_prefetch = 0 : i64, scratch_operands = 0 : i64, tpu.core_type = #tpu.core_type<tc>, window_params = [{transform_indices = @transform_0, window_bounds = array<i64: 128, 128>}, {pipeline_mode = #tpu.pipeline_mode<synchronous>, transform_indices = @transform_1, window_bounds = array<i64: 128, 128>}, {pipeline_mode = #tpu.pipeline_mode<synchronous>, transform_indices = @transform_2, window_bounds = array<i64: 128, 128>}, {pipeline_mode = #tpu.pipeline_mode<synchronous>, transform_indices = @transform_3, window_bounds = array<i64: 1, 128>}, {transform_indices = @transform_4, window_bounds = array<i64: 1>}, {transform_indices = @transform_5, window_bounds = array<i64: 128, 128>}]} {
    %c0 = arith.constant 0 : index
    %c0_0 = arith.constant 0 : index
    %0 = vector.load %arg1[%c0, %c0_0] : memref<128x128xbf16, #tpu.memory_space<vmem>>, vector<128x128xbf16>
    %c0_1 = arith.constant 0 : index
    %c0_2 = arith.constant 0 : index
    %1 = vector.load %arg2[%c0_1, %c0_2] : memref<128x128xbf16, #tpu.memory_space<vmem>>, vector<128x128xbf16>
    %cst = arith.constant dense<0.000000e+00> : vector<128x128xf32>
    %2 = tpu.matmul %0, %1, %cst {dimension_numbers = #tpu.dot_dimension_numbers<[1], [0], [0], [1], [0, 0, 1, 1], [], []>} : vector<128x128xbf16>, vector<128x128xbf16>, vector<128x128xf32> -> vector<128x128xf32>
    %3 = arith.mulf %2, %2 : vector<128x128xf32>
    %4 = arith.truncf %3 : vector<128x128xf32> to vector<128x128xbf16>
    %c0_3 = arith.constant 0 : index
    %c0_4 = arith.constant 0 : index
    %5 = vector.load %arg3[%c0_3, %c0_4] : memref<128x128xbf16, #tpu.memory_space<vmem>>, vector<128x128xbf16>
    %cst_5 = arith.constant dense<0.000000e+00> : vector<128x128xf32>
    %6 = tpu.matmul %4, %5, %cst_5 {dimension_numbers = #tpu.dot_dimension_numbers<[1], [0], [0], [1], [0, 0, 1, 1], [], []>} : vector<128x128xbf16>, vector<128x128xbf16>, vector<128x128xf32> -> vector<128x128xf32>
    %c0_6 = arith.constant 0 : index
    %c0_7 = arith.constant 0 : index
    %7 = vector.load %arg4[%c0_6, %c0_7] : memref<1x128xf32, #tpu.memory_space<vmem>>, vector<1x128xf32>
    %8 = vector.broadcast %7 : vector<1x128xf32> to vector<128x128xf32>
    %9 = arith.addf %6, %8 : vector<128x128xf32>
    %10 = math.sqrt %9 : vector<128x128xf32>
    %11 = arith.mulf %2, %10 : vector<128x128xf32>
    %c0_8 = arith.constant 0 : index
    %12 = memref.load %arg5[%c0_8] : memref<1xf32, #tpu.memory_space<smem>>
    %cst_9 = arith.constant 0.000000e+00 : f32
    %13 = vector.broadcast %cst_9 : f32 to vector<128x128xf32>
    %14 = arith.cmpf oge, %11, %13 : vector<128x128xf32>
    %15 = vector.broadcast %12 : f32 to vector<128x128xf32>
    %16 = arith.mulf %15, %11 : vector<128x128xf32>
    %17 = arith.select %14, %11, %16 : vector<128x128xi1>, vector<128x128xf32>
    %c0_10 = arith.constant 0 : index
    %c0_11 = arith.constant 0 : index
    %18 = vector.load %arg6[%c0_10, %c0_11] : memref<128x128xf32, #tpu.memory_space<vmem>>, vector<128x128xf32>
    tpu.vector_store %arg6[%c0_10, %c0_11], %17 {strides = array<i32>} : memref<128x128xf32, #tpu.memory_space<vmem>>, vector<128x128xf32>,
    return
  }
  func.func @transform_0(%arg0: i32) -> (i32, i32) {
    %c0_i32 = arith.constant 0 : i32
    %c0_i32_0 = arith.constant 0 : i32
    return %arg0, %c0_i32 : i32, i32
  }
  func.func @transform_1(%arg0: i32) -> (i32, i32) {
    %c0_i32 = arith.constant 0 : i32
    %c0_i32_0 = arith.constant 0 : i32
    %c0_i32_1 = arith.constant 0 : i32
    return %c0_i32, %c0_i32_0 : i32, i32
  }
  func.func @transform_2(%arg0: i32) -> (i32, i32) {
    %c0_i32 = arith.constant 0 : i32
    %c0_i32_0 = arith.constant 0 : i32
    %c0_i32_1 = arith.constant 0 : i32
    return %c0_i32, %c0_i32_0 : i32, i32
  }
  func.func @transform_3(%arg0: i32) -> (i32, i32) {
    %c0_i32 = arith.constant 0 : i32
    %c0_i32_0 = arith.constant 0 : i32
    %c0_i32_1 = arith.constant 0 : i32
    return %c0_i32, %c0_i32_0 : i32, i32
  }
  func.func @transform_4(%arg0: i32) -> i32 {
    %c0_i32 = arith.constant 0 : i32
    %c0_i32_0 = arith.constant 0 : i32
    return %c0_i32 : i32
  }
  func.func @transform_5(%arg0: i32) -> (i32, i32) {
    %c0_i32 = arith.constant 0 : i32
    %c0_i32_0 = arith.constant 0 : i32
    return %arg0, %c0_i32 : i32, i32
  }
}

module attributes {stable_mosaic.version = 11 : i64} {
  func.func @_conv_gdn_act_kernel(%arg0: i32, %arg1: memref<512x256xbf16, #tpu.memory_space<vmem>>, %arg2: memref<256x128xbf16, #tpu.memory_space<vmem>>, %arg3: memref<128x128xbf16, #tpu.memory_space<vmem>>, %arg4: memref<1x128xf32, #tpu.memory_space<vmem>>, %arg5: memref<1xf32, #tpu.memory_space<smem>>, %arg6: memref<512x128xf32, #tpu.memory_space<vmem>>) attributes {dimension_semantics = [#tpu.dimension_semantics<parallel>], iteration_bounds = array<i64: 1>, scalar_prefetch = 0 : i64, scratch_operands = 0 : i64, tpu.core_type = #tpu.core_type<tc>, window_params = [{transform_indices = @transform_0, window_bounds = array<i64: 512, 256>}, {pipeline_mode = #tpu.pipeline_mode<synchronous>, transform_indices = @transform_1, window_bounds = array<i64: 256, 128>}, {pipeline_mode = #tpu.pipeline_mode<synchronous>, transform_indices = @transform_2, window_bounds = array<i64: 128, 128>}, {pipeline_mode = #tpu.pipeline_mode<synchronous>, transform_indices = @transform_3, window_bounds = array<i64: 1, 128>}, {transform_indices = @transform_4, window_bounds = array<i64: 1>}, {transform_indices = @transform_5, window_bounds = array<i64: 512, 128>}]} {
    %c0 = arith.constant 0 : index
    %c0_0 = arith.constant 0 : index
    %0 = vector.load %arg1[%c0, %c0_0] : memref<512x256xbf16, #tpu.memory_space<vmem>>, vector<512x256xbf16>
    %c0_1 = arith.constant 0 : index
    %c0_2 = arith.constant 0 : index
    %1 = vector.load %arg2[%c0_1, %c0_2] : memref<256x128xbf16, #tpu.memory_space<vmem>>, vector<256x128xbf16>
    %cst = arith.constant dense<0.000000e+00> : vector<512x128xf32>
    %2 = tpu.matmul %0, %1, %cst {dimension_numbers = #tpu.dot_dimension_numbers<[1], [0], [0], [1], [0, 0, 1, 1], [], []>} : vector<512x256xbf16>, vector<256x128xbf16>, vector<512x128xf32> -> vector<512x128xf32>
    %3 = arith.mulf %2, %2 : vector<512x128xf32>
    %4 = arith.truncf %3 : vector<512x128xf32> to vector<512x128xbf16>
    %c0_3 = arith.constant 0 : index
    %c0_4 = arith.constant 0 : index
    %5 = vector.load %arg3[%c0_3, %c0_4] : memref<128x128xbf16, #tpu.memory_space<vmem>>, vector<128x128xbf16>
    %cst_5 = arith.constant dense<0.000000e+00> : vector<512x128xf32>
    %6 = tpu.matmul %4, %5, %cst_5 {dimension_numbers = #tpu.dot_dimension_numbers<[1], [0], [0], [1], [0, 0, 1, 1], [], []>} : vector<512x128xbf16>, vector<128x128xbf16>, vector<512x128xf32> -> vector<512x128xf32>
    %c0_6 = arith.constant 0 : index
    %c0_7 = arith.constant 0 : index
    %7 = vector.load %arg4[%c0_6, %c0_7] : memref<1x128xf32, #tpu.memory_space<vmem>>, vector<1x128xf32>
    %8 = vector.broadcast %7 : vector<1x128xf32> to vector<512x128xf32>
    %9 = arith.addf %6, %8 : vector<512x128xf32>
    %10 = math.sqrt %9 : vector<512x128xf32>
    %11 = arith.mulf %2, %10 : vector<512x128xf32>
    %c0_8 = arith.constant 0 : index
    %12 = memref.load %arg5[%c0_8] : memref<1xf32, #tpu.memory_space<smem>>
    %cst_9 = arith.constant 0.000000e+00 : f32
    %13 = vector.broadcast %cst_9 : f32 to vector<512x128xf32>
    %14 = arith.cmpf oge, %11, %13 : vector<512x128xf32>
    %15 = vector.broadcast %12 : f32 to vector<512x128xf32>
    %16 = arith.mulf %15, %11 : vector<512x128xf32>
    %17 = arith.select %14, %11, %16 : vector<512x128xi1>, vector<512x128xf32>
    %c0_10 = arith.constant 0 : index
    %c0_11 = arith.constant 0 : index
    %18 = vector.load %arg6[%c0_10, %c0_11] : memref<512x128xf32, #tpu.memory_space<vmem>>, vector<512x128xf32>
    tpu.vector_store %arg6[%c0_10, %c0_11], %17 {strides = array<i32>} : memref<512x128xf32, #tpu.memory_space<vmem>>, vector<512x128xf32>,
    return
  }
  func.func @transform_0(%arg0: i32) -> (i32, i32) {
    %c0_i32 = arith.constant 0 : i32
    %c0_i32_0 = arith.constant 0 : i32
    return %arg0, %c0_i32 : i32, i32
  }
  func.func @transform_1(%arg0: i32) -> (i32, i32) {
    %c0_i32 = arith.constant 0 : i32
    %c0_i32_0 = arith.constant 0 : i32
    %c0_i32_1 = arith.constant 0 : i32
    return %c0_i32, %c0_i32_0 : i32, i32
  }
  func.func @transform_2(%arg0: i32) -> (i32, i32) {
    %c0_i32 = arith.constant 0 : i32
    %c0_i32_0 = arith.constant 0 : i32
    %c0_i32_1 = arith.constant 0 : i32
    return %c0_i32, %c0_i32_0 : i32, i32
  }
  func.func @transform_3(%arg0: i32) -> (i32, i32) {
    %c0_i32 = arith.constant 0 : i32
    %c0_i32_0 = arith.constant 0 : i32
    %c0_i32_1 = arith.constant 0 : i32
    return %c0_i32, %c0_i32_0 : i32, i32
  }
  func.func @transform_4(%arg0: i32) -> i32 {
    %c0_i32 = arith.constant 0 : i32
    %c0_i32_0 = arith.constant 0 : i32
    return %c0_i32 : i32
  }
  func.func @transform_5(%arg0: i32) -> (i32, i32) {
    %c0_i32 = arith.constant 0 : i32
    %c0_i32_0 = arith.constant 0 : i32
    return %arg0, %c0_i32 : i32, i32
  }
}

module attributes {stable_mosaic.version = 11 : i64} {
  func.func @_conv_gdn_act_kernel(%arg0: i32, %arg1: memref<512x128xbf16, #tpu.memory_space<vmem>>, %arg2: memref<128x128xbf16, #tpu.memory_space<vmem>>, %arg3: memref<128x128xbf16, #tpu.memory_space<vmem>>, %arg4: memref<1x128xf32, #tpu.memory_space<vmem>>, %arg5: memref<1xf32, #tpu.memory_space<smem>>, %arg6: memref<512x128xf32, #tpu.memory_space<vmem>>) attributes {dimension_semantics = [#tpu.dimension_semantics<parallel>], iteration_bounds = array<i64: 1>, scalar_prefetch = 0 : i64, scratch_operands = 0 : i64, tpu.core_type = #tpu.core_type<tc>, window_params = [{transform_indices = @transform_0, window_bounds = array<i64: 512, 128>}, {pipeline_mode = #tpu.pipeline_mode<synchronous>, transform_indices = @transform_1, window_bounds = array<i64: 128, 128>}, {pipeline_mode = #tpu.pipeline_mode<synchronous>, transform_indices = @transform_2, window_bounds = array<i64: 128, 128>}, {pipeline_mode = #tpu.pipeline_mode<synchronous>, transform_indices = @transform_3, window_bounds = array<i64: 1, 128>}, {transform_indices = @transform_4, window_bounds = array<i64: 1>}, {transform_indices = @transform_5, window_bounds = array<i64: 512, 128>}]} {
    %c0 = arith.constant 0 : index
    %c0_0 = arith.constant 0 : index
    %0 = vector.load %arg1[%c0, %c0_0] : memref<512x128xbf16, #tpu.memory_space<vmem>>, vector<512x128xbf16>
    %c0_1 = arith.constant 0 : index
    %c0_2 = arith.constant 0 : index
    %1 = vector.load %arg2[%c0_1, %c0_2] : memref<128x128xbf16, #tpu.memory_space<vmem>>, vector<128x128xbf16>
    %cst = arith.constant dense<0.000000e+00> : vector<512x128xf32>
    %2 = tpu.matmul %0, %1, %cst {dimension_numbers = #tpu.dot_dimension_numbers<[1], [0], [0], [1], [0, 0, 1, 1], [], []>} : vector<512x128xbf16>, vector<128x128xbf16>, vector<512x128xf32> -> vector<512x128xf32>
    %3 = arith.mulf %2, %2 : vector<512x128xf32>
    %4 = arith.truncf %3 : vector<512x128xf32> to vector<512x128xbf16>
    %c0_3 = arith.constant 0 : index
    %c0_4 = arith.constant 0 : index
    %5 = vector.load %arg3[%c0_3, %c0_4] : memref<128x128xbf16, #tpu.memory_space<vmem>>, vector<128x128xbf16>
    %cst_5 = arith.constant dense<0.000000e+00> : vector<512x128xf32>
    %6 = tpu.matmul %4, %5, %cst_5 {dimension_numbers = #tpu.dot_dimension_numbers<[1], [0], [0], [1], [0, 0, 1, 1], [], []>} : vector<512x128xbf16>, vector<128x128xbf16>, vector<512x128xf32> -> vector<512x128xf32>
    %c0_6 = arith.constant 0 : index
    %c0_7 = arith.constant 0 : index
    %7 = vector.load %arg4[%c0_6, %c0_7] : memref<1x128xf32, #tpu.memory_space<vmem>>, vector<1x128xf32>
    %8 = vector.broadcast %7 : vector<1x128xf32> to vector<512x128xf32>
    %9 = arith.addf %6, %8 : vector<512x128xf32>
    %10 = math.sqrt %9 : vector<512x128xf32>
    %11 = arith.mulf %2, %10 : vector<512x128xf32>
    %cst_8 = arith.constant 0.000000e+00 : f32
    %12 = vector.broadcast %cst_8 : f32 to vector<512x128xf32>
    %13 = arith.subf %12, %11 : vector<512x128xf32>
    %14 = math.exp %13 : vector<512x128xf32>
    %cst_9 = arith.constant 1.000000e+00 : f32
    %15 = vector.broadcast %cst_9 : f32 to vector<512x128xf32>
    %16 = arith.addf %15, %14 : vector<512x128xf32>
    %17 = tpu.reciprocal %16 {approx = true} : vector<512x128xf32> -> vector<512x128xf32>
    %c0_10 = arith.constant 0 : index
    %c0_11 = arith.constant 0 : index
    %18 = vector.load %arg6[%c0_10, %c0_11] : memref<512x128xf32, #tpu.memory_space<vmem>>, vector<512x128xf32>
    tpu.vector_store %arg6[%c0_10, %c0_11], %17 {strides = array<i32>} : memref<512x128xf32, #tpu.memory_space<vmem>>, vector<512x128xf32>,
    return
  }
  func.func @transform_0(%arg0: i32) -> (i32, i32) {
    %c0_i32 = arith.constant 0 : i32
    %c0_i32_0 = arith.constant 0 : i32
    return %arg0, %c0_i32 : i32, i32
  }
  func.func @transform_1(%arg0: i32) -> (i32, i32) {
    %c0_i32 = arith.constant 0 : i32
    %c0_i32_0 = arith.constant 0 : i32
    %c0_i32_1 = arith.constant 0 : i32
    return %c0_i32, %c0_i32_0 : i32, i32
  }
  func.func @transform_2(%arg0: i32) -> (i32, i32) {
    %c0_i32 = arith.constant 0 : i32
    %c0_i32_0 = arith.constant 0 : i32
    %c0_i32_1 = arith.constant 0 : i32
    return %c0_i32, %c0_i32_0 : i32, i32
  }
  func.func @transform_3(%arg0: i32) -> (i32, i32) {
    %c0_i32 = arith.constant 0 : i32
    %c0_i32_0 = arith.constant 0 : i32
    %c0_i32_1 = arith.constant 0 : i32
    return %c0_i32, %c0_i32_0 : i32, i32
  }
  func.func @transform_4(%arg0: i32) -> i32 {
    %c0_i32 = arith.constant 0 : i32
    %c0_i32_0 = arith.constant 0 : i32
    return %c0_i32 : i32
  }
  func.func @transform_5(%arg0: i32) -> (i32, i32) {
    %c0_i32 = arith.constant 0 : i32
    %c0_i32_0 = arith.constant 0 : i32
    return %arg0, %c0_i32 : i32, i32
  }
}

</mosaic_0001>

<bundles_post_ra>
// kernel: forward.8
= control target key start
LH: loop header
LB: loop body
LE: loop exit
PB: predicated region body
PF: predicated region fallthrough
CT: control target
= control target key end

     0   :  { %s1834_s1 = inlined_call_operand.vmem [shape: bf16[128,128], index: 1, kind: input, shape index: {}]   ;;  %s1835_s0 = inlined_call_operand.vmem [shape: bf16[256,128], index: 0, kind: input, shape index: {}]   ;;  %s1836_s2 = inlined_call_operand.vmem [shape: bf16[128,128], index: 2, kind: input, shape index: {}]   ;;  %s1837_s3 = inlined_call_operand.vmem [shape: f32[1,128], index: 3, kind: input, shape index: {}]   ;;  %s1838_s4 = inlined_call_operand.<no memory space> [shape: f32[1], index: 4, kind: input, shape index: {}]   ;;  %s1839_s5 = inlined_call_operand.vmem [shape: f32[256,128], index: 5, kind: output, shape index: {}]  }
   0x1   :  { %v1144_v0 = vld [vmem:[%s1834_s1 + $0x38] sm:$0xff]  ;;  %v1143_v1 = vld [vmem:[%s1834_s1 + $0x30] sm:$0xff]  ;;  %v1142_v2 = vld [vmem:[%s1834_s1 + $0x28] sm:$0xff] }
   0x2   :  { %213 = vmatpush.bf16.msra.mxu0 %v1144_v0  ;;  %1153 = vmatpush.bf16.msra.mxu2 %v1144_v0  ;;  %v1141_v3 = vld [vmem:[%s1834_s1 + $0x20] sm:$0xff]  ;;  %v1140_v4 = vld [vmem:[%s1834_s1 + $0x18] sm:$0xff]  ;;  %v1139_v5 = vld [vmem:[%s1834_s1 + $0x10] sm:$0xff] }
   0x3   :  { %v1138_v6 = vld [vmem:[%s1834_s1 + $0x8] sm:$0xff]  ;;  %v1137_v7 = vld [vmem:[%s1834_s1] sm:$0xff]  ;;  %v1123_v12 = vld [vmem:[%s1835_s0 + $0x10] sm:$0xff] }
   0x4   :  { %v1121_v8 = vld [vmem:[%s1835_s0] sm:$0xff]  ;;  %v1122_v10 = vld [vmem:[%s1835_s0 + $0x8] sm:$0xff]  ;;  %v1131_v13 = vld [vmem:[%s1835_s0 + $0x50] sm:$0xff] }
   0x5   :  { %v1129_v9 = vld [vmem:[%s1835_s0 + $0x40] sm:$0xff]  ;;  %v1130_v11 = vld [vmem:[%s1835_s0 + $0x48] sm:$0xff]  ;;  %v1124_v14 = vld [vmem:[%s1835_s0 + $0x18] sm:$0xff] }
   0x6   :  { %214 = vmatpush.bf16.msra.mxu0 %v1143_v1  ;;  %1154 = vmatpush.bf16.msra.mxu2 %v1143_v1  ;;  %v1132_v15 = vld [vmem:[%s1835_s0 + $0x58] sm:$0xff]  ;;  %v1125_v16 = vld [vmem:[%s1835_s0 + $0x20] sm:$0xff]  ;;  %v1151_v19 = vld [vmem:[%s1836_s2 + $0x30] sm:$0xff] }
   0x7   :  { %v1133_v17 = vld [vmem:[%s1835_s0 + $0x60] sm:$0xff]  ;;  %v1152_v18 = vld [vmem:[%s1836_s2 + $0x38] sm:$0xff]  ;;  %v1126_v20 = vld [vmem:[%s1835_s0 + $0x28] sm:$0xff] }
   0x8   :  { %418 = vmatpush.bf16.msra.mxu1 %v1152_v18  ;;  %1161 = vmatpush.bf16.msra.mxu3 %v1152_v18  ;;  %v1134_v21 = vld [vmem:[%s1835_s0 + $0x68] sm:$0xff]  ;;  %v1149_v23 = vld [vmem:[%s1836_s2 + $0x20] sm:$0xff]  ;;  %v1148_v24 = vld [vmem:[%s1836_s2 + $0x18] sm:$0xff] }
   0x9   :  { %v1150_v22 = vld [vmem:[%s1836_s2 + $0x28] sm:$0xff]  ;;  %v1127_v25 = vld [vmem:[%s1835_s0 + $0x30] sm:$0xff]  ;;  %v1145_v29 = vld [vmem:[%s1836_s2] sm:$0xff] }
   0xa   :  { %215 = vmatpush.bf16.msra.mxu0 %v1142_v2  ;;  %1155 = vmatpush.bf16.msra.mxu2 %v1142_v2  ;;  %v1135_v26 = vld [vmem:[%s1835_s0 + $0x70] sm:$0xff]  ;;  %v1146_v28 = vld [vmem:[%s1836_s2 + $0x8] sm:$0xff]  ;;  %v1128_v30 = vld [vmem:[%s1835_s0 + $0x38] sm:$0xff] }
   0xb   :  { %v1147_v27 = vld [vmem:[%s1836_s2 + $0x10] sm:$0xff]  ;;  %v1136_v31 = vld [vmem:[%s1835_s0 + $0x78] sm:$0xff] }
   0xc   :  { %419 = vmatpush.bf16.msra.mxu1 %v1151_v19  ;;  %1162 = vmatpush.bf16.msra.mxu3 %v1151_v19 }
   0xe   :  { %216 = vmatpush.bf16.msra.mxu0 %v1141_v3  ;;  %1156 = vmatpush.bf16.msra.mxu2 %v1141_v3 }
  0x10   :  { %420 = vmatpush.bf16.msra.mxu1 %v1150_v22  ;;  %1163 = vmatpush.bf16.msra.mxu3 %v1150_v22 }
  0x12   :  { %217 = vmatpush.bf16.msra.mxu0 %v1140_v4  ;;  %1157 = vmatpush.bf16.msra.mxu2 %v1140_v4 }
  0x14   :  { %421 = vmatpush.bf16.msra.mxu1 %v1149_v23  ;;  %1164 = vmatpush.bf16.msra.mxu3 %v1149_v23 }
  0x16   :  { %218 = vmatpush.bf16.msra.mxu0 %v1139_v5  ;;  %1158 = vmatpush.bf16.msra.mxu2 %v1139_v5 }
  0x18   :  { %422 = vmatpush.bf16.msra.mxu1 %v1148_v24  ;;  %1165 = vmatpush.bf16.msra.mxu3 %v1148_v24 }
  0x1a   :  { %219 = vmatpush.bf16.msra.mxu0 %v1138_v6  ;;  %1159 = vmatpush.bf16.msra.mxu2 %v1138_v6 }
  0x1c   :  { %423 = vmatpush.bf16.msra.mxu1 %v1147_v27  ;;  %1166 = vmatpush.bf16.msra.mxu3 %v1147_v27 }
  0x1e   :  { %220 = vmatpush.bf16.msra.mxu0 %v1137_v7  ;;  %1160 = vmatpush.bf16.msra.mxu2 %v1137_v7 }
  0x20   :  { %424 = vmatpush.bf16.msra.mxu1 %v1146_v28  ;;  %1167 = vmatpush.bf16.msra.mxu3 %v1146_v28 }
  0x21   :  { %221 = vmatmul.bf16.vlgmr.msra.gmra.mxu0 %v1121_v8  ;;  %261 = vmatmul.bf16.vlgmr.msra.gmra.mxu2 %v1129_v9 }
  0x24   :  { %425 = vmatpush.bf16.msra.mxu1 %v1145_v29  ;;  %1168 = vmatpush.bf16.msra.mxu3 %v1145_v29 }
  0x31   :  { %226 = vmatmul.bf16.gmra.mxu0 %v1122_v10  ;;  %266 = vmatmul.bf16.gmra.mxu2 %v1130_v11 }
  0x41   :  { %231 = vmatmul.bf16.gmra.mxu0 %v1123_v12  ;;  %271 = vmatmul.bf16.gmra.mxu2 %v1131_v13 }
  0x51   :  { %236 = vmatmul.bf16.gmra.mxu0 %v1124_v14  ;;  %276 = vmatmul.bf16.gmra.mxu2 %v1132_v15 }
  0x61   :  { %241 = vmatmul.bf16.gmra.mxu0 %v1125_v16  ;;  %281 = vmatmul.bf16.gmra.mxu2 %v1133_v17 }
  0x71   :  { %246 = vmatmul.bf16.gmra.mxu0 %v1126_v20  ;;  %286 = vmatmul.bf16.gmra.mxu2 %v1134_v21 }
  0x81   :  { %251 = vmatmul.bf16.gmra.mxu0 %v1127_v25  ;;  %291 = vmatmul.bf16.gmra.mxu2 %v1135_v26 }
  0x91   :  { %256 = vmatmul.bf16.gmra.mxu0 %v1128_v30  ;;  %296 = vmatmul.bf16.gmra.mxu2 %v1136_v31 }
  0x9e   :  { %v1361_v32 = vpop.f32.mrf.mxu0 }
  0x9f   :  { %v302_v34 = vmul.f32 %v1361_v32, %v1361_v32 }
  0xa4   :  { %v1363_v33 = vpop.f32.mrf.mxu2 }
  0xa5   :  { %v318_v39 = vmul.f32 %v1363_v33, %v1363_v33 }
  0xa6   :  { %v1367_v35 = vpop.f32.mrf.mxu0 }
  0xa7   :  { %v303_v36 = vmul.f32 %v1367_v35, %v1367_v35 }
  0xa9   :  { %v334_v37 = vpack.c.bf16 %v303_v36, %v302_v34 }
  0xab   :  { %426 = vmatmul.bf16.vlgmr.msra.gmra.mxu1 %v334_v37 }
  0xac   :  { %v1371_v38 = vpop.f32.mrf.mxu2 }
  0xad   :  { %v319_v40 = vmul.f32 %v1371_v38, %v1371_v38 }
  0xae   :  { %v1377_v41 = vpop.f32.mrf.mxu0 }
  0xaf   :  { %v342_v42 = vpack.c.bf16 %v319_v40, %v318_v39  ;;  %v304_v44 = vmul.f32 %v1377_v41, %v1377_v41 }
  0xb1   :  { %466 = vmatmul.bf16.vlgmr.msra.gmra.mxu3 %v342_v42 }
  0xb4   :  { %v1379_v43 = vpop.f32.mrf.mxu2 }
  0xb5   :  { %v320_v49 = vmul.f32 %v1379_v43, %v1379_v43 }
  0xb6   :  { %v1383_v45 = vpop.f32.mrf.mxu0 }
  0xb7   :  { %v305_v46 = vmul.f32 %v1383_v45, %v1383_v45 }
  0xb9   :  { %v335_v47 = vpack.c.bf16 %v305_v46, %v304_v44 }
  0xbb   :  { %431 = vmatmul.bf16.gmra.mxu1 %v335_v47 }
  0xbc   :  { %v1387_v48 = vpop.f32.mrf.mxu2 }
  0xbd   :  { %v321_v50 = vmul.f32 %v1387_v48, %v1387_v48 }
  0xbe   :  { %v1393_v51 = vpop.f32.mrf.mxu0 }
  0xbf   :  { %v343_v52 = vpack.c.bf16 %v321_v50, %v320_v49  ;;  %v306_v54 = vmul.f32 %v1393_v51, %v1393_v51 }
  0xc1   :  { %471 = vmatmul.bf16.gmra.mxu3 %v343_v52 }
  0xc4   :  { %v1395_v53 = vpop.f32.mrf.mxu2 }
  0xc5   :  { %v322_v59 = vmul.f32 %v1395_v53, %v1395_v53 }
  0xc6   :  { %v1399_v55 = vpop.f32.mrf.mxu0 }
  0xc7   :  { %v307_v56 = vmul.f32 %v1399_v55, %v1399_v55 }
  0xc9   :  { %v336_v57 = vpack.c.bf16 %v307_v56, %v306_v54 }
  0xcb   :  { %436 = vmatmul.bf16.gmra.mxu1 %v336_v57 }
  0xcc   :  { %v1403_v58 = vpop.f32.mrf.mxu2 }
  0xcd   :  { %v323_v60 = vmul.f32 %v1403_v58, %v1403_v58 }
  0xce   :  { %v1409_v61 = vpop.f32.mrf.mxu0 }
  0xcf   :  { %v344_v62 = vpack.c.bf16 %v323_v60, %v322_v59  ;;  %v308_v0 = vmul.f32 %v1409_v61, %v1409_v61  ;;  %v1492_v60 = vld [vmem:[%s1837_s3] ss:$0 sm:$0xff] }
  0xd1   :  { %476 = vmatmul.bf16.gmra.mxu3 %v344_v62 }
  0xd4   :  { %v1411_v63 = vpop.f32.mrf.mxu2 }
  0xd5   :  { %v324_v5 = vmul.f32 %v1411_v63, %v1411_v63 }
  0xd6   :  { %v1415_v1 = vpop.f32.mrf.mxu0 }
  0xd7   :  { %v309_v2 = vmul.f32 %v1415_v1, %v1415_v1 }
  0xd9   :  { %v337_v3 = vpack.c.bf16 %v309_v2, %v308_v0 }
  0xdb   :  { %441 = vmatmul.bf16.gmra.mxu1 %v337_v3 }
  0xdc   :  { %v1419_v4 = vpop.f32.mrf.mxu2 }
  0xdd   :  { %v325_v6 = vmul.f32 %v1419_v4, %v1419_v4 }
  0xde   :  { %v1425_v7 = vpop.f32.mrf.mxu0 }
  0xdf   :  { %v345_v8 = vpack.c.bf16 %v325_v6, %v324_v5  ;;  %v310_v10 = vmul.f32 %v1425_v7, %v1425_v7 }
  0xe1   :  { %481 = vmatmul.bf16.gmra.mxu3 %v345_v8 }
  0xe4   :  { %v1427_v9 = vpop.f32.mrf.mxu2 }
  0xe5   :  { %v326_v15 = vmul.f32 %v1427_v9, %v1427_v9 }
  0xe6   :  { %v1431_v11 = vpop.f32.mrf.mxu0 }
  0xe7   :  { %v311_v12 = vmul.f32 %v1431_v11, %v1431_v11 }
  0xe9   :  { %v338_v13 = vpack.c.bf16 %v311_v12, %v310_v10 }
  0xeb   :  { %446 = vmatmul.bf16.gmra.mxu1 %v338_v13 }
  0xec   :  { %v1435_v14 = vpop.f32.mrf.mxu2 }
  0xed   :  { %v327_v16 = vmul.f32 %v1435_v14, %v1435_v14 }
  0xee   :  { %v1441_v17 = vpop.f32.mrf.mxu0 }
  0xef   :  { %v346_v18 = vpack.c.bf16 %v327_v16, %v326_v15  ;;  %v312_v20 = vmul.f32 %v1441_v17, %v1441_v17 }
  0xf1   :  { %486 = vmatmul.bf16.gmra.mxu3 %v346_v18 }
  0xf4   :  { %v1443_v19 = vpop.f32.mrf.mxu2 }
  0xf5   :  { %v328_v25 = vmul.f32 %v1443_v19, %v1443_v19 }
  0xf6   :  { %v1447_v21 = vpop.f32.mrf.mxu0 }
  0xf7   :  { %v313_v22 = vmul.f32 %v1447_v21, %v1447_v21 }
  0xf9   :  { %v339_v23 = vpack.c.bf16 %v313_v22, %v312_v20 }
  0xfb   :  { %451 = vmatmul.bf16.gmra.mxu1 %v339_v23 }
  0xfc   :  { %v1451_v24 = vpop.f32.mrf.mxu2 }
  0xfd   :  { %v329_v26 = vmul.f32 %v1451_v24, %v1451_v24 }
  0xfe   :  { %v1457_v27 = vpop.f32.mrf.mxu0 }
  0xff   :  { %v347_v28 = vpack.c.bf16 %v329_v26, %v328_v25  ;;  %v314_v30 = vmul.f32 %v1457_v27, %v1457_v27  ;;  %v1504_v26 = vstv %s1838_s4 }
 0x101   :  { %491 = vmatmul.bf16.gmra.mxu3 %v347_v28 }
 0x104   :  { %v1459_v29 = vpop.f32.mrf.mxu2 }
 0x105   :  { %v330_v39 = vmul.f32 %v1459_v29, %v1459_v29 }
 0x106   :  { %v1463_v31 = vpop.f32.mrf.mxu0 }
 0x107   :  { %v315_v34 = vmul.f32 %v1463_v31, %v1463_v31 }
 0x109   :  { %v340_v36 = vpack.c.bf16 %v315_v34, %v314_v30 }
 0x10b   :  { %456 = vmatmul.bf16.gmra.mxu1 %v340_v36 }
 0x10c   :  { %v1467_v37 = vpop.f32.mrf.mxu2 }
 0x10d   :  { %v331_v40 = vmul.f32 %v1467_v37, %v1467_v37 }
 0x10e   :  { %v1473_v42 = vpop.f32.mrf.mxu0 }
 0x10f   :  { %v348_v44 = vpack.c.bf16 %v331_v40, %v330_v39  ;;  %v316_v47 = vmul.f32 %v1473_v42, %v1473_v42 }
 0x111   :  { %496 = vmatmul.bf16.gmra.mxu3 %v348_v44 }
 0x114   :  { %v1475_v46 = vpop.f32.mrf.mxu2 }
 0x115   :  { %v332_v56 = vmul.f32 %v1475_v46, %v1475_v46 }
 0x116   :  { %v1479_v49 = vpop.f32.mrf.mxu0 }
 0x117   :  { %v317_v50 = vmul.f32 %v1479_v49, %v1479_v49 }
 0x119   :  { %v341_v52 = vpack.c.bf16 %v317_v50, %v316_v47 }
 0x11b   :  { %461 = vmatmul.bf16.gmra.mxu1 %v341_v52 }
 0x11c   :  { %v1483_v54 = vpop.f32.mrf.mxu2 }
 0x11d   :  { %v333_v57 = vmul.f32 %v1483_v54, %v1483_v54 }
 0x11f   :  { %v349_v59 = vpack.c.bf16 %v333_v57, %v332_v56 }
 0x121   :  { %501 = vmatmul.bf16.gmra.mxu3 %v349_v59 }
 0x128   :  { %v427_v62 = vpop.f32.mrf.mxu1 }
 0x129   :  { %v428_v0 = vadd.f32 %v1492_v60, %v427_v62 }
 0x12b   :  { %1170 = vrsqrt.f32 %v428_v0  ;;  %vm513_vm1 = vweird.f32 %v428_v0 }
 0x130   :  { %v429_v2 = vpop.f32.mrf.mxu1 }
 0x131   :  { %v1171_v3 = vpop.eup %1170  ;;  %v430_v5 = vadd.f32 %v1492_v60, %v429_v2 }
 0x132   :  { %v508_v6 = vmul.f32 %v1171_v3, %v428_v0  ;;  %vm514_vm0 = vweird.f32 %v1171_v3 }
 0x133   :  { %1172 = vrsqrt.f32 %v430_v5  ;;  %vm515_vm2 = vmor %vm513_vm1, %vm514_vm0  ;;  %vm523_vm5 = vweird.f32 %v430_v5 }
 0x134   :  { %v509_v8 = vmul.f32 %v1171_v3, %v508_v6  ;;  %v467_v10 = vpop.f32.mrf.mxu3 }
 0x135   :  { %v468_v12 = vadd.f32 %v1492_v60, %v467_v10 }
 0x136   :  { %v510_v13 = vmul.f32 0.5, %v509_v8 }
 0x137   :  { %1174 = vrsqrt.f32 %v468_v12  ;;  %vm673_vm8 = vweird.f32 %v468_v12 }
 0x138   :  { %v511_v15 = vsub.f32 1.5, %v510_v13  ;;  %v432_v16 = vpop.f32.mrf.mxu1 }
 0x139   :  { %v1173_v18 = vpop.eup %1172  ;;  %v1498_v20 = vadd.f32 %v1492_v60, %v432_v16 }
 0x13a   :  { %v512_v22 = vmul.f32 %v1171_v3, %v511_v15  ;;  %v518_v23 = vmul.f32 %v1173_v18, %v430_v5  ;;  %vm524_vm4 = vweird.f32 %v1173_v18 }
 0x13b   :  { %1176 = vrsqrt.f32 %v1498_v20  ;;  %vm525_vm6 = vmor %vm523_vm5, %vm524_vm4  ;;  %vm533_vm12 = vweird.f32 %v1498_v20 }
 0x13c   :  { %v516_v25 = vsel %vm515_vm2, %v1171_v3, %v512_v22  ;;  %v519_v28 = vmul.f32 %v1173_v18, %v518_v23  ;;  %v469_v30 = vpop.f32.mrf.mxu3 }
 0x13d   :  { %v1175_v34 = vpop.eup %1174  ;;  %v827_v36 = vmul.f32 %v516_v25, %v1361_v32  ;;  %v1508_v39 = vadd.f32 %v1492_v60, %v469_v30 }
 0x13e   :  { %v520_v40 = vmul.f32 0.5, %v519_v28  ;;  %v668_v44 = vmul.f32 %v1175_v34, %v468_v12  ;;  %vm674_vm7 = vweird.f32 %v1175_v34 }
 0x13f   :  { %vm860_vm3 = vcmp.ge.f32.partialorder %v827_v36, 0.0  ;;  %v893_v47 = vmul.f32 %v1504_v26, %v827_v36  ;;  %1178 = vrsqrt.f32 %v1508_v39  ;;  %vm675_vm10 = vmor %vm673_vm8, %vm674_vm7  ;;  %vm683_vm0 = vweird.f32 %v1508_v39 }
 0x140   :  { %v521_v50 = vsub.f32 1.5, %v520_v40  ;;  %v669_v52 = vmul.f32 %v1175_v34, %v668_v44  ;;  %v434_v56 = vpop.f32.mrf.mxu1 }
 0x141   :  { %v1177_v57 = vpop.eup %1176  ;;  %v925_v59 = vsel %vm860_vm3, %v827_v36, %v893_v47  ;;  %v1513_v62 = vadd.f32 %v1492_v60, %v434_v56 }
 0x142   :  { %957 = vst [vmem:[%s1839_s5] sm:$0xff] %v925_v59  ;;  %v522_v32 = vmul.f32 %v1173_v18, %v521_v50  ;;  %v670_v0 = vmul.f32 0.5, %v669_v52  ;;  %v528_v2 = vmul.f32 %v1177_v57, %v1498_v20  ;;  %vm534_vm11 = vweird.f32 %v1177_v57 }
 0x143   :  { %1180 = vrsqrt.f32 %v1513_v62  ;;  %vm535_vm14 = vmor %vm533_vm12, %vm534_vm11  ;;  %vm543_vm4 = vweird.f32 %v1513_v62 }
 0x144   :  { %v526_v3 = vsel %vm525_vm6, %v1173_v18, %v522_v32  ;;  %v671_v6 = vsub.f32 1.5, %v670_v0  ;;  %v529_v8 = vmul.f32 %v1177_v57, %v528_v2  ;;  %v472_v10 = vpop.f32.mrf.mxu3 }
 0x145   :  { %v1179_v13 = vpop.eup %1178  ;;  %v828_v15 = vmul.f32 %v526_v3, %v1367_v35  ;;  %v1522_v16 = vadd.f32 %v1492_v60, %v472_v10 }
 0x146   :  { %v672_v22 = vmul.f32 %v1175_v34, %v671_v6  ;;  %v530_v5 = vmul.f32 0.5, %v529_v8  ;;  %v678_v23 = vmul.f32 %v1179_v13, %v1508_v39  ;;  %vm684_vm15 = vweird.f32 %v1179_v13 }
 0x147   :  { %vm861_vm9 = vcmp.ge.f32.partialorder %v828_v15, 0.0  ;;  %v894_v25 = vmul.f32 %v1504_v26, %v828_v15  ;;  %1182 = vrsqrt.f32 %v1522_v16  ;;  %vm685_vm2 = vmor %vm683_vm0, %vm684_vm15  ;;  %vm693_vm8 = vweird.f32 %v1522_v16 }
 0x148   :  { %v676_v18 = vsel %vm675_vm10, %v1175_v34, %v672_v22  ;;  %v531_v28 = vsub.f32 1.5, %v530_v5  ;;  %v679_v30 = vmul.f32 %v1179_v13, %v678_v23  ;;  %v437_v36 = vpop.f32.mrf.mxu1 }
 0x149   :  { %v1181_v35 = vpop.eup %1180  ;;  %v926_v40 = vsel %vm861_vm9, %v828_v15, %v894_v25  ;;  %v843_v44 = vmul.f32 %v676_v18, %v1363_v33  ;;  %v1529_v12 = vadd.f32 %v1492_v60, %v437_v36 }
 0x14a   :  { %958 = vst [vmem:[%s1839_s5 + $0x8] sm:$0xff] %v926_v40  ;;  %v532_v47 = vmul.f32 %v1177_v57, %v531_v28  ;;  %v680_v50 = vmul.f32 0.5, %v679_v30  ;;  %v538_v34 = vmul.f32 %v1181_v35, %v1513_v62  ;;  %vm544_vm3 = vweird.f32 %v1181_v35 }
 0x14b   :  { %vm876_vm13 = vcmp.ge.f32.partialorder %v843_v44, 0.0  ;;  %v909_v52 = vmul.f32 %v1504_v26, %v843_v44  ;;  %1184 = vrsqrt.f32 %v1529_v12  ;;  %vm545_vm6 = vmor %vm543_vm4, %vm544_vm3  ;;  %vm553_vm12 = vweird.f32 %v1529_v12 }
 0x14c   :  { %v536_v33 = vsel %vm535_vm14, %v1177_v57, %v532_v47  ;;  %v681_v56 = vsub.f32 1.5, %v680_v50  ;;  %v539_v59 = vmul.f32 %v1181_v35, %v538_v34  ;;  %v474_v32 = vpop.f32.mrf.mxu3 }
 0x14d   :  { %v1183_v0 = vpop.eup %1182  ;;  %v941_v2 = vsel %vm876_vm13, %v843_v44, %v909_v52  ;;  %v829_v3 = vmul.f32 %v536_v33, %v1377_v41  ;;  %v1540_v20 = vadd.f32 %v1492_v60, %v474_v32 }
 0x14e   :  { %973 = vst [vmem:[%s1839_s5 + $0x80] sm:$0xff] %v941_v2  ;;  %v682_v6 = vmul.f32 %v1179_v13, %v681_v56  ;;  %v540_v8 = vmul.f32 0.5, %v539_v59  ;;  %v688_v57 = vmul.f32 %v1183_v0, %v1522_v16  ;;  %vm694_vm7 = vweird.f32 %v1183_v0 }
 0x14f   :  { %vm862_vm1 = vcmp.ge.f32.partialorder %v829_v3, 0.0  ;;  %v895_v10 = vmul.f32 %v1504_v26, %v829_v3  ;;  %1186 = vrsqrt.f32 %v1540_v20  ;;  %vm695_vm10 = vmor %vm693_vm8, %vm694_vm7  ;;  %vm703_vm0 = vweird.f32 %v1540_v20 }
 0x150   :  { %v686_v41 = vsel %vm685_vm2, %v1179_v13, %v682_v6  ;;  %v541_v15 = vsub.f32 1.5, %v540_v8  ;;  %v689_v22 = vmul.f32 %v1183_v0, %v688_v57  ;;  %v439_v5 = vpop.f32.mrf.mxu1 }
 0x151   :  { %v1185_v23 = vpop.eup %1184  ;;  %v927_v25 = vsel %vm862_vm1, %v829_v3, %v895_v10  ;;  %v844_v18 = vmul.f32 %v686_v41, %v1371_v38  ;;  %v1551_v39 = vadd.f32 %v1492_v60, %v439_v5 }
 0x152   :  { %959 = vst [vmem:[%s1839_s5 + $0x10] sm:$0xff] %v927_v25  ;;  %v542_v28 = vmul.f32 %v1181_v35, %v541_v15  ;;  %v690_v30 = vmul.f32 0.5, %v689_v22  ;;  %v548_v13 = vmul.f32 %v1185_v23, %v1529_v12  ;;  %vm554_vm11 = vweird.f32 %v1185_v23 }
 0x153   :  { %vm877_vm5 = vcmp.ge.f32.partialorder %v844_v18, 0.0  ;;  %v910_v36 = vmul.f32 %v1504_v26, %v844_v18  ;;  %1188 = vrsqrt.f32 %v1551_v39  ;;  %vm555_vm14 = vmor %vm553_vm12, %vm554_vm11  ;;  %vm563_vm4 = vweird.f32 %v1551_v39 }
 0x154   :  { %v546_v38 = vsel %vm545_vm6, %v1181_v35, %v542_v28  ;;  %v691_v40 = vsub.f32 1.5, %v690_v30  ;;  %v549_v44 = vmul.f32 %v1185_v23, %v548_v13  ;;  %v477_v47 = vpop.f32.mrf.mxu3 }
 0x155   :  { %v1187_v50 = vpop.eup %1186  ;;  %v942_v34 = vsel %vm877_vm5, %v844_v18, %v910_v36  ;;  %v830_v52 = vmul.f32 %v546_v38, %v1383_v45  ;;  %v1562_v62 = vadd.f32 %v1492_v60, %v477_v47 }
 0x156   :  { %974 = vst [vmem:[%s1839_s5 + $0x88] sm:$0xff] %v942_v34  ;;  %v692_v33 = vmul.f32 %v1183_v0, %v691_v40  ;;  %v550_v56 = vmul.f32 0.5, %v549_v44  ;;  %v698_v35 = vmul.f32 %v1187_v50, %v1540_v20  ;;  %vm704_vm15 = vweird.f32 %v1187_v50 }
 0x157   :  { %vm863_vm9 = vcmp.ge.f32.partialorder %v830_v52, 0.0  ;;  %v896_v59 = vmul.f32 %v1504_v26, %v830_v52  ;;  %1190 = vrsqrt.f32 %v1562_v62  ;;  %vm705_vm2 = vmor %vm703_vm0, %vm704_vm15  ;;  %vm713_vm8 = vweird.f32 %v1562_v62 }
 0x158   :  { %v696_v45 = vsel %vm695_vm10, %v1183_v0, %v692_v33  ;;  %v551_v32 = vsub.f32 1.5, %v550_v56  ;;  %v699_v2 = vmul.f32 %v1187_v50, %v698_v35  ;;  %v442_v3 = vpop.f32.mrf.mxu1 }
 0x159   :  { %v1189_v6 = vpop.eup %1188  ;;  %v928_v8 = vsel %vm863_vm9, %v830_v52, %v896_v59  ;;  %v845_v57 = vmul.f32 %v696_v45, %v1379_v43  ;;  %v1573_v16 = vadd.f32 %v1492_v60, %v442_v3 }
 0x15a   :  { %960 = vst [vmem:[%s1839_s5 + $0x18] sm:$0xff] %v928_v8  ;;  %v552_v10 = vmul.f32 %v1185_v23, %v551_v32  ;;  %v700_v41 = vmul.f32 0.5, %v699_v2  ;;  %v558_v0 = vmul.f32 %v1189_v6, %v1551_v39  ;;  %vm564_vm3 = vweird.f32 %v1189_v6 }
 0x15b   :  { %vm878_vm13 = vcmp.ge.f32.partialorder %v845_v57, 0.0  ;;  %v911_v15 = vmul.f32 %v1504_v26, %v845_v57  ;;  %1192 = vrsqrt.f32 %v1573_v16  ;;  %vm565_vm6 = vmor %vm563_vm4, %vm564_vm3  ;;  %vm573_vm12 = vweird.f32 %v1573_v16 }
 0x15c   :  { %v556_v43 = vsel %vm555_vm14, %v1185_v23, %v552_v10  ;;  %v701_v22 = vsub.f32 1.5, %v700_v41  ;;  %v559_v5 = vmul.f32 %v1189_v6, %v558_v0  ;;  %v479_v25 = vpop.f32.mrf.mxu3 }
 0x15d   :  { %v1191_v18 = vpop.eup %1190  ;;  %v943_v28 = vsel %vm878_vm13, %v845_v57, %v911_v15  ;;  %v831_v30 = vmul.f32 %v556_v43, %v1393_v51  ;;  %v1584_v12 = vadd.f32 %v1492_v60, %v479_v25 }
 0x15e   :  { %975 = vst [vmem:[%s1839_s5 + $0x90] sm:$0xff] %v943_v28  ;;  %v702_v13 = vmul.f32 %v1187_v50, %v701_v22  ;;  %v560_v36 = vmul.f32 0.5, %v559_v5  ;;  %v708_v23 = vmul.f32 %v1191_v18, %v1562_v62  ;;  %vm714_vm7 = vweird.f32 %v1191_v18 }
 0x15f   :  { %vm864_vm1 = vcmp.ge.f32.partialorder %v831_v30, 0.0  ;;  %v897_v38 = vmul.f32 %v1504_v26, %v831_v30  ;;  %1194 = vrsqrt.f32 %v1584_v12  ;;  %vm715_vm10 = vmor %vm713_vm8, %vm714_vm7  ;;  %vm723_vm0 = vweird.f32 %v1584_v12 }
 0x160   :  { %v706_v51 = vsel %vm705_vm2, %v1187_v50, %v702_v13  ;;  %v561_v40 = vsub.f32 1.5, %v560_v36  ;;  %v709_v44 = vmul.f32 %v1191_v18, %v708_v23  ;;  %v444_v47 = vpop.f32.mrf.mxu1 }
 0x161   :  { %v1193_v34 = vpop.eup %1192  ;;  %v929_v52 = vsel %vm864_vm1, %v831_v30, %v897_v38  ;;  %v846_v33 = vmul.f32 %v706_v51, %v1387_v48  ;;  %v1595_v20 = vadd.f32 %v1492_v60, %v444_v47 }
 0x162   :  { %961 = vst [vmem:[%s1839_s5 + $0x20] sm:$0xff] %v929_v52  ;;  %v562_v56 = vmul.f32 %v1189_v6, %v561_v40  ;;  %v710_v35 = vmul.f32 0.5, %v709_v44  ;;  %v568_v50 = vmul.f32 %v1193_v34, %v1573_v16  ;;  %vm574_vm11 = vweird.f32 %v1193_v34 }
 0x163   :  { %vm879_vm5 = vcmp.ge.f32.partialorder %v846_v33, 0.0  ;;  %v912_v59 = vmul.f32 %v1504_v26, %v846_v33  ;;  %1196 = vrsqrt.f32 %v1595_v20  ;;  %vm575_vm14 = vmor %vm573_vm12, %vm574_vm11  ;;  %vm583_vm4 = vweird.f32 %v1595_v20 }
 0x164   :  { %v566_v48 = vsel %vm565_vm6, %v1189_v6, %v562_v56  ;;  %v711_v45 = vsub.f32 1.5, %v710_v35  ;;  %v569_v32 = vmul.f32 %v1193_v34, %v568_v50  ;;  %v482_v2 = vpop.f32.mrf.mxu3 }
 0x165   :  { %v1195_v3 = vpop.eup %1194  ;;  %v944_v8 = vsel %vm879_vm5, %v846_v33, %v912_v59  ;;  %v832_v57 = vmul.f32 %v566_v48, %v1399_v55  ;;  %v1606_v39 = vadd.f32 %v1492_v60, %v482_v2 }
 0x166   :  { %976 = vst [vmem:[%s1839_s5 + $0x98] sm:$0xff] %v944_v8  ;;  %v712_v10 = vmul.f32 %v1191_v18, %v711_v45  ;;  %v570_v41 = vmul.f32 0.5, %v569_v32  ;;  %v718_v6 = vmul.f32 %v1195_v3, %v1584_v12  ;;  %vm724_vm15 = vweird.f32 %v1195_v3 }
 0x167   :  { %vm865_vm9 = vcmp.ge.f32.partialorder %v832_v57, 0.0  ;;  %v898_v0 = vmul.f32 %v1504_v26, %v832_v57  ;;  %1198 = vrsqrt.f32 %v1606_v39  ;;  %vm725_vm2 = vmor %vm723_vm0, %vm724_vm15  ;;  %vm733_vm8 = vweird.f32 %v1606_v39 }
 0x168   :  { %v716_v55 = vsel %vm715_vm10, %v1191_v18, %v712_v10  ;;  %v571_v15 = vsub.f32 1.5, %v570_v41  ;;  %v719_v43 = vmul.f32 %v1195_v3, %v718_v6  ;;  %v447_v22 = vpop.f32.mrf.mxu1 }
 0x169   :  { %v1197_v5 = vpop.eup %1196  ;;  %v930_v25 = vsel %vm865_vm9, %v832_v57, %v898_v0  ;;  %v847_v28 = vmul.f32 %v716_v55, %v1395_v53  ;;  %v1617_v62 = vadd.f32 %v1492_v60, %v447_v22 }
 0x16a   :  { %962 = vst [vmem:[%s1839_s5 + $0x28] sm:$0xff] %v930_v25  ;;  %v572_v30 = vmul.f32 %v1193_v34, %v571_v15  ;;  %v720_v13 = vmul.f32 0.5, %v719_v43  ;;  %v578_v18 = vmul.f32 %v1197_v5, %v1595_v20  ;;  %vm584_vm3 = vweird.f32 %v1197_v5 }
 0x16b   :  { %vm880_vm13 = vcmp.ge.f32.partialorder %v847_v28, 0.0  ;;  %v913_v36 = vmul.f32 %v1504_v26, %v847_v28  ;;  %1200 = vrsqrt.f32 %v1617_v62  ;;  %vm585_vm6 = vmor %vm583_vm4, %vm584_vm3  ;;  %vm593_vm12 = vweird.f32 %v1617_v62 }
 0x16c   :  { %v576_v53 = vsel %vm575_vm14, %v1193_v34, %v572_v30  ;;  %v721_v23 = vsub.f32 1.5, %v720_v13  ;;  %v579_v38 = vmul.f32 %v1197_v5, %v578_v18  ;;  %v484_v51 = vpop.f32.mrf.mxu3 }
 0x16d   :  { %v1199_v40 = vpop.eup %1198  ;;  %v945_v44 = vsel %vm880_vm13, %v847_v28, %v913_v36  ;;  %v833_v47 = vmul.f32 %v576_v53, %v1409_v61  ;;  %v1628_v16 = vadd.f32 %v1492_v60, %v484_v51 }
 0x16e   :  { %977 = vst [vmem:[%s1839_s5 + $0xa0] sm:$0xff] %v945_v44  ;;  %v722_v52 = vmul.f32 %v1195_v3, %v721_v23  ;;  %v580_v33 = vmul.f32 0.5, %v579_v38  ;;  %v728_v34 = vmul.f32 %v1199_v40, %v1606_v39  ;;  %vm734_vm7 = vweird.f32 %v1199_v40 }
 0x16f   :  { %vm866_vm1 = vcmp.ge.f32.partialorder %v833_v47, 0.0  ;;  %v899_v56 = vmul.f32 %v1504_v26, %v833_v47  ;;  %1202 = vrsqrt.f32 %v1628_v16  ;;  %vm735_vm10 = vmor %vm733_vm8, %vm734_vm7  ;;  %vm743_vm0 = vweird.f32 %v1628_v16 }
 0x170   :  { %v726_v61 = vsel %vm725_vm2, %v1195_v3, %v722_v52  ;;  %v581_v35 = vsub.f32 1.5, %v580_v33  ;;  %v729_v50 = vmul.f32 %v1199_v40, %v728_v34  ;;  %v449_v59 = vpop.f32.mrf.mxu1 }
 0x171   :  { %v1201_v48 = vpop.eup %1200  ;;  %v931_v45 = vsel %vm866_vm1, %v833_v47, %v899_v56  ;;  %v848_v32 = vmul.f32 %v726_v61, %v1403_v58  ;;  %v1639_v12 = vadd.f32 %v1492_v60, %v449_v59 }
 0x172   :  { %963 = vst [vmem:[%s1839_s5 + $0x30] sm:$0xff] %v931_v45  ;;  %v582_v2 = vmul.f32 %v1197_v5, %v581_v35  ;;  %v730_v8 = vmul.f32 0.5, %v729_v50  ;;  %v588_v3 = vmul.f32 %v1201_v48, %v1617_v62  ;;  %vm594_vm11 = vweird.f32 %v1201_v48 }
 0x173   :  { %vm881_vm5 = vcmp.ge.f32.partialorder %v848_v32, 0.0  ;;  %v914_v57 = vmul.f32 %v1504_v26, %v848_v32  ;;  %1204 = vrsqrt.f32 %v1639_v12  ;;  %vm595_vm14 = vmor %vm593_vm12, %vm594_vm11  ;;  %vm603_vm4 = vweird.f32 %v1639_v12 }
 0x174   :  { %v586_v58 = vsel %vm585_vm6, %v1197_v5, %v582_v2  ;;  %v731_v10 = vsub.f32 1.5, %v730_v8  ;;  %v589_v41 = vmul.f32 %v1201_v48, %v588_v3  ;;  %v487_v6 = vpop.f32.mrf.mxu3 }
 0x175   :  { %v1203_v0 = vpop.eup %1202  ;;  %v946_v55 = vsel %vm881_vm5, %v848_v32, %v914_v57  ;;  %v834_v15 = vmul.f32 %v586_v58, %v1415_v1  ;;  %v1650_v20 = vadd.f32 %v1492_v60, %v487_v6 }
 0x176   :  { %978 = vst [vmem:[%s1839_s5 + $0xa8] sm:$0xff] %v946_v55  ;;  %v732_v43 = vmul.f32 %v1199_v40, %v731_v10  ;;  %v590_v22 = vmul.f32 0.5, %v589_v41  ;;  %v738_v5 = vmul.f32 %v1203_v0, %v1628_v16  ;;  %vm744_vm15 = vweird.f32 %v1203_v0 }
 0x177   :  { %vm867_vm9 = vcmp.ge.f32.partialorder %v834_v15, 0.0  ;;  %v900_v25 = vmul.f32 %v1504_v26, %v834_v15  ;;  %1206 = vrsqrt.f32 %v1650_v20  ;;  %vm745_vm2 = vmor %vm743_vm0, %vm744_vm15  ;;  %vm753_vm8 = vweird.f32 %v1650_v20 }
 0x178   :  { %v736_v1 = vsel %vm735_vm10, %v1199_v40, %v732_v43  ;;  %v591_v28 = vsub.f32 1.5, %v590_v22  ;;  %v739_v30 = vmul.f32 %v1203_v0, %v738_v5  ;;  %v452_v13 = vpop.f32.mrf.mxu1 }
 0x179   :  { %v1205_v18 = vpop.eup %1204  ;;  %v932_v36 = vsel %vm867_vm9, %v834_v15, %v900_v25  ;;  %v849_v53 = vmul.f32 %v736_v1, %v1411_v63  ;;  %v1661_v39 = vadd.f32 %v1492_v60, %v452_v13 }
 0x17a   :  { %964 = vst [vmem:[%s1839_s5 + $0x38] sm:$0xff] %v932_v36  ;;  %v592_v23 = vmul.f32 %v1201_v48, %v591_v28  ;;  %v740_v38 = vmul.f32 0.5, %v739_v30  ;;  %v598_v51 = vmul.f32 %v1205_v18, %v1639_v12  ;;  %vm604_vm3 = vweird.f32 %v1205_v18 }
 0x17b   :  { %vm882_vm13 = vcmp.ge.f32.partialorder %v849_v53, 0.0  ;;  %v915_v40 = vmul.f32 %v1504_v26, %v849_v53  ;;  %1208 = vrsqrt.f32 %v1661_v39  ;;  %vm605_vm6 = vmor %vm603_vm4, %vm604_vm3  ;;  %vm613_vm12 = vweird.f32 %v1661_v39 }
 0x17c   :  { %v596_v63 = vsel %vm595_vm14, %v1201_v48, %v592_v23  ;;  %v741_v44 = vsub.f32 1.5, %v740_v38  ;;  %v599_v47 = vmul.f32 %v1205_v18, %v598_v51  ;;  %v489_v52 = vpop.f32.mrf.mxu3 }
 0x17d   :  { %v1207_v33 = vpop.eup %1206  ;;  %v947_v34 = vsel %vm882_vm13, %v849_v53, %v915_v40  ;;  %v835_v56 = vmul.f32 %v596_v63, %v1425_v7  ;;  %v1672_v62 = vadd.f32 %v1492_v60, %v489_v52 }
 0x17e   :  { %979 = vst [vmem:[%s1839_s5 + $0xb0] sm:$0xff] %v947_v34  ;;  %v742_v61 = vmul.f32 %v1203_v0, %v741_v44  ;;  %v600_v35 = vmul.f32 0.5, %v599_v47  ;;  %v748_v50 = vmul.f32 %v1207_v33, %v1650_v20  ;;  %vm754_vm7 = vweird.f32 %v1207_v33 }
 0x17f   :  { %vm868_vm1 = vcmp.ge.f32.partialorder %v835_v56, 0.0  ;;  %v901_v59 = vmul.f32 %v1504_v26, %v835_v56  ;;  %1210 = vrsqrt.f32 %v1672_v62  ;;  %vm755_vm10 = vmor %vm753_vm8, %vm754_vm7  ;;  %vm763_vm0 = vweird.f32 %v1672_v62 }
 0x180   :  { %v746_v7 = vsel %vm745_vm2, %v1203_v0, %v742_v61  ;;  %v601_v48 = vsub.f32 1.5, %v600_v35  ;;  %v749_v45 = vmul.f32 %v1207_v33, %v748_v50  ;;  %v454_v32 = vpop.f32.mrf.mxu1 }
 0x181   :  { %v1209_v2 = vpop.eup %1208  ;;  %v933_v8 = vsel %vm868_vm1, %v835_v56, %v901_v59  ;;  %v850_v3 = vmul.f32 %v746_v7, %v1419_v4  ;;  %v1683_v16 = vadd.f32 %v1492_v60, %v454_v32 }
 0x182   :  { %965 = vst [vmem:[%s1839_s5 + $0x40] sm:$0xff] %v933_v8  ;;  %v602_v57 = vmul.f32 %v1205_v18, %v601_v48  ;;  %v750_v58 = vmul.f32 0.5, %v749_v45  ;;  %v608_v10 = vmul.f32 %v1209_v2, %v1661_v39  ;;  %vm614_vm11 = vweird.f32 %v1209_v2 }
 0x183   :  { %vm883_vm5 = vcmp.ge.f32.partialorder %v850_v3, 0.0  ;;  %v916_v41 = vmul.f32 %v1504_v26, %v850_v3  ;;  %1212 = vrsqrt.f32 %v1683_v16  ;;  %vm615_vm14 = vmor %vm613_vm12, %vm614_vm11  ;;  %vm623_vm4 = vweird.f32 %v1683_v16 }
 0x184   :  { %v606_v4 = vsel %vm605_vm6, %v1205_v18, %v602_v57  ;;  %v751_v6 = vsub.f32 1.5, %v750_v58  ;;  %v609_v0 = vmul.f32 %v1209_v2, %v608_v10  ;;  %v492_v55 = vpop.f32.mrf.mxu3 }
 0x185   :  { %v1211_v15 = vpop.eup %1210  ;;  %v948_v43 = vsel %vm883_vm5, %v850_v3, %v916_v41  ;;  %v836_v22 = vmul.f32 %v606_v4, %v1431_v11  ;;  %v1694_v12 = vadd.f32 %v1492_v60, %v492_v55 }
 0x186   :  { %980 = vst [vmem:[%s1839_s5 + $0xb8] sm:$0xff] %v948_v43  ;;  %v752_v5 = vmul.f32 %v1207_v33, %v751_v6  ;;  %v610_v25 = vmul.f32 0.5, %v609_v0  ;;  %v758_v1 = vmul.f32 %v1211_v15, %v1672_v62  ;;  %vm764_vm15 = vweird.f32 %v1211_v15 }
 0x187   :  { %vm869_vm9 = vcmp.ge.f32.partialorder %v836_v22, 0.0  ;;  %v902_v28 = vmul.f32 %v1504_v26, %v836_v22  ;;  %1214 = vrsqrt.f32 %v1694_v12  ;;  %vm765_vm2 = vmor %vm763_vm0, %vm764_vm15  ;;  %vm773_vm8 = vweird.f32 %v1694_v12 }
 0x188   :  { %v756_v11 = vsel %vm755_vm10, %v1207_v33, %v752_v5  ;;  %v611_v30 = vsub.f32 1.5, %v610_v25  ;;  %v759_v13 = vmul.f32 %v1211_v15, %v758_v1  ;;  %v457_v18 = vpop.f32.mrf.mxu1 }
 0x189   :  { %v1213_v36 = vpop.eup %1212  ;;  %v934_v53 = vsel %vm869_vm9, %v836_v22, %v902_v28  ;;  %v851_v23 = vmul.f32 %v756_v11, %v1427_v9  ;;  %v1705_v20 = vadd.f32 %v1492_v60, %v457_v18 }
 0x18a   :  { %966 = vst [vmem:[%s1839_s5 + $0x48] sm:$0xff] %v934_v53  ;;  %v612_v38 = vmul.f32 %v1209_v2, %v611_v30  ;;  %v760_v51 = vmul.f32 0.5, %v759_v13  ;;  %v618_v40 = vmul.f32 %v1213_v36, %v1683_v16  ;;  %vm624_vm3 = vweird.f32 %v1213_v36 }
 0x18b   :  { %vm884_vm13 = vcmp.ge.f32.partialorder %v851_v23, 0.0  ;;  %v917_v63 = vmul.f32 %v1504_v26, %v851_v23  ;;  %1216 = vrsqrt.f32 %v1705_v20  ;;  %vm625_vm6 = vmor %vm623_vm4, %vm624_vm3  ;;  %vm633_vm12 = vweird.f32 %v1705_v20 }
 0x18c   :  { %v616_v9 = vsel %vm615_vm14, %v1209_v2, %v612_v38  ;;  %v761_v44 = vsub.f32 1.5, %v760_v51  ;;  %v619_v47 = vmul.f32 %v1213_v36, %v618_v40  ;;  %v494_v52 = vpop.f32.mrf.mxu3 }
 0x18d   :  { %v1215_v33 = vpop.eup %1214  ;;  %v949_v34 = vsel %vm884_vm13, %v851_v23, %v917_v63  ;;  %v837_v56 = vmul.f32 %v616_v9, %v1441_v17  ;;  %v1716_v39 = vadd.f32 %v1492_v60, %v494_v52 }
 0x18e   :  { %981 = vst [vmem:[%s1839_s5 + $0xc0] sm:$0xff] %v949_v34  ;;  %v762_v61 = vmul.f32 %v1211_v15, %v761_v44  ;;  %v620_v35 = vmul.f32 0.5, %v619_v47  ;;  %v768_v50 = vmul.f32 %v1215_v33, %v1694_v12  ;;  %vm774_vm7 = vweird.f32 %v1215_v33 }
 0x18f   :  { %vm870_vm1 = vcmp.ge.f32.partialorder %v837_v56, 0.0  ;;  %v903_v59 = vmul.f32 %v1504_v26, %v837_v56  ;;  %1218 = vrsqrt.f32 %v1716_v39  ;;  %vm775_vm10 = vmor %vm773_vm8, %vm774_vm7  ;;  %vm783_vm0 = vweird.f32 %v1716_v39 }
 0x190   :  { %v766_v17 = vsel %vm765_vm2, %v1211_v15, %v762_v61  ;;  %v621_v7 = vsub.f32 1.5, %v620_v35  ;;  %v769_v48 = vmul.f32 %v1215_v33, %v768_v50  ;;  %v459_v45 = vpop.f32.mrf.mxu1 }
 0x191   :  { %v1217_v32 = vpop.eup %1216  ;;  %v935_v2 = vsel %vm870_vm1, %v837_v56, %v903_v59  ;;  %v852_v8 = vmul.f32 %v766_v17, %v1435_v14  ;;  %v1727_v62 = vadd.f32 %v1492_v60, %v459_v45 }
 0x192   :  { %967 = vst [vmem:[%s1839_s5 + $0x50] sm:$0xff] %v935_v2  ;;  %v622_v3 = vmul.f32 %v1213_v36, %v621_v7  ;;  %v770_v57 = vmul.f32 0.5, %v769_v48  ;;  %v628_v58 = vmul.f32 %v1217_v32, %v1705_v20  ;;  %vm634_vm11 = vweird.f32 %v1217_v32 }
 0x193   :  { %vm885_vm5 = vcmp.ge.f32.partialorder %v852_v8, 0.0  ;;  %v918_v10 = vmul.f32 %v1504_v26, %v852_v8  ;;  %1220 = vrsqrt.f32 %v1727_v62  ;;  %vm635_vm14 = vmor %vm633_vm12, %vm634_vm11  ;;  %vm643_vm4 = vweird.f32 %v1727_v62 }
 0x194   :  { %v626_v14 = vsel %vm625_vm6, %v1213_v36, %v622_v3  ;;  %v771_v41 = vsub.f32 1.5, %v770_v57  ;;  %v629_v4 = vmul.f32 %v1217_v32, %v628_v58  ;;  %v497_v6 = vpop.f32.mrf.mxu3 }
 0x195   :  { %v1219_v0 = vpop.eup %1218  ;;  %v950_v55 = vsel %vm885_vm5, %v852_v8, %v918_v10  ;;  %v838_v15 = vmul.f32 %v626_v14, %v1447_v21  ;;  %v1738_v16 = vadd.f32 %v1492_v60, %v497_v6 }
 0x196   :  { %982 = vst [vmem:[%s1839_s5 + $0xc8] sm:$0xff] %v950_v55  ;;  %v772_v43 = vmul.f32 %v1215_v33, %v771_v41  ;;  %v630_v22 = vmul.f32 0.5, %v629_v4  ;;  %v778_v5 = vmul.f32 %v1219_v0, %v1716_v39  ;;  %vm784_vm15 = vweird.f32 %v1219_v0 }
 0x197   :  { %vm871_vm9 = vcmp.ge.f32.partialorder %v838_v15, 0.0  ;;  %v904_v25 = vmul.f32 %v1504_v26, %v838_v15  ;;  %1222 = vrsqrt.f32 %v1738_v16  ;;  %vm785_vm2 = vmor %vm783_vm0, %vm784_vm15  ;;  %vm793_vm8 = vweird.f32 %v1738_v16 }
 0x198   :  { %v776_v21 = vsel %vm775_vm10, %v1215_v33, %v772_v43  ;;  %v631_v1 = vsub.f32 1.5, %v630_v22  ;;  %v779_v28 = vmul.f32 %v1219_v0, %v778_v5  ;;  %v462_v11 = vpop.f32.mrf.mxu1 }
 0x199   :  { %v1221_v30 = vpop.eup %1220  ;;  %v936_v13 = vsel %vm871_vm9, %v838_v15, %v904_v25  ;;  %v853_v18 = vmul.f32 %v776_v21, %v1443_v19  ;;  %v1749_v12 = vadd.f32 %v1492_v60, %v462_v11 }
 0x19a   :  { %968 = vst [vmem:[%s1839_s5 + $0x58] sm:$0xff] %v936_v13  ;;  %v632_v36 = vmul.f32 %v1217_v32, %v631_v1  ;;  %v780_v53 = vmul.f32 0.5, %v779_v28  ;;  %v638_v23 = vmul.f32 %v1221_v30, %v1727_v62  ;;  %vm644_vm3 = vweird.f32 %v1221_v30 }
 0x19b   :  { %vm886_vm13 = vcmp.ge.f32.partialorder %v853_v18, 0.0  ;;  %v919_v38 = vmul.f32 %v1504_v26, %v853_v18  ;;  %1224 = vrsqrt.f32 %v1749_v12  ;;  %vm645_vm6 = vmor %vm643_vm4, %vm644_vm3  ;;  %vm653_vm12 = vweird.f32 %v1749_v12 }
 0x19c   :  { %v636_v19 = vsel %vm635_vm14, %v1217_v32, %v632_v36  ;;  %v781_v51 = vsub.f32 1.5, %v780_v53  ;;  %v639_v40 = vmul.f32 %v1221_v30, %v638_v23  ;;  %v499_v63 = vpop.f32.mrf.mxu3 }
 0x19d   :  { %v1223_v9 = vpop.eup %1222  ;;  %v951_v44 = vsel %vm886_vm13, %v853_v18, %v919_v38  ;;  %v839_v47 = vmul.f32 %v636_v19, %v1457_v27  ;;  %v1760_v20 = vadd.f32 %v1492_v60, %v499_v63 }
 0x19e   :  { %983 = vst [vmem:[%s1839_s5 + $0xd0] sm:$0xff] %v951_v44  ;;  %v782_v52 = vmul.f32 %v1219_v0, %v781_v51  ;;  %v640_v33 = vmul.f32 0.5, %v639_v40  ;;  %v788_v34 = vmul.f32 %v1223_v9, %v1738_v16  ;;  %vm794_vm7 = vweird.f32 %v1223_v9 }
 0x19f   :  { %vm872_vm1 = vcmp.ge.f32.partialorder %v839_v47, 0.0  ;;  %v905_v56 = vmul.f32 %v1504_v26, %v839_v47  ;;  %1226 = vrsqrt.f32 %v1760_v20  ;;  %vm795_vm10 = vmor %vm793_vm8, %vm794_vm7  ;;  %vm803_vm0 = vweird.f32 %v1760_v20 }
 0x1a0   :  { %v786_v27 = vsel %vm785_vm2, %v1219_v0, %v782_v52  ;;  %v641_v61 = vsub.f32 1.5, %v640_v33  ;;  %v789_v35 = vmul.f32 %v1223_v9, %v788_v34  ;;  %v464_v50 = vpop.f32.mrf.mxu1 }
 0x1a1   :  { %v1225_v59 = vpop.eup %1224  ;;  %v937_v17 = vsel %vm872_vm1, %v839_v47, %v905_v56  ;;  %v854_v7 = vmul.f32 %v786_v27, %v1451_v24  ;;  %v1771_v39 = vadd.f32 %v1492_v60, %v464_v50 }
 0x1a2   :  { %969 = vst [vmem:[%s1839_s5 + $0x60] sm:$0xff] %v937_v17  ;;  %v642_v48 = vmul.f32 %v1221_v30, %v641_v61  ;;  %v790_v45 = vmul.f32 0.5, %v789_v35  ;;  %v648_v32 = vmul.f32 %v1225_v59, %v1749_v12  ;;  %vm654_vm11 = vweird.f32 %v1225_v59  ;;  %v1234_v12 = vld [vmem:[%s1837_s3] ss:$0 sm:$0xff] }
 0x1a3   :  { %vm887_vm5 = vcmp.ge.f32.partialorder %v854_v7, 0.0  ;;  %v920_v2 = vmul.f32 %v1504_v26, %v854_v7  ;;  %1228 = vrsqrt.f32 %v1771_v39  ;;  %vm655_vm14 = vmor %vm653_vm12, %vm654_vm11  ;;  %vm663_vm4 = vweird.f32 %v1771_v39 }
 0x1a4   :  { %v646_v24 = vsel %vm645_vm6, %v1221_v30, %v642_v48  ;;  %v791_v8 = vsub.f32 1.5, %v790_v45  ;;  %v649_v3 = vmul.f32 %v1225_v59, %v648_v32  ;;  %v502_v57 = vpop.f32.mrf.mxu3 }
 0x1a5   :  { %v1227_v58 = vpop.eup %1226  ;;  %v952_v10 = vsel %vm887_vm5, %v854_v7, %v920_v2  ;;  %v840_v14 = vmul.f32 %v646_v24, %v1463_v31  ;;  %v1782_v62 = vadd.f32 %v1492_v60, %v502_v57 }
 0x1a6   :  { %984 = vst [vmem:[%s1839_s5 + $0xd8] sm:$0xff] %v952_v10  ;;  %v792_v41 = vmul.f32 %v1223_v9, %v791_v8  ;;  %v650_v4 = vmul.f32 0.5, %v649_v3  ;;  %v798_v6 = vmul.f32 %v1227_v58, %v1760_v20  ;;  %vm804_vm15 = vweird.f32 %v1227_v58 }
 0x1a7   :  { %vm873_vm9 = vcmp.ge.f32.partialorder %v840_v14, 0.0  ;;  %v906_v0 = vmul.f32 %v1504_v26, %v840_v14  ;;  %1230 = vrsqrt.f32 %v1782_v62  ;;  %vm805_vm2 = vmor %vm803_vm0, %vm804_vm15  ;;  %vm813_vm8 = vweird.f32 %v1782_v62 }
 0x1a8   :  { %v796_v31 = vsel %vm795_vm10, %v1223_v9, %v792_v41  ;;  %v651_v55 = vsub.f32 1.5, %v650_v4  ;;  %v799_v60 = vmul.f32 %v1227_v58, %v798_v6 }
 0x1a9   :  { %v1229_v15 = vpop.eup %1228  ;;  %v938_v43 = vsel %vm873_vm9, %v840_v14, %v906_v0  ;;  %v855_v22 = vmul.f32 %v796_v31, %v1459_v29 }
 0x1aa   :  { %970 = vst [vmem:[%s1839_s5 + $0x68] sm:$0xff] %v938_v43  ;;  %v652_v16 = vmul.f32 %v1225_v59, %v651_v55  ;;  %v800_v5 = vmul.f32 0.5, %v799_v60  ;;  %v658_v25 = vmul.f32 %v1229_v15, %v1771_v39  ;;  %vm664_vm3 = vweird.f32 %v1229_v15 }
 0x1ab   :  { %vm888_vm13 = vcmp.ge.f32.partialorder %v855_v22, 0.0  ;;  %v921_v21 = vmul.f32 %v1504_v26, %v855_v22  ;;  %vm665_vm6 = vmor %vm663_vm4, %vm664_vm3 }
 0x1ac   :  { %v656_v1 = vsel %vm655_vm14, %v1225_v59, %v652_v16  ;;  %v801_v28 = vsub.f32 1.5, %v800_v5  ;;  %v659_v11 = vmul.f32 %v1229_v15, %v658_v25  ;;  %v504_v30 = vpop.f32.mrf.mxu3 }
 0x1ad   :  { %v1231_v29 = vpop.eup %1230  ;;  %v953_v13 = vsel %vm888_vm13, %v855_v22, %v921_v21  ;;  %v841_v18 = vmul.f32 %v656_v1, %v1473_v42  ;;  %v505_v36 = vadd.f32 %v1234_v12, %v504_v30 }
 0x1ae   :  { %985 = vst [vmem:[%s1839_s5 + $0xe0] sm:$0xff] %v953_v13  ;;  %v802_v53 = vmul.f32 %v1227_v58, %v801_v28  ;;  %v660_v23 = vmul.f32 0.5, %v659_v11  ;;  %v808_v38 = vmul.f32 %v1231_v29, %v1782_v62  ;;  %vm814_vm7 = vweird.f32 %v1231_v29 }
 0x1af   :  { %vm874_vm1 = vcmp.ge.f32.partialorder %v841_v18, 0.0  ;;  %v907_v19 = vmul.f32 %v1504_v26, %v841_v18  ;;  %1232 = vrsqrt.f32 %v505_v36  ;;  %vm815_vm10 = vmor %vm813_vm8, %vm814_vm7  ;;  %vm823_vm13 = vweird.f32 %v505_v36 }
 0x1b0   :  { %v806_v42 = vsel %vm805_vm2, %v1227_v58, %v802_v53  ;;  %v661_v51 = vsub.f32 1.5, %v660_v23  ;;  %v809_v40 = vmul.f32 %v1231_v29, %v808_v38 }
 0x1b1   :  { %v939_v63 = vsel %vm874_vm1, %v841_v18, %v907_v19  ;;  %v856_v9 = vmul.f32 %v806_v42, %v1467_v37 }
 0x1b2   :  { %971 = vst [vmem:[%s1839_s5 + $0x70] sm:$0xff] %v939_v63  ;;  %v662_v44 = vmul.f32 %v1229_v15, %v661_v51  ;;  %v810_v47 = vmul.f32 0.5, %v809_v40 }
 0x1b3   :  { %vm889_vm5 = vcmp.ge.f32.partialorder %v856_v9, 0.0  ;;  %v922_v20 = vmul.f32 %v1504_v26, %v856_v9 }
 0x1b4   :  { %v666_v52 = vsel %vm665_vm6, %v1229_v15, %v662_v44  ;;  %v811_v33 = vsub.f32 1.5, %v810_v47 }
 0x1b5   :  { %v1233_v34 = vpop.eup %1232  ;;  %v954_v56 = vsel %vm889_vm5, %v856_v9, %v922_v20  ;;  %v842_v27 = vmul.f32 %v666_v52, %v1479_v49 }
 0x1b6   :  { %986 = vst [vmem:[%s1839_s5 + $0xe8] sm:$0xff] %v954_v56  ;;  %v812_v37 = vmul.f32 %v1231_v29, %v811_v33  ;;  %v818_v61 = vmul.f32 %v1233_v34, %v505_v36  ;;  %vm824_vm12 = vweird.f32 %v1233_v34 }
 0x1b7   :  { %vm875_vm9 = vcmp.ge.f32.partialorder %v842_v27, 0.0  ;;  %v908_v35 = vmul.f32 %v1504_v26, %v842_v27  ;;  %vm825_vm14 = vmor %vm823_vm13, %vm824_vm12 }
 0x1b8   :  { %v816_v50 = vsel %vm815_vm10, %v1231_v29, %v812_v37  ;;  %v819_v59 = vmul.f32 %v1233_v34, %v818_v61 }
 0x1b9   :  { %v940_v17 = vsel %vm875_vm9, %v842_v27, %v908_v35  ;;  %v857_v7 = vmul.f32 %v816_v50, %v1475_v46 }
 0x1ba   :  { %972 = vst [vmem:[%s1839_s5 + $0x78] sm:$0xff] %v940_v17  ;;  %v820_v49 = vmul.f32 0.5, %v819_v59 }
 0x1bb   :  { %vm890_vm11 = vcmp.ge.f32.partialorder %v857_v7, 0.0  ;;  %v923_v39 = vmul.f32 %v1504_v26, %v857_v7 }
 0x1bc   :  { %v821_v48 = vsub.f32 1.5, %v820_v49 }
 0x1bd   :  { %v955_v45 = vsel %vm890_vm11, %v857_v7, %v923_v39 }
 0x1be   :  { %987 = vst [vmem:[%s1839_s5 + $0xf0] sm:$0xff] %v955_v45  ;;  %v822_v32 = vmul.f32 %v1233_v34, %v821_v48 }
 0x1c0   :  { %v826_v2 = vsel %vm825_vm14, %v1233_v34, %v822_v32 }
 0x1c1   :  { %v858_v46 = vmul.f32 %v826_v2, %v1483_v54 }
 0x1c3   :  { %vm891_vm15 = vcmp.ge.f32.partialorder %v858_v46, 0.0  ;;  %v924_v24 = vmul.f32 %v1504_v26, %v858_v46 }
 0x1c5   :  { %v956_v8 = vsel %vm891_vm15, %v858_v46, %v924_v24 }
 0x1c6   :  { %988 = vst [vmem:[%s1839_s5 + $0xf8] sm:$0xff] %v956_v8 }

// kernel: forward.9
= control target key start
LH: loop header
LB: loop body
LE: loop exit
PB: predicated region body
PF: predicated region fallthrough
CT: control target
= control target key end

     0   :  { %s709_s1 = inlined_call_operand.vmem [shape: bf16[128,128], index: 1, kind: input, shape index: {}]   ;;  %s710_s2 = inlined_call_operand.vmem [shape: bf16[128,128], index: 2, kind: input, shape index: {}]   ;;  %s711_s0 = inlined_call_operand.vmem [shape: bf16[64,128], index: 0, kind: input, shape index: {}]   ;;  %s712_s3 = inlined_call_operand.vmem [shape: f32[1,128], index: 3, kind: input, shape index: {}]   ;;  %s713_s4 = inlined_call_operand.<no memory space> [shape: f32[1], index: 4, kind: input, shape index: {}]   ;;  %s714_s5 = inlined_call_operand.vmem [shape: f32[64,128], index: 5, kind: output, shape index: {}]  }
   0x1   :  { %v472_v0 = vld [vmem:[%s709_s1 + $0x38] sm:$0xff]  ;;  %v471_v1 = vld [vmem:[%s709_s1 + $0x30] sm:$0xff]  ;;  %v470_v2 = vld [vmem:[%s709_s1 + $0x28] sm:$0xff]  ;;  %v647_v58 = vstv %s713_s4 }
   0x2   :  { %117 = vmatpush.bf16.msra.mxu0 %v472_v0  ;;  %481 = vmatpush.bf16.msra.mxu2 %v472_v0  ;;  %v469_v3 = vld [vmem:[%s709_s1 + $0x20] sm:$0xff]  ;;  %v468_v4 = vld [vmem:[%s709_s1 + $0x18] sm:$0xff]  ;;  %v467_v6 = vld [vmem:[%s709_s1 + $0x10] sm:$0xff] }
   0x3   :  { %v480_v5 = vld [vmem:[%s710_s2 + $0x38] sm:$0xff]  ;;  %v479_v7 = vld [vmem:[%s710_s2 + $0x30] sm:$0xff]  ;;  %v466_v8 = vld [vmem:[%s709_s1 + $0x8] sm:$0xff] }
   0x4   :  { %226 = vmatpush.bf16.msra.mxu1 %v480_v5  ;;  %489 = vmatpush.bf16.msra.mxu3 %v480_v5  ;;  %v478_v9 = vld [vmem:[%s710_s2 + $0x28] sm:$0xff]  ;;  %v465_v10 = vld [vmem:[%s709_s1] sm:$0xff]  ;;  %v463_v13 = vld [vmem:[%s711_s0 + $0x10] sm:$0xff] }
   0x5   :  { %v477_v11 = vld [vmem:[%s710_s2 + $0x20] sm:$0xff]  ;;  %v476_v14 = vld [vmem:[%s710_s2 + $0x18] sm:$0xff]  ;;  %v462_v15 = vld [vmem:[%s711_s0 + $0x8] sm:$0xff] }
   0x6   :  { %118 = vmatpush.bf16.msra.mxu0 %v471_v1  ;;  %482 = vmatpush.bf16.msra.mxu2 %v471_v1  ;;  %v461_v12 = vld [vmem:[%s711_s0] sm:$0xff]  ;;  %v464_v16 = vld [vmem:[%s711_s0 + $0x18] sm:$0xff]  ;;  %v475_v17 = vld [vmem:[%s710_s2 + $0x10] sm:$0xff] }
   0x7   :  { %v474_v18 = vld [vmem:[%s710_s2 + $0x8] sm:$0xff]  ;;  %v473_v19 = vld [vmem:[%s710_s2] sm:$0xff] }
   0x8   :  { %227 = vmatpush.bf16.msra.mxu1 %v479_v7  ;;  %490 = vmatpush.bf16.msra.mxu3 %v479_v7  ;;  %v635_v40 = vld [vmem:[%s712_s3] ss:$0 sm:$0xff] }
   0xa   :  { %119 = vmatpush.bf16.msra.mxu0 %v470_v2  ;;  %483 = vmatpush.bf16.msra.mxu2 %v470_v2 }
   0xc   :  { %228 = vmatpush.bf16.msra.mxu1 %v478_v9  ;;  %491 = vmatpush.bf16.msra.mxu3 %v478_v9 }
   0xe   :  { %120 = vmatpush.bf16.msra.mxu0 %v469_v3  ;;  %484 = vmatpush.bf16.msra.mxu2 %v469_v3 }
  0x10   :  { %229 = vmatpush.bf16.msra.mxu1 %v477_v11  ;;  %492 = vmatpush.bf16.msra.mxu3 %v477_v11 }
  0x12   :  { %121 = vmatpush.bf16.msra.mxu0 %v468_v4  ;;  %485 = vmatpush.bf16.msra.mxu2 %v468_v4 }
  0x14   :  { %230 = vmatpush.bf16.msra.mxu1 %v476_v14  ;;  %493 = vmatpush.bf16.msra.mxu3 %v476_v14 }
  0x16   :  { %122 = vmatpush.bf16.msra.mxu0 %v467_v6  ;;  %486 = vmatpush.bf16.msra.mxu2 %v467_v6 }
  0x18   :  { %231 = vmatpush.bf16.msra.mxu1 %v475_v17  ;;  %494 = vmatpush.bf16.msra.mxu3 %v475_v17 }
  0x1a   :  { %123 = vmatpush.bf16.msra.mxu0 %v466_v8  ;;  %487 = vmatpush.bf16.msra.mxu2 %v466_v8 }
  0x1c   :  { %232 = vmatpush.bf16.msra.mxu1 %v474_v18  ;;  %495 = vmatpush.bf16.msra.mxu3 %v474_v18 }
  0x1e   :  { %124 = vmatpush.bf16.msra.mxu0 %v465_v10  ;;  %488 = vmatpush.bf16.msra.mxu2 %v465_v10 }
  0x20   :  { %233 = vmatpush.bf16.msra.mxu1 %v473_v19  ;;  %496 = vmatpush.bf16.msra.mxu3 %v473_v19 }
  0x21   :  { %125 = vmatmul.bf16.vlgmr.msra.gmra.mxu0 %v461_v12  ;;  %135 = vmatmul.bf16.vlgmr.msra.gmra.mxu2 %v463_v13 }
  0x31   :  { %130 = vmatmul.bf16.gmra.mxu0 %v462_v15  ;;  %140 = vmatmul.bf16.gmra.mxu2 %v464_v16 }
  0x9e   :  { %v126_v20 = vpop.f32.mrf.mxu0 }
  0x9f   :  { %v146_v22 = vmul.f32 %v126_v20, %v126_v20 }
  0xa4   :  { %v604_v21 = vpop.f32.mrf.mxu2 }
  0xa5   :  { %v150_v27 = vmul.f32 %v604_v21, %v604_v21 }
  0xa6   :  { %v606_v23 = vpop.f32.mrf.mxu0 }
  0xa7   :  { %v147_v24 = vmul.f32 %v606_v23, %v606_v23 }
  0xa9   :  { %v154_v25 = vpack.c.bf16 %v147_v24, %v146_v22 }
  0xab   :  { %234 = vmatmul.bf16.vlgmr.msra.gmra.mxu1 %v154_v25 }
  0xac   :  { %v610_v26 = vpop.f32.mrf.mxu2 }
  0xad   :  { %v151_v28 = vmul.f32 %v610_v26, %v610_v26 }
  0xae   :  { %v616_v29 = vpop.f32.mrf.mxu0 }
  0xaf   :  { %v156_v30 = vpack.c.bf16 %v151_v28, %v150_v27  ;;  %v148_v32 = vmul.f32 %v616_v29, %v616_v29 }
  0xb1   :  { %244 = vmatmul.bf16.vlgmr.msra.gmra.mxu3 %v156_v30 }
  0xb4   :  { %v618_v31 = vpop.f32.mrf.mxu2 }
  0xb5   :  { %v152_v37 = vmul.f32 %v618_v31, %v618_v31 }
  0xb6   :  { %v622_v33 = vpop.f32.mrf.mxu0 }
  0xb7   :  { %v149_v34 = vmul.f32 %v622_v33, %v622_v33 }
  0xb9   :  { %v155_v35 = vpack.c.bf16 %v149_v34, %v148_v32 }
  0xbb   :  { %239 = vmatmul.bf16.gmra.mxu1 %v155_v35 }
  0xbc   :  { %v626_v36 = vpop.f32.mrf.mxu2 }
  0xbd   :  { %v153_v38 = vmul.f32 %v626_v36, %v626_v36 }
  0xbf   :  { %v157_v39 = vpack.c.bf16 %v153_v38, %v152_v37 }
  0xc1   :  { %249 = vmatmul.bf16.gmra.mxu3 %v157_v39 }
 0x128   :  { %v235_v41 = vpop.f32.mrf.mxu1 }
 0x129   :  { %v236_v42 = vadd.f32 %v635_v40, %v235_v41 }
 0x12b   :  { %498 = vrsqrt.f32 %v236_v42  ;;  %vm261_vm1 = vweird.f32 %v236_v42 }
 0x130   :  { %v237_v43 = vpop.f32.mrf.mxu1 }
 0x131   :  { %v499_v44 = vpop.eup %498  ;;  %v238_v45 = vadd.f32 %v635_v40, %v237_v43 }
 0x132   :  { %v256_v46 = vmul.f32 %v499_v44, %v236_v42  ;;  %vm262_vm0 = vweird.f32 %v499_v44 }
 0x133   :  { %500 = vrsqrt.f32 %v238_v45  ;;  %vm263_vm2 = vmor %vm261_vm1, %vm262_vm0  ;;  %vm271_vm5 = vweird.f32 %v238_v45 }
 0x134   :  { %v257_v47 = vmul.f32 %v499_v44, %v256_v46  ;;  %v245_v48 = vpop.f32.mrf.mxu3 }
 0x135   :  { %v246_v49 = vadd.f32 %v635_v40, %v245_v48 }
 0x136   :  { %v258_v50 = vmul.f32 0.5, %v257_v47 }
 0x137   :  { %502 = vrsqrt.f32 %v246_v49  ;;  %vm301_vm8 = vweird.f32 %v246_v49 }
 0x138   :  { %v259_v51 = vsub.f32 1.5, %v258_v50  ;;  %v240_v52 = vpop.f32.mrf.mxu1 }
 0x139   :  { %v501_v53 = vpop.eup %500  ;;  %v641_v54 = vadd.f32 %v635_v40, %v240_v52 }
 0x13a   :  { %v260_v55 = vmul.f32 %v499_v44, %v259_v51  ;;  %v266_v56 = vmul.f32 %v501_v53, %v238_v45  ;;  %vm272_vm4 = vweird.f32 %v501_v53 }
 0x13b   :  { %504 = vrsqrt.f32 %v641_v54  ;;  %vm273_vm6 = vmor %vm271_vm5, %vm272_vm4  ;;  %vm281_vm12 = vweird.f32 %v641_v54 }
 0x13c   :  { %v264_v57 = vsel %vm263_vm2, %v499_v44, %v260_v55  ;;  %v267_v59 = vmul.f32 %v501_v53, %v266_v56  ;;  %v247_v60 = vpop.f32.mrf.mxu3 }
 0x13d   :  { %v503_v61 = vpop.eup %502  ;;  %v335_v62 = vmul.f32 %v264_v57, %v126_v20  ;;  %v650_v63 = vadd.f32 %v635_v40, %v247_v60 }
 0x13e   :  { %v268_v0 = vmul.f32 0.5, %v267_v59  ;;  %v296_v1 = vmul.f32 %v503_v61, %v246_v49  ;;  %vm302_vm7 = vweird.f32 %v503_v61 }
 0x13f   :  { %vm344_vm3 = vcmp.ge.f32.partialorder %v335_v62, 0.0  ;;  %v353_v2 = vmul.f32 %v647_v58, %v335_v62  ;;  %506 = vrsqrt.f32 %v650_v63  ;;  %vm303_vm10 = vmor %vm301_vm8, %vm302_vm7  ;;  %vm311_vm0 = vweird.f32 %v650_v63 }
 0x140   :  { %v269_v3 = vsub.f32 1.5, %v268_v0  ;;  %v297_v4 = vmul.f32 %v503_v61, %v296_v1  ;;  %v242_v5 = vpop.f32.mrf.mxu1 }
 0x141   :  { %v505_v6 = vpop.eup %504  ;;  %v361_v7 = vsel %vm344_vm3, %v335_v62, %v353_v2  ;;  %v655_v8 = vadd.f32 %v635_v40, %v242_v5 }
 0x142   :  { %369 = vst [vmem:[%s714_s5] sm:$0xff] %v361_v7  ;;  %v270_v9 = vmul.f32 %v501_v53, %v269_v3  ;;  %v298_v10 = vmul.f32 0.5, %v297_v4  ;;  %v276_v11 = vmul.f32 %v505_v6, %v641_v54  ;;  %vm282_vm11 = vweird.f32 %v505_v6 }
 0x143   :  { %508 = vrsqrt.f32 %v655_v8  ;;  %vm283_vm14 = vmor %vm281_vm12, %vm282_vm11  ;;  %vm291_vm4 = vweird.f32 %v655_v8 }
 0x144   :  { %v274_v12 = vsel %vm273_vm6, %v501_v53, %v270_v9  ;;  %v299_v13 = vsub.f32 1.5, %v298_v10  ;;  %v277_v14 = vmul.f32 %v505_v6, %v276_v11  ;;  %v250_v15 = vpop.f32.mrf.mxu3 }
 0x145   :  { %v507_v16 = vpop.eup %506  ;;  %v336_v17 = vmul.f32 %v274_v12, %v606_v23  ;;  %v664_v18 = vadd.f32 %v635_v40, %v250_v15 }
 0x146   :  { %v300_v19 = vmul.f32 %v503_v61, %v299_v13  ;;  %v278_v20 = vmul.f32 0.5, %v277_v14  ;;  %v306_v22 = vmul.f32 %v507_v16, %v650_v63  ;;  %vm312_vm15 = vweird.f32 %v507_v16 }
 0x147   :  { %vm345_vm9 = vcmp.ge.f32.partialorder %v336_v17, 0.0  ;;  %v354_v24 = vmul.f32 %v647_v58, %v336_v17  ;;  %510 = vrsqrt.f32 %v664_v18  ;;  %vm313_vm2 = vmor %vm311_vm0, %vm312_vm15  ;;  %vm321_vm8 = vweird.f32 %v664_v18 }
 0x148   :  { %v304_v25 = vsel %vm303_vm10, %v503_v61, %v300_v19  ;;  %v279_v27 = vsub.f32 1.5, %v278_v20  ;;  %v307_v28 = vmul.f32 %v507_v16, %v306_v22 }
 0x149   :  { %v509_v30 = vpop.eup %508  ;;  %v362_v23 = vsel %vm345_vm9, %v336_v17, %v354_v24  ;;  %v339_v32 = vmul.f32 %v304_v25, %v604_v21 }
 0x14a   :  { %370 = vst [vmem:[%s714_s5 + $0x8] sm:$0xff] %v362_v23  ;;  %v280_v34 = vmul.f32 %v505_v6, %v279_v27  ;;  %v308_v35 = vmul.f32 0.5, %v307_v28  ;;  %v286_v37 = vmul.f32 %v509_v30, %v655_v8  ;;  %vm292_vm3 = vweird.f32 %v509_v30 }
 0x14b   :  { %vm348_vm13 = vcmp.ge.f32.partialorder %v339_v32, 0.0  ;;  %v357_v38 = vmul.f32 %v647_v58, %v339_v32  ;;  %vm293_vm6 = vmor %vm291_vm4, %vm292_vm3 }
 0x14c   :  { %v284_v39 = vsel %vm283_vm14, %v505_v6, %v280_v34  ;;  %v309_v41 = vsub.f32 1.5, %v308_v35  ;;  %v287_v42 = vmul.f32 %v509_v30, %v286_v37  ;;  %v252_v43 = vpop.f32.mrf.mxu3 }
 0x14d   :  { %v511_v21 = vpop.eup %510  ;;  %v365_v44 = vsel %vm348_vm13, %v339_v32, %v357_v38  ;;  %v337_v45 = vmul.f32 %v284_v39, %v616_v29  ;;  %v253_v46 = vadd.f32 %v635_v40, %v252_v43 }
 0x14e   :  { %373 = vst [vmem:[%s714_s5 + $0x20] sm:$0xff] %v365_v44  ;;  %v310_v47 = vmul.f32 %v507_v16, %v309_v41  ;;  %v288_v48 = vmul.f32 0.5, %v287_v42  ;;  %v316_v49 = vmul.f32 %v511_v21, %v664_v18  ;;  %vm322_vm7 = vweird.f32 %v511_v21 }
 0x14f   :  { %vm346_vm1 = vcmp.ge.f32.partialorder %v337_v45, 0.0  ;;  %v355_v50 = vmul.f32 %v647_v58, %v337_v45  ;;  %512 = vrsqrt.f32 %v253_v46  ;;  %vm323_vm10 = vmor %vm321_vm8, %vm322_vm7  ;;  %vm331_vm13 = vweird.f32 %v253_v46 }
 0x150   :  { %v314_v51 = vsel %vm313_vm2, %v507_v16, %v310_v47  ;;  %v289_v52 = vsub.f32 1.5, %v288_v48  ;;  %v317_v29 = vmul.f32 %v511_v21, %v316_v49 }
 0x151   :  { %v363_v40 = vsel %vm346_vm1, %v337_v45, %v355_v50  ;;  %v340_v53 = vmul.f32 %v314_v51, %v610_v26 }
 0x152   :  { %371 = vst [vmem:[%s714_s5 + $0x10] sm:$0xff] %v363_v40  ;;  %v290_v54 = vmul.f32 %v509_v30, %v289_v52  ;;  %v318_v55 = vmul.f32 0.5, %v317_v29 }
 0x153   :  { %vm349_vm5 = vcmp.ge.f32.partialorder %v340_v53, 0.0  ;;  %v358_v56 = vmul.f32 %v647_v58, %v340_v53 }
 0x154   :  { %v294_v57 = vsel %vm293_vm6, %v509_v30, %v290_v54  ;;  %v319_v59 = vsub.f32 1.5, %v318_v55 }
 0x155   :  { %v513_v60 = vpop.eup %512  ;;  %v366_v61 = vsel %vm349_vm5, %v340_v53, %v358_v56  ;;  %v338_v62 = vmul.f32 %v294_v57, %v622_v33 }
 0x156   :  { %374 = vst [vmem:[%s714_s5 + $0x28] sm:$0xff] %v366_v61  ;;  %v320_v26 = vmul.f32 %v511_v21, %v319_v59  ;;  %v326_v63 = vmul.f32 %v513_v60, %v253_v46  ;;  %vm332_vm12 = vweird.f32 %v513_v60 }
 0x157   :  { %vm347_vm9 = vcmp.ge.f32.partialorder %v338_v62, 0.0  ;;  %v356_v0 = vmul.f32 %v647_v58, %v338_v62  ;;  %vm333_vm14 = vmor %vm331_vm13, %vm332_vm12 }
 0x158   :  { %v324_v1 = vsel %vm323_vm10, %v511_v21, %v320_v26  ;;  %v327_v2 = vmul.f32 %v513_v60, %v326_v63 }
 0x159   :  { %v364_v3 = vsel %vm347_vm9, %v338_v62, %v356_v0  ;;  %v341_v4 = vmul.f32 %v324_v1, %v618_v31 }
 0x15a   :  { %372 = vst [vmem:[%s714_s5 + $0x18] sm:$0xff] %v364_v3  ;;  %v328_v33 = vmul.f32 0.5, %v327_v2 }
 0x15b   :  { %vm350_vm11 = vcmp.ge.f32.partialorder %v341_v4, 0.0  ;;  %v359_v5 = vmul.f32 %v647_v58, %v341_v4 }
 0x15c   :  { %v329_v6 = vsub.f32 1.5, %v328_v33 }
 0x15d   :  { %v367_v7 = vsel %vm350_vm11, %v341_v4, %v359_v5 }
 0x15e   :  { %375 = vst [vmem:[%s714_s5 + $0x30] sm:$0xff] %v367_v7  ;;  %v330_v8 = vmul.f32 %v513_v60, %v329_v6 }
 0x160   :  { %v334_v9 = vsel %vm333_vm14, %v513_v60, %v330_v8 }
 0x161   :  { %v342_v31 = vmul.f32 %v334_v9, %v626_v36 }
 0x163   :  { %vm351_vm15 = vcmp.ge.f32.partialorder %v342_v31, 0.0  ;;  %v360_v10 = vmul.f32 %v647_v58, %v342_v31 }
 0x165   :  { %v368_v11 = vsel %vm351_vm15, %v342_v31, %v360_v10 }
 0x166   :  { %376 = vst [vmem:[%s714_s5 + $0x38] sm:$0xff] %v368_v11 }

// kernel: forward.11
= control target key start
LH: loop header
LB: loop body
LE: loop exit
PB: predicated region body
PF: predicated region fallthrough
CT: control target
= control target key end

     0   :  { %vm13_vm0 = vcmask 1041408   ;;  %s64_s0 = inlined_call_operand.vmem [shape: f32[2,128], index: 0, kind: input, shape index: {}]   ;;  %s65_s1 = inlined_call_operand.vmem [shape: f32[2,128], index: 1, kind: input, shape index: {}]   ;;  %s66_s2 = inlined_call_operand.vmem [shape: f32[2,128], index: 2, kind: output, shape index: {}]  }
   0x1   :  { %v11_v0 = vld [vmem:[%s64_s0] sm:$0x3] }
   0x2   :  { %v12_v1 = vmul.f32 %v11_v0, %v11_v0  ;;  %v30_v10 = vld [vmem:[%s65_s1] sm:$0x3]  ;;  %v28_v11 = vmul.f32 8.0, %v11_v0 }
   0x3   :  { %v31_v13 = vmul.f32 0.31622776, %v30_v10 }
   0x4   :  { %v14_v2 = vsel %vm13_vm0, %v12_v1, 0.0 }
   0x5   :  { %15 = vadd.xlane.f32.xlu0 %v14_v2 }
  0x78   :  { %v16_v3 = vpop.xlane.xlu0 %15 }
  0x79   :  { %v17_v4 = vmax.f32 %v16_v3, 1e-12 }
  0x7b   :  { %38 = vrsqrt.f32 %v17_v4  ;;  %vm24_vm2 = vweird.f32 %v17_v4 }
  0x81   :  { %v39_v5 = vpop.eup %38 }
  0x82   :  { %v19_v6 = vmul.f32 %v39_v5, %v17_v4  ;;  %vm25_vm1 = vweird.f32 %v39_v5 }
  0x83   :  { %vm26_vm3 = vmor %vm24_vm2, %vm25_vm1 }
  0x84   :  { %v20_v7 = vmul.f32 %v39_v5, %v19_v6 }
  0x86   :  { %v21_v8 = vmul.f32 0.5, %v20_v7 }
  0x88   :  { %v22_v9 = vsub.f32 1.5, %v21_v8 }
  0x8a   :  { %v23_v12 = vmul.f32 %v39_v5, %v22_v9 }
  0x8c   :  { %v27_v14 = vsel %vm26_vm3, %v39_v5, %v23_v12 }
  0x8d   :  { %v29_v15 = vmul.f32 %v28_v11, %v27_v14 }
  0x8f   :  { %v32_v16 = vadd.f32 %v31_v13, %v29_v15 }
  0x91   :  { %33 = vst [vmem:[%s66_s2] sm:$0x3] %v32_v16 }

// kernel: forward.12
= control target key start
LH: loop header
LB: loop body
LE: loop exit
PB: predicated region body
PF: predicated region fallthrough
CT: control target
= control target key end

     0   :  { %s519_s1 = inlined_call_operand.vmem [shape: bf16[128,128], index: 1, kind: input, shape index: {}]   ;;  %s520_s2 = inlined_call_operand.vmem [shape: bf16[128,128], index: 2, kind: input, shape index: {}]   ;;  %s521_s0 = inlined_call_operand.vmem [shape: bf16[32,128], index: 0, kind: input, shape index: {}]   ;;  %s522_s3 = inlined_call_operand.vmem [shape: f32[1,128], index: 3, kind: input, shape index: {}]   ;;  %s523_s4 = inlined_call_operand.<no memory space> [shape: f32[1], index: 4, kind: input, shape index: {}]   ;;  %s524_s5 = inlined_call_operand.vmem [shape: f32[32,128], index: 5, kind: output, shape index: {}]  }
   0x1   :  { %v368_v0 = vld [vmem:[%s519_s1 + $0x38] sm:$0xff]  ;;  %v367_v1 = vld [vmem:[%s519_s1 + $0x30] sm:$0xff]  ;;  %v366_v4 = vld [vmem:[%s519_s1 + $0x28] sm:$0xff]  ;;  %v270_v53 = vstv %s523_s4 }
   0x2   :  { %101 = vmatpush.bf16.msra.mxu0 %v368_v0  ;;  %377 = vmatpush.bf16.msra.mxu2 %v368_v0  ;;  %v376_v2 = vld [vmem:[%s520_s2 + $0x38] sm:$0xff]  ;;  %v375_v3 = vld [vmem:[%s520_s2 + $0x30] sm:$0xff]  ;;  %v374_v5 = vld [vmem:[%s520_s2 + $0x28] sm:$0xff] }
   0x3   :  { %194 = vmatpush.bf16.msra.mxu1 %v376_v2  ;;  %385 = vmatpush.bf16.msra.mxu3 %v376_v2  ;;  %v365_v6 = vld [vmem:[%s519_s1 + $0x20] sm:$0xff]  ;;  %v364_v8 = vld [vmem:[%s519_s1 + $0x18] sm:$0xff]  ;;  %v363_v10 = vld [vmem:[%s519_s1 + $0x10] sm:$0xff] }
   0x4   :  { %v373_v7 = vld [vmem:[%s520_s2 + $0x20] sm:$0xff]  ;;  %v372_v9 = vld [vmem:[%s520_s2 + $0x18] sm:$0xff]  ;;  %v362_v11 = vld [vmem:[%s519_s1 + $0x8] sm:$0xff] }
   0x5   :  { %v361_v12 = vld [vmem:[%s519_s1] sm:$0xff]  ;;  %v360_v14 = vld [vmem:[%s521_s0 + $0x8] sm:$0xff]  ;;  %v371_v15 = vld [vmem:[%s520_s2 + $0x10] sm:$0xff] }
   0x6   :  { %102 = vmatpush.bf16.msra.mxu0 %v367_v1  ;;  %378 = vmatpush.bf16.msra.mxu2 %v367_v1  ;;  %v359_v13 = vld [vmem:[%s521_s0] sm:$0xff]  ;;  %v370_v16 = vld [vmem:[%s520_s2 + $0x8] sm:$0xff] }
   0x7   :  { %195 = vmatpush.bf16.msra.mxu1 %v375_v3  ;;  %386 = vmatpush.bf16.msra.mxu3 %v375_v3  ;;  %v369_v17 = vld [vmem:[%s520_s2] sm:$0xff] }
   0x8   :  { %v393_v28 = vld [vmem:[%s522_s3] ss:$0 sm:$0xff] }
   0xa   :  { %103 = vmatpush.bf16.msra.mxu0 %v366_v4  ;;  %379 = vmatpush.bf16.msra.mxu2 %v366_v4 }
   0xb   :  { %196 = vmatpush.bf16.msra.mxu1 %v374_v5  ;;  %387 = vmatpush.bf16.msra.mxu3 %v374_v5 }
   0xe   :  { %104 = vmatpush.bf16.msra.mxu0 %v365_v6  ;;  %380 = vmatpush.bf16.msra.mxu2 %v365_v6 }
   0xf   :  { %197 = vmatpush.bf16.msra.mxu1 %v373_v7  ;;  %388 = vmatpush.bf16.msra.mxu3 %v373_v7 }
  0x12   :  { %105 = vmatpush.bf16.msra.mxu0 %v364_v8  ;;  %381 = vmatpush.bf16.msra.mxu2 %v364_v8 }
  0x13   :  { %198 = vmatpush.bf16.msra.mxu1 %v372_v9  ;;  %389 = vmatpush.bf16.msra.mxu3 %v372_v9 }
  0x16   :  { %106 = vmatpush.bf16.msra.mxu0 %v363_v10  ;;  %382 = vmatpush.bf16.msra.mxu2 %v363_v10 }
  0x17   :  { %199 = vmatpush.bf16.msra.mxu1 %v371_v15  ;;  %390 = vmatpush.bf16.msra.mxu3 %v371_v15 }
  0x1a   :  { %107 = vmatpush.bf16.msra.mxu0 %v362_v11  ;;  %383 = vmatpush.bf16.msra.mxu2 %v362_v11 }
  0x1b   :  { %200 = vmatpush.bf16.msra.mxu1 %v370_v16  ;;  %391 = vmatpush.bf16.msra.mxu3 %v370_v16 }
  0x1e   :  { %108 = vmatpush.bf16.msra.mxu0 %v361_v12  ;;  %384 = vmatpush.bf16.msra.mxu2 %v361_v12 }
  0x1f   :  { %201 = vmatpush.bf16.msra.mxu1 %v369_v17  ;;  %392 = vmatpush.bf16.msra.mxu3 %v369_v17 }
  0x21   :  { %109 = vmatmul.bf16.vlgmr.msra.gmra.mxu0 %v359_v13  ;;  %114 = vmatmul.bf16.vlgmr.msra.gmra.mxu2 %v360_v14 }
  0x9e   :  { %v110_v18 = vpop.f32.mrf.mxu0 }
  0x9f   :  { %v120_v20 = vmul.f32 %v110_v18, %v110_v18 }
  0xa4   :  { %v486_v19 = vpop.f32.mrf.mxu2 }
  0xa5   :  { %v122_v25 = vmul.f32 %v486_v19, %v486_v19 }
  0xa6   :  { %v488_v21 = vpop.f32.mrf.mxu0 }
  0xa7   :  { %v121_v22 = vmul.f32 %v488_v21, %v488_v21 }
  0xa9   :  { %v124_v23 = vpack.c.bf16 %v121_v22, %v120_v20 }
  0xab   :  { %202 = vmatmul.bf16.vlgmr.msra.gmra.mxu1 %v124_v23 }
  0xac   :  { %v492_v24 = vpop.f32.mrf.mxu2 }
  0xad   :  { %v123_v26 = vmul.f32 %v492_v24, %v492_v24 }
  0xaf   :  { %v125_v27 = vpack.c.bf16 %v123_v26, %v122_v25 }
  0xb1   :  { %207 = vmatmul.bf16.vlgmr.msra.gmra.mxu3 %v125_v27 }
 0x128   :  { %v203_v29 = vpop.f32.mrf.mxu1 }
 0x129   :  { %v204_v30 = vadd.f32 %v393_v28, %v203_v29 }
 0x12b   :  { %394 = vrsqrt.f32 %v204_v30  ;;  %vm220_vm0 = vcmp.eq.f32.partialorder %v204_v30, inf  ;;  %v223_v47 = vand.u32 2147483648, %v204_v30  ;;  %vm222_vm1 = vcmp.eq.f32.partialorder %v204_v30, 0.0 }
 0x130   :  { %v205_v31 = vpop.f32.mrf.mxu1 }
 0x131   :  { %v395_v32 = vpop.eup %394  ;;  %v206_v33 = vadd.f32 %v393_v28, %v205_v31 }
 0x132   :  { %v214_v34 = vmul.f32 %v395_v32, %v204_v30 }
 0x133   :  { %396 = vrsqrt.f32 %v206_v33  ;;  %vm232_vm3 = vcmp.eq.f32.partialorder %v206_v33, inf  ;;  %v235_v0 = vand.u32 2147483648, %v206_v33  ;;  %vm234_vm4 = vcmp.eq.f32.partialorder %v206_v33, 0.0 }
 0x134   :  { %v215_v35 = vmul.f32 %v395_v32, %v214_v34  ;;  %v208_v36 = vpop.f32.mrf.mxu3 }
 0x135   :  { %v209_v37 = vadd.f32 %v393_v28, %v208_v36 }
 0x136   :  { %v216_v38 = vmul.f32 0.5, %v215_v35 }
 0x137   :  { %398 = vrsqrt.f32 %v209_v37  ;;  %vm244_vm5 = vcmp.eq.f32.partialorder %v209_v37, inf  ;;  %vm246_vm6 = vcmp.eq.f32.partialorder %v209_v37, 0.0  ;;  %v247_v8 = vand.u32 2147483648, %v209_v37 }
 0x138   :  { %v217_v39 = vsub.f32 1.5, %v216_v38 }
 0x139   :  { %v397_v40 = vpop.eup %396 }
 0x13a   :  { %v218_v41 = vmul.f32 %v395_v32, %v217_v39  ;;  %v226_v42 = vmul.f32 %v397_v40, %v206_v33 }
 0x13c   :  { %v219_v43 = vmul.f32 %v218_v41, %v204_v30  ;;  %v227_v44 = vmul.f32 %v397_v40, %v226_v42  ;;  %v210_v45 = vpop.f32.mrf.mxu3 }
 0x13d   :  { %v399_v46 = vpop.eup %398  ;;  %v211_v48 = vadd.f32 %v393_v28, %v210_v45 }
 0x13e   :  { %v221_v49 = vsel %vm220_vm0, %v204_v30, %v219_v43  ;;  %v228_v50 = vmul.f32 0.5, %v227_v44  ;;  %v238_v51 = vmul.f32 %v399_v46, %v209_v37 }
 0x13f   :  { %v224_v52 = vsel %vm222_vm1, %v223_v47, %v221_v49  ;;  %400 = vrsqrt.f32 %v211_v48  ;;  %vm256_vm9 = vcmp.eq.f32.partialorder %v211_v48, inf  ;;  %vm258_vm10 = vcmp.eq.f32.partialorder %v211_v48, 0.0 }
 0x140   :  { %v261_v54 = vmul.f32 %v224_v52, %v110_v18  ;;  %v229_v55 = vsub.f32 1.5, %v228_v50  ;;  %v239_v56 = vmul.f32 %v399_v46, %v238_v51 }
 0x142   :  { %vm266_vm2 = vcmp.ge.f32.partialorder %v261_v54, 0.0  ;;  %v271_v57 = vmul.f32 %v270_v53, %v261_v54  ;;  %v230_v58 = vmul.f32 %v397_v40, %v229_v55  ;;  %v240_v59 = vmul.f32 0.5, %v239_v56 }
 0x144   :  { %v275_v60 = vsel %vm266_vm2, %v261_v54, %v271_v57  ;;  %v231_v61 = vmul.f32 %v230_v58, %v206_v33  ;;  %v241_v62 = vsub.f32 1.5, %v240_v59 }
 0x145   :  { %v401_v63 = vpop.eup %400  ;;  %279 = vst [vmem:[%s524_s5] sm:$0xff] %v275_v60 }
 0x146   :  { %v233_v1 = vsel %vm232_vm3, %v206_v33, %v231_v61  ;;  %v242_v2 = vmul.f32 %v399_v46, %v241_v62  ;;  %v250_v3 = vmul.f32 %v401_v63, %v211_v48 }
 0x147   :  { %v236_v4 = vsel %vm234_vm4, %v235_v0, %v233_v1 }
 0x148   :  { %v262_v5 = vmul.f32 %v236_v4, %v488_v21  ;;  %v243_v6 = vmul.f32 %v242_v2, %v209_v37  ;;  %v251_v7 = vmul.f32 %v401_v63, %v250_v3  ;;  %v259_v21 = vand.u32 2147483648, %v211_v48 }
 0x14a   :  { %vm267_vm7 = vcmp.ge.f32.partialorder %v262_v5, 0.0  ;;  %v272_v9 = vmul.f32 %v270_v53, %v262_v5  ;;  %v245_v10 = vsel %vm244_vm5, %v209_v37, %v243_v6  ;;  %v252_v11 = vmul.f32 0.5, %v251_v7 }
 0x14b   :  { %v248_v12 = vsel %vm246_vm6, %v247_v8, %v245_v10 }
 0x14c   :  { %v276_v13 = vsel %vm267_vm7, %v262_v5, %v272_v9  ;;  %v263_v14 = vmul.f32 %v248_v12, %v486_v19  ;;  %v253_v15 = vsub.f32 1.5, %v252_v11 }
 0x14d   :  { %280 = vst [vmem:[%s524_s5 + $0x8] sm:$0xff] %v276_v13 }
 0x14e   :  { %vm268_vm8 = vcmp.ge.f32.partialorder %v263_v14, 0.0  ;;  %v273_v16 = vmul.f32 %v270_v53, %v263_v14  ;;  %v254_v17 = vmul.f32 %v401_v63, %v253_v15 }
 0x150   :  { %v277_v18 = vsel %vm268_vm8, %v263_v14, %v273_v16  ;;  %v255_v20 = vmul.f32 %v254_v17, %v211_v48 }
 0x151   :  { %281 = vst [vmem:[%s524_s5 + $0x10] sm:$0xff] %v277_v18 }
 0x152   :  { %v257_v22 = vsel %vm256_vm9, %v211_v48, %v255_v20 }
 0x153   :  { %v260_v23 = vsel %vm258_vm10, %v259_v21, %v257_v22 }
 0x154   :  { %v264_v19 = vmul.f32 %v260_v23, %v492_v24 }
 0x156   :  { %vm269_vm11 = vcmp.ge.f32.partialorder %v264_v19, 0.0  ;;  %v274_v25 = vmul.f32 %v270_v53, %v264_v19 }
 0x158   :  { %v278_v26 = vsel %vm269_vm11, %v264_v19, %v274_v25 }
 0x159   :  { %282 = vst [vmem:[%s524_s5 + $0x18] sm:$0xff] %v278_v26 }

// kernel: forward.13
= control target key start
LH: loop header
LB: loop body
LE: loop exit
PB: predicated region body
PF: predicated region fallthrough
CT: control target
= control target key end

     0   :  { %s1200_s1 = inlined_call_operand.vmem [shape: bf16[128,128], index: 1, kind: input, shape index: {}]   ;;  %s1201_s0 = inlined_call_operand.vmem [shape: bf16[128,128], index: 0, kind: input, shape index: {}]   ;;  %s1202_s2 = inlined_call_operand.vmem [shape: bf16[128,128], index: 2, kind: input, shape index: {}]   ;;  %s1203_s3 = inlined_call_operand.vmem [shape: f32[1,128], index: 3, kind: input, shape index: {}]   ;;  %s1204_s4 = inlined_call_operand.<no memory space> [shape: f32[1], index: 4, kind: input, shape index: {}]   ;;  %s1205_s5 = inlined_call_operand.vmem [shape: f32[128,128], index: 5, kind: output, shape index: {}]  }
   0x1   :  { %v728_v0 = vld [vmem:[%s1200_s1 + $0x38] sm:$0xff]  ;;  %v727_v1 = vld [vmem:[%s1200_s1 + $0x30] sm:$0xff]  ;;  %v726_v2 = vld [vmem:[%s1200_s1 + $0x28] sm:$0xff] }
   0x2   :  { %149 = vmatpush.bf16.msra.mxu0 %v728_v0  ;;  %737 = vmatpush.bf16.msra.mxu2 %v728_v0  ;;  %v725_v3 = vld [vmem:[%s1200_s1 + $0x20] sm:$0xff]  ;;  %v724_v4 = vld [vmem:[%s1200_s1 + $0x18] sm:$0xff]  ;;  %v723_v5 = vld [vmem:[%s1200_s1 + $0x10] sm:$0xff] }
   0x3   :  { %v722_v6 = vld [vmem:[%s1200_s1 + $0x8] sm:$0xff]  ;;  %v721_v7 = vld [vmem:[%s1200_s1] sm:$0xff]  ;;  %v736_v12 = vld [vmem:[%s1202_s2 + $0x38] sm:$0xff] }
   0x4   :  { %v713_v8 = vld [vmem:[%s1201_s0] sm:$0xff]  ;;  %v714_v10 = vld [vmem:[%s1201_s0 + $0x8] sm:$0xff]  ;;  %290 = vmatpush.bf16.msra.mxu1 %v736_v12  ;;  %v735_v13 = vld [vmem:[%s1202_s2 + $0x30] sm:$0xff]  ;;  %745 = vmatpush.bf16.msra.mxu3 %v736_v12 }
   0x5   :  { %v717_v9 = vld [vmem:[%s1201_s0 + $0x20] sm:$0xff]  ;;  %v718_v11 = vld [vmem:[%s1201_s0 + $0x28] sm:$0xff]  ;;  %v715_v16 = vld [vmem:[%s1201_s0 + $0x10] sm:$0xff] }
   0x6   :  { %150 = vmatpush.bf16.msra.mxu0 %v727_v1  ;;  %738 = vmatpush.bf16.msra.mxu2 %v727_v1  ;;  %v734_v14 = vld [vmem:[%s1202_s2 + $0x28] sm:$0xff]  ;;  %v733_v15 = vld [vmem:[%s1202_s2 + $0x20] sm:$0xff]  ;;  %v719_v17 = vld [vmem:[%s1201_s0 + $0x30] sm:$0xff] }
   0x7   :  { %v732_v18 = vld [vmem:[%s1202_s2 + $0x18] sm:$0xff]  ;;  %v731_v21 = vld [vmem:[%s1202_s2 + $0x10] sm:$0xff]  ;;  %v730_v22 = vld [vmem:[%s1202_s2 + $0x8] sm:$0xff] }
   0x8   :  { %291 = vmatpush.bf16.msra.mxu1 %v735_v13  ;;  %746 = vmatpush.bf16.msra.mxu3 %v735_v13  ;;  %v716_v19 = vld [vmem:[%s1201_s0 + $0x18] sm:$0xff]  ;;  %v729_v23 = vld [vmem:[%s1202_s2] sm:$0xff] }
   0x9   :  { %v720_v20 = vld [vmem:[%s1201_s0 + $0x38] sm:$0xff]  ;;  %v955_v0 = vld [vmem:[%s1203_s3] ss:$0 sm:$0xff] }
   0xa   :  { %151 = vmatpush.bf16.msra.mxu0 %v726_v2  ;;  %739 = vmatpush.bf16.msra.mxu2 %v726_v2 }
   0xc   :  { %292 = vmatpush.bf16.msra.mxu1 %v734_v14  ;;  %747 = vmatpush.bf16.msra.mxu3 %v734_v14 }
   0xe   :  { %152 = vmatpush.bf16.msra.mxu0 %v725_v3  ;;  %740 = vmatpush.bf16.msra.mxu2 %v725_v3 }
  0x10   :  { %293 = vmatpush.bf16.msra.mxu1 %v733_v15  ;;  %748 = vmatpush.bf16.msra.mxu3 %v733_v15 }
  0x12   :  { %153 = vmatpush.bf16.msra.mxu0 %v724_v4  ;;  %741 = vmatpush.bf16.msra.mxu2 %v724_v4 }
  0x14   :  { %294 = vmatpush.bf16.msra.mxu1 %v732_v18  ;;  %749 = vmatpush.bf16.msra.mxu3 %v732_v18 }
  0x16   :  { %154 = vmatpush.bf16.msra.mxu0 %v723_v5  ;;  %742 = vmatpush.bf16.msra.mxu2 %v723_v5 }
  0x18   :  { %295 = vmatpush.bf16.msra.mxu1 %v731_v21  ;;  %750 = vmatpush.bf16.msra.mxu3 %v731_v21 }
  0x1a   :  { %155 = vmatpush.bf16.msra.mxu0 %v722_v6  ;;  %743 = vmatpush.bf16.msra.mxu2 %v722_v6 }
  0x1c   :  { %296 = vmatpush.bf16.msra.mxu1 %v730_v22  ;;  %751 = vmatpush.bf16.msra.mxu3 %v730_v22 }
  0x1e   :  { %156 = vmatpush.bf16.msra.mxu0 %v721_v7  ;;  %744 = vmatpush.bf16.msra.mxu2 %v721_v7 }
  0x20   :  { %297 = vmatpush.bf16.msra.mxu1 %v729_v23  ;;  %752 = vmatpush.bf16.msra.mxu3 %v729_v23 }
  0x21   :  { %157 = vmatmul.bf16.vlgmr.msra.gmra.mxu0 %v713_v8  ;;  %177 = vmatmul.bf16.vlgmr.msra.gmra.mxu2 %v717_v9 }
  0x31   :  { %162 = vmatmul.bf16.gmra.mxu0 %v714_v10  ;;  %182 = vmatmul.bf16.gmra.mxu2 %v718_v11 }
  0x41   :  { %167 = vmatmul.bf16.gmra.mxu0 %v715_v16  ;;  %187 = vmatmul.bf16.gmra.mxu2 %v719_v17 }
  0x51   :  { %172 = vmatmul.bf16.gmra.mxu0 %v716_v19  ;;  %192 = vmatmul.bf16.gmra.mxu2 %v720_v20 }
  0x9e   :  { %v888_v24 = vpop.f32.mrf.mxu0 }
  0x9f   :  { %v198_v26 = vmul.f32 %v888_v24, %v888_v24 }
  0xa4   :  { %v890_v25 = vpop.f32.mrf.mxu2 }
  0xa5   :  { %v206_v31 = vmul.f32 %v890_v25, %v890_v25 }
  0xa6   :  { %v894_v27 = vpop.f32.mrf.mxu0 }
  0xa7   :  { %v199_v28 = vmul.f32 %v894_v27, %v894_v27 }
  0xa9   :  { %v214_v29 = vpack.c.bf16 %v199_v28, %v198_v26 }
  0xab   :  { %298 = vmatmul.bf16.vlgmr.msra.gmra.mxu1 %v214_v29 }
  0xac   :  { %v898_v30 = vpop.f32.mrf.mxu2 }
  0xad   :  { %v207_v32 = vmul.f32 %v898_v30, %v898_v30 }
  0xae   :  { %v904_v33 = vpop.f32.mrf.mxu0 }
  0xaf   :  { %v218_v34 = vpack.c.bf16 %v207_v32, %v206_v31  ;;  %v200_v36 = vmul.f32 %v904_v33, %v904_v33  ;;  %v974_v31 = vstv %s1204_s4 }
  0xb1   :  { %318 = vmatmul.bf16.vlgmr.msra.gmra.mxu3 %v218_v34 }
  0xb4   :  { %v906_v35 = vpop.f32.mrf.mxu2 }
  0xb5   :  { %v208_v41 = vmul.f32 %v906_v35, %v906_v35 }
  0xb6   :  { %v910_v37 = vpop.f32.mrf.mxu0 }
  0xb7   :  { %v201_v38 = vmul.f32 %v910_v37, %v910_v37 }
  0xb9   :  { %v215_v39 = vpack.c.bf16 %v201_v38, %v200_v36 }
  0xbb   :  { %303 = vmatmul.bf16.gmra.mxu1 %v215_v39 }
  0xbc   :  { %v914_v40 = vpop.f32.mrf.mxu2 }
  0xbd   :  { %v209_v42 = vmul.f32 %v914_v40, %v914_v40 }
  0xbe   :  { %v920_v43 = vpop.f32.mrf.mxu0 }
  0xbf   :  { %v219_v44 = vpack.c.bf16 %v209_v42, %v208_v41  ;;  %v202_v46 = vmul.f32 %v920_v43, %v920_v43 }
  0xc1   :  { %323 = vmatmul.bf16.gmra.mxu3 %v219_v44 }
  0xc4   :  { %v922_v45 = vpop.f32.mrf.mxu2 }
  0xc5   :  { %v210_v51 = vmul.f32 %v922_v45, %v922_v45 }
  0xc6   :  { %v926_v47 = vpop.f32.mrf.mxu0 }
  0xc7   :  { %v203_v48 = vmul.f32 %v926_v47, %v926_v47 }
  0xc9   :  { %v216_v49 = vpack.c.bf16 %v203_v48, %v202_v46 }
  0xcb   :  { %308 = vmatmul.bf16.gmra.mxu1 %v216_v49 }
  0xcc   :  { %v930_v50 = vpop.f32.mrf.mxu2 }
  0xcd   :  { %v211_v52 = vmul.f32 %v930_v50, %v930_v50 }
  0xce   :  { %v936_v53 = vpop.f32.mrf.mxu0 }
  0xcf   :  { %v220_v54 = vpack.c.bf16 %v211_v52, %v210_v51  ;;  %v204_v56 = vmul.f32 %v936_v53, %v936_v53 }
  0xd1   :  { %328 = vmatmul.bf16.gmra.mxu3 %v220_v54 }
  0xd4   :  { %v938_v55 = vpop.f32.mrf.mxu2 }
  0xd5   :  { %v212_v61 = vmul.f32 %v938_v55, %v938_v55 }
  0xd6   :  { %v942_v57 = vpop.f32.mrf.mxu0 }
  0xd7   :  { %v205_v58 = vmul.f32 %v942_v57, %v942_v57 }
  0xd9   :  { %v217_v59 = vpack.c.bf16 %v205_v58, %v204_v56 }
  0xdb   :  { %313 = vmatmul.bf16.gmra.mxu1 %v217_v59 }
  0xdc   :  { %v946_v60 = vpop.f32.mrf.mxu2 }
  0xdd   :  { %v213_v62 = vmul.f32 %v946_v60, %v946_v60 }
  0xdf   :  { %v221_v63 = vpack.c.bf16 %v213_v62, %v212_v61 }
  0xe1   :  { %333 = vmatmul.bf16.gmra.mxu3 %v221_v63 }
 0x128   :  { %v299_v1 = vpop.f32.mrf.mxu1 }
 0x129   :  { %v300_v2 = vadd.f32 %v955_v0, %v299_v1 }
 0x12b   :  { %754 = vrsqrt.f32 %v300_v2  ;;  %vm346_vm0 = vcmp.eq.f32.partialorder %v300_v2, inf  ;;  %v349_v21 = vand.u32 2147483648, %v300_v2  ;;  %vm348_vm1 = vcmp.eq.f32.partialorder %v300_v2, 0.0 }
 0x130   :  { %v301_v3 = vpop.f32.mrf.mxu1 }
 0x131   :  { %v755_v4 = vpop.eup %754  ;;  %v302_v5 = vadd.f32 %v955_v0, %v301_v3 }
 0x132   :  { %v340_v6 = vmul.f32 %v755_v4, %v300_v2 }
 0x133   :  { %756 = vrsqrt.f32 %v302_v5  ;;  %vm358_vm3 = vcmp.eq.f32.partialorder %v302_v5, inf  ;;  %v361_v56 = vand.u32 2147483648, %v302_v5  ;;  %vm360_vm4 = vcmp.eq.f32.partialorder %v302_v5, 0.0 }
 0x134   :  { %v341_v7 = vmul.f32 %v755_v4, %v340_v6  ;;  %v319_v8 = vpop.f32.mrf.mxu3 }
 0x135   :  { %v960_v9 = vadd.f32 %v955_v0, %v319_v8 }
 0x136   :  { %v342_v10 = vmul.f32 0.5, %v341_v7 }
 0x137   :  { %758 = vrsqrt.f32 %v960_v9  ;;  %vm442_vm5 = vcmp.eq.f32.partialorder %v960_v9, inf  ;;  %vm444_vm6 = vcmp.eq.f32.partialorder %v960_v9, 0.0 }
 0x138   :  { %v343_v11 = vsub.f32 1.5, %v342_v10  ;;  %v304_v12 = vpop.f32.mrf.mxu1 }
 0x139   :  { %v757_v13 = vpop.eup %756  ;;  %v964_v14 = vadd.f32 %v955_v0, %v304_v12 }
 0x13a   :  { %v344_v15 = vmul.f32 %v755_v4, %v343_v11  ;;  %v352_v16 = vmul.f32 %v757_v13, %v302_v5 }
 0x13b   :  { %760 = vrsqrt.f32 %v964_v14  ;;  %vm370_vm7 = vcmp.eq.f32.partialorder %v964_v14, inf  ;;  %vm372_vm9 = vcmp.eq.f32.partialorder %v964_v14, 0.0 }
 0x13c   :  { %v345_v17 = vmul.f32 %v344_v15, %v300_v2  ;;  %v353_v18 = vmul.f32 %v757_v13, %v352_v16  ;;  %v321_v19 = vpop.f32.mrf.mxu3 }
 0x13d   :  { %v759_v20 = vpop.eup %758  ;;  %v968_v22 = vadd.f32 %v955_v0, %v321_v19 }
 0x13e   :  { %v347_v23 = vsel %vm346_vm0, %v300_v2, %v345_v17  ;;  %v354_v26 = vmul.f32 0.5, %v353_v18  ;;  %v436_v28 = vmul.f32 %v759_v20, %v960_v9 }
 0x13f   :  { %v350_v29 = vsel %vm348_vm1, %v349_v21, %v347_v23  ;;  %762 = vrsqrt.f32 %v968_v22  ;;  %vm454_vm10 = vcmp.eq.f32.partialorder %v968_v22, inf  ;;  %vm456_vm12 = vcmp.eq.f32.partialorder %v968_v22, 0.0 }
 0x140   :  { %v531_v32 = vmul.f32 %v350_v29, %v888_v24  ;;  %v355_v34 = vsub.f32 1.5, %v354_v26  ;;  %v437_v36 = vmul.f32 %v759_v20, %v436_v28  ;;  %v306_v38 = vpop.f32.mrf.mxu1  ;;  %v373_v26 = vand.u32 2147483648, %v964_v14 }
 0x141   :  { %v761_v39 = vpop.eup %760  ;;  %v979_v41 = vadd.f32 %v955_v0, %v306_v38 }
 0x142   :  { %vm548_vm2 = vcmp.ge.f32.partialorder %v531_v32, 0.0  ;;  %v565_v42 = vmul.f32 %v974_v31, %v531_v32  ;;  %v356_v44 = vmul.f32 %v757_v13, %v355_v34  ;;  %v438_v46 = vmul.f32 0.5, %v437_v36 }
 0x143   :  { %v364_v48 = vmul.f32 %v761_v39, %v964_v14  ;;  %764 = vrsqrt.f32 %v979_v41  ;;  %vm382_vm13 = vcmp.eq.f32.partialorder %v979_v41, inf  ;;  %vm384_vm0 = vcmp.eq.f32.partialorder %v979_v41, 0.0 }
 0x144   :  { %v581_v49 = vsel %vm548_vm2, %v531_v32, %v565_v42  ;;  %v357_v51 = vmul.f32 %v356_v44, %v302_v5  ;;  %v439_v52 = vsub.f32 1.5, %v438_v46  ;;  %v324_v24 = vpop.f32.mrf.mxu3 }
 0x145   :  { %v763_v54 = vpop.eup %762  ;;  %597 = vst [vmem:[%s1205_s5] sm:$0xff] %v581_v49  ;;  %v365_v58 = vmul.f32 %v761_v39, %v364_v48  ;;  %v988_v59 = vadd.f32 %v955_v0, %v324_v24 }
 0x146   :  { %v359_v61 = vsel %vm358_vm3, %v302_v5, %v357_v51  ;;  %v440_v62 = vmul.f32 %v759_v20, %v439_v52  ;;  %v448_v63 = vmul.f32 %v763_v54, %v968_v22  ;;  %v445_v5 = vand.u32 2147483648, %v960_v9 }
 0x147   :  { %v362_v1 = vsel %vm360_vm4, %v361_v56, %v359_v61  ;;  %v366_v2 = vmul.f32 0.5, %v365_v58  ;;  %766 = vrsqrt.f32 %v988_v59  ;;  %v457_v52 = vand.u32 2147483648, %v968_v22 }
 0x148   :  { %v532_v3 = vmul.f32 %v362_v1, %v894_v27  ;;  %v441_v4 = vmul.f32 %v440_v62, %v960_v9  ;;  %v449_v6 = vmul.f32 %v763_v54, %v448_v63  ;;  %v309_v7 = vpop.f32.mrf.mxu1  ;;  %v385_v63 = vand.u32 2147483648, %v979_v41 }
 0x149   :  { %v765_v8 = vpop.eup %764  ;;  %v367_v10 = vsub.f32 1.5, %v366_v2  ;;  %v999_v11 = vadd.f32 %v955_v0, %v309_v7  ;;  %vm466_vm1 = vcmp.eq.f32.partialorder %v988_v59, inf  ;;  %vm468_vm2 = vcmp.eq.f32.partialorder %v988_v59, 0.0 }
 0x14a   :  { %vm549_vm8 = vcmp.ge.f32.partialorder %v532_v3, 0.0  ;;  %v566_v12 = vmul.f32 %v974_v31, %v532_v3  ;;  %v443_v27 = vsel %vm442_vm5, %v960_v9, %v441_v4  ;;  %v450_v13 = vmul.f32 0.5, %v449_v6 }
 0x14b   :  { %v446_v15 = vsel %vm444_vm6, %v445_v5, %v443_v27  ;;  %v368_v16 = vmul.f32 %v761_v39, %v367_v10  ;;  %v376_v17 = vmul.f32 %v765_v8, %v979_v41  ;;  %768 = vrsqrt.f32 %v999_v11 }
 0x14c   :  { %v582_v18 = vsel %vm549_vm8, %v532_v3, %v566_v12  ;;  %v539_v19 = vmul.f32 %v446_v15, %v890_v25  ;;  %v451_v20 = vsub.f32 1.5, %v450_v13  ;;  %v326_v21 = vpop.f32.mrf.mxu3  ;;  %vm394_vm3 = vcmp.eq.f32.partialorder %v999_v11, inf }
 0x14d   :  { %v767_v23 = vpop.eup %766  ;;  %598 = vst [vmem:[%s1205_s5 + $0x8] sm:$0xff] %v582_v18  ;;  %v369_v9 = vmul.f32 %v368_v16, %v964_v14  ;;  %v377_v28 = vmul.f32 %v765_v8, %v376_v17  ;;  %v1020_v38 = vadd.f32 %v955_v0, %v326_v21  ;;  %vm396_vm5 = vcmp.eq.f32.partialorder %v999_v11, 0.0 }
 0x14e   :  { %vm556_vm11 = vcmp.ge.f32.partialorder %v539_v19, 0.0  ;;  %v573_v29 = vmul.f32 %v974_v31, %v539_v19  ;;  %v452_v25 = vmul.f32 %v763_v54, %v451_v20  ;;  %v460_v32 = vmul.f32 %v767_v23, %v988_v59 }
 0x14f   :  { %v371_v34 = vsel %vm370_vm7, %v964_v14, %v369_v9  ;;  %v378_v36 = vmul.f32 0.5, %v377_v28  ;;  %770 = vrsqrt.f32 %v1020_v38  ;;  %vm478_vm8 = vcmp.eq.f32.partialorder %v1020_v38, inf }
 0x150   :  { %v589_v39 = vsel %vm556_vm11, %v539_v19, %v573_v29  ;;  %v374_v42 = vsel %vm372_vm9, %v373_v26, %v371_v34  ;;  %v453_v44 = vmul.f32 %v452_v25, %v968_v22  ;;  %v461_v46 = vmul.f32 %v767_v23, %v460_v32  ;;  %v311_v48 = vpop.f32.mrf.mxu1 }
 0x151   :  { %v769_v49 = vpop.eup %768  ;;  %605 = vst [vmem:[%s1205_s5 + $0x40] sm:$0xff] %v589_v39  ;;  %v533_v51 = vmul.f32 %v374_v42, %v904_v33  ;;  %v379_v24 = vsub.f32 1.5, %v378_v36  ;;  %v1043_v7 = vadd.f32 %v955_v0, %v311_v48  ;;  %v469_v19 = vand.u32 2147483648, %v988_v59 }
 0x152   :  { %v455_v14 = vsel %vm454_vm10, %v968_v22, %v453_v44  ;;  %v462_v54 = vmul.f32 0.5, %v461_v46  ;;  %v388_v56 = vmul.f32 %v769_v49, %v999_v11  ;;  %v397_v34 = vand.u32 2147483648, %v999_v11 }
 0x153   :  { %vm550_vm14 = vcmp.ge.f32.partialorder %v533_v51, 0.0  ;;  %v567_v58 = vmul.f32 %v974_v31, %v533_v51  ;;  %v458_v33 = vsel %vm456_vm12, %v457_v52, %v455_v14  ;;  %v380_v61 = vmul.f32 %v765_v8, %v379_v24 }
 0x154   :  { %v540_v62 = vmul.f32 %v458_v33, %v898_v30  ;;  %v463_v1 = vsub.f32 1.5, %v462_v54  ;;  %v389_v2 = vmul.f32 %v769_v49, %v388_v56  ;;  %v329_v3 = vpop.f32.mrf.mxu3  ;;  %772 = vrsqrt.f32 %v1043_v7 }
 0x155   :  { %v583_v4 = vsel %vm550_vm14, %v533_v51, %v567_v58  ;;  %v381_v6 = vmul.f32 %v380_v61, %v979_v41  ;;  %v1046_v5 = vadd.f32 %v955_v0, %v329_v3  ;;  %v771_v10 = vpop.eup %770  ;;  %vm480_vm9 = vcmp.eq.f32.partialorder %v1020_v38, 0.0 }
 0x156   :  { %599 = vst [vmem:[%s1205_s5 + $0x10] sm:$0xff] %v583_v4  ;;  %vm557_vm15 = vcmp.ge.f32.partialorder %v540_v62, 0.0  ;;  %v574_v30 = vmul.f32 %v974_v31, %v540_v62  ;;  %v464_v22 = vmul.f32 %v767_v23, %v463_v1  ;;  %v390_v8 = vmul.f32 0.5, %v389_v2 }
 0x157   :  { %v383_v12 = vsel %vm382_vm13, %v979_v41, %v381_v6  ;;  %v472_v41 = vmul.f32 %v771_v10, %v1020_v38  ;;  %774 = vrsqrt.f32 %v1046_v5  ;;  %vm406_vm10 = vcmp.eq.f32.partialorder %v1043_v7, inf }
 0x158   :  { %v590_v27 = vsel %vm557_vm15, %v540_v62, %v574_v30  ;;  %v386_v13 = vsel %vm384_vm0, %v385_v63, %v383_v12  ;;  %v465_v15 = vmul.f32 %v464_v22, %v988_v59  ;;  %v391_v16 = vsub.f32 1.5, %v390_v8  ;;  %v314_v17 = vpop.f32.mrf.mxu1 }
 0x159   :  { %606 = vst [vmem:[%s1205_s5 + $0x48] sm:$0xff] %v590_v27  ;;  %v534_v18 = vmul.f32 %v386_v13, %v910_v37  ;;  %v473_v26 = vmul.f32 %v771_v10, %v472_v41  ;;  %v1074_v29 = vadd.f32 %v955_v0, %v314_v17  ;;  %vm408_vm11 = vcmp.eq.f32.partialorder %v1043_v7, 0.0 }
 0x15a   :  { %v467_v20 = vsel %vm466_vm1, %v988_v59, %v465_v15  ;;  %v392_v21 = vmul.f32 %v769_v49, %v391_v16  ;;  %v773_v32 = vpop.eup %772  ;;  %v409_v15 = vand.u32 2147483648, %v1043_v7  ;;  %vm490_vm13 = vcmp.eq.f32.partialorder %v1046_v5, inf }
 0x15b   :  { %vm551_vm4 = vcmp.ge.f32.partialorder %v534_v18, 0.0  ;;  %v568_v23 = vmul.f32 %v974_v31, %v534_v18  ;;  %v470_v9 = vsel %vm468_vm2, %v469_v19, %v467_v20  ;;  %v474_v36 = vmul.f32 0.5, %v473_v26 }
 0x15c   :  { %v541_v37 = vmul.f32 %v470_v9, %v906_v35  ;;  %v393_v28 = vmul.f32 %v392_v21, %v999_v11  ;;  %v331_v25 = vpop.f32.mrf.mxu3  ;;  %v400_v44 = vmul.f32 %v773_v32, %v1043_v7  ;;  %776 = vrsqrt.f32 %v1074_v29 }
 0x15d   :  { %v584_v59 = vsel %vm551_vm4, %v534_v18, %v568_v23  ;;  %v1078_v39 = vadd.f32 %v955_v0, %v331_v25  ;;  %v775_v46 = vpop.eup %774  ;;  %v475_v49 = vsub.f32 1.5, %v474_v36  ;;  %vm492_vm14 = vcmp.eq.f32.partialorder %v1046_v5, 0.0 }
 0x15e   :  { %600 = vst [vmem:[%s1205_s5 + $0x18] sm:$0xff] %v584_v59  ;;  %vm558_vm6 = vcmp.ge.f32.partialorder %v541_v37, 0.0  ;;  %v575_v35 = vmul.f32 %v974_v31, %v541_v37  ;;  %v395_v42 = vsel %vm394_vm3, %v999_v11, %v393_v28  ;;  %v401_v24 = vmul.f32 %v773_v32, %v400_v44 }
 0x15f   :  { %v398_v48 = vsel %vm396_vm5, %v397_v34, %v395_v42  ;;  %v484_v14 = vmul.f32 %v775_v46, %v1046_v5  ;;  %v476_v54 = vmul.f32 %v771_v10, %v475_v49  ;;  %778 = vrsqrt.f32 %v1078_v39 }
 0x160   :  { %v591_v51 = vsel %vm558_vm6, %v541_v37, %v575_v35  ;;  %v535_v52 = vmul.f32 %v398_v48, %v920_v43  ;;  %v316_v11 = vpop.f32.mrf.mxu1  ;;  %v402_v58 = vmul.f32 0.5, %v401_v24  ;;  %v481_v43 = vand.u32 2147483648, %v1020_v38 }
 0x161   :  { %607 = vst [vmem:[%s1205_s5 + $0x50] sm:$0xff] %v591_v51  ;;  %v485_v33 = vmul.f32 %v775_v46, %v484_v14  ;;  %v477_v61 = vmul.f32 %v476_v54, %v1020_v38  ;;  %v1100_v2 = vadd.f32 %v955_v0, %v316_v11  ;;  %v493_v26 = vand.u32 2147483648, %v1046_v5 }
 0x162   :  { %vm552_vm7 = vcmp.ge.f32.partialorder %v535_v52, 0.0  ;;  %v569_v56 = vmul.f32 %v974_v31, %v535_v52  ;;  %v403_v63 = vsub.f32 1.5, %v402_v58  ;;  %v777_v4 = vpop.eup %776  ;;  %vm418_vm0 = vcmp.eq.f32.partialorder %v1074_v29, inf }
 0x163   :  { %v486_v1 = vmul.f32 0.5, %v485_v33  ;;  %v479_v6 = vsel %vm478_vm8, %v1020_v38, %v477_v61  ;;  %v412_v12 = vmul.f32 %v777_v4, %v1074_v29  ;;  %780 = vrsqrt.f32 %v1100_v2 }
 0x164   :  { %v585_v62 = vsel %vm552_vm7, %v535_v52, %v569_v56  ;;  %v334_v3 = vpop.f32.mrf.mxu3  ;;  %v482_v22 = vsel %vm480_vm9, %v481_v43, %v479_v6  ;;  %v404_v8 = vmul.f32 %v773_v32, %v403_v63  ;;  %vm420_vm2 = vcmp.eq.f32.partialorder %v1074_v29, 0.0 }
 0x165   :  { %601 = vst [vmem:[%s1205_s5 + $0x20] sm:$0xff] %v585_v62  ;;  %v1109_v30 = vadd.f32 %v955_v0, %v334_v3  ;;  %v487_v10 = vsub.f32 1.5, %v486_v1  ;;  %v779_v27 = vpop.eup %778  ;;  %v542_v13 = vmul.f32 %v482_v22, %v914_v40  ;;  %v413_v17 = vmul.f32 %v777_v4, %v412_v12 }
 0x166   :  { %v405_v38 = vmul.f32 %v404_v8, %v1043_v7  ;;  %v496_v18 = vmul.f32 %v779_v27, %v1078_v39  ;;  %vm502_vm3 = vcmp.eq.f32.partialorder %v1078_v39, inf  ;;  %v505_v43 = vand.u32 2147483648, %v1078_v39 }
 0x167   :  { %v488_v16 = vmul.f32 %v775_v46, %v487_v10  ;;  %vm559_vm12 = vcmp.ge.f32.partialorder %v542_v13, 0.0  ;;  %v576_v19 = vmul.f32 %v974_v31, %v542_v13  ;;  %782 = vrsqrt.f32 %v1109_v30 }
 0x168   :  { %v407_v40 = vsel %vm406_vm10, %v1043_v7, %v405_v38  ;;  %v414_v20 = vmul.f32 0.5, %v413_v17  ;;  %v497_v21 = vmul.f32 %v779_v27, %v496_v18  ;;  %vm504_vm4 = vcmp.eq.f32.partialorder %v1078_v39, 0.0 }
 0x169   :  { %v489_v41 = vmul.f32 %v488_v16, %v1046_v5  ;;  %v592_v23 = vsel %vm559_vm12, %v542_v13, %v576_v19  ;;  %v410_v9 = vsel %vm408_vm11, %v409_v15, %v407_v40  ;;  %v781_v34 = vpop.eup %780  ;;  %vm430_vm7 = vcmp.eq.f32.partialorder %v1100_v2, inf }
 0x16a   :  { %608 = vst [vmem:[%s1205_s5 + $0x58] sm:$0xff] %v592_v23  ;;  %v536_v37 = vmul.f32 %v410_v9, %v926_v47  ;;  %v415_v25 = vsub.f32 1.5, %v414_v20  ;;  %v498_v32 = vmul.f32 0.5, %v497_v21  ;;  %v433_v15 = vand.u32 2147483648, %v1100_v2 }
 0x16b   :  { %v491_v28 = vsel %vm490_vm13, %v1046_v5, %v489_v41  ;;  %v424_v5 = vmul.f32 %v781_v34, %v1100_v2  ;;  %vm432_vm8 = vcmp.eq.f32.partialorder %v1100_v2, 0.0  ;;  %vm514_vm9 = vcmp.eq.f32.partialorder %v1109_v30, inf }
 0x16c   :  { %v336_v59 = vpop.f32.mrf.mxu3  ;;  %v494_v36 = vsel %vm492_vm14, %v493_v26, %v491_v28  ;;  %vm553_vm15 = vcmp.ge.f32.partialorder %v536_v37, 0.0  ;;  %v570_v35 = vmul.f32 %v974_v31, %v536_v37  ;;  %v416_v44 = vmul.f32 %v777_v4, %v415_v25 }
 0x16d   :  { %v1135_v7 = vadd.f32 %v955_v0, %v336_v59  ;;  %v543_v42 = vmul.f32 %v494_v36, %v922_v45  ;;  %v783_v46 = vpop.eup %782  ;;  %v499_v47 = vsub.f32 1.5, %v498_v32  ;;  %v421_v45 = vand.u32 2147483648, %v1074_v29 }
 0x16e   :  { %v586_v48 = vsel %vm553_vm15, %v536_v37, %v570_v35  ;;  %v417_v0 = vmul.f32 %v416_v44, %v1074_v29  ;;  %v425_v52 = vmul.f32 %v781_v34, %v424_v5  ;;  %v508_v24 = vmul.f32 %v783_v46, %v1109_v30 }
 0x16f   :  { %784 = vrsqrt.f32 %v1135_v7  ;;  %vm560_vm1 = vcmp.ge.f32.partialorder %v543_v42, 0.0  ;;  %v577_v49 = vmul.f32 %v974_v31, %v543_v42  ;;  %602 = vst [vmem:[%s1205_s5 + $0x28] sm:$0xff] %v586_v48  ;;  %v500_v51 = vmul.f32 %v779_v27, %v499_v47 }
 0x170   :  { %v419_v54 = vsel %vm418_vm0, %v1074_v29, %v417_v0  ;;  %v426_v58 = vmul.f32 0.5, %v425_v52  ;;  %v509_v33 = vmul.f32 %v783_v46, %v508_v24  ;;  %v517_v19 = vand.u32 2147483648, %v1109_v30 }
 0x171   :  { %v593_v14 = vsel %vm560_vm1, %v543_v42, %v577_v49  ;;  %v422_v11 = vsel %vm420_vm2, %v421_v45, %v419_v54  ;;  %v501_v56 = vmul.f32 %v500_v51, %v1078_v39  ;;  %vm516_vm10 = vcmp.eq.f32.partialorder %v1109_v30, 0.0 }
 0x172   :  { %609 = vst [vmem:[%s1205_s5 + $0x60] sm:$0xff] %v593_v14  ;;  %v537_v61 = vmul.f32 %v422_v11, %v936_v53  ;;  %v427_v29 = vsub.f32 1.5, %v426_v58  ;;  %v510_v1 = vmul.f32 0.5, %v509_v33  ;;  %vm526_vm12 = vcmp.eq.f32.partialorder %v1135_v7, inf }
 0x173   :  { %v503_v63 = vsel %vm502_vm3, %v1078_v39, %v501_v56  ;;  %vm528_vm14 = vcmp.eq.f32.partialorder %v1135_v7, 0.0 }
 0x174   :  { %vm554_vm5 = vcmp.ge.f32.partialorder %v537_v61, 0.0  ;;  %v571_v3 = vmul.f32 %v974_v31, %v537_v61  ;;  %v506_v4 = vsel %vm504_vm4, %v505_v43, %v503_v63  ;;  %v428_v53 = vmul.f32 %v781_v34, %v427_v29 }
 0x175   :  { %v785_v62 = vpop.eup %784  ;;  %v544_v22 = vmul.f32 %v506_v4, %v930_v50  ;;  %v511_v8 = vsub.f32 1.5, %v510_v1 }
 0x176   :  { %v520_v6 = vmul.f32 %v785_v62, %v1135_v7  ;;  %v587_v10 = vsel %vm554_vm5, %v537_v61, %v571_v3  ;;  %v429_v27 = vmul.f32 %v428_v53, %v1100_v2 }
 0x177   :  { %603 = vst [vmem:[%s1205_s5 + $0x30] sm:$0xff] %v587_v10  ;;  %vm561_vm6 = vcmp.ge.f32.partialorder %v544_v22, 0.0  ;;  %v578_v39 = vmul.f32 %v974_v31, %v544_v22  ;;  %v512_v13 = vmul.f32 %v783_v46, %v511_v8 }
 0x178   :  { %v521_v12 = vmul.f32 %v785_v62, %v520_v6  ;;  %v431_v16 = vsel %vm430_vm7, %v1100_v2, %v429_v27 }
 0x179   :  { %v594_v50 = vsel %vm561_vm6, %v544_v22, %v578_v39  ;;  %v513_v17 = vmul.f32 %v512_v13, %v1109_v30  ;;  %v434_v18 = vsel %vm432_vm8, %v433_v15, %v431_v16 }
 0x17a   :  { %v522_v38 = vmul.f32 0.5, %v521_v12  ;;  %610 = vst [vmem:[%s1205_s5 + $0x68] sm:$0xff] %v594_v50  ;;  %v538_v41 = vmul.f32 %v434_v18, %v942_v57  ;;  %v529_v57 = vand.u32 2147483648, %v1135_v7 }
 0x17b   :  { %v515_v20 = vsel %vm514_vm9, %v1109_v30, %v513_v17 }
 0x17c   :  { %v523_v40 = vsub.f32 1.5, %v522_v38  ;;  %v518_v21 = vsel %vm516_vm10, %v517_v19, %v515_v20  ;;  %vm555_vm11 = vcmp.ge.f32.partialorder %v538_v41, 0.0  ;;  %v572_v23 = vmul.f32 %v974_v31, %v538_v41 }
 0x17d   :  { %v545_v9 = vmul.f32 %v518_v21, %v938_v55 }
 0x17e   :  { %v524_v2 = vmul.f32 %v785_v62, %v523_v40  ;;  %v588_v37 = vsel %vm555_vm11, %v538_v41, %v572_v23 }
 0x17f   :  { %vm562_vm13 = vcmp.ge.f32.partialorder %v545_v9, 0.0  ;;  %v579_v28 = vmul.f32 %v974_v31, %v545_v9  ;;  %604 = vst [vmem:[%s1205_s5 + $0x38] sm:$0xff] %v588_v37 }
 0x180   :  { %v525_v26 = vmul.f32 %v524_v2, %v1135_v7 }
 0x181   :  { %v595_v25 = vsel %vm562_vm13, %v545_v9, %v579_v28 }
 0x182   :  { %v527_v30 = vsel %vm526_vm12, %v1135_v7, %v525_v26  ;;  %611 = vst [vmem:[%s1205_s5 + $0x70] sm:$0xff] %v595_v25 }
 0x183   :  { %v530_v55 = vsel %vm528_vm14, %v529_v57, %v527_v30 }
 0x184   :  { %v546_v32 = vmul.f32 %v530_v55, %v946_v60 }
 0x186   :  { %vm563_vm15 = vcmp.ge.f32.partialorder %v546_v32, 0.0  ;;  %v580_v59 = vmul.f32 %v974_v31, %v546_v32 }
 0x188   :  { %v596_v34 = vsel %vm563_vm15, %v546_v32, %v580_v59 }
 0x189   :  { %612 = vst [vmem:[%s1205_s5 + $0x78] sm:$0xff] %v596_v34 }

// kernel: forward.14
= control target key start
LH: loop header
LB: loop body
LE: loop exit
PB: predicated region body
PF: predicated region fallthrough
CT: control target
= control target key end

     0   :  { %s4686_s1 = inlined_call_operand.vmem [shape: bf16[256,128], index: 1, kind: input, shape index: {}]   ;;  %s4687_s0 = inlined_call_operand.vmem [shape: bf16[512,256], index: 0, kind: input, shape index: {}]   ;;  %s4688_s2 = inlined_call_operand.vmem [shape: bf16[128,128], index: 2, kind: input, shape index: {}]   ;;  %s4689_s3 = inlined_call_operand.vmem [shape: f32[1,128], index: 3, kind: input, shape index: {}]   ;;  %s4690_s4 = inlined_call_operand.<no memory space> [shape: f32[1], index: 4, kind: input, shape index: {}]   ;;  %s4691_s5 = inlined_call_operand.vmem [shape: f32[512,128], index: 5, kind: output, shape index: {}]  }
   0x1   :  { %v2721_v0 = vld [vmem:[%s4686_s1 + $0x38] sm:$0xff]  ;;  %v2720_v2 = vld [vmem:[%s4686_s1 + $0x30] sm:$0xff]  ;;  %v2719_v4 = vld [vmem:[%s4686_s1 + $0x28] sm:$0xff] }
   0x2   :  { %v2729_v1 = vld [vmem:[%s4686_s1 + $0x78] sm:$0xff]  ;;  %533 = vmatpush.bf16.msra.mxu0 %v2721_v0  ;;  %2738 = vmatpush.bf16.msra.mxu3 %v2721_v0  ;;  %v2728_v3 = vld [vmem:[%s4686_s1 + $0x70] sm:$0xff]  ;;  %v2727_v5 = vld [vmem:[%s4686_s1 + $0x68] sm:$0xff] }
   0x3   :  { %702 = vmatpush.bf16.msra.mxu1 %v2729_v1  ;;  %v2718_v6 = vld [vmem:[%s4686_s1 + $0x20] sm:$0xff]  ;;  %v2717_v8 = vld [vmem:[%s4686_s1 + $0x18] sm:$0xff]  ;;  %v2716_v10 = vld [vmem:[%s4686_s1 + $0x10] sm:$0xff] }
   0x4   :  { %v2726_v7 = vld [vmem:[%s4686_s1 + $0x60] sm:$0xff]  ;;  %v2725_v9 = vld [vmem:[%s4686_s1 + $0x58] sm:$0xff]  ;;  %v2724_v11 = vld [vmem:[%s4686_s1 + $0x50] sm:$0xff] }
   0x5   :  { %v2715_v12 = vld [vmem:[%s4686_s1 + $0x8] sm:$0xff]  ;;  %v2714_v14 = vld [vmem:[%s4686_s1] sm:$0xff]  ;;  %v2308_v25 = vld [vmem:[%s4687_s0 + $0x10] sm:$0xf] }
   0x6   :  { %534 = vmatpush.bf16.msra.mxu0 %v2720_v2  ;;  %2739 = vmatpush.bf16.msra.mxu3 %v2720_v2  ;;  %v2723_v13 = vld [vmem:[%s4686_s1 + $0x48] sm:$0xff]  ;;  %v2300_v15 = vld [vmem:[%s4687_s0] sm:$0xf]  ;;  %v2650_v20 = vld [vmem:[%s4687_s0 + $0x4] sm:$0xf] }
   0x7   :  { %703 = vmatpush.bf16.msra.mxu1 %v2728_v3  ;;  %v2651_v16 = vld [vmem:[%s4687_s0 + $0x4] sm:$0xf0]  ;;  %v2492_v17 = vld [vmem:[%s4687_s0 + $0x180] sm:$0xf]  ;;  %v2302_v21 = vld [vmem:[%s4687_s0 + $0x8] sm:$0xf0] }
   0x8   :  { %v2699_v18 = vld [vmem:[%s4687_s0 + $0x184] sm:$0xf0]  ;;  %v2722_v19 = vld [vmem:[%s4686_s1 + $0x40] sm:$0xff]  ;;  %v2301_v22 = vor.u32 %v2651_v16, %v2300_v15  ;;  %v2305_v24 = vor.u32 %v2650_v20, %v2302_v21  ;;  %v2653_v26 = vld [vmem:[%s4687_s0 + $0x14] sm:$0xf0] }
   0x9   :  { %v2493_v23 = vor.u32 %v2699_v18, %v2492_v17  ;;  %v2500_v27 = vld [vmem:[%s4687_s0 + $0x190] sm:$0xf]  ;;  %v2701_v28 = vld [vmem:[%s4687_s0 + $0x194] sm:$0xf0]  ;;  %v2652_v29 = vld [vmem:[%s4687_s0 + $0x14] sm:$0xf]  ;;  %v2309_v31 = vor.u32 %v2653_v26, %v2308_v25 }
   0xa   :  { %535 = vmatpush.bf16.msra.mxu0 %v2719_v4  ;;  %2740 = vmatpush.bf16.msra.mxu3 %v2719_v4  ;;  %v2310_v30 = vld [vmem:[%s4687_s0 + $0x18] sm:$0xf0]  ;;  %v2501_v32 = vor.u32 %v2701_v28, %v2500_v27  ;;  %v2316_v34 = vld [vmem:[%s4687_s0 + $0x20] sm:$0xf]  ;;  %v2655_v35 = vld [vmem:[%s4687_s0 + $0x24] sm:$0xf0] }
   0xb   :  { %704 = vmatpush.bf16.msra.mxu1 %v2727_v5  ;;  %v2313_v33 = vor.u32 %v2652_v29, %v2310_v30  ;;  %v2508_v36 = vld [vmem:[%s4687_s0 + $0x1a0] sm:$0xf]  ;;  %v2703_v37 = vld [vmem:[%s4687_s0 + $0x1a4] sm:$0xf0]  ;;  %v2654_v38 = vld [vmem:[%s4687_s0 + $0x24] sm:$0xf]  ;;  %v2317_v40 = vor.u32 %v2655_v35, %v2316_v34 }
   0xc   :  { %v2318_v39 = vld [vmem:[%s4687_s0 + $0x28] sm:$0xf0]  ;;  %v2509_v41 = vor.u32 %v2703_v37, %v2508_v36  ;;  %v2324_v43 = vld [vmem:[%s4687_s0 + $0x30] sm:$0xf]  ;;  %v2657_v44 = vld [vmem:[%s4687_s0 + $0x34] sm:$0xf0] }
   0xd   :  { %v2321_v42 = vor.u32 %v2654_v38, %v2318_v39  ;;  %v2516_v45 = vld [vmem:[%s4687_s0 + $0x1b0] sm:$0xf]  ;;  %v2705_v46 = vld [vmem:[%s4687_s0 + $0x1b4] sm:$0xf0]  ;;  %v2656_v47 = vld [vmem:[%s4687_s0 + $0x34] sm:$0xf]  ;;  %v2325_v49 = vor.u32 %v2657_v44, %v2324_v43 }
   0xe   :  { %536 = vmatpush.bf16.msra.mxu0 %v2718_v6  ;;  %2741 = vmatpush.bf16.msra.mxu3 %v2718_v6  ;;  %v2326_v48 = vld [vmem:[%s4687_s0 + $0x38] sm:$0xf0]  ;;  %v2517_v50 = vor.u32 %v2705_v46, %v2516_v45  ;;  %v2332_v52 = vld [vmem:[%s4687_s0 + $0x40] sm:$0xf]  ;;  %v2659_v53 = vld [vmem:[%s4687_s0 + $0x44] sm:$0xf0] }
   0xf   :  { %705 = vmatpush.bf16.msra.mxu1 %v2726_v7  ;;  %v2329_v51 = vor.u32 %v2656_v47, %v2326_v48  ;;  %v2524_v54 = vld [vmem:[%s4687_s0 + $0x1c0] sm:$0xf]  ;;  %v2707_v55 = vld [vmem:[%s4687_s0 + $0x1c4] sm:$0xf0]  ;;  %v2658_v56 = vld [vmem:[%s4687_s0 + $0x44] sm:$0xf]  ;;  %v2333_v58 = vor.u32 %v2659_v53, %v2332_v52 }
  0x10   :  { %v2334_v57 = vld [vmem:[%s4687_s0 + $0x48] sm:$0xf0]  ;;  %v2525_v59 = vor.u32 %v2707_v55, %v2524_v54  ;;  %v2737_v61 = vld [vmem:[%s4688_s2 + $0x38] sm:$0xff]  ;;  %v2340_v62 = vld [vmem:[%s4687_s0 + $0x50] sm:$0xf] }
  0x11   :  { %v2337_v60 = vor.u32 %v2658_v56, %v2334_v57  ;;  %1035 = vmatpush.bf16.msra.mxu2 %v2737_v61  ;;  %v2661_v63 = vld [vmem:[%s4687_s0 + $0x54] sm:$0xf0]  ;;  %v2532_v0 = vld [vmem:[%s4687_s0 + $0x1d0] sm:$0xf]  ;;  %v2660_v2 = vld [vmem:[%s4687_s0 + $0x54] sm:$0xf] }
  0x12   :  { %537 = vmatpush.bf16.msra.mxu0 %v2717_v8  ;;  %2742 = vmatpush.bf16.msra.mxu3 %v2717_v8  ;;  %v2341_v4 = vor.u32 %v2661_v63, %v2340_v62  ;;  %v2735_v8 = vld [vmem:[%s4688_s2 + $0x28] sm:$0xff]  ;;  %v2733_v18 = vld [vmem:[%s4688_s2 + $0x18] sm:$0xff]  ;;  %v2732_v20 = vld [vmem:[%s4688_s2 + $0x10] sm:$0xff] }
  0x13   :  { %706 = vmatpush.bf16.msra.mxu1 %v2725_v9  ;;  %v2350_v15 = vld [vmem:[%s4687_s0 + $0x68] sm:$0xf0]  ;;  %v2548_v25 = vld [vmem:[%s4687_s0 + $0x1f0] sm:$0xf]  ;;  %v2713_v26 = vld [vmem:[%s4687_s0 + $0x1f4] sm:$0xf0] }
  0x14   :  { %v2731_v21 = vld [vmem:[%s4688_s2 + $0x8] sm:$0xff]  ;;  %v2664_v27 = vld [vmem:[%s4687_s0 + $0x74] sm:$0xf]  ;;  %v2358_v28 = vld [vmem:[%s4687_s0 + $0x78] sm:$0xf0]  ;;  %v2549_v30 = vor.u32 %v2713_v26, %v2548_v25 }
  0x15   :  { %v2698_v34 = vld [vmem:[%s4687_s0 + $0x184] sm:$0xf]  ;;  %v2494_v35 = vld [vmem:[%s4687_s0 + $0x188] sm:$0xf0]  ;;  %v2372_v48 = vld [vmem:[%s4687_s0 + $0x90] sm:$0xf] }
  0x16   :  { %538 = vmatpush.bf16.msra.mxu0 %v2716_v10  ;;  %2743 = vmatpush.bf16.msra.mxu3 %v2716_v10  ;;  %v2348_v10 = vld [vmem:[%s4687_s0 + $0x60] sm:$0xf]  ;;  %v2666_v36 = vld [vmem:[%s4687_s0 + $0x84] sm:$0xf]  ;;  %v2366_v37 = vld [vmem:[%s4687_s0 + $0x88] sm:$0xf0]  ;;  %v2497_v39 = vor.u32 %v2698_v34, %v2494_v35 }
  0x17   :  { %707 = vmatpush.bf16.msra.mxu1 %v2724_v11  ;;  %v2700_v52 = vld [vmem:[%s4687_s0 + $0x194] sm:$0xf]  ;;  %v2502_v53 = vld [vmem:[%s4687_s0 + $0x198] sm:$0xf0] }
  0x18   :  { %v2668_v54 = vld [vmem:[%s4687_s0 + $0x94] sm:$0xf]  ;;  %v2374_v55 = vld [vmem:[%s4687_s0 + $0x98] sm:$0xf0] }
  0x1a   :  { %539 = vmatpush.bf16.msra.mxu0 %v2715_v12  ;;  %2744 = vmatpush.bf16.msra.mxu3 %v2715_v12  ;;  %v2540_v12 = vld [vmem:[%s4687_s0 + $0x1e0] sm:$0xf] }
  0x1b   :  { %708 = vmatpush.bf16.msra.mxu1 %v2723_v13 }
  0x1e   :  { %540 = vmatpush.bf16.msra.mxu0 %v2714_v14  ;;  %2745 = vmatpush.bf16.msra.mxu3 %v2714_v14  ;;  %v2662_v14 = vld [vmem:[%s4687_s0 + $0x64] sm:$0xf] }
  0x1f   :  { %709 = vmatpush.bf16.msra.mxu1 %v2722_v19 }
  0x21   :  { %541 = vmatmul.bf16.vlgmr.msra.gmra.mxu0 %v2301_v22  ;;  %661 = vmatmul.bf16.vlgmr.msra.gmra.mxu3 %v2493_v23  ;;  %v2730_v22 = vld [vmem:[%s4688_s2] sm:$0xff]  ;;  %v2356_v23 = vld [vmem:[%s4687_s0 + $0x70] sm:$0xf] }
  0x22   :  { %2746 = vmatpush.bf16.msrb.mxu3 %v2729_v1  ;;  %710 = vmatmul.bf16.vlgmr.msra.gmra.mxu1 %v2305_v24  ;;  %v2709_v1 = vld [vmem:[%s4687_s0 + $0x1d4] sm:$0xf0] }
  0x23   :  { %v2665_v24 = vld [vmem:[%s4687_s0 + $0x74] sm:$0xf0] }
  0x24   :  { %v2357_v29 = vor.u32 %v2665_v24, %v2356_v23  ;;  %v2388_v24 = vld [vmem:[%s4687_s0 + $0xb0] sm:$0xf] }
  0x26   :  { %2747 = vmatpush.bf16.msrb.mxu3 %v2728_v3  ;;  %v2342_v3 = vld [vmem:[%s4687_s0 + $0x58] sm:$0xf0] }
  0x27   :  { %v2345_v6 = vor.u32 %v2660_v2, %v2342_v3 }
  0x2a   :  { %2748 = vmatpush.bf16.msrb.mxu3 %v2727_v5  ;;  %v2533_v5 = vor.u32 %v2709_v1, %v2532_v0 }
  0x2e   :  { %2749 = vmatpush.bf16.msrb.mxu3 %v2726_v7  ;;  %v2736_v7 = vld [vmem:[%s4688_s2 + $0x30] sm:$0xff] }
  0x2f   :  { %1036 = vmatpush.bf16.msra.mxu2 %v2736_v7 }
  0x31   :  { %546 = vmatmul.bf16.gmra.mxu0 %v2309_v31  ;;  %666 = vmatmul.bf16.gmra.mxu3 %v2501_v32  ;;  %v2361_v31 = vor.u32 %v2664_v27, %v2358_v28  ;;  %v2364_v32 = vld [vmem:[%s4687_s0 + $0x80] sm:$0xf]  ;;  %v2673_v27 = vld [vmem:[%s4687_s0 + $0xb4] sm:$0xf0]  ;;  %v2704_v28 = vld [vmem:[%s4687_s0 + $0x1b4] sm:$0xf] }
  0x32   :  { %2750 = vmatpush.bf16.msrb.mxu3 %v2725_v9  ;;  %715 = vmatmul.bf16.gmra.mxu1 %v2313_v33  ;;  %v2734_v9 = vld [vmem:[%s4688_s2 + $0x20] sm:$0xff]  ;;  %v2667_v33 = vld [vmem:[%s4687_s0 + $0x84] sm:$0xf0]  ;;  %v2389_v34 = vor.u32 %v2673_v27, %v2388_v24 }
  0x33   :  { %1037 = vmatpush.bf16.msra.mxu2 %v2735_v8  ;;  %v2365_v38 = vor.u32 %v2667_v33, %v2364_v32 }
  0x36   :  { %2751 = vmatpush.bf16.msrb.mxu3 %v2724_v11  ;;  %v2663_v11 = vld [vmem:[%s4687_s0 + $0x64] sm:$0xf0] }
  0x37   :  { %1038 = vmatpush.bf16.msra.mxu2 %v2734_v9  ;;  %v2349_v16 = vor.u32 %v2663_v11, %v2348_v10  ;;  %v2670_v10 = vld [vmem:[%s4687_s0 + $0xa4] sm:$0xf]  ;;  %v2382_v11 = vld [vmem:[%s4687_s0 + $0xa8] sm:$0xf0] }
  0x3a   :  { %2752 = vmatpush.bf16.msrb.mxu3 %v2723_v13  ;;  %v2711_v13 = vld [vmem:[%s4687_s0 + $0x1e4] sm:$0xf0] }
  0x3b   :  { %v2541_v17 = vor.u32 %v2711_v13, %v2540_v12  ;;  %1039 = vmatpush.bf16.msra.mxu2 %v2733_v18 }
  0x3e   :  { %2753 = vmatpush.bf16.msrb.mxu3 %v2722_v19  ;;  %v2353_v19 = vor.u32 %v2662_v14, %v2350_v15 }
  0x3f   :  { %1040 = vmatpush.bf16.msra.mxu2 %v2732_v20 }
  0x41   :  { %551 = vmatmul.bf16.gmra.mxu0 %v2317_v40  ;;  %671 = vmatmul.bf16.gmra.mxu3 %v2509_v41  ;;  %v2369_v41 = vor.u32 %v2666_v36, %v2366_v37 }
  0x42   :  { %720 = vmatmul.bf16.gmra.mxu1 %v2321_v42  ;;  %2754 = vmatpush.bf16.msra.mxu3 %v2737_v61  ;;  %v2377_v61 = vor.u32 %v2668_v54, %v2374_v55  ;;  %v2398_v54 = vld [vmem:[%s4687_s0 + $0xc8] sm:$0xf0] }
  0x43   :  { %1041 = vmatpush.bf16.msra.mxu2 %v2731_v21 }
  0x46   :  { %2755 = vmatpush.bf16.msra.mxu3 %v2736_v7  ;;  %v2671_v7 = vld [vmem:[%s4687_s0 + $0xa4] sm:$0xf0] }
  0x47   :  { %1042 = vmatpush.bf16.msra.mxu2 %v2730_v22 }
  0x4a   :  { %2756 = vmatpush.bf16.msra.mxu3 %v2735_v8  ;;  %v2702_v8 = vld [vmem:[%s4687_s0 + $0x1a4] sm:$0xf] }
  0x4e   :  { %2757 = vmatpush.bf16.msra.mxu3 %v2734_v9  ;;  %v2510_v9 = vld [vmem:[%s4687_s0 + $0x1a8] sm:$0xf0] }
  0x4f   :  { %v2513_v15 = vor.u32 %v2702_v8, %v2510_v9 }
  0x51   :  { %556 = vmatmul.bf16.gmra.mxu0 %v2325_v49  ;;  %676 = vmatmul.bf16.gmra.mxu3 %v2517_v50 }
  0x52   :  { %725 = vmatmul.bf16.gmra.mxu1 %v2329_v51  ;;  %2758 = vmatpush.bf16.msra.mxu3 %v2733_v18  ;;  %v2669_v51 = vld [vmem:[%s4687_s0 + $0x94] sm:$0xf0] }
  0x56   :  { %2759 = vmatpush.bf16.msra.mxu3 %v2732_v20 }
  0x5a   :  { %2760 = vmatpush.bf16.msra.mxu3 %v2731_v21 }
  0x5e   :  { %2761 = vmatpush.bf16.msra.mxu3 %v2730_v22 }
  0x61   :  { %561 = vmatmul.bf16.gmra.mxu0 %v2333_v58  ;;  %681 = vmatmul.bf16.gmra.mxu3 %v2525_v59  ;;  %v2373_v58 = vor.u32 %v2669_v51, %v2372_v48  ;;  %v2505_v59 = vor.u32 %v2700_v52, %v2502_v53  ;;  %v2706_v51 = vld [vmem:[%s4687_s0 + $0x1c4] sm:$0xf]  ;;  %v2526_v52 = vld [vmem:[%s4687_s0 + $0x1c8] sm:$0xf0] }
  0x62   :  { %730 = vmatmul.bf16.gmra.mxu1 %v2337_v60  ;;  %v2674_v53 = vld [vmem:[%s4687_s0 + $0xc4] sm:$0xf] }
  0x71   :  { %566 = vmatmul.bf16.gmra.mxu0 %v2341_v4  ;;  %686 = vmatmul.bf16.gmra.mxu3 %v2533_v5  ;;  %v2380_v4 = vld [vmem:[%s4687_s0 + $0xa0] sm:$0xf] }
  0x72   :  { %735 = vmatmul.bf16.gmra.mxu1 %v2345_v6  ;;  %v2381_v14 = vor.u32 %v2671_v7, %v2380_v4  ;;  %v2404_v7 = vld [vmem:[%s4687_s0 + $0xd0] sm:$0xf] }
  0x81   :  { %571 = vmatmul.bf16.gmra.mxu0 %v2349_v16  ;;  %691 = vmatmul.bf16.gmra.mxu3 %v2541_v17  ;;  %v2385_v17 = vor.u32 %v2670_v10, %v2382_v11  ;;  %v2677_v10 = vld [vmem:[%s4687_s0 + $0xd4] sm:$0xf0]  ;;  %v2708_v11 = vld [vmem:[%s4687_s0 + $0x1d4] sm:$0xf] }
  0x82   :  { %740 = vmatmul.bf16.gmra.mxu1 %v2353_v19 }
  0x91   :  { %576 = vmatmul.bf16.gmra.mxu0 %v2357_v29  ;;  %696 = vmatmul.bf16.gmra.mxu3 %v2549_v30  ;;  %v2518_v29 = vld [vmem:[%s4687_s0 + $0x1b8] sm:$0xf0]  ;;  %v2672_v30 = vld [vmem:[%s4687_s0 + $0xb4] sm:$0xf] }
  0x92   :  { %745 = vmatmul.bf16.gmra.mxu1 %v2361_v31  ;;  %v2390_v31 = vld [vmem:[%s4687_s0 + $0xb8] sm:$0xf0]  ;;  %v2521_v35 = vor.u32 %v2704_v28, %v2518_v29 }
  0x93   :  { %v2393_v37 = vor.u32 %v2672_v30, %v2390_v31  ;;  %v2412_v31 = vld [vmem:[%s4687_s0 + $0xe0] sm:$0xf] }
  0x9e   :  { %v542_v40 = vpop.f32.mrf.mxu0 }
  0x9f   :  { %v711_v42 = vpop.f32.mrf.mxu1 }
  0xa0   :  { %v3159_v44 = vadd.f32 %v711_v42, %v542_v40 }
  0xa1   :  { %581 = vmatmul.bf16.gmra.mxu0 %v2365_v38  ;;  %830 = vmatmul.bf16.vlgmr.msrb.gmra.mxu3 %v2497_v39 }
  0xa2   :  { %750 = vmatmul.bf16.gmra.mxu1 %v2369_v41  ;;  %v871_v49 = vmul.f32 %v3159_v44, %v3159_v44 }
  0xa4   :  { %v3157_v43 = vpop.f32.mrf.mxu3 }
  0xa6   :  { %v544_v45 = vpop.f32.mrf.mxu0 }
  0xa7   :  { %v713_v46 = vpop.f32.mrf.mxu1 }
  0xa8   :  { %v3161_v47 = vadd.f32 %v713_v46, %v544_v45  ;;  %v2396_v46 = vld [vmem:[%s4687_s0 + $0xc0] sm:$0xf] }
  0xaa   :  { %v872_v50 = vmul.f32 %v3161_v47, %v3161_v47 }
  0xac   :  { %v3185_v56 = vpop.f32.mrf.mxu3  ;;  %v935_v57 = vpack.c.bf16 %v872_v50, %v871_v49  ;;  %v2675_v50 = vld [vmem:[%s4687_s0 + $0xc4] sm:$0xf0] }
  0xae   :  { %1043 = vmatmul.bf16.vlgmr.msra.gmra.mxu2 %v935_v57  ;;  %v547_v60 = vpop.f32.mrf.mxu0 }
  0xaf   :  { %v716_v62 = vpop.f32.mrf.mxu1 }
  0xb0   :  { %v3189_v0 = vadd.f32 %v716_v62, %v547_v60 }
  0xb1   :  { %586 = vmatmul.bf16.gmra.mxu0 %v2373_v58  ;;  %835 = vmatmul.bf16.gmra.mxu3 %v2505_v59  ;;  %v2397_v58 = vor.u32 %v2675_v50, %v2396_v46  ;;  %v2529_v59 = vor.u32 %v2706_v51, %v2526_v52 }
  0xb2   :  { %755 = vmatmul.bf16.gmra.mxu1 %v2377_v61  ;;  %v873_v5 = vmul.f32 %v3189_v0, %v3189_v0  ;;  %v2401_v61 = vor.u32 %v2674_v53, %v2398_v54 }
  0xb4   :  { %v3187_v63 = vpop.f32.mrf.mxu3 }
  0xb6   :  { %v549_v1 = vpop.f32.mrf.mxu0 }
  0xb7   :  { %v718_v2 = vpop.f32.mrf.mxu1 }
  0xb8   :  { %v3191_v3 = vadd.f32 %v718_v2, %v549_v1 }
  0xba   :  { %v874_v6 = vmul.f32 %v3191_v3, %v3191_v3 }
  0xbc   :  { %v3215_v12 = vpop.f32.mrf.mxu3  ;;  %v936_v13 = vpack.c.bf16 %v874_v6, %v873_v5 }
  0xbe   :  { %1048 = vmatmul.bf16.gmra.mxu2 %v936_v13  ;;  %v552_v16 = vpop.f32.mrf.mxu0  ;;  %v2534_v13 = vld [vmem:[%s4687_s0 + $0x1d8] sm:$0xf0] }
  0xbf   :  { %v721_v18 = vpop.f32.mrf.mxu1 }
  0xc0   :  { %v3219_v20 = vadd.f32 %v721_v18, %v552_v16  ;;  %v2405_v18 = vor.u32 %v2677_v10, %v2404_v7  ;;  %v2550_v7 = vld [vmem:[%s4687_s0 + $0x1f8] sm:$0xf0] }
  0xc1   :  { %591 = vmatmul.bf16.gmra.mxu0 %v2381_v14  ;;  %840 = vmatmul.bf16.gmra.mxu3 %v2513_v15  ;;  %v2676_v14 = vld [vmem:[%s4687_s0 + $0xd4] sm:$0xf]  ;;  %v2406_v15 = vld [vmem:[%s4687_s0 + $0xd8] sm:$0xf0] }
  0xc2   :  { %760 = vmatmul.bf16.gmra.mxu1 %v2385_v17  ;;  %v875_v25 = vmul.f32 %v3219_v20, %v3219_v20  ;;  %v2409_v24 = vor.u32 %v2676_v14, %v2406_v15 }
  0xc4   :  { %v3217_v19 = vpop.f32.mrf.mxu3 }
  0xc6   :  { %v554_v21 = vpop.f32.mrf.mxu0 }
  0xc7   :  { %v723_v22 = vpop.f32.mrf.mxu1 }
  0xc8   :  { %v3221_v23 = vadd.f32 %v723_v22, %v554_v21  ;;  %v2537_v21 = vor.u32 %v2708_v11, %v2534_v13 }
  0xca   :  { %v876_v26 = vmul.f32 %v3221_v23, %v3221_v23 }
  0xcc   :  { %v3245_v32 = vpop.f32.mrf.mxu3  ;;  %v937_v33 = vpack.c.bf16 %v876_v26, %v875_v25 }
  0xce   :  { %1053 = vmatmul.bf16.gmra.mxu2 %v937_v33  ;;  %v557_v36 = vpop.f32.mrf.mxu0 }
  0xcf   :  { %v726_v38 = vpop.f32.mrf.mxu1 }
  0xd0   :  { %v3249_v40 = vadd.f32 %v726_v38, %v557_v36  ;;  %v2710_v36 = vld [vmem:[%s4687_s0 + $0x1e4] sm:$0xf] }
  0xd1   :  { %596 = vmatmul.bf16.gmra.mxu0 %v2389_v34  ;;  %845 = vmatmul.bf16.gmra.mxu3 %v2521_v35  ;;  %v2679_v35 = vld [vmem:[%s4687_s0 + $0xe4] sm:$0xf0]  ;;  %v2678_v38 = vld [vmem:[%s4687_s0 + $0xe4] sm:$0xf] }
  0xd2   :  { %765 = vmatmul.bf16.gmra.mxu1 %v2393_v37  ;;  %v877_v48 = vmul.f32 %v3249_v40, %v3249_v40  ;;  %v2542_v37 = vld [vmem:[%s4687_s0 + $0x1e8] sm:$0xf0] }
  0xd4   :  { %v3247_v39 = vpop.f32.mrf.mxu3 }
  0xd6   :  { %v559_v41 = vpop.f32.mrf.mxu0 }
  0xd7   :  { %v728_v42 = vpop.f32.mrf.mxu1 }
  0xd8   :  { %v3251_v45 = vadd.f32 %v728_v42, %v559_v41  ;;  %v2414_v41 = vld [vmem:[%s4687_s0 + $0xe8] sm:$0xf0] }
  0xd9   :  { %v2417_v51 = vor.u32 %v2678_v38, %v2414_v41 }
  0xda   :  { %v878_v49 = vmul.f32 %v3251_v45, %v3251_v45 }
  0xdc   :  { %v3275_v55 = vpop.f32.mrf.mxu3  ;;  %v938_v57 = vpack.c.bf16 %v878_v49, %v877_v48  ;;  %v2413_v48 = vor.u32 %v2679_v35, %v2412_v31  ;;  %v2545_v49 = vor.u32 %v2710_v36, %v2542_v37  ;;  %v2682_v35 = vld [vmem:[%s4687_s0 + $0x104] sm:$0xf]  ;;  %v2430_v36 = vld [vmem:[%s4687_s0 + $0x108] sm:$0xf0] }
  0xde   :  { %1058 = vmatmul.bf16.gmra.mxu2 %v938_v57  ;;  %v562_v60 = vpop.f32.mrf.mxu0 }
  0xdf   :  { %v731_v62 = vpop.f32.mrf.mxu1 }
  0xe0   :  { %v3279_v2 = vadd.f32 %v731_v62, %v562_v60  ;;  %v2420_v60 = vld [vmem:[%s4687_s0 + $0xf0] sm:$0xf] }
  0xe1   :  { %601 = vmatmul.bf16.gmra.mxu0 %v2397_v58  ;;  %850 = vmatmul.bf16.gmra.mxu3 %v2529_v59 }
  0xe2   :  { %770 = vmatmul.bf16.gmra.mxu1 %v2401_v61  ;;  %v879_v8 = vmul.f32 %v3279_v2, %v3279_v2 }
  0xe4   :  { %v3277_v1 = vpop.f32.mrf.mxu3 }
  0xe6   :  { %v564_v4 = vpop.f32.mrf.mxu0 }
  0xe7   :  { %v733_v5 = vpop.f32.mrf.mxu1 }
  0xe8   :  { %v3281_v6 = vadd.f32 %v733_v5, %v564_v4  ;;  %v2681_v4 = vld [vmem:[%s4687_s0 + $0xf4] sm:$0xf0]  ;;  %v2712_v5 = vld [vmem:[%s4687_s0 + $0x1f4] sm:$0xf] }
  0xe9   :  { %v2421_v13 = vor.u32 %v2681_v4, %v2420_v60  ;;  %v2553_v14 = vor.u32 %v2712_v5, %v2550_v7  ;;  %v2685_v4 = vld [vmem:[%s4687_s0 + $0x114] sm:$0xf0]  ;;  %v2684_v7 = vld [vmem:[%s4687_s0 + $0x114] sm:$0xf] }
  0xea   :  { %v880_v9 = vmul.f32 %v3281_v6, %v3281_v6 }
  0xec   :  { %v3305_v16 = vpop.f32.mrf.mxu3  ;;  %v939_v17 = vpack.c.bf16 %v880_v9, %v879_v8  ;;  %v2680_v8 = vld [vmem:[%s4687_s0 + $0xf4] sm:$0xf]  ;;  %v2422_v9 = vld [vmem:[%s4687_s0 + $0xf8] sm:$0xf0] }
  0xee   :  { %1063 = vmatmul.bf16.gmra.mxu2 %v939_v17  ;;  %v567_v22 = vpop.f32.mrf.mxu0  ;;  %v2425_v17 = vor.u32 %v2680_v8, %v2422_v9  ;;  %v2438_v8 = vld [vmem:[%s4687_s0 + $0x118] sm:$0xf0] }
  0xef   :  { %v736_v25 = vpop.f32.mrf.mxu1 }
  0xf0   :  { %v3309_v27 = vadd.f32 %v736_v25, %v567_v22 }
  0xf1   :  { %606 = vmatmul.bf16.gmra.mxu0 %v2405_v18  ;;  %855 = vmatmul.bf16.gmra.mxu3 %v2537_v21 }
  0xf2   :  { %775 = vmatmul.bf16.gmra.mxu1 %v2409_v24  ;;  %v881_v33 = vmul.f32 %v3309_v27, %v3309_v27 }
  0xf4   :  { %v3307_v26 = vpop.f32.mrf.mxu3 }
  0xf6   :  { %v569_v28 = vpop.f32.mrf.mxu0 }
  0xf7   :  { %v738_v29 = vpop.f32.mrf.mxu1 }
  0xf8   :  { %v3311_v30 = vadd.f32 %v738_v29, %v569_v28 }
  0xfa   :  { %v882_v34 = vmul.f32 %v3311_v30, %v3311_v30 }
  0xfc   :  { %v3335_v42 = vpop.f32.mrf.mxu3  ;;  %v940_v46 = vpack.c.bf16 %v882_v34, %v881_v33  ;;  %v2428_v33 = vld [vmem:[%s4687_s0 + $0x100] sm:$0xf]  ;;  %v2683_v34 = vld [vmem:[%s4687_s0 + $0x104] sm:$0xf0] }
  0xfd   :  { %v2429_v41 = vor.u32 %v2683_v34, %v2428_v33 }
  0xfe   :  { %1068 = vmatmul.bf16.gmra.mxu2 %v940_v46  ;;  %v572_v50 = vpop.f32.mrf.mxu0 }
  0xff   :  { %v741_v52 = vpop.f32.mrf.mxu1 }
 0x100   :  { %v3339_v54 = vadd.f32 %v741_v52, %v572_v50 }
 0x101   :  { %611 = vmatmul.bf16.gmra.mxu0 %v2413_v48  ;;  %860 = vmatmul.bf16.gmra.mxu3 %v2545_v49  ;;  %v2433_v48 = vor.u32 %v2682_v35, %v2430_v36 }
 0x102   :  { %780 = vmatmul.bf16.gmra.mxu1 %v2417_v51  ;;  %v883_v61 = vmul.f32 %v3339_v54, %v3339_v54 }
 0x104   :  { %v3337_v53 = vpop.f32.mrf.mxu3 }
 0x106   :  { %v574_v57 = vpop.f32.mrf.mxu0 }
 0x107   :  { %v743_v58 = vpop.f32.mrf.mxu1 }
 0x108   :  { %v3341_v59 = vadd.f32 %v743_v58, %v574_v57 }
 0x10a   :  { %v884_v62 = vmul.f32 %v3341_v59, %v3341_v59 }
 0x10c   :  { %v3365_v10 = vpop.f32.mrf.mxu3  ;;  %v941_v11 = vpack.c.bf16 %v884_v62, %v883_v61  ;;  %v2436_v62 = vld [vmem:[%s4687_s0 + $0x110] sm:$0xf] }
 0x10e   :  { %1073 = vmatmul.bf16.gmra.mxu2 %v941_v11  ;;  %v577_v15 = vpop.f32.mrf.mxu0 }
 0x10f   :  { %v746_v18 = vpop.f32.mrf.mxu1 }
 0x110   :  { %v3369_v22 = vadd.f32 %v746_v18, %v577_v15 }
 0x111   :  { %616 = vmatmul.bf16.gmra.mxu0 %v2421_v13  ;;  %865 = vmatmul.bf16.gmra.mxu3 %v2553_v14  ;;  %v2437_v14 = vor.u32 %v2685_v4, %v2436_v62  ;;  %v2686_v62 = vld [vmem:[%s4687_s0 + $0x124] sm:$0xf]  ;;  %v2446_v4 = vld [vmem:[%s4687_s0 + $0x128] sm:$0xf0] }
 0x112   :  { %785 = vmatmul.bf16.gmra.mxu1 %v2425_v17  ;;  %v885_v29 = vmul.f32 %v3369_v22, %v3369_v22  ;;  %v2441_v17 = vor.u32 %v2684_v7, %v2438_v8 }
 0x114   :  { %v3367_v21 = vpop.f32.mrf.mxu3 }
 0x116   :  { %v579_v24 = vpop.f32.mrf.mxu0 }
 0x117   :  { %v748_v25 = vpop.f32.mrf.mxu1 }
 0x118   :  { %v3371_v28 = vadd.f32 %v748_v25, %v579_v24 }
 0x11a   :  { %v886_v31 = vmul.f32 %v3371_v28, %v3371_v28 }
 0x11c   :  { %v3389_v37 = vpop.f32.mrf.mxu3  ;;  %v942_v38 = vpack.c.bf16 %v886_v31, %v885_v29 }
 0x11e   :  { %1078 = vmatmul.bf16.gmra.mxu2 %v942_v38  ;;  %v582_v46 = vpop.f32.mrf.mxu0 }
 0x11f   :  { %v751_v49 = vpop.f32.mrf.mxu1 }
 0x120   :  { %v3391_v51 = vadd.f32 %v751_v49, %v582_v46 }
 0x121   :  { %621 = vmatmul.bf16.gmra.mxu0 %v2429_v41 }
 0x122   :  { %790 = vmatmul.bf16.gmra.mxu1 %v2433_v48  ;;  %v887_v60 = vmul.f32 %v3391_v51, %v3391_v51 }
 0x124   :  { %v831_v50 = vpop.f32.mrf.mxu3 }
 0x125   :  { %v3406_v5 = vadd.f32 %v831_v50, %v3157_v43  ;;  %v3420_v43 = vld [vmem:[%s4689_s3] ss:$0 sm:$0xff] }
 0x126   :  { %v584_v52 = vpop.f32.mrf.mxu0  ;;  %v2444_v50 = vld [vmem:[%s4687_s0 + $0x120] sm:$0xf] }
 0x127   :  { %v753_v57 = vpop.f32.mrf.mxu1  ;;  %v919_v18 = vmul.f32 %v3406_v5, %v3406_v5 }
 0x128   :  { %v3393_v58 = vadd.f32 %v753_v57, %v584_v52  ;;  %v2687_v52 = vld [vmem:[%s4687_s0 + $0x124] sm:$0xf0] }
 0x12a   :  { %v888_v61 = vmul.f32 %v3393_v58, %v3393_v58 }
 0x12c   :  { %v833_v9 = vpop.f32.mrf.mxu3  ;;  %v943_v11 = vpack.c.bf16 %v888_v61, %v887_v60 }
 0x12d   :  { %v3415_v13 = vadd.f32 %v833_v9, %v3185_v56 }
 0x12e   :  { %1083 = vmatmul.bf16.gmra.mxu2 %v943_v11  ;;  %v587_v15 = vpop.f32.mrf.mxu0 }
 0x12f   :  { %v920_v24 = vmul.f32 %v3415_v13, %v3415_v13  ;;  %v756_v25 = vpop.f32.mrf.mxu1 }
 0x130   :  { %v3427_v35 = vadd.f32 %v756_v25, %v587_v15 }
 0x131   :  { %v959_v29 = vpack.c.bf16 %v920_v24, %v919_v18  ;;  %v1044_v31 = vpop.f32.mrf.mxu2  ;;  %626 = vmatmul.bf16.gmra.mxu0 %v2437_v14  ;;  %v2445_v14 = vor.u32 %v2687_v52, %v2444_v50 }
 0x132   :  { %v1045_v56 = vadd.f32 %v3420_v43, %v1044_v31  ;;  %795 = vmatmul.bf16.gmra.mxu1 %v2441_v17  ;;  %v889_v57 = vmul.f32 %v3427_v35, %v3427_v35 }
 0x133   :  { %1163 = vmatmul.bf16.vlgmr.msra.gmra.mxu3 %v959_v29 }
 0x134   :  { %2763 = vrsqrt.f32 %v1045_v56  ;;  %v836_v33 = vpop.f32.mrf.mxu3  ;;  %vm1211_vm0 = vcmp.eq.f32.partialorder %v1045_v56, inf  ;;  %vm1213_vm1 = vcmp.eq.f32.partialorder %v1045_v56, 0.0 }
 0x135   :  { %v3445_v61 = vadd.f32 %v836_v33, %v3187_v63  ;;  %v2449_v63 = vor.u32 %v2686_v62, %v2446_v4 }
 0x136   :  { %v589_v34 = vpop.f32.mrf.mxu0 }
 0x137   :  { %v758_v36 = vpop.f32.mrf.mxu1  ;;  %v921_v18 = vmul.f32 %v3445_v61, %v3445_v61 }
 0x138   :  { %v3429_v38 = vadd.f32 %v758_v36, %v589_v34 }
 0x139   :  { %v1046_v41 = vpop.f32.mrf.mxu2 }
 0x13a   :  { %v2764_v46 = vpop.eup %2763  ;;  %v3432_v48 = vadd.f32 %v3420_v43, %v1046_v41  ;;  %v890_v49 = vmul.f32 %v3429_v38, %v3429_v38 }
 0x13b   :  { %v1205_v60 = vmul.f32 %v2764_v46, %v1045_v56 }
 0x13c   :  { %2765 = vrsqrt.f32 %v3432_v48  ;;  %v838_v7 = vpop.f32.mrf.mxu3  ;;  %v944_v11 = vpack.c.bf16 %v890_v49, %v889_v57  ;;  %v1214_v57 = vand.u32 2147483648, %v1045_v56  ;;  %vm1223_vm3 = vcmp.eq.f32.partialorder %v3432_v48, inf }
 0x13d   :  { %v1206_v8 = vmul.f32 %v2764_v46, %v1205_v60  ;;  %v3455_v9 = vadd.f32 %v838_v7, %v3215_v12  ;;  %vm1225_vm4 = vcmp.eq.f32.partialorder %v3432_v48, 0.0 }
 0x13e   :  { %v592_v15 = vpop.f32.mrf.mxu0  ;;  %1088 = vmatmul.bf16.gmra.mxu2 %v944_v11 }
 0x13f   :  { %v1207_v17 = vmul.f32 0.5, %v1206_v8  ;;  %v922_v24 = vmul.f32 %v3455_v9, %v3455_v9  ;;  %v761_v25 = vpop.f32.mrf.mxu1 }
 0x140   :  { %v3471_v11 = vadd.f32 %v761_v25, %v592_v15  ;;  %v2454_v15 = vld [vmem:[%s4687_s0 + $0x138] sm:$0xf0] }
 0x141   :  { %v1208_v29 = vsub.f32 1.5, %v1207_v17  ;;  %v1049_v31 = vpop.f32.mrf.mxu2  ;;  %631 = vmatmul.bf16.gmra.mxu0 %v2445_v14  ;;  %v960_v33 = vpack.c.bf16 %v922_v24, %v921_v18 }
 0x142   :  { %v2766_v34 = vpop.eup %2765  ;;  %v3462_v12 = vadd.f32 %v3420_v43, %v1049_v31  ;;  %800 = vmatmul.bf16.gmra.mxu1 %v2449_v63  ;;  %v2452_v63 = vld [vmem:[%s4687_s0 + $0x130] sm:$0xf] }
 0x143   :  { %v1209_v36 = vmul.f32 %v2764_v46, %v1208_v29  ;;  %v1217_v41 = vmul.f32 %v2766_v34, %v3432_v48  ;;  %1168 = vmatmul.bf16.gmra.mxu3 %v960_v33  ;;  %v3469_v46 = vstv %s4690_s4  ;;  %v2688_v29 = vld [vmem:[%s4687_s0 + $0x134] sm:$0xf] }
 0x144   :  { %2767 = vrsqrt.f32 %v3462_v12  ;;  %v841_v49 = vpop.f32.mrf.mxu3  ;;  %vm1235_vm6 = vcmp.eq.f32.partialorder %v3462_v12, inf  ;;  %vm1237_vm7 = vcmp.eq.f32.partialorder %v3462_v12, 0.0 }
 0x145   :  { %v1210_v50 = vmul.f32 %v1209_v36, %v1045_v56  ;;  %v1218_v52 = vmul.f32 %v2766_v34, %v1217_v41  ;;  %v3489_v31 = vadd.f32 %v841_v49, %v3217_v19  ;;  %v2457_v49 = vor.u32 %v2688_v29, %v2454_v15 }
 0x146   :  { %v594_v60 = vpop.f32.mrf.mxu0 }
 0x147   :  { %v1212_v62 = vsel %vm1211_vm0, %v1045_v56, %v1210_v50  ;;  %v1219_v4 = vmul.f32 0.5, %v1218_v52  ;;  %v763_v7 = vpop.f32.mrf.mxu1  ;;  %v2689_v56 = vld [vmem:[%s4687_s0 + $0x134] sm:$0xf0]  ;;  %v891_v52 = vmul.f32 %v3471_v11, %v3471_v11 }
 0x148   :  { %v1215_v8 = vsel %vm1213_vm1, %v1214_v57, %v1212_v62  ;;  %v3473_v14 = vadd.f32 %v763_v7, %v594_v60  ;;  %v2453_v19 = vor.u32 %v2689_v56, %v2452_v63 }
 0x149   :  { %v1972_v17 = vmul.f32 %v1215_v8, %v3159_v44  ;;  %v1220_v18 = vsub.f32 1.5, %v1219_v4  ;;  %v1051_v24 = vpop.f32.mrf.mxu2 }
 0x14a   :  { %v2768_v25 = vpop.eup %2767  ;;  %v3492_v33 = vadd.f32 %v3420_v43, %v1051_v24  ;;  %v892_v44 = vmul.f32 %v3473_v14, %v3473_v14 }
 0x14b   :  { %vm2037_vm2 = vcmp.ge.f32.partialorder %v1972_v17, 0.0  ;;  %v2102_v36 = vmul.f32 %v3469_v46, %v1972_v17  ;;  %v1221_v41 = vmul.f32 %v2766_v34, %v1220_v18  ;;  %v1229_v50 = vmul.f32 %v2768_v25, %v3462_v12 }
 0x14c   :  { %2769 = vrsqrt.f32 %v3492_v33  ;;  %v843_v57 = vpop.f32.mrf.mxu3  ;;  %v1226_v34 = vand.u32 2147483648, %v3432_v48  ;;  %v945_v8 = vpack.c.bf16 %v892_v44, %v891_v52  ;;  %v923_v18 = vmul.f32 %v3489_v31, %v3489_v31 }
 0x14d   :  { %v2166_v60 = vsel %vm2037_vm2, %v1972_v17, %v2102_v36  ;;  %v1222_v62 = vmul.f32 %v1221_v41, %v3432_v48  ;;  %v1230_v4 = vmul.f32 %v2768_v25, %v1229_v50  ;;  %v3503_v7 = vadd.f32 %v843_v57, %v3245_v32 }
 0x14e   :  { %2230 = vst [vmem:[%s4691_s5] sm:$0xff] %v2166_v60  ;;  %v597_v63 = vpop.f32.mrf.mxu0  ;;  %1093 = vmatmul.bf16.gmra.mxu2 %v945_v8  ;;  %vm1247_vm9 = vcmp.eq.f32.partialorder %v3492_v33, inf  ;;  %vm1249_vm10 = vcmp.eq.f32.partialorder %v3492_v33, 0.0 }
 0x14f   :  { %v1224_v56 = vsel %vm1223_vm3, %v3432_v48, %v1222_v62  ;;  %v1231_v17 = vmul.f32 0.5, %v1230_v4  ;;  %v924_v32 = vmul.f32 %v3503_v7, %v3503_v7  ;;  %v766_v24 = vpop.f32.mrf.mxu1 }
 0x150   :  { %v1227_v29 = vsel %vm1225_vm4, %v1226_v34, %v1224_v56 }
 0x151   :  { %v1973_v15 = vmul.f32 %v1227_v29, %v3161_v47  ;;  %v1232_v36 = vsub.f32 1.5, %v1231_v17  ;;  %v1054_v41 = vpop.f32.mrf.mxu2  ;;  %636 = vmatmul.bf16.gmra.mxu0 %v2453_v19  ;;  %v961_v50 = vpack.c.bf16 %v924_v32, %v923_v18  ;;  %v3531_v18 = vadd.f32 %v766_v24, %v597_v63  ;;  %v2460_v29 = vld [vmem:[%s4687_s0 + $0x140] sm:$0xf]  ;;  %v2462_v63 = vld [vmem:[%s4687_s0 + $0x148] sm:$0xf0] }
 0x152   :  { %v2770_v44 = vpop.eup %2769  ;;  %v3518_v52 = vadd.f32 %v3420_v43, %v1054_v41  ;;  %805 = vmatmul.bf16.gmra.mxu1 %v2457_v49  ;;  %v1238_v49 = vand.u32 2147483648, %v3462_v12 }
 0x153   :  { %vm2038_vm5 = vcmp.ge.f32.partialorder %v1973_v15, 0.0  ;;  %v2103_v48 = vmul.f32 %v3469_v46, %v1973_v15  ;;  %v1233_v57 = vmul.f32 %v2768_v25, %v1232_v36  ;;  %v1241_v60 = vmul.f32 %v2770_v44, %v3492_v33  ;;  %1173 = vmatmul.bf16.gmra.mxu3 %v961_v50 }
 0x154   :  { %2771 = vrsqrt.f32 %v3518_v52  ;;  %v846_v62 = vpop.f32.mrf.mxu3  ;;  %vm1259_vm12 = vcmp.eq.f32.partialorder %v3518_v52, inf  ;;  %vm1261_vm13 = vcmp.eq.f32.partialorder %v3518_v52, 0.0 }
 0x155   :  { %v2167_v47 = vsel %vm2038_vm5, %v1973_v15, %v2103_v48  ;;  %v1234_v4 = vmul.f32 %v1233_v57, %v3462_v12  ;;  %v1242_v19 = vmul.f32 %v2770_v44, %v1241_v60  ;;  %v2691_v15 = vld [vmem:[%s4687_s0 + $0x144] sm:$0xf0]  ;;  %v3549_v48 = vadd.f32 %v846_v62, %v3247_v39 }
 0x156   :  { %2231 = vst [vmem:[%s4691_s5 + $0x8] sm:$0xff] %v2167_v47  ;;  %v599_v34 = vpop.f32.mrf.mxu0  ;;  %v2461_v39 = vor.u32 %v2691_v15, %v2460_v29 }
 0x157   :  { %v1236_v25 = vsel %vm1235_vm6, %v3462_v12, %v1234_v4  ;;  %v1243_v8 = vmul.f32 0.5, %v1242_v19  ;;  %v768_v56 = vpop.f32.mrf.mxu1  ;;  %v2690_v12 = vld [vmem:[%s4687_s0 + $0x144] sm:$0xf]  ;;  %v893_v19 = vmul.f32 %v3531_v18, %v3531_v18 }
 0x158   :  { %v1239_v17 = vsel %vm1237_vm7, %v1238_v49, %v1236_v25  ;;  %v3533_v32 = vadd.f32 %v768_v56, %v599_v34  ;;  %v2465_v62 = vor.u32 %v2690_v12, %v2462_v63 }
 0x159   :  { %v1974_v36 = vmul.f32 %v1239_v17, %v3189_v0  ;;  %v1244_v41 = vsub.f32 1.5, %v1243_v8  ;;  %v1056_v50 = vpop.f32.mrf.mxu2 }
 0x15a   :  { %v2772_v24 = vpop.eup %2771  ;;  %v3552_v57 = vadd.f32 %v3420_v43, %v1056_v50  ;;  %v894_v0 = vmul.f32 %v3533_v32, %v3533_v32 }
 0x15b   :  { %vm2039_vm8 = vcmp.ge.f32.partialorder %v1974_v36, 0.0  ;;  %v2104_v60 = vmul.f32 %v3469_v46, %v1974_v36  ;;  %v1245_v47 = vmul.f32 %v2770_v44, %v1244_v41  ;;  %v1253_v4 = vmul.f32 %v2772_v24, %v3518_v52 }
 0x15c   :  { %2773 = vrsqrt.f32 %v3552_v57  ;;  %v848_v49 = vpop.f32.mrf.mxu3  ;;  %v1250_v44 = vand.u32 2147483648, %v3492_v33  ;;  %v946_v17 = vpack.c.bf16 %v894_v0, %v893_v19  ;;  %v925_v41 = vmul.f32 %v3549_v48, %v3549_v48 }
 0x15d   :  { %v2168_v34 = vsel %vm2039_vm8, %v1974_v36, %v2104_v60  ;;  %v1246_v25 = vmul.f32 %v1245_v47, %v3492_v33  ;;  %v1254_v8 = vmul.f32 %v2772_v24, %v1253_v4  ;;  %v3563_v56 = vadd.f32 %v848_v49, %v3275_v55 }
 0x15e   :  { %2232 = vst [vmem:[%s4691_s5 + $0x10] sm:$0xff] %v2168_v34  ;;  %v602_v29 = vpop.f32.mrf.mxu0  ;;  %1098 = vmatmul.bf16.gmra.mxu2 %v946_v17  ;;  %vm1271_vm15 = vcmp.eq.f32.partialorder %v3552_v57, inf  ;;  %vm1273_vm0 = vcmp.eq.f32.partialorder %v3552_v57, 0.0 }
 0x15f   :  { %v1248_v15 = vsel %vm1247_vm9, %v3492_v33, %v1246_v25  ;;  %v1255_v36 = vmul.f32 0.5, %v1254_v8  ;;  %v926_v55 = vmul.f32 %v3563_v56, %v3563_v56  ;;  %v771_v50 = vpop.f32.mrf.mxu1 }
 0x160   :  { %v1251_v12 = vsel %vm1249_vm10, %v1250_v44, %v1248_v15 }
 0x161   :  { %v1975_v63 = vmul.f32 %v1251_v12, %v3191_v3  ;;  %v1256_v60 = vsub.f32 1.5, %v1255_v36  ;;  %v1059_v47 = vpop.f32.mrf.mxu2  ;;  %641 = vmatmul.bf16.gmra.mxu0 %v2461_v39  ;;  %v962_v4 = vpack.c.bf16 %v926_v55, %v925_v41  ;;  %v3591_v41 = vadd.f32 %v771_v50, %v602_v29  ;;  %v2468_v12 = vld [vmem:[%s4687_s0 + $0x150] sm:$0xf]  ;;  %v2470_v29 = vld [vmem:[%s4687_s0 + $0x158] sm:$0xf0] }
 0x162   :  { %v2774_v0 = vpop.eup %2773  ;;  %v3578_v19 = vadd.f32 %v3420_v43, %v1059_v47  ;;  %810 = vmatmul.bf16.gmra.mxu1 %v2465_v62  ;;  %v1262_v62 = vand.u32 2147483648, %v3518_v52 }
 0x163   :  { %vm2040_vm11 = vcmp.ge.f32.partialorder %v1975_v63, 0.0  ;;  %v2105_v33 = vmul.f32 %v3469_v46, %v1975_v63  ;;  %v1257_v49 = vmul.f32 %v2772_v24, %v1256_v60  ;;  %v1265_v34 = vmul.f32 %v2774_v0, %v3552_v57  ;;  %1178 = vmatmul.bf16.gmra.mxu3 %v962_v4 }
 0x164   :  { %2775 = vrsqrt.f32 %v3578_v19  ;;  %v851_v25 = vpop.f32.mrf.mxu3  ;;  %vm1283_vm2 = vcmp.eq.f32.partialorder %v3578_v19, inf  ;;  %vm1285_vm3 = vcmp.eq.f32.partialorder %v3578_v19, 0.0 }
 0x165   :  { %v2169_v3 = vsel %vm2040_vm11, %v1975_v63, %v2105_v33  ;;  %v1258_v8 = vmul.f32 %v1257_v49, %v3518_v52  ;;  %v1266_v39 = vmul.f32 %v2774_v0, %v1265_v34  ;;  %v2693_v63 = vld [vmem:[%s4687_s0 + $0x154] sm:$0xf0]  ;;  %v3609_v33 = vadd.f32 %v851_v25, %v3277_v1 }
 0x166   :  { %2233 = vst [vmem:[%s4691_s5 + $0x18] sm:$0xff] %v2169_v3  ;;  %v604_v44 = vpop.f32.mrf.mxu0  ;;  %v2469_v1 = vor.u32 %v2693_v63, %v2468_v12 }
 0x167   :  { %v1260_v24 = vsel %vm1259_vm12, %v3518_v52, %v1258_v8  ;;  %v1267_v17 = vmul.f32 0.5, %v1266_v39  ;;  %v773_v15 = vpop.f32.mrf.mxu1  ;;  %v2692_v52 = vld [vmem:[%s4687_s0 + $0x154] sm:$0xf]  ;;  %v895_v39 = vmul.f32 %v3591_v41, %v3591_v41 }
 0x168   :  { %v1263_v36 = vsel %vm1261_vm13, %v1262_v62, %v1260_v24  ;;  %v3593_v55 = vadd.f32 %v773_v15, %v604_v44  ;;  %v2473_v25 = vor.u32 %v2692_v52, %v2470_v29 }
 0x169   :  { %v1976_v60 = vmul.f32 %v1263_v36, %v3219_v20  ;;  %v1268_v47 = vsub.f32 1.5, %v1267_v17  ;;  %v1061_v4 = vpop.f32.mrf.mxu2 }
 0x16a   :  { %v2776_v50 = vpop.eup %2775  ;;  %v896_v49 = vmul.f32 %v3593_v55, %v3593_v55  ;;  %v3614_v34 = vadd.f32 %v3420_v43, %v1061_v4 }
 0x16b   :  { %vm2041_vm14 = vcmp.ge.f32.partialorder %v1976_v60, 0.0  ;;  %v2106_v20 = vmul.f32 %v3469_v46, %v1976_v60  ;;  %v1269_v3 = vmul.f32 %v2774_v0, %v1268_v47  ;;  %v1277_v8 = vmul.f32 %v2776_v50, %v3578_v19 }
 0x16c   :  { %2777 = vrsqrt.f32 %v3614_v34  ;;  %v853_v62 = vpop.f32.mrf.mxu3  ;;  %v1274_v0 = vand.u32 2147483648, %v3552_v57  ;;  %v947_v36 = vpack.c.bf16 %v896_v49, %v895_v39  ;;  %v927_v47 = vmul.f32 %v3609_v33, %v3609_v33 }
 0x16d   :  { %v2170_v44 = vsel %vm2041_vm14, %v1976_v60, %v2106_v20  ;;  %v1270_v24 = vmul.f32 %v1269_v3, %v3552_v57  ;;  %v1278_v17 = vmul.f32 %v2776_v50, %v1277_v8  ;;  %v3623_v15 = vadd.f32 %v853_v62, %v3305_v16 }
 0x16e   :  { %2234 = vst [vmem:[%s4691_s5 + $0x20] sm:$0xff] %v2170_v44  ;;  %v607_v12 = vpop.f32.mrf.mxu0  ;;  %1103 = vmatmul.bf16.gmra.mxu2 %v947_v36  ;;  %vm1295_vm5 = vcmp.eq.f32.partialorder %v3614_v34, inf  ;;  %vm1297_vm6 = vcmp.eq.f32.partialorder %v3614_v34, 0.0 }
 0x16f   :  { %v1272_v63 = vsel %vm1271_vm15, %v3552_v57, %v1270_v24  ;;  %v1279_v60 = vmul.f32 0.5, %v1278_v17  ;;  %v928_v16 = vmul.f32 %v3623_v15, %v3623_v15  ;;  %v776_v4 = vpop.f32.mrf.mxu1 }
 0x170   :  { %v1275_v52 = vsel %vm1273_vm0, %v1274_v0, %v1272_v63 }
 0x171   :  { %v1977_v29 = vmul.f32 %v1275_v52, %v3221_v23  ;;  %v1280_v20 = vsub.f32 1.5, %v1279_v60  ;;  %v1064_v3 = vpop.f32.mrf.mxu2  ;;  %646 = vmatmul.bf16.gmra.mxu0 %v2469_v1  ;;  %v963_v8 = vpack.c.bf16 %v928_v16, %v927_v47  ;;  %v3651_v47 = vadd.f32 %v776_v4, %v607_v12  ;;  %v2476_v52 = vld [vmem:[%s4687_s0 + $0x160] sm:$0xf]  ;;  %v2478_v12 = vld [vmem:[%s4687_s0 + $0x168] sm:$0xf0] }
 0x172   :  { %v2778_v49 = vpop.eup %2777  ;;  %v3638_v39 = vadd.f32 %v3420_v43, %v1064_v3  ;;  %815 = vmatmul.bf16.gmra.mxu1 %v2473_v25  ;;  %v1286_v25 = vand.u32 2147483648, %v3578_v19 }
 0x173   :  { %vm2042_vm1 = vcmp.ge.f32.partialorder %v1977_v29, 0.0  ;;  %v2107_v57 = vmul.f32 %v3469_v46, %v1977_v29  ;;  %v1281_v62 = vmul.f32 %v2776_v50, %v1280_v20  ;;  %v1289_v44 = vmul.f32 %v2778_v49, %v3614_v34  ;;  %1183 = vmatmul.bf16.gmra.mxu3 %v963_v8 }
 0x174   :  { %2779 = vrsqrt.f32 %v3638_v39  ;;  %v856_v24 = vpop.f32.mrf.mxu3  ;;  %vm1307_vm8 = vcmp.eq.f32.partialorder %v3638_v39, inf  ;;  %vm1309_vm9 = vcmp.eq.f32.partialorder %v3638_v39, 0.0 }
 0x175   :  { %v2171_v23 = vsel %vm2042_vm1, %v1977_v29, %v2107_v57  ;;  %v1282_v17 = vmul.f32 %v1281_v62, %v3578_v19  ;;  %v1290_v1 = vmul.f32 %v2778_v49, %v1289_v44  ;;  %v2695_v29 = vld [vmem:[%s4687_s0 + $0x164] sm:$0xf0]  ;;  %v3669_v57 = vadd.f32 %v856_v24, %v3307_v26 }
 0x176   :  { %2235 = vst [vmem:[%s4691_s5 + $0x28] sm:$0xff] %v2171_v23  ;;  %v609_v0 = vpop.f32.mrf.mxu0  ;;  %v2477_v26 = vor.u32 %v2695_v29, %v2476_v52 }
 0x177   :  { %v1284_v50 = vsel %vm1283_vm2, %v3578_v19, %v1282_v17  ;;  %v1291_v36 = vmul.f32 0.5, %v1290_v1  ;;  %v778_v63 = vpop.f32.mrf.mxu1  ;;  %v2694_v19 = vld [vmem:[%s4687_s0 + $0x164] sm:$0xf]  ;;  %v897_v1 = vmul.f32 %v3651_v47, %v3651_v47 }
 0x178   :  { %v1287_v60 = vsel %vm1285_vm3, %v1286_v25, %v1284_v50  ;;  %v3653_v16 = vadd.f32 %v778_v63, %v609_v0  ;;  %v2481_v24 = vor.u32 %v2694_v19, %v2478_v12 }
 0x179   :  { %v1978_v20 = vmul.f32 %v1287_v60, %v3249_v40  ;;  %v1292_v3 = vsub.f32 1.5, %v1291_v36  ;;  %v1066_v8 = vpop.f32.mrf.mxu2 }
 0x17a   :  { %v2780_v4 = vpop.eup %2779  ;;  %v898_v62 = vmul.f32 %v3653_v16, %v3653_v16  ;;  %v3674_v44 = vadd.f32 %v3420_v43, %v1066_v8 }
 0x17b   :  { %vm2043_vm4 = vcmp.ge.f32.partialorder %v1978_v20, 0.0  ;;  %v2108_v40 = vmul.f32 %v3469_v46, %v1978_v20  ;;  %v1293_v23 = vmul.f32 %v2778_v49, %v1292_v3  ;;  %v1301_v17 = vmul.f32 %v2780_v4, %v3638_v39 }
 0x17c   :  { %2781 = vrsqrt.f32 %v3674_v44  ;;  %v858_v25 = vpop.f32.mrf.mxu3  ;;  %v1298_v49 = vand.u32 2147483648, %v3614_v34  ;;  %v948_v60 = vpack.c.bf16 %v898_v62, %v897_v1  ;;  %v929_v3 = vmul.f32 %v3669_v57, %v3669_v57 }
 0x17d   :  { %v2172_v0 = vsel %vm2043_vm4, %v1978_v20, %v2108_v40  ;;  %v1294_v50 = vmul.f32 %v1293_v23, %v3614_v34  ;;  %v1302_v36 = vmul.f32 %v2780_v4, %v1301_v17  ;;  %v3683_v63 = vadd.f32 %v858_v25, %v3335_v42 }
 0x17e   :  { %2236 = vst [vmem:[%s4691_s5 + $0x30] sm:$0xff] %v2172_v0  ;;  %v612_v52 = vpop.f32.mrf.mxu0  ;;  %1108 = vmatmul.bf16.gmra.mxu2 %v948_v60  ;;  %vm1319_vm11 = vcmp.eq.f32.partialorder %v3674_v44, inf  ;;  %vm1321_vm12 = vcmp.eq.f32.partialorder %v3674_v44, 0.0 }
 0x17f   :  { %v1296_v29 = vsel %vm1295_vm5, %v3614_v34, %v1294_v50  ;;  %v1303_v20 = vmul.f32 0.5, %v1302_v36  ;;  %v930_v42 = vmul.f32 %v3683_v63, %v3683_v63  ;;  %v781_v8 = vpop.f32.mrf.mxu1 }
 0x180   :  { %v1299_v19 = vsel %vm1297_vm6, %v1298_v49, %v1296_v29 }
 0x181   :  { %v1979_v12 = vmul.f32 %v1299_v19, %v3251_v45  ;;  %v1304_v40 = vsub.f32 1.5, %v1303_v20  ;;  %v1069_v23 = vpop.f32.mrf.mxu2  ;;  %651 = vmatmul.bf16.gmra.mxu0 %v2477_v26  ;;  %v964_v17 = vpack.c.bf16 %v930_v42, %v929_v3  ;;  %v3711_v3 = vadd.f32 %v781_v8, %v612_v52  ;;  %v2484_v19 = vld [vmem:[%s4687_s0 + $0x170] sm:$0xf]  ;;  %v2486_v52 = vld [vmem:[%s4687_s0 + $0x178] sm:$0xf0] }
 0x182   :  { %v2782_v62 = vpop.eup %2781  ;;  %v3698_v1 = vadd.f32 %v3420_v43, %v1069_v23  ;;  %820 = vmatmul.bf16.gmra.mxu1 %v2481_v24  ;;  %v1310_v24 = vand.u32 2147483648, %v3638_v39 }
 0x183   :  { %vm2044_vm7 = vcmp.ge.f32.partialorder %v1979_v12, 0.0  ;;  %v2109_v34 = vmul.f32 %v3469_v46, %v1979_v12  ;;  %v1305_v25 = vmul.f32 %v2780_v4, %v1304_v40  ;;  %v1313_v0 = vmul.f32 %v2782_v62, %v3674_v44  ;;  %1188 = vmatmul.bf16.gmra.mxu3 %v964_v17 }
 0x184   :  { %2783 = vrsqrt.f32 %v3698_v1  ;;  %v861_v50 = vpop.f32.mrf.mxu3  ;;  %vm1331_vm14 = vcmp.eq.f32.partialorder %v3698_v1, inf  ;;  %vm1333_vm15 = vcmp.eq.f32.partialorder %v3698_v1, 0.0 }
 0x185   :  { %v2173_v45 = vsel %vm2044_vm7, %v1979_v12, %v2109_v34  ;;  %v1306_v36 = vmul.f32 %v1305_v25, %v3638_v39  ;;  %v1314_v26 = vmul.f32 %v2782_v62, %v1313_v0  ;;  %v2697_v12 = vld [vmem:[%s4687_s0 + $0x174] sm:$0xf0]  ;;  %v3729_v34 = vadd.f32 %v861_v50, %v3337_v53 }
 0x186   :  { %2237 = vst [vmem:[%s4691_s5 + $0x38] sm:$0xff] %v2173_v45  ;;  %v614_v49 = vpop.f32.mrf.mxu0  ;;  %v2485_v53 = vor.u32 %v2697_v12, %v2484_v19 }
 0x187   :  { %v1308_v4 = vsel %vm1307_vm8, %v3638_v39, %v1306_v36  ;;  %v1315_v60 = vmul.f32 0.5, %v1314_v26  ;;  %v783_v29 = vpop.f32.mrf.mxu1  ;;  %v2696_v39 = vld [vmem:[%s4687_s0 + $0x174] sm:$0xf]  ;;  %v899_v26 = vmul.f32 %v3711_v3, %v3711_v3 }
 0x188   :  { %v1311_v20 = vsel %vm1309_vm9, %v1310_v24, %v1308_v4  ;;  %v3713_v42 = vadd.f32 %v783_v29, %v614_v49  ;;  %v2489_v50 = vor.u32 %v2696_v39, %v2486_v52 }
 0x189   :  { %v1980_v40 = vmul.f32 %v1311_v20, %v3279_v2  ;;  %v1316_v23 = vsub.f32 1.5, %v1315_v60  ;;  %v1071_v17 = vpop.f32.mrf.mxu2 }
 0x18a   :  { %v2784_v8 = vpop.eup %2783  ;;  %v900_v25 = vmul.f32 %v3713_v42, %v3713_v42  ;;  %v3734_v0 = vadd.f32 %v3420_v43, %v1071_v17 }
 0x18b   :  { %vm2045_vm10 = vcmp.ge.f32.partialorder %v1980_v40, 0.0  ;;  %v2110_v2 = vmul.f32 %v3469_v46, %v1980_v40  ;;  %v1317_v45 = vmul.f32 %v2782_v62, %v1316_v23  ;;  %v1325_v36 = vmul.f32 %v2784_v8, %v3698_v1 }
 0x18c   :  { %2785 = vrsqrt.f32 %v3734_v0  ;;  %v863_v24 = vpop.f32.mrf.mxu3  ;;  %v1322_v62 = vand.u32 2147483648, %v3674_v44  ;;  %v949_v20 = vpack.c.bf16 %v900_v25, %v899_v26  ;;  %v931_v23 = vmul.f32 %v3729_v34, %v3729_v34 }
 0x18d   :  { %v2174_v49 = vsel %vm2045_vm10, %v1980_v40, %v2110_v2  ;;  %v1318_v4 = vmul.f32 %v1317_v45, %v3674_v44  ;;  %v1326_v60 = vmul.f32 %v2784_v8, %v1325_v36  ;;  %v3743_v29 = vadd.f32 %v863_v24, %v3365_v10 }
 0x18e   :  { %2238 = vst [vmem:[%s4691_s5 + $0x40] sm:$0xff] %v2174_v49  ;;  %v617_v19 = vpop.f32.mrf.mxu0  ;;  %1113 = vmatmul.bf16.gmra.mxu2 %v949_v20  ;;  %vm1343_vm1 = vcmp.eq.f32.partialorder %v3734_v0, inf  ;;  %vm1345_vm2 = vcmp.eq.f32.partialorder %v3734_v0, 0.0 }
 0x18f   :  { %v1320_v12 = vsel %vm1319_vm11, %v3674_v44, %v1318_v4  ;;  %v1327_v40 = vmul.f32 0.5, %v1326_v60  ;;  %v932_v10 = vmul.f32 %v3743_v29, %v3743_v29  ;;  %v786_v17 = vpop.f32.mrf.mxu1 }
 0x190   :  { %v1323_v39 = vsel %vm1321_vm12, %v1322_v62, %v1320_v12 }
 0x191   :  { %v1981_v52 = vmul.f32 %v1323_v39, %v3281_v6  ;;  %v1328_v2 = vsub.f32 1.5, %v1327_v40  ;;  %v1074_v45 = vpop.f32.mrf.mxu2  ;;  %656 = vmatmul.bf16.gmra.mxu0 %v2485_v53  ;;  %v965_v36 = vpack.c.bf16 %v932_v10, %v931_v23  ;;  %v3771_v23 = vadd.f32 %v786_v17, %v617_v19 }
 0x192   :  { %v2786_v25 = vpop.eup %2785  ;;  %v3758_v26 = vadd.f32 %v3420_v43, %v1074_v45  ;;  %825 = vmatmul.bf16.gmra.mxu1 %v2489_v50  ;;  %v1334_v50 = vand.u32 2147483648, %v3698_v1 }
 0x193   :  { %vm2046_vm13 = vcmp.ge.f32.partialorder %v1981_v52, 0.0  ;;  %v2111_v44 = vmul.f32 %v3469_v46, %v1981_v52  ;;  %v1329_v24 = vmul.f32 %v2784_v8, %v1328_v2  ;;  %v1337_v49 = vmul.f32 %v2786_v25, %v3734_v0  ;;  %1193 = vmatmul.bf16.gmra.mxu3 %v965_v36 }
 0x194   :  { %2787 = vrsqrt.f32 %v3758_v26  ;;  %v866_v4 = vpop.f32.mrf.mxu3  ;;  %vm1355_vm4 = vcmp.eq.f32.partialorder %v3758_v26, inf  ;;  %vm1357_vm5 = vcmp.eq.f32.partialorder %v3758_v26, 0.0 }
 0x195   :  { %v2175_v6 = vsel %vm2046_vm13, %v1981_v52, %v2111_v44  ;;  %v1330_v60 = vmul.f32 %v1329_v24, %v3698_v1  ;;  %v1338_v53 = vmul.f32 %v2786_v25, %v1337_v49  ;;  %v3777_v36 = vadd.f32 %v866_v4, %v3367_v21 }
 0x196   :  { %2239 = vst [vmem:[%s4691_s5 + $0x48] sm:$0xff] %v2175_v6  ;;  %v619_v62 = vpop.f32.mrf.mxu0 }
 0x197   :  { %v1332_v8 = vsel %vm1331_vm14, %v3698_v1, %v1330_v60  ;;  %v1339_v20 = vmul.f32 0.5, %v1338_v53  ;;  %v788_v12 = vpop.f32.mrf.mxu1 }
 0x198   :  { %v1335_v40 = vsel %vm1333_vm15, %v1334_v50, %v1332_v8  ;;  %v3773_v10 = vadd.f32 %v788_v12, %v619_v62 }
 0x199   :  { %v1982_v39 = vmul.f32 %v1335_v40, %v3309_v27  ;;  %v1340_v52 = vsub.f32 1.5, %v1339_v20  ;;  %v1076_v2 = vpop.f32.mrf.mxu2  ;;  %v901_v27 = vmul.f32 %v3771_v23, %v3771_v23  ;;  %v933_v20 = vmul.f32 %v3777_v36, %v3777_v36 }
 0x19a   :  { %v2788_v45 = vpop.eup %2787  ;;  %v902_v44 = vmul.f32 %v3773_v10, %v3773_v10  ;;  %v3782_v1 = vadd.f32 %v3420_v43, %v1076_v2 }
 0x19b   :  { %vm2047_vm0 = vcmp.ge.f32.partialorder %v1982_v39, 0.0  ;;  %v2112_v19 = vmul.f32 %v3469_v46, %v1982_v39  ;;  %v1341_v17 = vmul.f32 %v2786_v25, %v1340_v52  ;;  %v1349_v24 = vmul.f32 %v2788_v45, %v3758_v26 }
 0x19c   :  { %2789 = vrsqrt.f32 %v3782_v1  ;;  %v868_v49 = vpop.f32.mrf.mxu3  ;;  %v1346_v25 = vand.u32 2147483648, %v3734_v0  ;;  %v950_v53 = vpack.c.bf16 %v902_v44, %v901_v27  ;;  %vm1367_vm7 = vcmp.eq.f32.partialorder %v3782_v1, inf }
 0x19d   :  { %v2176_v21 = vsel %vm2047_vm0, %v1982_v39, %v2112_v19  ;;  %v1342_v4 = vmul.f32 %v1341_v17, %v3734_v0  ;;  %v1350_v6 = vmul.f32 %v2788_v45, %v1349_v24  ;;  %v3791_v60 = vadd.f32 %v868_v49, %v3389_v37 }
 0x19e   :  { %2240 = vst [vmem:[%s4691_s5 + $0x50] sm:$0xff] %v2176_v21  ;;  %v622_v50 = vpop.f32.mrf.mxu0  ;;  %1118 = vmatmul.bf16.gmra.mxu2 %v950_v53  ;;  %vm1369_vm8 = vcmp.eq.f32.partialorder %v3782_v1, 0.0 }
 0x19f   :  { %v1344_v62 = vsel %vm1343_vm1, %v3734_v0, %v1342_v4  ;;  %v1351_v8 = vmul.f32 0.5, %v1350_v6  ;;  %v934_v37 = vmul.f32 %v3791_v60, %v3791_v60  ;;  %v791_v12 = vpop.f32.mrf.mxu1  ;;  %v1358_v4 = vand.u32 2147483648, %v3758_v26 }
 0x1a0   :  { %v1347_v40 = vsel %vm1345_vm2, %v1346_v25, %v1344_v62  ;;  %v3817_v6 = vadd.f32 %v791_v12, %v622_v50 }
 0x1a1   :  { %v1983_v39 = vmul.f32 %v1347_v40, %v3311_v30  ;;  %v1352_v52 = vsub.f32 1.5, %v1351_v8  ;;  %v1079_v2 = vpop.f32.mrf.mxu2  ;;  %v966_v19 = vpack.c.bf16 %v934_v37, %v933_v20 }
 0x1a2   :  { %v2790_v17 = vpop.eup %2789  ;;  %v3806_v44 = vadd.f32 %v3420_v43, %v1079_v2  ;;  %v903_v2 = vmul.f32 %v3817_v6, %v3817_v6 }
 0x1a3   :  { %vm2048_vm3 = vcmp.ge.f32.partialorder %v1983_v39, 0.0  ;;  %v2113_v0 = vmul.f32 %v3469_v46, %v1983_v39  ;;  %v1353_v24 = vmul.f32 %v2788_v45, %v1352_v52  ;;  %v1361_v27 = vmul.f32 %v2790_v17, %v3782_v1  ;;  %1198 = vmatmul.bf16.gmra.mxu3 %v966_v19 }
 0x1a4   :  { %2791 = vrsqrt.f32 %v3806_v44  ;;  %vm1379_vm10 = vcmp.eq.f32.partialorder %v3806_v44, inf  ;;  %vm1381_vm11 = vcmp.eq.f32.partialorder %v3806_v44, 0.0 }
 0x1a5   :  { %v2177_v49 = vsel %vm2048_vm3, %v1983_v39, %v2113_v0  ;;  %v1354_v21 = vmul.f32 %v1353_v24, %v3758_v26  ;;  %v1362_v30 = vmul.f32 %v2790_v17, %v1361_v27 }
 0x1a6   :  { %2241 = vst [vmem:[%s4691_s5 + $0x58] sm:$0xff] %v2177_v49  ;;  %v624_v45 = vpop.f32.mrf.mxu0 }
 0x1a7   :  { %v1356_v25 = vsel %vm1355_vm4, %v3758_v26, %v1354_v21  ;;  %v1363_v53 = vmul.f32 0.5, %v1362_v30  ;;  %v793_v62 = vpop.f32.mrf.mxu1  ;;  %v1370_v21 = vand.u32 2147483648, %v3782_v1 }
 0x1a8   :  { %v1359_v8 = vsel %vm1357_vm5, %v1358_v4, %v1356_v25  ;;  %v3821_v20 = vadd.f32 %v793_v62, %v624_v45 }
 0x1a9   :  { %v1984_v37 = vmul.f32 %v1359_v8, %v3339_v54  ;;  %v1364_v40 = vsub.f32 1.5, %v1363_v53  ;;  %v1081_v39 = vpop.f32.mrf.mxu2 }
 0x1aa   :  { %v2792_v52 = vpop.eup %2791  ;;  %v904_v50 = vmul.f32 %v3821_v20, %v3821_v20  ;;  %v3829_v12 = vadd.f32 %v3420_v43, %v1081_v39 }
 0x1ab   :  { %vm2049_vm6 = vcmp.ge.f32.partialorder %v1984_v37, 0.0  ;;  %v2114_v26 = vmul.f32 %v3469_v46, %v1984_v37  ;;  %v1365_v19 = vmul.f32 %v2790_v17, %v1364_v40  ;;  %v1373_v0 = vmul.f32 %v2792_v52, %v3806_v44 }
 0x1ac   :  { %2793 = vrsqrt.f32 %v3829_v12  ;;  %v951_v49 = vpack.c.bf16 %v904_v50, %v903_v2  ;;  %vm1391_vm13 = vcmp.eq.f32.partialorder %v3829_v12, inf  ;;  %vm1393_vm14 = vcmp.eq.f32.partialorder %v3829_v12, 0.0 }
 0x1ad   :  { %v2178_v54 = vsel %vm2049_vm6, %v1984_v37, %v2114_v26  ;;  %v1366_v24 = vmul.f32 %v1365_v19, %v3782_v1  ;;  %v1374_v27 = vmul.f32 %v2792_v52, %v1373_v0 }
 0x1ae   :  { %2242 = vst [vmem:[%s4691_s5 + $0x60] sm:$0xff] %v2178_v54  ;;  %v627_v30 = vpop.f32.mrf.mxu0  ;;  %1123 = vmatmul.bf16.gmra.mxu2 %v951_v49 }
 0x1af   :  { %v1368_v17 = vsel %vm1367_vm7, %v3782_v1, %v1366_v24  ;;  %v1375_v4 = vmul.f32 0.5, %v1374_v27  ;;  %v796_v45 = vpop.f32.mrf.mxu1 }
 0x1b0   :  { %v1371_v25 = vsel %vm1369_vm8, %v1370_v21, %v1368_v17  ;;  %v3855_v0 = vadd.f32 %v796_v45, %v627_v30 }
 0x1b1   :  { %v1985_v53 = vmul.f32 %v1371_v25, %v3341_v59  ;;  %v1376_v62 = vsub.f32 1.5, %v1375_v4  ;;  %v1084_v8 = vpop.f32.mrf.mxu2  ;;  %v1382_v59 = vand.u32 2147483648, %v3806_v44 }
 0x1b2   :  { %v2794_v37 = vpop.eup %2793  ;;  %v3844_v40 = vadd.f32 %v3420_v43, %v1084_v8 }
 0x1b3   :  { %vm2050_vm9 = vcmp.ge.f32.partialorder %v1985_v53, 0.0  ;;  %v2115_v39 = vmul.f32 %v3469_v46, %v1985_v53  ;;  %v1377_v2 = vmul.f32 %v2792_v52, %v1376_v62  ;;  %v1385_v50 = vmul.f32 %v2794_v37, %v3829_v12 }
 0x1b4   :  { %2795 = vrsqrt.f32 %v3844_v40  ;;  %v905_v62 = vmul.f32 %v3855_v0, %v3855_v0  ;;  %vm1403_vm0 = vcmp.eq.f32.partialorder %v3844_v40, inf  ;;  %vm1405_vm1 = vcmp.eq.f32.partialorder %v3844_v40, 0.0 }
 0x1b5   :  { %v2179_v1 = vsel %vm2050_vm9, %v1985_v53, %v2115_v39  ;;  %v1378_v26 = vmul.f32 %v1377_v2, %v3806_v44  ;;  %v1386_v19 = vmul.f32 %v2794_v37, %v1385_v50 }
 0x1b6   :  { %2243 = vst [vmem:[%s4691_s5 + $0x68] sm:$0xff] %v2179_v1  ;;  %v629_v54 = vpop.f32.mrf.mxu0  ;;  %v1164_v52 = vpop.f32.mrf.mxu3 }
 0x1b7   :  { %v1380_v24 = vsel %vm1379_vm10, %v3806_v44, %v1378_v26  ;;  %v1387_v27 = vmul.f32 0.5, %v1386_v19  ;;  %v798_v49 = vpop.f32.mrf.mxu1  ;;  %v3860_v21 = vadd.f32 %v3420_v43, %v1164_v52  ;;  %v3873_v43 = vld [vmem:[%s4689_s3] ss:$0 sm:$0xff] }
 0x1b8   :  { %v1383_v17 = vsel %vm1381_vm11, %v1382_v59, %v1380_v24  ;;  %v3862_v4 = vadd.f32 %v798_v49, %v629_v54  ;;  %v1394_v59 = vand.u32 2147483648, %v3829_v12 }
 0x1b9   :  { %v1986_v25 = vmul.f32 %v1383_v17, %v3369_v22  ;;  %v1388_v53 = vsub.f32 1.5, %v1387_v27  ;;  %2797 = vrsqrt.f32 %v3860_v21  ;;  %v1086_v30 = vpop.f32.mrf.mxu2  ;;  %vm1787_vm2 = vcmp.eq.f32.partialorder %v3860_v21, inf }
 0x1ba   :  { %v2796_v45 = vpop.eup %2795  ;;  %v906_v44 = vmul.f32 %v3862_v4, %v3862_v4  ;;  %v3876_v8 = vadd.f32 %v3873_v43, %v1086_v30  ;;  %vm1789_vm3 = vcmp.eq.f32.partialorder %v3860_v21, 0.0 }
 0x1bb   :  { %vm2051_vm12 = vcmp.ge.f32.partialorder %v1986_v25, 0.0  ;;  %v2116_v22 = vmul.f32 %v3469_v46, %v1986_v25  ;;  %v1389_v39 = vmul.f32 %v2794_v37, %v1388_v53  ;;  %v1397_v2 = vmul.f32 %v2796_v45, %v3844_v40 }
 0x1bc   :  { %2799 = vrsqrt.f32 %v3876_v8  ;;  %v952_v19 = vpack.c.bf16 %v906_v44, %v905_v62  ;;  %vm1415_vm5 = vcmp.eq.f32.partialorder %v3876_v8, inf  ;;  %vm1417_vm6 = vcmp.eq.f32.partialorder %v3876_v8, 0.0 }
 0x1bd   :  { %v2180_v50 = vsel %vm2051_vm12, %v1986_v25, %v2116_v22  ;;  %v1390_v1 = vmul.f32 %v1389_v39, %v3829_v12  ;;  %v1398_v26 = vmul.f32 %v2796_v45, %v1397_v2 }
 0x1be   :  { %2244 = vst [vmem:[%s4691_s5 + $0x70] sm:$0xff] %v2180_v50  ;;  %v632_v54 = vpop.f32.mrf.mxu0  ;;  %v1166_v52 = vpop.f32.mrf.mxu3  ;;  %1128 = vmatmul.bf16.gmra.mxu2 %v952_v19 }
 0x1bf   :  { %v2798_v37 = vpop.eup %2797  ;;  %v1392_v24 = vsel %vm1391_vm13, %v3829_v12, %v1390_v1  ;;  %v1399_v27 = vmul.f32 0.5, %v1398_v26  ;;  %v801_v49 = vpop.f32.mrf.mxu1  ;;  %v3890_v17 = vadd.f32 %v3873_v43, %v1166_v52 }
 0x1c0   :  { %v1395_v25 = vsel %vm1393_vm14, %v1394_v59, %v1392_v24  ;;  %v1781_v53 = vmul.f32 %v2798_v37, %v3860_v21  ;;  %v1406_v59 = vand.u32 2147483648, %v3844_v40  ;;  %v3908_v24 = vadd.f32 %v801_v49, %v632_v54 }
 0x1c1   :  { %v1987_v30 = vmul.f32 %v1395_v25, %v3371_v28  ;;  %v1400_v62 = vsub.f32 1.5, %v1399_v27  ;;  %2801 = vrsqrt.f32 %v3890_v17  ;;  %v1089_v39 = vpop.f32.mrf.mxu2  ;;  %vm1799_vm8 = vcmp.eq.f32.partialorder %v3890_v17, inf }
 0x1c2   :  { %v2800_v44 = vpop.eup %2799  ;;  %v1782_v22 = vmul.f32 %v2798_v37, %v1781_v53  ;;  %v3900_v26 = vadd.f32 %v3873_v43, %v1089_v39  ;;  %vm1801_vm10 = vcmp.eq.f32.partialorder %v3890_v17, 0.0 }
 0x1c3   :  { %vm2052_vm15 = vcmp.ge.f32.partialorder %v1987_v30, 0.0  ;;  %v2117_v12 = vmul.f32 %v3469_v46, %v1987_v30  ;;  %v1401_v2 = vmul.f32 %v2796_v45, %v1400_v62  ;;  %v1409_v50 = vmul.f32 %v2800_v44, %v3876_v8 }
 0x1c4   :  { %v1783_v1 = vmul.f32 0.5, %v1782_v22  ;;  %2803 = vrsqrt.f32 %v3900_v26  ;;  %vm1427_vm11 = vcmp.eq.f32.partialorder %v3900_v26, inf  ;;  %vm1429_vm12 = vcmp.eq.f32.partialorder %v3900_v26, 0.0 }
 0x1c5   :  { %v2181_v28 = vsel %vm2052_vm15, %v1987_v30, %v2117_v12  ;;  %v1402_v19 = vmul.f32 %v1401_v2, %v3844_v40  ;;  %v1410_v52 = vmul.f32 %v2800_v44, %v1409_v50 }
 0x1c6   :  { %2245 = vst [vmem:[%s4691_s5 + $0x78] sm:$0xff] %v2181_v28  ;;  %v1784_v45 = vsub.f32 1.5, %v1783_v1  ;;  %v634_v27 = vpop.f32.mrf.mxu0  ;;  %v1169_v25 = vpop.f32.mrf.mxu3  ;;  %v1790_v1 = vand.u32 2147483648, %v3860_v21 }
 0x1c7   :  { %v2802_v53 = vpop.eup %2801  ;;  %v1404_v30 = vsel %vm1403_vm0, %v3844_v40, %v1402_v19  ;;  %v1411_v62 = vmul.f32 0.5, %v1410_v52  ;;  %v803_v22 = vpop.f32.mrf.mxu1  ;;  %v3916_v39 = vadd.f32 %v3873_v43, %v1169_v25  ;;  %v907_v52 = vmul.f32 %v3908_v24, %v3908_v24 }
 0x1c8   :  { %v1407_v54 = vsel %vm1405_vm1, %v1406_v59, %v1404_v30  ;;  %v1785_v49 = vmul.f32 %v2798_v37, %v1784_v45  ;;  %v1793_v12 = vmul.f32 %v2802_v53, %v3890_v17  ;;  %v3921_v2 = vadd.f32 %v803_v22, %v634_v27 }
 0x1c9   :  { %v1988_v50 = vmul.f32 %v1407_v54, %v3391_v51  ;;  %v1412_v28 = vsub.f32 1.5, %v1411_v62  ;;  %2805 = vrsqrt.f32 %v3916_v39  ;;  %v1091_v37 = vpop.f32.mrf.mxu2  ;;  %vm1811_vm14 = vcmp.eq.f32.partialorder %v3916_v39, inf }
 0x1ca   :  { %v1786_v19 = vmul.f32 %v1785_v49, %v3860_v21  ;;  %v1794_v25 = vmul.f32 %v2802_v53, %v1793_v12  ;;  %v908_v40 = vmul.f32 %v3921_v2, %v3921_v2  ;;  %v2804_v51 = vpop.eup %2803  ;;  %v3937_v62 = vadd.f32 %v3873_v43, %v1091_v37 }
 0x1cb   :  { %vm2053_vm4 = vcmp.ge.f32.partialorder %v1988_v50, 0.0  ;;  %v2118_v59 = vmul.f32 %v3469_v46, %v1988_v50  ;;  %v1413_v45 = vmul.f32 %v2800_v44, %v1412_v28  ;;  %v1421_v44 = vmul.f32 %v2804_v51, %v3900_v26 }
 0x1cc   :  { %v1788_v27 = vsel %vm1787_vm2, %v3860_v21, %v1786_v19  ;;  %v1795_v30 = vmul.f32 0.5, %v1794_v25  ;;  %v953_v22 = vpack.c.bf16 %v908_v40, %v907_v52  ;;  %v1418_v19 = vand.u32 2147483648, %v3876_v8 }
 0x1cd   :  { %v2182_v54 = vsel %vm2053_vm4, %v1988_v50, %v2118_v59  ;;  %v1791_v49 = vsel %vm1789_vm3, %v1790_v1, %v1788_v27  ;;  %v1414_v12 = vmul.f32 %v1413_v45, %v3876_v8  ;;  %2807 = vrsqrt.f32 %v3937_v62 }
 0x1ce   :  { %2246 = vst [vmem:[%s4691_s5 + $0x80] sm:$0xff] %v2182_v54  ;;  %v2020_v28 = vmul.f32 %v1791_v49, %v3406_v5  ;;  %v1796_v25 = vsub.f32 1.5, %v1795_v30  ;;  %v637_v52 = vpop.f32.mrf.mxu0  ;;  %v1171_v50 = vpop.f32.mrf.mxu3  ;;  %v1422_v1 = vmul.f32 %v2804_v51, %v1421_v44  ;;  %1133 = vmatmul.bf16.gmra.mxu2 %v953_v22  ;;  %vm1813_vm15 = vcmp.eq.f32.partialorder %v3916_v39, 0.0 }
 0x1cf   :  { %v2806_v40 = vpop.eup %2805  ;;  %v1416_v21 = vsel %vm1415_vm5, %v3876_v8, %v1414_v12  ;;  %v806_v37 = vpop.f32.mrf.mxu1  ;;  %v1802_v8 = vand.u32 2147483648, %v3890_v17  ;;  %v3960_v44 = vadd.f32 %v3873_v43, %v1171_v50  ;;  %vm1439_vm1 = vcmp.eq.f32.partialorder %v3937_v62, inf }
 0x1d0   :  { %vm2085_vm7 = vcmp.ge.f32.partialorder %v2020_v28, 0.0  ;;  %v2150_v59 = vmul.f32 %v3469_v46, %v2020_v28  ;;  %v1419_v5 = vsel %vm1417_vm6, %v1418_v19, %v1416_v21  ;;  %v1797_v45 = vmul.f32 %v2802_v53, %v1796_v25 }
 0x1d1   :  { %v1989_v27 = vmul.f32 %v1419_v5, %v3393_v58  ;;  %v1423_v30 = vmul.f32 0.5, %v1422_v1  ;;  %v1805_v54 = vmul.f32 %v2806_v40, %v3916_v39  ;;  %v1094_v19 = vpop.f32.mrf.mxu2  ;;  %2809 = vrsqrt.f32 %v3960_v44 }
 0x1d2   :  { %v2214_v49 = vsel %vm2085_vm7, %v2020_v28, %v2150_v59  ;;  %v1798_v12 = vmul.f32 %v1797_v45, %v3890_v17  ;;  %v1430_v45 = vand.u32 2147483648, %v3900_v26  ;;  %vm1441_vm3 = vcmp.eq.f32.partialorder %v3937_v62, 0.0 }
 0x1d3   :  { %2278 = vst [vmem:[%s4691_s5 + $0x180] sm:$0xff] %v2214_v49  ;;  %vm2054_vm9 = vcmp.ge.f32.partialorder %v1989_v27, 0.0  ;;  %v2119_v58 = vmul.f32 %v3469_v46, %v1989_v27  ;;  %v1424_v53 = vsub.f32 1.5, %v1423_v30  ;;  %v1806_v22 = vmul.f32 %v2806_v40, %v1805_v54  ;;  %v2808_v25 = vpop.eup %2807 }
 0x1d4   :  { %v1800_v28 = vsel %vm1799_vm8, %v3890_v17, %v1798_v12  ;;  %v1433_v17 = vmul.f32 %v2808_v25, %v3937_v62  ;;  %vm1823_vm4 = vcmp.eq.f32.partialorder %v3960_v44, inf  ;;  %vm1825_vm5 = vcmp.eq.f32.partialorder %v3960_v44, 0.0 }
 0x1d5   :  { %v2183_v50 = vsel %vm2054_vm9, %v1989_v27, %v2119_v58  ;;  %v1803_v21 = vsel %vm1801_vm10, %v1802_v8, %v1800_v28  ;;  %v1425_v1 = vmul.f32 %v2804_v51, %v1424_v53  ;;  %v1807_v59 = vmul.f32 0.5, %v1806_v22 }
 0x1d6   :  { %2247 = vst [vmem:[%s4691_s5 + $0x88] sm:$0xff] %v2183_v50  ;;  %v2021_v5 = vmul.f32 %v1803_v21, %v3415_v13  ;;  %v639_v30 = vpop.f32.mrf.mxu0  ;;  %v1174_v54 = vpop.f32.mrf.mxu3  ;;  %v3979_v51 = vadd.f32 %v3873_v43, %v1094_v19  ;;  %v1434_v58 = vmul.f32 %v2808_v25, %v1433_v17 }
 0x1d7   :  { %v1426_v49 = vmul.f32 %v1425_v1, %v3900_v26  ;;  %v1808_v27 = vsub.f32 1.5, %v1807_v59  ;;  %v808_v12 = vpop.f32.mrf.mxu1  ;;  %v3982_v8 = vadd.f32 %v3873_v43, %v1174_v54  ;;  %v2810_v19 = vpop.eup %2809  ;;  %v3994_v59 = vadd.f32 %v806_v37, %v637_v52 }
 0x1d8   :  { %vm2086_vm13 = vcmp.ge.f32.partialorder %v2021_v5, 0.0  ;;  %v2151_v13 = vmul.f32 %v3469_v46, %v2021_v5  ;;  %v3985_v53 = vadd.f32 %v808_v12, %v639_v30  ;;  %2811 = vrsqrt.f32 %v3979_v51 }
 0x1d9   :  { %v1428_v22 = vsel %vm1427_vm11, %v3900_v26, %v1426_v49  ;;  %v1809_v28 = vmul.f32 %v2806_v40, %v1808_v27  ;;  %v1435_v1 = vmul.f32 0.5, %v1434_v58  ;;  %v1817_v30 = vmul.f32 %v2810_v19, %v3960_v44  ;;  %v1096_v54 = vpop.f32.mrf.mxu2 }
 0x1da   :  { %v2215_v50 = vsel %vm2086_vm13, %v2021_v5, %v2151_v13  ;;  %v1431_v21 = vsel %vm1429_vm12, %v1430_v45, %v1428_v22  ;;  %v1814_v5 = vand.u32 2147483648, %v3916_v39  ;;  %v910_v52 = vmul.f32 %v3985_v53, %v3985_v53 }
 0x1db   :  { %2279 = vst [vmem:[%s4691_s5 + $0x188] sm:$0xff] %v2215_v50  ;;  %v1990_v17 = vmul.f32 %v1431_v21, %v3427_v35  ;;  %v1810_v40 = vmul.f32 %v1809_v28, %v3916_v39  ;;  %v1436_v26 = vsub.f32 1.5, %v1435_v1  ;;  %2813 = vrsqrt.f32 %v3982_v8 }
 0x1dc   :  { %v1818_v45 = vmul.f32 %v2810_v19, %v1817_v30  ;;  %v909_v12 = vmul.f32 %v3994_v59, %v3994_v59  ;;  %v4018_v1 = vadd.f32 %v3873_v43, %v1096_v54  ;;  %vm1451_vm6 = vcmp.eq.f32.partialorder %v3979_v51, inf }
 0x1dd   :  { %vm2055_vm0 = vcmp.ge.f32.partialorder %v1990_v17, 0.0  ;;  %v2120_v37 = vmul.f32 %v3469_v46, %v1990_v17  ;;  %v1812_v35 = vsel %vm1811_vm14, %v3916_v39, %v1810_v40  ;;  %v1437_v27 = vmul.f32 %v2808_v25, %v1436_v26 }
 0x1de   :  { %v1815_v49 = vsel %vm1813_vm15, %v1814_v5, %v1812_v35  ;;  %v4014_v13 = vpop.f32.mrf.mxu0  ;;  %v1176_v58 = vpop.f32.mrf.mxu3  ;;  %v1819_v21 = vmul.f32 0.5, %v1818_v45  ;;  %v1442_v40 = vand.u32 2147483648, %v3937_v62  ;;  %v954_v5 = vpack.c.bf16 %v910_v52, %v909_v12 }
 0x1df   :  { %v2812_v22 = vpop.eup %2811  ;;  %v2184_v28 = vsel %vm2055_vm0, %v1990_v17, %v2120_v37  ;;  %v2022_v50 = vmul.f32 %v1815_v49, %v3445_v61  ;;  %v811_v39 = vpop.f32.mrf.mxu1  ;;  %v1438_v25 = vmul.f32 %v1437_v27, %v3937_v62  ;;  %2815 = vrsqrt.f32 %v4018_v1 }
 0x1e0   :  { %2248 = vst [vmem:[%s4691_s5 + $0x90] sm:$0xff] %v2184_v28  ;;  %v1445_v30 = vmul.f32 %v2812_v22, %v3979_v51  ;;  %v1820_v61 = vsub.f32 1.5, %v1819_v21  ;;  %1138 = vmatmul.bf16.gmra.mxu2 %v954_v5  ;;  %vm1453_vm8 = vcmp.eq.f32.partialorder %v3979_v51, 0.0  ;;  %vm1835_vm9 = vcmp.eq.f32.partialorder %v3982_v8, inf }
 0x1e1   :  { %vm2087_vm2 = vcmp.ge.f32.partialorder %v2022_v50, 0.0  ;;  %v2152_v17 = vmul.f32 %v3469_v46, %v2022_v50  ;;  %v2814_v54 = vpop.eup %2813  ;;  %v1440_v26 = vsel %vm1439_vm1, %v3937_v62, %v1438_v25  ;;  %v1099_v27 = vpop.f32.mrf.mxu2  ;;  %v1826_v62 = vand.u32 2147483648, %v3960_v44 }
 0x1e2   :  { %v1446_v37 = vmul.f32 %v2812_v22, %v1445_v30  ;;  %v1443_v45 = vsel %vm1441_vm3, %v1442_v40, %v1440_v26  ;;  %v1821_v52 = vmul.f32 %v2810_v19, %v1820_v61  ;;  %v1829_v49 = vmul.f32 %v2814_v54, %v3982_v8 }
 0x1e3   :  { %v2216_v35 = vsel %vm2087_vm2, %v2022_v50, %v2152_v17  ;;  %v1991_v12 = vmul.f32 %v1443_v45, %v3429_v38  ;;  %v4043_v19 = vadd.f32 %v3873_v43, %v1176_v58  ;;  %v4047_v30 = vadd.f32 %v3873_v43, %v1099_v27 }
 0x1e4   :  { %2280 = vst [vmem:[%s4691_s5 + $0x190] sm:$0xff] %v2216_v35  ;;  %v1447_v28 = vmul.f32 0.5, %v1446_v37  ;;  %v1822_v21 = vmul.f32 %v1821_v52, %v3960_v44  ;;  %v1830_v50 = vmul.f32 %v2814_v54, %v1829_v49  ;;  %v1454_v27 = vand.u32 2147483648, %v3979_v51 }
 0x1e5   :  { %vm2056_vm7 = vcmp.ge.f32.partialorder %v1991_v12, 0.0  ;;  %v2121_v25 = vmul.f32 %v3469_v46, %v1991_v12  ;;  %v2816_v17 = vpop.eup %2815  ;;  %2817 = vrsqrt.f32 %v4043_v19  ;;  %vm1837_vm10 = vcmp.eq.f32.partialorder %v3982_v8, 0.0 }
 0x1e6   :  { %v1448_v40 = vsub.f32 1.5, %v1447_v28  ;;  %v644_v38 = vpop.f32.mrf.mxu0  ;;  %v1179_v5 = vpop.f32.mrf.mxu3  ;;  %v1824_v61 = vsel %vm1823_vm4, %v3960_v44, %v1822_v21  ;;  %v1831_v26 = vmul.f32 0.5, %v1830_v50  ;;  %v1457_v52 = vmul.f32 %v2816_v17, %v4018_v1 }
 0x1e7   :  { %v813_v58 = vpop.f32.mrf.mxu1  ;;  %v2185_v37 = vsel %vm2056_vm7, %v1991_v12, %v2121_v25  ;;  %v1827_v35 = vsel %vm1825_vm5, %v1826_v62, %v1824_v61  ;;  %2819 = vrsqrt.f32 %v4047_v30  ;;  %v4068_v62 = vadd.f32 %v811_v39, %v4014_v13 }
 0x1e8   :  { %v1449_v45 = vmul.f32 %v2812_v22, %v1448_v40  ;;  %2249 = vst [vmem:[%s4691_s5 + $0x98] sm:$0xff] %v2185_v37  ;;  %v2023_v49 = vmul.f32 %v1827_v35, %v3455_v9  ;;  %v1832_v28 = vsub.f32 1.5, %v1831_v26  ;;  %v1458_v44 = vmul.f32 %v2816_v17, %v1457_v52 }
 0x1e9   :  { %v1101_v9 = vpop.f32.mrf.mxu2  ;;  %v1838_v25 = vand.u32 2147483648, %v3982_v8  ;;  %v4074_v61 = vadd.f32 %v813_v58, %v644_v38  ;;  %v4080_v13 = vadd.f32 %v3873_v43, %v1179_v5  ;;  %vm1463_vm12 = vcmp.eq.f32.partialorder %v4018_v1, inf }
 0x1ea   :  { %v1450_v21 = vmul.f32 %v1449_v45, %v3979_v51  ;;  %vm2088_vm11 = vcmp.ge.f32.partialorder %v2023_v49, 0.0  ;;  %v2153_v22 = vmul.f32 %v3469_v46, %v2023_v49  ;;  %v1833_v12 = vmul.f32 %v2814_v54, %v1832_v28 }
 0x1eb   :  { %v1459_v40 = vmul.f32 0.5, %v1458_v44  ;;  %4693 = vst [vmem:[#allocation3_spill] sm:$0xff] %v4074_v61  ;;  %v2818_v26 = vpop.eup %2817  ;;  %v912_v58 = vmul.f32 %v4074_v61, %v4074_v61  ;;  %2821 = vrsqrt.f32 %v4080_v13  ;;  %vm1465_vm15 = vcmp.eq.f32.partialorder %v4018_v1, 0.0 }
 0x1ec   :  { %v1452_v50 = vsel %vm1451_vm6, %v3979_v51, %v1450_v21  ;;  %v2217_v37 = vsel %vm2088_vm11, %v2023_v49, %v2153_v22  ;;  %v1834_v54 = vmul.f32 %v1833_v12, %v3982_v8  ;;  %v1841_v38 = vmul.f32 %v2818_v26, %v4043_v19 }
 0x1ed   :  { %v1455_v35 = vsel %vm1453_vm8, %v1454_v27, %v1452_v50  ;;  %2281 = vst [vmem:[%s4691_s5 + $0x198] sm:$0xff] %v2217_v37  ;;  %v1460_v45 = vsub.f32 1.5, %v1459_v40  ;;  %v911_v49 = vmul.f32 %v4068_v62, %v4068_v62  ;;  %v2820_v27 = vpop.eup %2819  ;;  %v1466_v12 = vand.u32 2147483648, %v4018_v1 }
 0x1ee   :  { %v1992_v39 = vmul.f32 %v1455_v35, %v3471_v11  ;;  %v4089_v52 = vpop.f32.mrf.mxu0  ;;  %v1181_v51 = vpop.f32.mrf.mxu3  ;;  %v1836_v5 = vsel %vm1835_vm9, %v3982_v8, %v1834_v54  ;;  %v1842_v50 = vmul.f32 %v2818_v26, %v1841_v38  ;;  %v1469_v40 = vmul.f32 %v2820_v27, %v4047_v30 }
 0x1ef   :  { %v4098_v11 = vpop.f32.mrf.mxu1  ;;  %v1839_v21 = vsel %vm1837_vm10, %v1838_v25, %v1836_v5  ;;  %v1461_v44 = vmul.f32 %v2816_v17, %v1460_v45  ;;  %v4108_v54 = vadd.f32 %v3873_v43, %v1101_v9  ;;  %v955_v61 = vpack.c.bf16 %v912_v58, %v911_v49 }
 0x1f0   :  { %vm2057_vm13 = vcmp.ge.f32.partialorder %v1992_v39, 0.0  ;;  %v2122_v28 = vmul.f32 %v3469_v46, %v1992_v39  ;;  %v2024_v22 = vmul.f32 %v1839_v21, %v3489_v31  ;;  %v1843_v31 = vmul.f32 0.5, %v1842_v50 }
 0x1f1   :  { %v1462_v35 = vmul.f32 %v1461_v44, %v4018_v1  ;;  %v1470_v17 = vmul.f32 %v2820_v27, %v1469_v40  ;;  %v1104_v25 = vpop.f32.mrf.mxu2  ;;  %vm1847_vm0 = vcmp.eq.f32.partialorder %v4043_v19, inf  ;;  %2823 = vrsqrt.f32 %v4108_v54  ;;  %1143 = vmatmul.bf16.gmra.mxu2 %v955_v61  ;;  %v2822_v9 = vpop.eup %2821 }
 0x1f2   :  { %v2186_v37 = vsel %vm2057_vm13, %v1992_v39, %v2122_v28  ;;  %vm2089_vm14 = vcmp.ge.f32.partialorder %v2024_v22, 0.0  ;;  %v2154_v8 = vmul.f32 %v3469_v46, %v2024_v22  ;;  %v1844_v58 = vsub.f32 1.5, %v1843_v31 }
 0x1f3   :  { %2250 = vst [vmem:[%s4691_s5 + $0xa0] sm:$0xff] %v2186_v37  ;;  %v1464_v39 = vsel %vm1463_vm12, %v4018_v1, %v1462_v35  ;;  %v1471_v5 = vmul.f32 0.5, %v1470_v17  ;;  %vm1849_vm1 = vcmp.eq.f32.partialorder %v4043_v19, 0.0  ;;  %v1850_v1 = vand.u32 2147483648, %v4043_v19 }
 0x1f4   :  { %v2218_v45 = vsel %vm2089_vm14, %v2024_v22, %v2154_v8  ;;  %v1467_v38 = vsel %vm1465_vm15, %v1466_v12, %v1464_v39  ;;  %v1853_v28 = vmul.f32 %v2822_v9, %v4080_v13  ;;  %v1845_v61 = vmul.f32 %v2818_v26, %v1844_v58 }
 0x1f5   :  { %2282 = vst [vmem:[%s4691_s5 + $0x1a0] sm:$0xff] %v2218_v45  ;;  %v1993_v49 = vmul.f32 %v1467_v38, %v3473_v14  ;;  %v1472_v50 = vsub.f32 1.5, %v1471_v5  ;;  %v4128_v22 = vadd.f32 %v3873_v43, %v1181_v51  ;;  %v4131_v12 = vadd.f32 %v3873_v43, %v1104_v25 }
 0x1f6   :  { %v649_v21 = vpop.f32.mrf.mxu0  ;;  %v1184_v44 = vpop.f32.mrf.mxu3  ;;  %vm1475_vm3 = vcmp.eq.f32.partialorder %v4047_v30, inf  ;;  %v1854_v37 = vmul.f32 %v2822_v9, %v1853_v28  ;;  %v1846_v35 = vmul.f32 %v1845_v61, %v4043_v19  ;;  %vm1477_vm4 = vcmp.eq.f32.partialorder %v4047_v30, 0.0 }
 0x1f7   :  { %v818_v40 = vpop.f32.mrf.mxu1  ;;  %vm2058_vm2 = vcmp.ge.f32.partialorder %v1993_v49, 0.0  ;;  %v2123_v14 = vmul.f32 %v3469_v46, %v1993_v49  ;;  %v1473_v8 = vmul.f32 %v2820_v27, %v1472_v50  ;;  %2825 = vrsqrt.f32 %v4128_v22  ;;  %v2824_v26 = vpop.eup %2823 }
 0x1f8   :  { %v1478_v31 = vand.u32 2147483648, %v4047_v30  ;;  %v1855_v17 = vmul.f32 0.5, %v1854_v37  ;;  %vm1859_vm5 = vcmp.eq.f32.partialorder %v4080_v13, inf  ;;  %v1848_v25 = vsel %vm1847_vm0, %v4043_v19, %v1846_v35 }
 0x1f9   :  { %v2187_v51 = vsel %vm2058_vm2, %v1993_v49, %v2123_v14  ;;  %v1474_v27 = vmul.f32 %v1473_v8, %v4047_v30  ;;  %v1481_v39 = vmul.f32 %v2824_v26, %v4108_v54  ;;  %2827 = vrsqrt.f32 %v4131_v12  ;;  %v1106_v45 = vpop.f32.mrf.mxu2 }
 0x1fa   :  { %2251 = vst [vmem:[%s4691_s5 + $0xa8] sm:$0xff] %v2187_v51  ;;  %v1851_v38 = vsel %vm1849_vm1, %v1850_v1, %v1848_v25  ;;  %v1856_v58 = vsub.f32 1.5, %v1855_v17  ;;  %vm1861_vm6 = vcmp.eq.f32.partialorder %v4080_v13, 0.0  ;;  %v1862_v5 = vand.u32 2147483648, %v4080_v13 }
 0x1fb   :  { %v2025_v49 = vmul.f32 %v1851_v38, %v3503_v7  ;;  %v1476_v28 = vsel %vm1475_vm3, %v4047_v30, %v1474_v27  ;;  %v1482_v61 = vmul.f32 %v2824_v26, %v1481_v39  ;;  %v4159_v50 = vadd.f32 %v4098_v11, %v4089_v52 }
 0x1fc   :  { %v1479_v19 = vsel %vm1477_vm4, %v1478_v31, %v1476_v28  ;;  %v1857_v1 = vmul.f32 %v2822_v9, %v1856_v58  ;;  %v4163_v14 = vadd.f32 %v818_v40, %v649_v21  ;;  %v4166_v37 = vadd.f32 %v3873_v43, %v1184_v44 }
 0x1fd   :  { %v2826_v8 = vpop.eup %2825  ;;  %vm2090_vm7 = vcmp.ge.f32.partialorder %v2025_v49, 0.0  ;;  %v2155_v51 = vmul.f32 %v3469_v46, %v2025_v49  ;;  %v1994_v17 = vmul.f32 %v1479_v19, %v3531_v18  ;;  %v1483_v52 = vmul.f32 0.5, %v1482_v61 }
 0x1fe   :  { %v4168_v35 = vpop.f32.mrf.mxu0  ;;  %v1186_v7 = vpop.f32.mrf.mxu3  ;;  %v1858_v30 = vmul.f32 %v1857_v1, %v4080_v13  ;;  %v1865_v9 = vmul.f32 %v2826_v8, %v4128_v22  ;;  %v914_v21 = vmul.f32 %v4163_v14, %v4163_v14  ;;  %2829 = vrsqrt.f32 %v4166_v37 }
 0x1ff   :  { %v4172_v11 = vpop.f32.mrf.mxu1  ;;  %v2828_v44 = vpop.eup %2827  ;;  %v2219_v40 = vsel %vm2090_vm7, %v2025_v49, %v2155_v51  ;;  %vm2059_vm8 = vcmp.ge.f32.partialorder %v1994_v17, 0.0  ;;  %v2124_v31 = vmul.f32 %v3469_v46, %v1994_v17  ;;  %v1484_v25 = vsub.f32 1.5, %v1483_v52 }
 0x200   :  { %2283 = vst [vmem:[%s4691_s5 + $0x1a8] sm:$0xff] %v2219_v40  ;;  %v1860_v18 = vsel %vm1859_vm5, %v4080_v13, %v1858_v30  ;;  %vm1487_vm9 = vcmp.eq.f32.partialorder %v4108_v54, inf  ;;  %v1866_v27 = vmul.f32 %v2826_v8, %v1865_v9  ;;  %v1493_v39 = vmul.f32 %v2828_v44, %v4131_v12 }
 0x201   :  { %v2188_v38 = vsel %vm2059_vm8, %v1994_v17, %v2124_v31  ;;  %v1863_v58 = vsel %vm1861_vm6, %v1862_v5, %v1860_v18  ;;  %v1485_v49 = vmul.f32 %v2824_v26, %v1484_v25  ;;  %v913_v28 = vmul.f32 %v4159_v50, %v4159_v50  ;;  %v1109_v61 = vpop.f32.mrf.mxu2 }
 0x202   :  { %2252 = vst [vmem:[%s4691_s5 + $0xb0] sm:$0xff] %v2188_v38  ;;  %v2026_v19 = vmul.f32 %v1863_v58, %v3549_v48  ;;  %vm1489_vm10 = vcmp.eq.f32.partialorder %v4108_v54, 0.0  ;;  %v1867_v1 = vmul.f32 0.5, %v1866_v27  ;;  %v1494_v51 = vmul.f32 %v2828_v44, %v1493_v39 }
 0x203   :  { %v1486_v17 = vmul.f32 %v1485_v49, %v4108_v54  ;;  %v1490_v13 = vand.u32 2147483648, %v4108_v54  ;;  %v4200_v26 = vadd.f32 %v3873_v43, %v1106_v45  ;;  %v956_v5 = vpack.c.bf16 %v914_v21, %v913_v28 }
 0x204   :  { %v2830_v52 = vpop.eup %2829  ;;  %vm2091_vm11 = vcmp.ge.f32.partialorder %v2026_v19, 0.0  ;;  %v2156_v30 = vmul.f32 %v3469_v46, %v2026_v19  ;;  %v1868_v9 = vsub.f32 1.5, %v1867_v1  ;;  %v1495_v40 = vmul.f32 0.5, %v1494_v51 }
 0x205   :  { %v1488_v25 = vsel %vm1487_vm9, %v4108_v54, %v1486_v17  ;;  %vm1871_vm12 = vcmp.eq.f32.partialorder %v4128_v22, inf  ;;  %v1877_v18 = vmul.f32 %v2830_v52, %v4166_v37  ;;  %2831 = vrsqrt.f32 %v4200_v26  ;;  %1148 = vmatmul.bf16.gmra.mxu2 %v956_v5 }
 0x206   :  { %v654_v31 = vpop.f32.mrf.mxu0  ;;  %v4203_v48 = vpop.f32.mrf.mxu3  ;;  %v2220_v21 = vsel %vm2091_vm11, %v2026_v19, %v2156_v30  ;;  %v1491_v27 = vsel %vm1489_vm10, %v1490_v13, %v1488_v25  ;;  %v1869_v39 = vmul.f32 %v2826_v8, %v1868_v9  ;;  %v1496_v38 = vsub.f32 1.5, %v1495_v40 }
 0x207   :  { %v823_v45 = vpop.f32.mrf.mxu1  ;;  %2284 = vst [vmem:[%s4691_s5 + $0x1b0] sm:$0xff] %v2220_v21  ;;  %v1995_v58 = vmul.f32 %v1491_v27, %v3533_v32  ;;  %vm1873_vm13 = vcmp.eq.f32.partialorder %v4128_v22, 0.0  ;;  %v1874_v49 = vand.u32 2147483648, %v4128_v22  ;;  %v1878_v28 = vmul.f32 %v2830_v52, %v1877_v18 }
 0x208   :  { %v1870_v1 = vmul.f32 %v1869_v39, %v4128_v22  ;;  %v1497_v51 = vmul.f32 %v2828_v44, %v1496_v38  ;;  %vm1499_vm14 = vcmp.eq.f32.partialorder %v4131_v12, inf  ;;  %v4222_v54 = vadd.f32 %v3873_v43, %v1186_v7 }
 0x209   :  { %vm2060_vm15 = vcmp.ge.f32.partialorder %v1995_v58, 0.0  ;;  %v2125_v8 = vmul.f32 %v3469_v46, %v1995_v58  ;;  %v1879_v19 = vmul.f32 0.5, %v1878_v28  ;;  %v4226_v17 = vadd.f32 %v3873_v43, %v1109_v61  ;;  %v1111_v32 = vpop.f32.mrf.mxu2 }
 0x20a   :  { %v1872_v13 = vsel %vm1871_vm12, %v4128_v22, %v1870_v1  ;;  %v1498_v5 = vmul.f32 %v1497_v51, %v4131_v12  ;;  %vm1501_vm0 = vcmp.eq.f32.partialorder %v4131_v12, 0.0  ;;  %2833 = vrsqrt.f32 %v4222_v54 }
 0x20b   :  { %v2832_v7 = vpop.eup %2831  ;;  %v2189_v44 = vsel %vm2060_vm15, %v1995_v58, %v2125_v8  ;;  %v1875_v30 = vsel %vm1873_vm13, %v1874_v49, %v1872_v13  ;;  %v1502_v9 = vand.u32 2147483648, %v4131_v12  ;;  %v1880_v61 = vsub.f32 1.5, %v1879_v19 }
 0x20c   :  { %2253 = vst [vmem:[%s4691_s5 + $0xb8] sm:$0xff] %v2189_v44  ;;  %v2027_v40 = vmul.f32 %v1875_v30, %v3563_v56  ;;  %v1500_v25 = vsel %vm1499_vm14, %v4131_v12, %v1498_v5  ;;  %vm1883_vm1 = vcmp.eq.f32.partialorder %v4166_v37, inf  ;;  %v1505_v18 = vmul.f32 %v2832_v7, %v4200_v26 }
 0x20d   :  { %v1503_v22 = vsel %vm1501_vm0, %v1502_v9, %v1500_v25  ;;  %v1881_v27 = vmul.f32 %v2830_v52, %v1880_v61  ;;  %vm1885_vm2 = vcmp.eq.f32.partialorder %v4166_v37, 0.0  ;;  %2835 = vrsqrt.f32 %v4226_v17 }
 0x20e   :  { %v1191_v21 = vpop.f32.mrf.mxu3  ;;  %vm2092_vm3 = vcmp.ge.f32.partialorder %v2027_v40, 0.0  ;;  %v2157_v39 = vmul.f32 %v3469_v46, %v2027_v40  ;;  %v1996_v56 = vmul.f32 %v1503_v22, %v3591_v41  ;;  %v1506_v38 = vmul.f32 %v2832_v7, %v1505_v18  ;;  %v4250_v58 = vpop.f32.mrf.mxu0 }
 0x20f   :  { %v4252_v12 = vpop.f32.mrf.mxu1  ;;  %v1882_v49 = vmul.f32 %v1881_v27, %v4166_v37  ;;  %v1886_v28 = vand.u32 2147483648, %v4166_v37  ;;  %v4258_v52 = vadd.f32 %v4172_v11, %v4168_v35  ;;  %v4260_v1 = vadd.f32 %v823_v45, %v654_v31 }
 0x210   :  { %v2834_v51 = vpop.eup %2833  ;;  %v2221_v8 = vsel %vm2092_vm3, %v2027_v40, %v2157_v39  ;;  %vm2061_vm4 = vcmp.ge.f32.partialorder %v1996_v56, 0.0  ;;  %v2126_v41 = vmul.f32 %v3469_v46, %v1996_v56  ;;  %v1507_v19 = vmul.f32 0.5, %v1506_v38 }
 0x211   :  { %2285 = vst [vmem:[%s4691_s5 + $0x1b8] sm:$0xff] %v2221_v8  ;;  %v1884_v13 = vsel %vm1883_vm1, %v4166_v37, %v1882_v49  ;;  %vm1511_vm5 = vcmp.eq.f32.partialorder %v4200_v26, inf  ;;  %v1889_v35 = vmul.f32 %v2834_v51, %v4222_v54  ;;  %v4273_v11 = vadd.f32 %v3873_v43, %v4203_v48  ;;  %v1114_v31 = vpop.f32.mrf.mxu2 }
 0x212   :  { %v2190_v45 = vsel %vm2061_vm4, %v1996_v56, %v2126_v41  ;;  %v1887_v5 = vsel %vm1885_vm2, %v1886_v28, %v1884_v13  ;;  %v1508_v44 = vsub.f32 1.5, %v1507_v19  ;;  %v4278_v30 = vadd.f32 %v3873_v43, %v1111_v32 }
 0x213   :  { %v2836_v9 = vpop.eup %2835  ;;  %2254 = vst [vmem:[%s4691_s5 + $0xc0] sm:$0xff] %v2190_v45  ;;  %v2028_v61 = vmul.f32 %v1887_v5, %v3609_v33  ;;  %v1890_v40 = vmul.f32 %v2834_v51, %v1889_v35  ;;  %v916_v48 = vmul.f32 %v4260_v1, %v4260_v1  ;;  %2837 = vrsqrt.f32 %v4273_v11 }
 0x214   :  { %v1509_v25 = vmul.f32 %v2832_v7, %v1508_v44  ;;  %vm1513_vm6 = vcmp.eq.f32.partialorder %v4200_v26, 0.0  ;;  %v915_v37 = vmul.f32 %v4258_v52, %v4258_v52  ;;  %v1517_v32 = vmul.f32 %v2836_v9, %v4226_v17 }
 0x215   :  { %vm2093_vm7 = vcmp.ge.f32.partialorder %v2028_v61, 0.0  ;;  %v2158_v18 = vmul.f32 %v3469_v46, %v2028_v61  ;;  %v1891_v22 = vmul.f32 0.5, %v1890_v40  ;;  %2839 = vrsqrt.f32 %v4278_v30 }
 0x216   :  { %v1510_v33 = vmul.f32 %v1509_v25, %v4200_v26  ;;  %v1514_v27 = vand.u32 2147483648, %v4200_v26  ;;  %vm1895_vm8 = vcmp.eq.f32.partialorder %v4222_v54, inf  ;;  %v1518_v7 = vmul.f32 %v2836_v9, %v1517_v32  ;;  %v1194_v39 = vpop.f32.mrf.mxu3  ;;  %v659_v13 = vpop.f32.mrf.mxu0 }
 0x217   :  { %v2222_v56 = vsel %vm2093_vm7, %v2028_v61, %v2158_v18  ;;  %v1892_v38 = vsub.f32 1.5, %v1891_v22  ;;  %vm1897_vm9 = vcmp.eq.f32.partialorder %v4222_v54, 0.0  ;;  %v957_v49 = vpack.c.bf16 %v916_v48, %v915_v37  ;;  %v828_v35 = vpop.f32.mrf.mxu1 }
 0x218   :  { %2286 = vst [vmem:[%s4691_s5 + $0x1c0] sm:$0xff] %v2222_v56  ;;  %v1512_v28 = vsel %vm1511_vm5, %v4200_v26, %v1510_v33  ;;  %v1898_v8 = vand.u32 2147483648, %v4222_v54  ;;  %v1519_v41 = vmul.f32 0.5, %v1518_v7  ;;  %v4305_v19 = vadd.f32 %v3873_v43, %v1191_v21 }
 0x219   :  { %v2838_v45 = vpop.eup %2837  ;;  %v1515_v5 = vsel %vm1513_vm6, %v1514_v27, %v1512_v28  ;;  %v1893_v44 = vmul.f32 %v2834_v51, %v1892_v38  ;;  %vm1523_vm10 = vcmp.eq.f32.partialorder %v4226_v17, inf  ;;  %1153 = vmatmul.bf16.gmra.mxu2 %v957_v49  ;;  %v4311_v61 = vadd.f32 %v3873_v43, %v1114_v31  ;;  %v1116_v40 = vpop.f32.mrf.mxu2 }
 0x21a   :  { %v1997_v48 = vmul.f32 %v1515_v5, %v3593_v55  ;;  %v1520_v25 = vsub.f32 1.5, %v1519_v41  ;;  %vm1525_vm11 = vcmp.eq.f32.partialorder %v4226_v17, 0.0  ;;  %v1901_v21 = vmul.f32 %v2838_v45, %v4273_v11 }
 0x21b   :  { %v2840_v37 = vpop.eup %2839  ;;  %v1894_v32 = vmul.f32 %v1893_v44, %v4222_v54  ;;  %v1526_v26 = vand.u32 2147483648, %v4226_v17  ;;  %2841 = vrsqrt.f32 %v4305_v19  ;;  %v4319_v51 = vadd.f32 %v828_v35, %v659_v13 }
 0x21c   :  { %vm2062_vm12 = vcmp.ge.f32.partialorder %v1997_v48, 0.0  ;;  %v2127_v43 = vmul.f32 %v3469_v46, %v1997_v48  ;;  %v1521_v31 = vmul.f32 %v2836_v9, %v1520_v25  ;;  %v1902_v18 = vmul.f32 %v2838_v45, %v1901_v21  ;;  %v4354_v21 = vld [vmem:[%s4689_s3] ss:$0 sm:$0xff] }
 0x21d   :  { %v1896_v55 = vsel %vm1895_vm8, %v4222_v54, %v1894_v32  ;;  %vm1907_vm13 = vcmp.eq.f32.partialorder %v4273_v11, inf  ;;  %v1529_v22 = vmul.f32 %v2840_v37, %v4278_v30  ;;  %2843 = vrsqrt.f32 %v4311_v61 }
 0x21e   :  { %v2191_v33 = vsel %vm2062_vm12, %v1997_v48, %v2127_v43  ;;  %v1899_v27 = vsel %vm1897_vm9, %v1898_v8, %v1896_v55  ;;  %v1522_v7 = vmul.f32 %v1521_v31, %v4226_v17  ;;  %v1903_v56 = vmul.f32 0.5, %v1902_v18  ;;  %v1196_v13 = vpop.f32.mrf.mxu3 }
 0x21f   :  { %2255 = vst [vmem:[%s4691_s5 + $0xc8] sm:$0xff] %v2191_v33  ;;  %v2029_v9 = vmul.f32 %v1899_v27, %v3623_v15  ;;  %vm1909_vm14 = vcmp.eq.f32.partialorder %v4273_v11, 0.0  ;;  %v1530_v38 = vmul.f32 %v2840_v37, %v1529_v22  ;;  %v4338_v49 = vadd.f32 %v4252_v12, %v4250_v58 }
 0x220   :  { %v1524_v54 = vsel %vm1523_vm10, %v4226_v17, %v1522_v7  ;;  %v1904_v28 = vsub.f32 1.5, %v1903_v56  ;;  %v1910_v8 = vand.u32 2147483648, %v4273_v11  ;;  %v918_v41 = vmul.f32 %v4319_v51, %v4319_v51 }
 0x221   :  { %v2842_v35 = vpop.eup %2841  ;;  %vm2094_vm15 = vcmp.ge.f32.partialorder %v2029_v9, 0.0  ;;  %v2159_v15 = vmul.f32 %v3469_v46, %v2029_v9  ;;  %v1527_v5 = vsel %vm1525_vm11, %v1526_v26, %v1524_v54  ;;  %v1531_v58 = vmul.f32 0.5, %v1530_v38  ;;  %v1119_v12 = vpop.f32.mrf.mxu2 }
 0x222   :  { %v1998_v44 = vmul.f32 %v1527_v5, %v3651_v47  ;;  %v1905_v48 = vmul.f32 %v2838_v45, %v1904_v28  ;;  %v1913_v25 = vmul.f32 %v2842_v35, %v4305_v19  ;;  %v4357_v32 = vadd.f32 %v4354_v21, %v1194_v39 }
 0x223   :  { %v2844_v43 = vpop.eup %2843  ;;  %v2223_v31 = vsel %vm2094_vm15, %v2029_v9, %v2159_v15  ;;  %v1532_v18 = vsub.f32 1.5, %v1531_v58  ;;  %v917_v17 = vmul.f32 %v4338_v49, %v4338_v49  ;;  %v4362_v26 = vadd.f32 %v4354_v21, %v1116_v40 }
 0x224   :  { %2287 = vst [vmem:[%s4691_s5 + $0x1c8] sm:$0xff] %v2223_v31  ;;  %vm2063_vm0 = vcmp.ge.f32.partialorder %v1998_v44, 0.0  ;;  %v2128_v47 = vmul.f32 %v3469_v46, %v1998_v44  ;;  %v1906_v45 = vmul.f32 %v1905_v48, %v4273_v11  ;;  %v1914_v39 = vmul.f32 %v2842_v35, %v1913_v25 }
 0x225   :  { %v1533_v55 = vmul.f32 %v2840_v37, %v1532_v18  ;;  %v1541_v22 = vmul.f32 %v2844_v43, %v4311_v61  ;;  %2845 = vrsqrt.f32 %v4357_v32  ;;  %v958_v33 = vpack.c.bf16 %v918_v41, %v917_v17 }
 0x226   :  { %v2192_v27 = vsel %vm2063_vm0, %v1998_v44, %v2128_v47  ;;  %v1908_v40 = vsel %vm1907_vm13, %v4273_v11, %v1906_v45  ;;  %vm1535_vm1 = vcmp.eq.f32.partialorder %v4278_v30, inf  ;;  %v1915_v7 = vmul.f32 0.5, %v1914_v39 }
 0x227   :  { %2256 = vst [vmem:[%s4691_s5 + $0xd0] sm:$0xff] %v2192_v27  ;;  %v1911_v37 = vsel %vm1909_vm14, %v1910_v8, %v1908_v40  ;;  %v1534_v56 = vmul.f32 %v1533_v55, %v4278_v30  ;;  %vm1537_vm2 = vcmp.eq.f32.partialorder %v4278_v30, 0.0  ;;  %v1542_v9 = vmul.f32 %v2844_v43, %v1541_v22 }
 0x228   :  { %v2030_v38 = vmul.f32 %v1911_v37, %v3669_v57  ;;  %v1538_v54 = vand.u32 2147483648, %v4278_v30  ;;  %v1916_v28 = vsub.f32 1.5, %v1915_v7  ;;  %2847 = vrsqrt.f32 %v4362_v26  ;;  %v1199_v57 = vpop.f32.mrf.mxu3 }
 0x229   :  { %v1536_v41 = vsel %vm1535_vm1, %v4278_v30, %v1534_v56  ;;  %vm1919_vm3 = vcmp.eq.f32.partialorder %v4305_v19, inf  ;;  %vm1921_vm4 = vcmp.eq.f32.partialorder %v4305_v19, 0.0  ;;  %v1543_v11 = vmul.f32 0.5, %v1542_v9  ;;  %1158 = vmatmul.bf16.gmra.mxu2 %v958_v33  ;;  %v1121_v8 = vpop.f32.mrf.mxu2 }
 0x22a   :  { %vm2095_vm5 = vcmp.ge.f32.partialorder %v2030_v38, 0.0  ;;  %v2160_v15 = vmul.f32 %v3469_v46, %v2030_v38  ;;  %v1539_v5 = vsel %vm1537_vm2, %v1538_v54, %v1536_v41  ;;  %v1917_v58 = vmul.f32 %v2842_v35, %v1916_v28 }
 0x22b   :  { %v2846_v44 = vpop.eup %2845  ;;  %v1999_v48 = vmul.f32 %v1539_v5, %v3653_v16  ;;  %v1922_v25 = vand.u32 2147483648, %v4305_v19  ;;  %v1544_v31 = vsub.f32 1.5, %v1543_v11  ;;  %v4392_v30 = vadd.f32 %v4354_v21, %v1196_v13 }
 0x22c   :  { %v2224_v18 = vsel %vm2095_vm5, %v2030_v38, %v2160_v15  ;;  %v1918_v17 = vmul.f32 %v1917_v58, %v4305_v19  ;;  %v1925_v47 = vmul.f32 %v2846_v44, %v4357_v32  ;;  %v4397_v45 = vadd.f32 %v4354_v21, %v1119_v12 }
 0x22d   :  { %2288 = vst [vmem:[%s4691_s5 + $0x1d0] sm:$0xff] %v2224_v18  ;;  %vm2064_vm6 = vcmp.ge.f32.partialorder %v1999_v48, 0.0  ;;  %v2129_v16 = vmul.f32 %v3469_v46, %v1999_v48  ;;  %v1545_v35 = vmul.f32 %v2844_v43, %v1544_v31  ;;  %2849 = vrsqrt.f32 %v4392_v30 }
 0x22e   :  { %v2848_v13 = vpop.eup %2847  ;;  %v1920_v39 = vsel %vm1919_vm3, %v4305_v19, %v1918_v17  ;;  %vm1547_vm7 = vcmp.eq.f32.partialorder %v4311_v61, inf  ;;  %v1926_v55 = vmul.f32 %v2846_v44, %v1925_v47  ;;  %v4409_v12 = vadd.f32 %v4354_v21, %v1199_v57 }
 0x22f   :  { %v2193_v22 = vsel %vm2064_vm6, %v1999_v48, %v2129_v16  ;;  %v1923_v33 = vsel %vm1921_vm4, %v1922_v25, %v1920_v39  ;;  %v1546_v27 = vmul.f32 %v1545_v35, %v4311_v61  ;;  %v1553_v43 = vmul.f32 %v2848_v13, %v4362_v26 }
 0x230   :  { %2257 = vst [vmem:[%s4691_s5 + $0xd8] sm:$0xff] %v2193_v22  ;;  %v2031_v40 = vmul.f32 %v1923_v33, %v3683_v63  ;;  %v1550_v7 = vand.u32 2147483648, %v4311_v61  ;;  %v1927_v37 = vmul.f32 0.5, %v1926_v55  ;;  %2851 = vrsqrt.f32 %v4397_v45  ;;  %v1201_v58 = vpop.f32.mrf.mxu3 }
 0x231   :  { %v1548_v56 = vsel %vm1547_vm7, %v4311_v61, %v1546_v27  ;;  %vm1549_vm8 = vcmp.eq.f32.partialorder %v4311_v61, 0.0  ;;  %v1554_v19 = vmul.f32 %v2848_v13, %v1553_v43  ;;  %v1124_v9 = vpop.f32.mrf.mxu2  ;;  %vm1931_vm10 = vcmp.eq.f32.partialorder %v4357_v32, inf }
 0x232   :  { %vm2096_vm9 = vcmp.ge.f32.partialorder %v2031_v40, 0.0  ;;  %v2161_v38 = vmul.f32 %v3469_v46, %v2031_v40  ;;  %v1551_v54 = vsel %vm1549_vm8, %v1550_v7, %v1548_v56  ;;  %v1928_v28 = vsub.f32 1.5, %v1927_v37 }
 0x233   :  { %v2850_v41 = vpop.eup %2849  ;;  %v2000_v11 = vmul.f32 %v1551_v54, %v3711_v3  ;;  %v1555_v63 = vmul.f32 0.5, %v1554_v19  ;;  %2853 = vrsqrt.f32 %v4409_v12  ;;  %vm1933_vm11 = vcmp.eq.f32.partialorder %v4357_v32, 0.0 }
 0x234   :  { %v2225_v15 = vsel %vm2096_vm9, %v2031_v40, %v2161_v38  ;;  %v1929_v5 = vmul.f32 %v2846_v44, %v1928_v28  ;;  %v1937_v61 = vmul.f32 %v2850_v41, %v4392_v30  ;;  %v1934_v3 = vand.u32 2147483648, %v4357_v32 }
 0x235   :  { %2289 = vst [vmem:[%s4691_s5 + $0x1d8] sm:$0xff] %v2225_v15  ;;  %vm2065_vm12 = vcmp.ge.f32.partialorder %v2000_v11, 0.0  ;;  %v2130_v57 = vmul.f32 %v3469_v46, %v2000_v11  ;;  %v1556_v48 = vsub.f32 1.5, %v1555_v63  ;;  %vm1559_vm13 = vcmp.eq.f32.partialorder %v4362_v26, inf }
 0x236   :  { %v2852_v25 = vpop.eup %2851  ;;  %v1930_v31 = vmul.f32 %v1929_v5, %v4357_v32  ;;  %v1938_v44 = vmul.f32 %v2850_v41, %v1937_v61  ;;  %v4437_v18 = vadd.f32 %v4354_v21, %v1121_v8  ;;  %v4441_v35 = vadd.f32 %v4354_v21, %v1201_v58 }
 0x237   :  { %v2194_v17 = vsel %vm2065_vm12, %v2000_v11, %v2130_v57  ;;  %v1557_v47 = vmul.f32 %v2848_v13, %v1556_v48  ;;  %v1565_v16 = vmul.f32 %v2852_v25, %v4397_v45  ;;  %vm1561_vm14 = vcmp.eq.f32.partialorder %v4362_v26, 0.0 }
 0x238   :  { %2258 = vst [vmem:[%s4691_s5 + $0xe0] sm:$0xff] %v2194_v17  ;;  %v1932_v39 = vsel %vm1931_vm10, %v4357_v32, %v1930_v31  ;;  %v1939_v55 = vmul.f32 0.5, %v1938_v44  ;;  %2855 = vrsqrt.f32 %v4437_v18  ;;  %v1562_v33 = vand.u32 2147483648, %v4362_v26 }
 0x239   :  { %v2854_v8 = vpop.eup %2853  ;;  %v1935_v13 = vsel %vm1933_vm11, %v1934_v3, %v1932_v39  ;;  %v1558_v22 = vmul.f32 %v1557_v47, %v4362_v26  ;;  %v1566_v27 = vmul.f32 %v2852_v25, %v1565_v16  ;;  %v1126_v43 = vpop.f32.mrf.mxu2  ;;  %vm1943_vm15 = vcmp.eq.f32.partialorder %v4392_v30, inf }
 0x23a   :  { %v2032_v40 = vmul.f32 %v1935_v13, %v3729_v34  ;;  %v1940_v7 = vsub.f32 1.5, %v1939_v55  ;;  %v1949_v37 = vmul.f32 %v2854_v8, %v4409_v12  ;;  %vm1945_vm0 = vcmp.eq.f32.partialorder %v4392_v30, 0.0 }
 0x23b   :  { %v1560_v56 = vsel %vm1559_vm13, %v4362_v26, %v1558_v22  ;;  %v1567_v32 = vmul.f32 0.5, %v1566_v27  ;;  %2857 = vrsqrt.f32 %v4441_v35  ;;  %v1946_v28 = vand.u32 2147483648, %v4392_v30 }
 0x23c   :  { %vm2097_vm1 = vcmp.ge.f32.partialorder %v2032_v40, 0.0  ;;  %v2162_v19 = vmul.f32 %v3469_v46, %v2032_v40  ;;  %v1563_v34 = vsel %vm1561_vm14, %v1562_v33, %v1560_v56  ;;  %v1941_v38 = vmul.f32 %v2850_v41, %v1940_v7 }
 0x23d   :  { %v2001_v54 = vmul.f32 %v1563_v34, %v3713_v42  ;;  %v1568_v11 = vsub.f32 1.5, %v1567_v32  ;;  %v1950_v63 = vmul.f32 %v2854_v8, %v1949_v37  ;;  %vm1571_vm2 = vcmp.eq.f32.partialorder %v4397_v45, inf }
 0x23e   :  { %v2856_v15 = vpop.eup %2855  ;;  %v2226_v5 = vsel %vm2097_vm1, %v2032_v40, %v2162_v19  ;;  %v1942_v61 = vmul.f32 %v1941_v38, %v4392_v30  ;;  %v4471_v58 = vadd.f32 %v4354_v21, %v1124_v9  ;;  %vm1573_vm4 = vcmp.eq.f32.partialorder %v4397_v45, 0.0 }
 0x23f   :  { %2290 = vst [vmem:[%s4691_s5 + $0x1e0] sm:$0xff] %v2226_v5  ;;  %vm2066_vm3 = vcmp.ge.f32.partialorder %v2001_v54, 0.0  ;;  %v2131_v42 = vmul.f32 %v3469_v46, %v2001_v54  ;;  %v1569_v26 = vmul.f32 %v2852_v25, %v1568_v11  ;;  %v1951_v41 = vmul.f32 0.5, %v1950_v63 }
 0x240   :  { %v1944_v57 = vsel %vm1943_vm15, %v4392_v30, %v1942_v61  ;;  %v1577_v3 = vmul.f32 %v2856_v15, %v4437_v18  ;;  %2859 = vrsqrt.f32 %v4471_v58  ;;  %v1574_v16 = vand.u32 2147483648, %v4397_v45 }
 0x241   :  { %v2858_v9 = vpop.eup %2857  ;;  %v2195_v48 = vsel %vm2066_vm3, %v2001_v54, %v2131_v42  ;;  %v1947_v31 = vsel %vm1945_vm0, %v1946_v28, %v1944_v57  ;;  %v1570_v44 = vmul.f32 %v1569_v26, %v4397_v45  ;;  %v1952_v17 = vsub.f32 1.5, %v1951_v41  ;;  %v1129_v25 = vpop.f32.mrf.mxu2 }
 0x242   :  { %2259 = vst [vmem:[%s4691_s5 + $0xe8] sm:$0xff] %v2195_v48  ;;  %v2033_v47 = vmul.f32 %v1947_v31, %v3743_v29  ;;  %v1578_v39 = vmul.f32 %v2856_v15, %v1577_v3  ;;  %v1961_v55 = vmul.f32 %v2858_v9, %v4441_v35  ;;  %vm1955_vm5 = vcmp.eq.f32.partialorder %v4409_v12, inf }
 0x243   :  { %v1572_v30 = vsel %vm1571_vm2, %v4397_v45, %v1570_v44  ;;  %v1953_v13 = vmul.f32 %v2854_v8, %v1952_v17  ;;  %v4497_v22 = vadd.f32 %v4354_v21, %v1126_v43  ;;  %vm1957_vm7 = vcmp.eq.f32.partialorder %v4409_v12, 0.0 }
 0x244   :  { %vm2098_vm6 = vcmp.ge.f32.partialorder %v2033_v47, 0.0  ;;  %v2163_v33 = vmul.f32 %v3469_v46, %v2033_v47  ;;  %v1575_v29 = vsel %vm1573_vm4, %v1574_v16, %v1572_v30  ;;  %v1579_v27 = vmul.f32 0.5, %v1578_v39 }
 0x245   :  { %v2002_v40 = vmul.f32 %v1575_v29, %v3771_v23  ;;  %v1954_v7 = vmul.f32 %v1953_v13, %v4409_v12  ;;  %v1962_v37 = vmul.f32 %v2858_v9, %v1961_v55  ;;  %2861 = vrsqrt.f32 %v4497_v22 }
 0x246   :  { %v2860_v8 = vpop.eup %2859  ;;  %v2227_v56 = vsel %vm2098_vm6, %v2033_v47, %v2163_v33  ;;  %v1958_v43 = vand.u32 2147483648, %v4409_v12  ;;  %v1580_v32 = vsub.f32 1.5, %v1579_v27  ;;  %vm1583_vm9 = vcmp.eq.f32.partialorder %v4437_v18, inf }
 0x247   :  { %2291 = vst [vmem:[%s4691_s5 + $0x1e8] sm:$0xff] %v2227_v56  ;;  %vm2067_vm8 = vcmp.ge.f32.partialorder %v2002_v40, 0.0  ;;  %v2132_v45 = vmul.f32 %v3469_v46, %v2002_v40  ;;  %v1956_v23 = vsel %vm1955_vm5, %v4409_v12, %v1954_v7  ;;  %v1963_v19 = vmul.f32 0.5, %v1962_v37 }
 0x248   :  { %v1959_v34 = vsel %vm1957_vm7, %v1958_v43, %v1956_v23  ;;  %v1581_v38 = vmul.f32 %v2856_v15, %v1580_v32  ;;  %v1589_v54 = vmul.f32 %v2860_v8, %v4471_v58  ;;  %v4518_v5 = vadd.f32 %v4354_v21, %v1129_v25 }
 0x249   :  { %v2196_v28 = vsel %vm2067_vm8, %v2002_v40, %v2132_v45  ;;  %v2034_v11 = vmul.f32 %v1959_v34, %v3777_v36  ;;  %v1964_v63 = vsub.f32 1.5, %v1963_v19  ;;  %v1131_v61 = vpop.f32.mrf.mxu2  ;;  %v1586_v15 = vand.u32 2147483648, %v4437_v18 }
 0x24a   :  { %2260 = vst [vmem:[%s4691_s5 + $0xf0] sm:$0xff] %v2196_v28  ;;  %v1582_v12 = vmul.f32 %v1581_v38, %v4437_v18  ;;  %v1590_v42 = vmul.f32 %v2860_v8, %v1589_v54  ;;  %v4526_v26 = vadd.f32 %v4354_v21, %v1131_v61  ;;  %2863 = vrsqrt.f32 %v4518_v5 }
 0x24b   :  { %v2862_v41 = vpop.eup %2861  ;;  %vm2099_vm10 = vcmp.ge.f32.partialorder %v2034_v11, 0.0  ;;  %v2164_v36 = vmul.f32 %v3469_v46, %v2034_v11  ;;  %v1965_v57 = vmul.f32 %v2858_v9, %v1964_v63  ;;  %vm1585_vm11 = vcmp.eq.f32.partialorder %v4437_v18, 0.0 }
 0x24c   :  { %v1584_v3 = vsel %vm1583_vm9, %v4437_v18, %v1582_v12  ;;  %v1591_v48 = vmul.f32 0.5, %v1590_v42  ;;  %v1601_v31 = vmul.f32 %v2862_v41, %v4497_v22  ;;  %vm1967_vm12 = vcmp.eq.f32.partialorder %v4441_v35, inf }
 0x24d   :  { %v2228_v44 = vsel %vm2099_vm10, %v2034_v11, %v2164_v36  ;;  %v1587_v17 = vsel %vm1585_vm11, %v1586_v15, %v1584_v3  ;;  %v1966_v25 = vmul.f32 %v1965_v57, %v4441_v35  ;;  %v1970_v47 = vand.u32 2147483648, %v4441_v35 }
 0x24e   :  { %2292 = vst [vmem:[%s4691_s5 + $0x1f0] sm:$0xff] %v2228_v44  ;;  %v2003_v9 = vmul.f32 %v1587_v17, %v3773_v10  ;;  %v1592_v16 = vsub.f32 1.5, %v1591_v48  ;;  %v1602_v39 = vmul.f32 %v2862_v41, %v1601_v31  ;;  %vm1969_vm13 = vcmp.eq.f32.partialorder %v4441_v35, 0.0 }
 0x24f   :  { %v1968_v18 = vsel %vm1967_vm12, %v4441_v35, %v1966_v25  ;;  %2865 = vrsqrt.f32 %v4526_v26  ;;  %vm1595_vm15 = vcmp.eq.f32.partialorder %v4471_v58, inf  ;;  %vm1597_vm1 = vcmp.eq.f32.partialorder %v4471_v58, 0.0 }
 0x250   :  { %vm2068_vm14 = vcmp.ge.f32.partialorder %v2003_v9, 0.0  ;;  %v2133_v55 = vmul.f32 %v3469_v46, %v2003_v9  ;;  %v1971_v30 = vsel %vm1969_vm13, %v1970_v47, %v1968_v18  ;;  %v1593_v13 = vmul.f32 %v2860_v8, %v1592_v16  ;;  %v2864_v33 = vpop.eup %2863 }
 0x251   :  { %v2035_v29 = vmul.f32 %v1971_v30, %v3791_v60  ;;  %v1603_v10 = vmul.f32 0.5, %v1602_v39  ;;  %v1134_v27 = vpop.f32.mrf.mxu2  ;;  %v1613_v37 = vmul.f32 %v2864_v33, %v4518_v5  ;;  %v1598_v60 = vand.u32 2147483648, %v4471_v58 }
 0x252   :  { %v2197_v40 = vsel %vm2068_vm14, %v2003_v9, %v2133_v55  ;;  %v1594_v7 = vmul.f32 %v1593_v13, %v4471_v58  ;;  %v4551_v35 = vadd.f32 %v4354_v21, %v1134_v27  ;;  %vm1607_vm2 = vcmp.eq.f32.partialorder %v4497_v22, inf }
 0x253   :  { %2261 = vst [vmem:[%s4691_s5 + $0xf8] sm:$0xff] %v2197_v40  ;;  %vm2100_vm0 = vcmp.ge.f32.partialorder %v2035_v29, 0.0  ;;  %v2165_v8 = vmul.f32 %v3469_v46, %v2035_v29  ;;  %v1604_v56 = vsub.f32 1.5, %v1603_v10  ;;  %v1614_v32 = vmul.f32 %v2864_v33, %v1613_v37 }
 0x254   :  { %v1596_v43 = vsel %vm1595_vm15, %v4471_v58, %v1594_v7  ;;  %2867 = vrsqrt.f32 %v4551_v35  ;;  %v1610_v58 = vand.u32 2147483648, %v4497_v22  ;;  %vm1609_vm4 = vcmp.eq.f32.partialorder %v4497_v22, 0.0 }
 0x255   :  { %v2866_v45 = vpop.eup %2865  ;;  %v2229_v23 = vsel %vm2100_vm0, %v2035_v29, %v2165_v8  ;;  %v1599_v19 = vsel %vm1597_vm1, %v1598_v60, %v1596_v43  ;;  %v1605_v34 = vmul.f32 %v2862_v41, %v1604_v56  ;;  %v1615_v54 = vmul.f32 0.5, %v1614_v32 }
 0x256   :  { %2293 = vst [vmem:[%s4691_s5 + $0x1f8] sm:$0xff] %v2229_v23  ;;  %v2004_v38 = vmul.f32 %v1599_v19, %v3817_v6  ;;  %v1625_v28 = vmul.f32 %v2866_v45, %v4526_v26  ;;  %vm1619_vm5 = vcmp.eq.f32.partialorder %v4518_v5, inf  ;;  %vm1621_vm7 = vcmp.eq.f32.partialorder %v4518_v5, 0.0 }
 0x257   :  { %v1606_v11 = vmul.f32 %v1605_v34, %v4497_v22  ;;  %v1616_v61 = vsub.f32 1.5, %v1615_v54  ;;  %vm1631_vm8 = vcmp.eq.f32.partialorder %v4526_v26, inf  ;;  %vm1633_vm10 = vcmp.eq.f32.partialorder %v4526_v26, 0.0 }
 0x258   :  { %vm2069_vm3 = vcmp.ge.f32.partialorder %v2004_v38, 0.0  ;;  %v2134_v63 = vmul.f32 %v3469_v46, %v2004_v38  ;;  %v1626_v12 = vmul.f32 %v2866_v45, %v1625_v28  ;;  %vm1643_vm11 = vcmp.eq.f32.partialorder %v4551_v35, inf }
 0x259   :  { %v1608_v15 = vsel %vm1607_vm2, %v4497_v22, %v1606_v11  ;;  %v1136_v42 = vpop.f32.mrf.mxu2  ;;  %v1617_v57 = vmul.f32 %v2864_v33, %v1616_v61  ;;  %v1622_v22 = vand.u32 2147483648, %v4518_v5  ;;  %v1634_v33 = vand.u32 2147483648, %v4526_v26 }
 0x25a   :  { %v2868_v6 = vpop.eup %2867  ;;  %v2198_v41 = vsel %vm2069_vm3, %v2004_v38, %v2134_v63  ;;  %v1611_v36 = vsel %vm1609_vm4, %v1610_v58, %v1608_v15  ;;  %v1627_v3 = vmul.f32 0.5, %v1626_v12  ;;  %v4578_v44 = vadd.f32 %v4354_v21, %v1136_v42 }
 0x25b   :  { %2262 = vst [vmem:[%s4691_s5 + $0x100] sm:$0xff] %v2198_v41  ;;  %v2005_v48 = vmul.f32 %v1611_v36, %v3821_v20  ;;  %v1637_v31 = vmul.f32 %v2868_v6, %v4551_v35  ;;  %v1618_v17 = vmul.f32 %v1617_v57, %v4518_v5  ;;  %vm1645_vm13 = vcmp.eq.f32.partialorder %v4551_v35, 0.0 }
 0x25c   :  { %v1628_v25 = vsub.f32 1.5, %v1627_v3  ;;  %2869 = vrsqrt.f32 %v4578_v44  ;;  %vm1655_vm15 = vcmp.eq.f32.partialorder %v4578_v44, inf  ;;  %vm1657_vm0 = vcmp.eq.f32.partialorder %v4578_v44, 0.0 }
 0x25d   :  { %vm2070_vm6 = vcmp.ge.f32.partialorder %v2005_v48, 0.0  ;;  %v2135_v9 = vmul.f32 %v3469_v46, %v2005_v48  ;;  %v1638_v47 = vmul.f32 %v2868_v6, %v1637_v31  ;;  %v1620_v20 = vsel %vm1619_vm5, %v4518_v5, %v1618_v17 }
 0x25e   :  { %v1629_v16 = vmul.f32 %v2866_v45, %v1628_v25  ;;  %v1623_v18 = vsel %vm1621_vm7, %v1622_v22, %v1620_v20 }
 0x25f   :  { %v2199_v39 = vsel %vm2070_vm6, %v2005_v48, %v2135_v9  ;;  %v1639_v55 = vmul.f32 0.5, %v1638_v47  ;;  %v2006_v30 = vmul.f32 %v1623_v18, %v3855_v0 }
 0x260   :  { %2263 = vst [vmem:[%s4691_s5 + $0x108] sm:$0xff] %v2199_v39  ;;  %v1630_v13 = vmul.f32 %v1629_v16, %v4526_v26 }
 0x261   :  { %v1640_v29 = vsub.f32 1.5, %v1639_v55  ;;  %vm2071_vm9 = vcmp.ge.f32.partialorder %v2006_v30, 0.0  ;;  %v2136_v5 = vmul.f32 %v3469_v46, %v2006_v30 }
 0x262   :  { %v1632_v10 = vsel %vm1631_vm8, %v4526_v26, %v1630_v13  ;;  %v2870_v27 = vpop.eup %2869  ;;  %v1646_v26 = vand.u32 2147483648, %v4551_v35 }
 0x263   :  { %v1635_v40 = vsel %vm1633_vm10, %v1634_v33, %v1632_v10  ;;  %v1641_v7 = vmul.f32 %v2868_v6, %v1640_v29  ;;  %v1139_v37 = vpop.f32.mrf.mxu2  ;;  %v2200_v8 = vsel %vm2071_vm9, %v2006_v30, %v2136_v5  ;;  %v1649_v60 = vmul.f32 %v2870_v27, %v4578_v44 }
 0x264   :  { %v2007_v0 = vmul.f32 %v1635_v40, %v3862_v4  ;;  %v1140_v56 = vadd.f32 %v4354_v21, %v1139_v37  ;;  %2264 = vst [vmem:[%s4691_s5 + $0x110] sm:$0xff] %v2200_v8 }
 0x265   :  { %v1642_v43 = vmul.f32 %v1641_v7, %v4551_v35  ;;  %v1650_v45 = vmul.f32 %v2870_v27, %v1649_v60 }
 0x266   :  { %vm2072_vm12 = vcmp.ge.f32.partialorder %v2007_v0, 0.0  ;;  %v2137_v32 = vmul.f32 %v3469_v46, %v2007_v0  ;;  %2871 = vrsqrt.f32 %v1140_v56  ;;  %vm1667_vm2 = vcmp.eq.f32.partialorder %v1140_v56, inf }
 0x267   :  { %v1644_v4 = vsel %vm1643_vm11, %v4551_v35, %v1642_v43  ;;  %v1651_v34 = vmul.f32 0.5, %v1650_v45  ;;  %v1670_v16 = vand.u32 2147483648, %v1140_v56  ;;  %vm1669_vm3 = vcmp.eq.f32.partialorder %v1140_v56, 0.0 }
 0x268   :  { %v2201_v23 = vsel %vm2072_vm12, %v2007_v0, %v2137_v32  ;;  %v1647_v19 = vsel %vm1645_vm13, %v1646_v26, %v1644_v4 }
 0x269   :  { %2265 = vst [vmem:[%s4691_s5 + $0x118] sm:$0xff] %v2201_v23  ;;  %v2008_v38 = vmul.f32 %v1647_v19, %v3908_v24  ;;  %v1652_v54 = vsub.f32 1.5, %v1651_v34  ;;  %v1658_v24 = vand.u32 2147483648, %v4578_v44 }
 0x26b   :  { %vm2073_vm14 = vcmp.ge.f32.partialorder %v2008_v38, 0.0  ;;  %v2138_v28 = vmul.f32 %v3469_v46, %v2008_v38  ;;  %v1141_v11 = vpop.f32.mrf.mxu2  ;;  %v1653_v63 = vmul.f32 %v2870_v27, %v1652_v54 }
 0x26c   :  { %v2872_v58 = vpop.eup %2871  ;;  %v1142_v61 = vadd.f32 %v4354_v21, %v1141_v11 }
 0x26d   :  { %v2202_v12 = vsel %vm2073_vm14, %v2008_v38, %v2138_v28  ;;  %v1661_v35 = vmul.f32 %v2872_v58, %v1140_v56  ;;  %v1654_v15 = vmul.f32 %v1653_v63, %v4578_v44 }
 0x26e   :  { %2266 = vst [vmem:[%s4691_s5 + $0x120] sm:$0xff] %v2202_v12  ;;  %2873 = vrsqrt.f32 %v1142_v61  ;;  %vm1679_vm5 = vcmp.eq.f32.partialorder %v1142_v61, inf  ;;  %v1682_v37 = vand.u32 2147483648, %v1142_v61  ;;  %vm1681_vm6 = vcmp.eq.f32.partialorder %v1142_v61, 0.0 }
 0x26f   :  { %v1662_v42 = vmul.f32 %v2872_v58, %v1661_v35  ;;  %v1656_v6 = vsel %vm1655_vm15, %v4578_v44, %v1654_v15 }
 0x270   :  { %v1659_v41 = vsel %vm1657_vm0, %v1658_v24, %v1656_v6 }
 0x271   :  { %v1663_v36 = vmul.f32 0.5, %v1662_v42  ;;  %v2009_v57 = vmul.f32 %v1659_v41, %v3921_v2 }
 0x273   :  { %v1664_v3 = vsub.f32 1.5, %v1663_v36  ;;  %vm2074_vm1 = vcmp.ge.f32.partialorder %v2009_v57, 0.0  ;;  %v2139_v31 = vmul.f32 %v3469_v46, %v2009_v57 }
 0x274   :  { %v2874_v48 = vpop.eup %2873  ;;  %v1144_v25 = vpop.f32.mrf.mxu2 }
 0x275   :  { %v1665_v17 = vmul.f32 %v2872_v58, %v1664_v3  ;;  %v1673_v22 = vmul.f32 %v2874_v48, %v1142_v61  ;;  %v2203_v9 = vsel %vm2074_vm1, %v2009_v57, %v2139_v31  ;;  %v1145_v47 = vadd.f32 %v4354_v21, %v1144_v25  ;;  %v4694_v31 = vld [vmem:[#allocation3_spill] sm:$0xff] }
 0x276   :  { %2267 = vst [vmem:[%s4691_s5 + $0x128] sm:$0xff] %v2203_v9 }
 0x277   :  { %v1666_v44 = vmul.f32 %v1665_v17, %v1140_v56  ;;  %v1674_v20 = vmul.f32 %v2874_v48, %v1673_v22  ;;  %2875 = vrsqrt.f32 %v1145_v47  ;;  %vm1691_vm8 = vcmp.eq.f32.partialorder %v1145_v47, inf }
 0x278   :  { %vm1693_vm9 = vcmp.eq.f32.partialorder %v1145_v47, 0.0 }
 0x279   :  { %v1668_v2 = vsel %vm1667_vm2, %v1140_v56, %v1666_v44  ;;  %v1675_v39 = vmul.f32 0.5, %v1674_v20 }
 0x27a   :  { %v1671_v18 = vsel %vm1669_vm3, %v1670_v16, %v1668_v2 }
 0x27b   :  { %v2010_v55 = vmul.f32 %v1671_v18, %v3994_v59  ;;  %v1676_v30 = vsub.f32 1.5, %v1675_v39 }
 0x27c   :  { %v1146_v29 = vpop.f32.mrf.mxu2 }
 0x27d   :  { %vm2075_vm4 = vcmp.ge.f32.partialorder %v2010_v55, 0.0  ;;  %v2140_v13 = vmul.f32 %v3469_v46, %v2010_v55  ;;  %v1677_v33 = vmul.f32 %v2874_v48, %v1676_v30  ;;  %v2876_v5 = vpop.eup %2875  ;;  %v1147_v10 = vadd.f32 %v4354_v21, %v1146_v29 }
 0x27e   :  { %v1685_v7 = vmul.f32 %v2876_v5, %v1145_v47 }
 0x27f   :  { %v2204_v27 = vsel %vm2075_vm4, %v2010_v55, %v2140_v13  ;;  %v1678_v40 = vmul.f32 %v1677_v33, %v1142_v61  ;;  %2877 = vrsqrt.f32 %v1147_v10  ;;  %vm1703_vm11 = vcmp.eq.f32.partialorder %v1147_v10, inf }
 0x280   :  { %2268 = vst [vmem:[%s4691_s5 + $0x130] sm:$0xff] %v2204_v27  ;;  %v1686_v8 = vmul.f32 %v2876_v5, %v1685_v7  ;;  %v1706_v36 = vand.u32 2147483648, %v1147_v10  ;;  %vm1705_vm12 = vcmp.eq.f32.partialorder %v1147_v10, 0.0 }
 0x281   :  { %v1680_v59 = vsel %vm1679_vm5, %v1142_v61, %v1678_v40 }
 0x282   :  { %v1683_v0 = vsel %vm1681_vm6, %v1682_v37, %v1680_v59  ;;  %v1687_v56 = vmul.f32 0.5, %v1686_v8 }
 0x283   :  { %v2011_v60 = vmul.f32 %v1683_v0, %v3985_v53  ;;  %v1694_v53 = vand.u32 2147483648, %v1145_v47 }
 0x284   :  { %v1688_v26 = vsub.f32 1.5, %v1687_v56 }
 0x285   :  { %vm2076_vm7 = vcmp.ge.f32.partialorder %v2011_v60, 0.0  ;;  %v2141_v43 = vmul.f32 %v3469_v46, %v2011_v60  ;;  %v2878_v32 = vpop.eup %2877 }
 0x286   :  { %v1689_v4 = vmul.f32 %v2876_v5, %v1688_v26  ;;  %v1697_v23 = vmul.f32 %v2878_v32, %v1147_v10 }
 0x287   :  { %v2205_v45 = vsel %vm2076_vm7, %v2011_v60, %v2141_v43 }
 0x288   :  { %2269 = vst [vmem:[%s4691_s5 + $0x138] sm:$0xff] %v2205_v45  ;;  %v1149_v19 = vpop.f32.mrf.mxu2  ;;  %v1690_v34 = vmul.f32 %v1689_v4, %v1145_v47  ;;  %v1698_v38 = vmul.f32 %v2878_v32, %v1697_v23 }
 0x289   :  { %v1150_v54 = vadd.f32 %v4354_v21, %v1149_v19 }
 0x28a   :  { %v1692_v28 = vsel %vm1691_vm8, %v1145_v47, %v1690_v34  ;;  %v1699_v11 = vmul.f32 0.5, %v1698_v38 }
 0x28b   :  { %2879 = vrsqrt.f32 %v1150_v54  ;;  %v1695_v58 = vsel %vm1693_vm9, %v1694_v53, %v1692_v28  ;;  %vm1715_vm14 = vcmp.eq.f32.partialorder %v1150_v54, inf  ;;  %v1718_v55 = vand.u32 2147483648, %v1150_v54 }
 0x28c   :  { %v2012_v63 = vmul.f32 %v1695_v58, %v4068_v62  ;;  %v1700_v61 = vsub.f32 1.5, %v1699_v11  ;;  %vm1717_vm15 = vcmp.eq.f32.partialorder %v1150_v54, 0.0 }
 0x28e   :  { %vm2077_vm10 = vcmp.ge.f32.partialorder %v2012_v63, 0.0  ;;  %v2142_v12 = vmul.f32 %v3469_v46, %v2012_v63  ;;  %v1701_v35 = vmul.f32 %v2878_v32, %v1700_v61 }
 0x290   :  { %v1151_v15 = vpop.f32.mrf.mxu2  ;;  %v2206_v42 = vsel %vm2077_vm10, %v2012_v63, %v2142_v12  ;;  %v1702_v6 = vmul.f32 %v1701_v35, %v1147_v10 }
 0x291   :  { %v2880_v24 = vpop.eup %2879  ;;  %v1152_v41 = vadd.f32 %v4354_v21, %v1151_v15  ;;  %2270 = vst [vmem:[%s4691_s5 + $0x140] sm:$0xff] %v2206_v42 }
 0x292   :  { %v1709_v57 = vmul.f32 %v2880_v24, %v1150_v54  ;;  %v1704_v3 = vsel %vm1703_vm11, %v1147_v10, %v1702_v6 }
 0x293   :  { %2881 = vrsqrt.f32 %v1152_v41  ;;  %v1707_v62 = vsel %vm1705_vm12, %v1706_v36, %v1704_v3  ;;  %vm1727_vm1 = vcmp.eq.f32.partialorder %v1152_v41, inf  ;;  %v1730_v0 = vand.u32 2147483648, %v1152_v41 }
 0x294   :  { %v1710_v48 = vmul.f32 %v2880_v24, %v1709_v57  ;;  %v2013_v17 = vmul.f32 %v1707_v62, %v4694_v31  ;;  %vm1729_vm2 = vcmp.eq.f32.partialorder %v1152_v41, 0.0 }
 0x296   :  { %v1711_v22 = vmul.f32 0.5, %v1710_v48  ;;  %vm2078_vm13 = vcmp.ge.f32.partialorder %v2013_v17, 0.0  ;;  %v2143_v25 = vmul.f32 %v3469_v46, %v2013_v17 }
 0x298   :  { %v1712_v9 = vsub.f32 1.5, %v1711_v22  ;;  %v2207_v44 = vsel %vm2078_vm13, %v2013_v17, %v2143_v25 }
 0x299   :  { %v2882_v47 = vpop.eup %2881  ;;  %2271 = vst [vmem:[%s4691_s5 + $0x148] sm:$0xff] %v2207_v44 }
 0x29a   :  { %v1713_v20 = vmul.f32 %v2880_v24, %v1712_v9  ;;  %v1721_v16 = vmul.f32 %v2882_v47, %v1152_v41 }
 0x29c   :  { %v1714_v2 = vmul.f32 %v1713_v20, %v1150_v54  ;;  %v1722_v39 = vmul.f32 %v2882_v47, %v1721_v16  ;;  %v1154_v18 = vpop.f32.mrf.mxu2 }
 0x29d   :  { %v1155_v30 = vadd.f32 %v4354_v21, %v1154_v18 }
 0x29e   :  { %v1716_v13 = vsel %vm1715_vm14, %v1150_v54, %v1714_v2  ;;  %v1723_v33 = vmul.f32 0.5, %v1722_v39 }
 0x29f   :  { %v1719_v29 = vsel %vm1717_vm15, %v1718_v55, %v1716_v13  ;;  %2883 = vrsqrt.f32 %v1155_v30  ;;  %vm1739_vm4 = vcmp.eq.f32.partialorder %v1155_v30, inf  ;;  %v1742_v58 = vand.u32 2147483648, %v1155_v30 }
 0x2a0   :  { %v2014_v5 = vmul.f32 %v1719_v29, %v4159_v50  ;;  %v1724_v10 = vsub.f32 1.5, %v1723_v33  ;;  %vm1741_vm5 = vcmp.eq.f32.partialorder %v1155_v30, 0.0 }
 0x2a2   :  { %vm2079_vm0 = vcmp.ge.f32.partialorder %v2014_v5, 0.0  ;;  %v2144_v27 = vmul.f32 %v3469_v46, %v2014_v5  ;;  %v1725_v40 = vmul.f32 %v2882_v47, %v1724_v10 }
 0x2a4   :  { %v2208_v7 = vsel %vm2079_vm0, %v2014_v5, %v2144_v27  ;;  %v1726_v37 = vmul.f32 %v1725_v40, %v1152_v41  ;;  %v1156_v59 = vpop.f32.mrf.mxu2 }
 0x2a5   :  { %v2884_v8 = vpop.eup %2883  ;;  %2272 = vst [vmem:[%s4691_s5 + $0x150] sm:$0xff] %v2208_v7  ;;  %v1157_v60 = vadd.f32 %v4354_v21, %v1156_v59 }
 0x2a6   :  { %v1728_v56 = vsel %vm1727_vm1, %v1152_v41, %v1726_v37  ;;  %v1733_v50 = vmul.f32 %v2884_v8, %v1155_v30 }
 0x2a7   :  { %v1731_v43 = vsel %vm1729_vm2, %v1730_v0, %v1728_v56  ;;  %2885 = vrsqrt.f32 %v1157_v60  ;;  %vm1751_vm7 = vcmp.eq.f32.partialorder %v1157_v60, inf  ;;  %vm1753_vm8 = vcmp.eq.f32.partialorder %v1157_v60, 0.0 }
 0x2a8   :  { %v2015_v26 = vmul.f32 %v1731_v43, %v4163_v14  ;;  %v1734_v32 = vmul.f32 %v2884_v8, %v1733_v50 }
 0x2aa   :  { %vm2080_vm3 = vcmp.ge.f32.partialorder %v2015_v26, 0.0  ;;  %v2145_v45 = vmul.f32 %v3469_v46, %v2015_v26  ;;  %v1735_v4 = vmul.f32 0.5, %v1734_v32 }
 0x2ac   :  { %v2209_v23 = vsel %vm2080_vm3, %v2015_v26, %v2145_v45  ;;  %v1736_v19 = vsub.f32 1.5, %v1735_v4  ;;  %v1159_v34 = vpop.f32.mrf.mxu2 }
 0x2ad   :  { %v2886_v38 = vpop.eup %2885  ;;  %2273 = vst [vmem:[%s4691_s5 + $0x158] sm:$0xff] %v2209_v23  ;;  %v1160_v54 = vadd.f32 %v4354_v21, %v1159_v34 }
 0x2ae   :  { %v1737_v53 = vmul.f32 %v2884_v8, %v1736_v19  ;;  %v1745_v28 = vmul.f32 %v2886_v38, %v1157_v60 }
 0x2af   :  { %2887 = vrsqrt.f32 %v1160_v54  ;;  %vm1763_vm10 = vcmp.eq.f32.partialorder %v1160_v54, inf  ;;  %v1766_v18 = vand.u32 2147483648, %v1160_v54  ;;  %vm1765_vm11 = vcmp.eq.f32.partialorder %v1160_v54, 0.0 }
 0x2b0   :  { %v1738_v11 = vmul.f32 %v1737_v53, %v1155_v30  ;;  %v1746_v14 = vmul.f32 %v2886_v38, %v1745_v28 }
 0x2b2   :  { %v1740_v63 = vsel %vm1739_vm4, %v1155_v30, %v1738_v11  ;;  %v1747_v61 = vmul.f32 0.5, %v1746_v14 }
 0x2b3   :  { %v1743_v12 = vsel %vm1741_vm5, %v1742_v58, %v1740_v63 }
 0x2b4   :  { %v2016_v35 = vmul.f32 %v1743_v12, %v4258_v52  ;;  %v1748_v15 = vsub.f32 1.5, %v1747_v61  ;;  %v1161_v24 = vpop.f32.mrf.mxu2  ;;  %v1754_v52 = vand.u32 2147483648, %v1157_v60 }
 0x2b5   :  { %v2888_v42 = vpop.eup %2887  ;;  %v1162_v6 = vadd.f32 %v4354_v21, %v1161_v24 }
 0x2b6   :  { %vm2081_vm6 = vcmp.ge.f32.partialorder %v2016_v35, 0.0  ;;  %v2146_v41 = vmul.f32 %v3469_v46, %v2016_v35  ;;  %v1749_v36 = vmul.f32 %v2886_v38, %v1748_v15  ;;  %v1757_v57 = vmul.f32 %v2888_v42, %v1160_v54 }
 0x2b7   :  { %2889 = vrsqrt.f32 %v1162_v6  ;;  %vm1775_vm13 = vcmp.eq.f32.partialorder %v1162_v6, inf  ;;  %v1778_v40 = vand.u32 2147483648, %v1162_v6  ;;  %vm1777_vm14 = vcmp.eq.f32.partialorder %v1162_v6, 0.0 }
 0x2b8   :  { %v2210_v3 = vsel %vm2081_vm6, %v2016_v35, %v2146_v41  ;;  %v1750_v62 = vmul.f32 %v1749_v36, %v1157_v60  ;;  %v1758_v48 = vmul.f32 %v2888_v42, %v1757_v57 }
 0x2b9   :  { %2274 = vst [vmem:[%s4691_s5 + $0x160] sm:$0xff] %v2210_v3 }
 0x2ba   :  { %v1752_v31 = vsel %vm1751_vm7, %v1157_v60, %v1750_v62  ;;  %v1759_v17 = vmul.f32 0.5, %v1758_v48 }
 0x2bb   :  { %v1755_v22 = vsel %vm1753_vm8, %v1754_v52, %v1752_v31 }
 0x2bc   :  { %v2017_v21 = vmul.f32 %v1755_v22, %v4260_v1  ;;  %v1760_v25 = vsub.f32 1.5, %v1759_v17 }
 0x2bd   :  { %v2890_v9 = vpop.eup %2889 }
 0x2be   :  { %vm2082_vm9 = vcmp.ge.f32.partialorder %v2017_v21, 0.0  ;;  %v2147_v47 = vmul.f32 %v3469_v46, %v2017_v21  ;;  %v1761_v44 = vmul.f32 %v2888_v42, %v1760_v25  ;;  %v1769_v20 = vmul.f32 %v2890_v9, %v1162_v6 }
 0x2c0   :  { %v2211_v16 = vsel %vm2082_vm9, %v2017_v21, %v2147_v47  ;;  %v1762_v2 = vmul.f32 %v1761_v44, %v1160_v54  ;;  %v1770_v39 = vmul.f32 %v2890_v9, %v1769_v20 }
 0x2c1   :  { %2275 = vst [vmem:[%s4691_s5 + $0x168] sm:$0xff] %v2211_v16 }
 0x2c2   :  { %v1764_v55 = vsel %vm1763_vm10, %v1160_v54, %v1762_v2  ;;  %v1771_v30 = vmul.f32 0.5, %v1770_v39 }
 0x2c3   :  { %v1767_v1 = vsel %vm1765_vm11, %v1766_v18, %v1764_v55 }
 0x2c4   :  { %v2018_v13 = vmul.f32 %v1767_v1, %v4338_v49  ;;  %v1772_v33 = vsub.f32 1.5, %v1771_v30 }
 0x2c6   :  { %vm2083_vm12 = vcmp.ge.f32.partialorder %v2018_v13, 0.0  ;;  %v2148_v29 = vmul.f32 %v3469_v46, %v2018_v13  ;;  %v1773_v5 = vmul.f32 %v2890_v9, %v1772_v33 }
 0x2c8   :  { %v2212_v10 = vsel %vm2083_vm12, %v2018_v13, %v2148_v29  ;;  %v1774_v27 = vmul.f32 %v1773_v5, %v1162_v6 }
 0x2c9   :  { %2276 = vst [vmem:[%s4691_s5 + $0x170] sm:$0xff] %v2212_v10 }
 0x2ca   :  { %v1776_v7 = vsel %vm1775_vm13, %v1162_v6, %v1774_v27 }
 0x2cb   :  { %v1779_v37 = vsel %vm1777_vm14, %v1778_v40, %v1776_v7 }
 0x2cc   :  { %v2019_v59 = vmul.f32 %v1779_v37, %v4319_v51 }
 0x2ce   :  { %vm2084_vm15 = vcmp.ge.f32.partialorder %v2019_v59, 0.0  ;;  %v2149_v49 = vmul.f32 %v3469_v46, %v2019_v59 }
 0x2d0   :  { %v2213_v8 = vsel %vm2084_vm15, %v2019_v59, %v2149_v49 }
 0x2d1   :  { %2277 = vst [vmem:[%s4691_s5 + $0x178] sm:$0xff] %v2213_v8 }

// kernel: forward.15
= control target key start
LH: loop header
LB: loop body
LE: loop exit
PB: predicated region body
PF: predicated region fallthrough
CT: control target
= control target key end

     0   :  { %s4304_s1 = inlined_call_operand.vmem [shape: bf16[128,128], index: 1, kind: input, shape index: {}]   ;;  %s4305_s4 = inlined_call_operand.<no memory space> [shape: f32[1], index: 4, kind: input, shape index: {}]   ;;  %s4306_s0 = inlined_call_operand.vmem [shape: bf16[512,128], index: 0, kind: input, shape index: {}]   ;;  %s4307_s2 = inlined_call_operand.vmem [shape: bf16[128,128], index: 2, kind: input, shape index: {}]   ;;  %s4308_s3 = inlined_call_operand.vmem [shape: f32[1,128], index: 3, kind: input, shape index: {}]   ;;  %s4309_s5 = inlined_call_operand.vmem [shape: f32[512,128], index: 5, kind: output, shape index: {}]  }
   0x1   :  { %v2294_v0 = vld [vmem:[%s4304_s1 + $0x38] sm:$0xff]  ;;  %v2293_v1 = vld [vmem:[%s4304_s1 + $0x30] sm:$0xff]  ;;  %v2292_v2 = vld [vmem:[%s4304_s1 + $0x28] sm:$0xff] }
   0x2   :  { %341 = vmatpush.bf16.msra.mxu0 %v2294_v0  ;;  %2303 = vmatpush.bf16.msra.mxu2 %v2294_v0  ;;  %v2291_v3 = vld [vmem:[%s4304_s1 + $0x20] sm:$0xff]  ;;  %v2290_v4 = vld [vmem:[%s4304_s1 + $0x18] sm:$0xff]  ;;  %v2289_v5 = vld [vmem:[%s4304_s1 + $0x10] sm:$0xff] }
   0x3   :  { %v2288_v6 = vld [vmem:[%s4304_s1 + $0x8] sm:$0xff]  ;;  %v2287_v7 = vld [vmem:[%s4304_s1] sm:$0xff]  ;;  %v2257_v12 = vld [vmem:[%s4306_s0 + $0x10] sm:$0xff] }
   0x4   :  { %v2255_v8 = vld [vmem:[%s4306_s0] sm:$0xff]  ;;  %v2256_v10 = vld [vmem:[%s4306_s0 + $0x8] sm:$0xff]  ;;  %v2273_v13 = vld [vmem:[%s4306_s0 + $0x90] sm:$0xff] }
   0x5   :  { %v2271_v9 = vld [vmem:[%s4306_s0 + $0x80] sm:$0xff]  ;;  %v2272_v11 = vld [vmem:[%s4306_s0 + $0x88] sm:$0xff]  ;;  %v2258_v14 = vld [vmem:[%s4306_s0 + $0x18] sm:$0xff] }
   0x6   :  { %342 = vmatpush.bf16.msra.mxu0 %v2293_v1  ;;  %2304 = vmatpush.bf16.msra.mxu2 %v2293_v1  ;;  %v2274_v15 = vld [vmem:[%s4306_s0 + $0x98] sm:$0xff]  ;;  %v2259_v16 = vld [vmem:[%s4306_s0 + $0x20] sm:$0xff]  ;;  %v2301_v19 = vld [vmem:[%s4307_s2 + $0x30] sm:$0xff] }
   0x7   :  { %v2275_v17 = vld [vmem:[%s4306_s0 + $0xa0] sm:$0xff]  ;;  %v2302_v18 = vld [vmem:[%s4307_s2 + $0x38] sm:$0xff]  ;;  %v2260_v20 = vld [vmem:[%s4306_s0 + $0x28] sm:$0xff] }
   0x8   :  { %674 = vmatpush.bf16.msra.mxu1 %v2302_v18  ;;  %2311 = vmatpush.bf16.msra.mxu3 %v2302_v18  ;;  %v2276_v21 = vld [vmem:[%s4306_s0 + $0xa8] sm:$0xff]  ;;  %v2299_v23 = vld [vmem:[%s4307_s2 + $0x20] sm:$0xff]  ;;  %v2298_v24 = vld [vmem:[%s4307_s2 + $0x18] sm:$0xff] }
   0x9   :  { %v2300_v22 = vld [vmem:[%s4307_s2 + $0x28] sm:$0xff]  ;;  %v2261_v25 = vld [vmem:[%s4306_s0 + $0x30] sm:$0xff]  ;;  %v2295_v29 = vld [vmem:[%s4307_s2] sm:$0xff] }
   0xa   :  { %343 = vmatpush.bf16.msra.mxu0 %v2292_v2  ;;  %2305 = vmatpush.bf16.msra.mxu2 %v2292_v2  ;;  %v2277_v26 = vld [vmem:[%s4306_s0 + $0xb0] sm:$0xff]  ;;  %v2296_v28 = vld [vmem:[%s4307_s2 + $0x8] sm:$0xff]  ;;  %v2262_v30 = vld [vmem:[%s4306_s0 + $0x38] sm:$0xff] }
   0xb   :  { %v2297_v27 = vld [vmem:[%s4307_s2 + $0x10] sm:$0xff]  ;;  %v2278_v31 = vld [vmem:[%s4306_s0 + $0xb8] sm:$0xff]  ;;  %v2263_v32 = vld [vmem:[%s4306_s0 + $0x40] sm:$0xff] }
   0xc   :  { %675 = vmatpush.bf16.msra.mxu1 %v2301_v19  ;;  %2312 = vmatpush.bf16.msra.mxu3 %v2301_v19  ;;  %v2279_v33 = vld [vmem:[%s4306_s0 + $0xc0] sm:$0xff]  ;;  %v2264_v42 = vld [vmem:[%s4306_s0 + $0x48] sm:$0xff]  ;;  %v2265_v54 = vld [vmem:[%s4306_s0 + $0x50] sm:$0xff] }
   0xd   :  { %v2280_v43 = vld [vmem:[%s4306_s0 + $0xc8] sm:$0xff]  ;;  %v2281_v55 = vld [vmem:[%s4306_s0 + $0xd0] sm:$0xff]  ;;  %v2266_v2 = vld [vmem:[%s4306_s0 + $0x58] sm:$0xff] }
   0xe   :  { %344 = vmatpush.bf16.msra.mxu0 %v2291_v3  ;;  %2306 = vmatpush.bf16.msra.mxu2 %v2291_v3  ;;  %v2282_v3 = vld [vmem:[%s4306_s0 + $0xd8] sm:$0xff] }
  0x10   :  { %676 = vmatpush.bf16.msra.mxu1 %v2300_v22  ;;  %2313 = vmatpush.bf16.msra.mxu3 %v2300_v22 }
  0x12   :  { %345 = vmatpush.bf16.msra.mxu0 %v2290_v4  ;;  %2307 = vmatpush.bf16.msra.mxu2 %v2290_v4 }
  0x14   :  { %677 = vmatpush.bf16.msra.mxu1 %v2299_v23  ;;  %2314 = vmatpush.bf16.msra.mxu3 %v2299_v23 }
  0x16   :  { %346 = vmatpush.bf16.msra.mxu0 %v2289_v5  ;;  %2308 = vmatpush.bf16.msra.mxu2 %v2289_v5 }
  0x18   :  { %678 = vmatpush.bf16.msra.mxu1 %v2298_v24  ;;  %2315 = vmatpush.bf16.msra.mxu3 %v2298_v24 }
  0x1a   :  { %347 = vmatpush.bf16.msra.mxu0 %v2288_v6  ;;  %2309 = vmatpush.bf16.msra.mxu2 %v2288_v6 }
  0x1c   :  { %679 = vmatpush.bf16.msra.mxu1 %v2297_v27  ;;  %2316 = vmatpush.bf16.msra.mxu3 %v2297_v27  ;;  %v2268_v27 = vld [vmem:[%s4306_s0 + $0x68] sm:$0xff] }
  0x1e   :  { %348 = vmatpush.bf16.msra.mxu0 %v2287_v7  ;;  %2310 = vmatpush.bf16.msra.mxu2 %v2287_v7 }
  0x20   :  { %680 = vmatpush.bf16.msra.mxu1 %v2296_v28  ;;  %2317 = vmatpush.bf16.msra.mxu3 %v2296_v28  ;;  %v2284_v28 = vld [vmem:[%s4306_s0 + $0xe8] sm:$0xff] }
  0x21   :  { %349 = vmatmul.bf16.vlgmr.msra.gmra.mxu0 %v2255_v8  ;;  %429 = vmatmul.bf16.vlgmr.msra.gmra.mxu2 %v2271_v9 }
  0x24   :  { %681 = vmatpush.bf16.msra.mxu1 %v2295_v29  ;;  %2318 = vmatpush.bf16.msra.mxu3 %v2295_v29 }
  0x31   :  { %354 = vmatmul.bf16.gmra.mxu0 %v2256_v10  ;;  %434 = vmatmul.bf16.gmra.mxu2 %v2272_v11 }
  0x41   :  { %359 = vmatmul.bf16.gmra.mxu0 %v2257_v12  ;;  %439 = vmatmul.bf16.gmra.mxu2 %v2273_v13 }
  0x51   :  { %364 = vmatmul.bf16.gmra.mxu0 %v2258_v14  ;;  %444 = vmatmul.bf16.gmra.mxu2 %v2274_v15  ;;  %v2267_v14 = vld [vmem:[%s4306_s0 + $0x60] sm:$0xff] }
  0x52   :  { %v2283_v15 = vld [vmem:[%s4306_s0 + $0xe0] sm:$0xff] }
  0x61   :  { %369 = vmatmul.bf16.gmra.mxu0 %v2259_v16  ;;  %449 = vmatmul.bf16.gmra.mxu2 %v2275_v17 }
  0x71   :  { %374 = vmatmul.bf16.gmra.mxu0 %v2260_v20  ;;  %454 = vmatmul.bf16.gmra.mxu2 %v2276_v21 }
  0x81   :  { %379 = vmatmul.bf16.gmra.mxu0 %v2261_v25  ;;  %459 = vmatmul.bf16.gmra.mxu2 %v2277_v26 }
  0x91   :  { %384 = vmatmul.bf16.gmra.mxu0 %v2262_v30  ;;  %464 = vmatmul.bf16.gmra.mxu2 %v2278_v31 }
  0x9e   :  { %v2838_v34 = vpop.f32.mrf.mxu0 }
  0x9f   :  { %v510_v36 = vmul.f32 %v2838_v34, %v2838_v34 }
  0xa1   :  { %389 = vmatmul.bf16.gmra.mxu0 %v2263_v32  ;;  %469 = vmatmul.bf16.gmra.mxu2 %v2279_v33 }
  0xa4   :  { %v2840_v35 = vpop.f32.mrf.mxu2 }
  0xa5   :  { %v542_v41 = vmul.f32 %v2840_v35, %v2840_v35 }
  0xa6   :  { %v2844_v37 = vpop.f32.mrf.mxu0 }
  0xa7   :  { %v511_v38 = vmul.f32 %v2844_v37, %v2844_v37 }
  0xa9   :  { %v574_v39 = vpack.c.bf16 %v511_v38, %v510_v36 }
  0xab   :  { %682 = vmatmul.bf16.vlgmr.msra.gmra.mxu1 %v574_v39 }
  0xac   :  { %v2848_v40 = vpop.f32.mrf.mxu2 }
  0xad   :  { %v543_v44 = vmul.f32 %v2848_v40, %v2848_v40 }
  0xae   :  { %v2860_v45 = vpop.f32.mrf.mxu0 }
  0xaf   :  { %v590_v46 = vpack.c.bf16 %v543_v44, %v542_v41  ;;  %v512_v48 = vmul.f32 %v2860_v45, %v2860_v45  ;;  %v2285_v44 = vld [vmem:[%s4306_s0 + $0xf0] sm:$0xff] }
  0xb1   :  { %394 = vmatmul.bf16.gmra.mxu0 %v2264_v42  ;;  %474 = vmatmul.bf16.gmra.mxu2 %v2280_v43  ;;  %v2269_v43 = vld [vmem:[%s4306_s0 + $0x70] sm:$0xff] }
  0xb2   :  { %762 = vmatmul.bf16.vlgmr.msra.gmra.mxu3 %v590_v46 }
  0xb4   :  { %v2862_v47 = vpop.f32.mrf.mxu2 }
  0xb5   :  { %v544_v53 = vmul.f32 %v2862_v47, %v2862_v47 }
  0xb6   :  { %v2866_v49 = vpop.f32.mrf.mxu0 }
  0xb7   :  { %v513_v50 = vmul.f32 %v2866_v49, %v2866_v49 }
  0xb9   :  { %v575_v51 = vpack.c.bf16 %v513_v50, %v512_v48 }
  0xbb   :  { %687 = vmatmul.bf16.gmra.mxu1 %v575_v51 }
  0xbc   :  { %v2870_v52 = vpop.f32.mrf.mxu2 }
  0xbd   :  { %v545_v56 = vmul.f32 %v2870_v52, %v2870_v52 }
  0xbe   :  { %v2882_v57 = vpop.f32.mrf.mxu0 }
  0xbf   :  { %v591_v58 = vpack.c.bf16 %v545_v56, %v544_v53  ;;  %v514_v60 = vmul.f32 %v2882_v57, %v2882_v57 }
  0xc1   :  { %399 = vmatmul.bf16.gmra.mxu0 %v2265_v54  ;;  %479 = vmatmul.bf16.gmra.mxu2 %v2281_v55 }
  0xc2   :  { %767 = vmatmul.bf16.gmra.mxu3 %v591_v58 }
  0xc4   :  { %v2884_v59 = vpop.f32.mrf.mxu2 }
  0xc5   :  { %v546_v1 = vmul.f32 %v2884_v59, %v2884_v59 }
  0xc6   :  { %v2888_v61 = vpop.f32.mrf.mxu0 }
  0xc7   :  { %v515_v62 = vmul.f32 %v2888_v61, %v2888_v61 }
  0xc9   :  { %v576_v63 = vpack.c.bf16 %v515_v62, %v514_v60  ;;  %v2270_v62 = vld [vmem:[%s4306_s0 + $0x78] sm:$0xff] }
  0xcb   :  { %692 = vmatmul.bf16.gmra.mxu1 %v576_v63  ;;  %v2286_v63 = vld [vmem:[%s4306_s0 + $0xf8] sm:$0xff] }
  0xcc   :  { %v2892_v0 = vpop.f32.mrf.mxu2 }
  0xcd   :  { %v547_v4 = vmul.f32 %v2892_v0, %v2892_v0 }
  0xce   :  { %v2904_v5 = vpop.f32.mrf.mxu0 }
  0xcf   :  { %v592_v6 = vpack.c.bf16 %v547_v4, %v546_v1  ;;  %v516_v8 = vmul.f32 %v2904_v5, %v2904_v5 }
  0xd1   :  { %404 = vmatmul.bf16.gmra.mxu0 %v2266_v2  ;;  %484 = vmatmul.bf16.gmra.mxu2 %v2282_v3 }
  0xd2   :  { %772 = vmatmul.bf16.gmra.mxu3 %v592_v6 }
  0xd4   :  { %v2906_v7 = vpop.f32.mrf.mxu2 }
  0xd5   :  { %v548_v13 = vmul.f32 %v2906_v7, %v2906_v7 }
  0xd6   :  { %v2910_v9 = vpop.f32.mrf.mxu0 }
  0xd7   :  { %v517_v10 = vmul.f32 %v2910_v9, %v2910_v9 }
  0xd9   :  { %v577_v11 = vpack.c.bf16 %v517_v10, %v516_v8 }
  0xdb   :  { %697 = vmatmul.bf16.gmra.mxu1 %v577_v11 }
  0xdc   :  { %v2914_v12 = vpop.f32.mrf.mxu2 }
  0xdd   :  { %v549_v16 = vmul.f32 %v2914_v12, %v2914_v12 }
  0xde   :  { %v2926_v17 = vpop.f32.mrf.mxu0 }
  0xdf   :  { %v593_v18 = vpack.c.bf16 %v549_v16, %v548_v13  ;;  %v518_v20 = vmul.f32 %v2926_v17, %v2926_v17 }
  0xe1   :  { %409 = vmatmul.bf16.gmra.mxu0 %v2267_v14  ;;  %489 = vmatmul.bf16.gmra.mxu2 %v2283_v15 }
  0xe2   :  { %777 = vmatmul.bf16.gmra.mxu3 %v593_v18 }
  0xe4   :  { %v2928_v19 = vpop.f32.mrf.mxu2 }
  0xe5   :  { %v550_v25 = vmul.f32 %v2928_v19, %v2928_v19 }
  0xe6   :  { %v2932_v21 = vpop.f32.mrf.mxu0 }
  0xe7   :  { %v519_v22 = vmul.f32 %v2932_v21, %v2932_v21 }
  0xe9   :  { %v578_v23 = vpack.c.bf16 %v519_v22, %v518_v20  ;;  %v3017_v22 = vld [vmem:[%s4308_s3] ss:$0 sm:$0xff] }
  0xeb   :  { %702 = vmatmul.bf16.gmra.mxu1 %v578_v23 }
  0xec   :  { %v2936_v24 = vpop.f32.mrf.mxu2 }
  0xed   :  { %v551_v26 = vmul.f32 %v2936_v24, %v2936_v24 }
  0xee   :  { %v2948_v29 = vpop.f32.mrf.mxu0 }
  0xef   :  { %v594_v30 = vpack.c.bf16 %v551_v26, %v550_v25  ;;  %v520_v32 = vmul.f32 %v2948_v29, %v2948_v29 }
  0xf1   :  { %414 = vmatmul.bf16.gmra.mxu0 %v2268_v27  ;;  %494 = vmatmul.bf16.gmra.mxu2 %v2284_v28 }
  0xf2   :  { %782 = vmatmul.bf16.gmra.mxu3 %v594_v30 }
  0xf4   :  { %v2950_v31 = vpop.f32.mrf.mxu2 }
  0xf5   :  { %v552_v41 = vmul.f32 %v2950_v31, %v2950_v31 }
  0xf6   :  { %v2954_v33 = vpop.f32.mrf.mxu0 }
  0xf7   :  { %v521_v36 = vmul.f32 %v2954_v33, %v2954_v33 }
  0xf9   :  { %v579_v38 = vpack.c.bf16 %v521_v36, %v520_v32 }
  0xfb   :  { %707 = vmatmul.bf16.gmra.mxu1 %v579_v38 }
  0xfc   :  { %v2958_v39 = vpop.f32.mrf.mxu2 }
  0xfd   :  { %v553_v42 = vmul.f32 %v2958_v39, %v2958_v39 }
  0xfe   :  { %v2970_v46 = vpop.f32.mrf.mxu0 }
  0xff   :  { %v595_v48 = vpack.c.bf16 %v553_v42, %v552_v41  ;;  %v522_v51 = vmul.f32 %v2970_v46, %v2970_v46 }
 0x101   :  { %419 = vmatmul.bf16.gmra.mxu0 %v2269_v43  ;;  %499 = vmatmul.bf16.gmra.mxu2 %v2285_v44 }
 0x102   :  { %787 = vmatmul.bf16.gmra.mxu3 %v595_v48 }
 0x104   :  { %v2972_v50 = vpop.f32.mrf.mxu2 }
 0x105   :  { %v554_v58 = vmul.f32 %v2972_v50, %v2972_v50 }
 0x106   :  { %v2976_v53 = vpop.f32.mrf.mxu0 }
 0x107   :  { %v523_v54 = vmul.f32 %v2976_v53, %v2976_v53 }
 0x109   :  { %v580_v55 = vpack.c.bf16 %v523_v54, %v522_v51 }
 0x10b   :  { %712 = vmatmul.bf16.gmra.mxu1 %v580_v55 }
 0x10c   :  { %v2980_v56 = vpop.f32.mrf.mxu2 }
 0x10d   :  { %v555_v60 = vmul.f32 %v2980_v56, %v2980_v56 }
 0x10e   :  { %v2992_v1 = vpop.f32.mrf.mxu0 }
 0x10f   :  { %v596_v2 = vpack.c.bf16 %v555_v60, %v554_v58  ;;  %v524_v4 = vmul.f32 %v2992_v1, %v2992_v1 }
 0x111   :  { %424 = vmatmul.bf16.gmra.mxu0 %v2270_v62  ;;  %504 = vmatmul.bf16.gmra.mxu2 %v2286_v63 }
 0x112   :  { %792 = vmatmul.bf16.gmra.mxu3 %v596_v2 }
 0x114   :  { %v2994_v3 = vpop.f32.mrf.mxu2 }
 0x115   :  { %v556_v13 = vmul.f32 %v2994_v3, %v2994_v3 }
 0x116   :  { %v2998_v6 = vpop.f32.mrf.mxu0 }
 0x117   :  { %v525_v8 = vmul.f32 %v2998_v6, %v2998_v6 }
 0x119   :  { %v581_v10 = vpack.c.bf16 %v525_v8, %v524_v4 }
 0x11b   :  { %717 = vmatmul.bf16.gmra.mxu1 %v581_v10 }
 0x11c   :  { %v3002_v11 = vpop.f32.mrf.mxu2 }
 0x11d   :  { %v557_v14 = vmul.f32 %v3002_v11, %v3002_v11 }
 0x11e   :  { %v3008_v15 = vpop.f32.mrf.mxu0 }
 0x11f   :  { %v597_v16 = vpack.c.bf16 %v557_v14, %v556_v13  ;;  %v526_v20 = vmul.f32 %v3008_v15, %v3008_v15 }
 0x122   :  { %797 = vmatmul.bf16.gmra.mxu3 %v597_v16 }
 0x124   :  { %v3010_v18 = vpop.f32.mrf.mxu2 }
 0x125   :  { %v558_v32 = vmul.f32 %v3010_v18, %v3010_v18 }
 0x126   :  { %v3019_v23 = vpop.f32.mrf.mxu0 }
 0x127   :  { %v527_v25 = vmul.f32 %v3019_v23, %v3019_v23 }
 0x128   :  { %v683_v26 = vpop.f32.mrf.mxu1 }
 0x129   :  { %v684_v27 = vadd.f32 %v3017_v22, %v683_v26  ;;  %v582_v28 = vpack.c.bf16 %v527_v25, %v526_v20 }
 0x12b   :  { %2320 = vrsqrt.f32 %v684_v27  ;;  %722 = vmatmul.bf16.gmra.mxu1 %v582_v28  ;;  %vm850_vm0 = vcmp.eq.f32.partialorder %v684_v27, inf  ;;  %vm852_vm1 = vcmp.eq.f32.partialorder %v684_v27, 0.0 }
 0x12c   :  { %v3024_v30 = vpop.f32.mrf.mxu2 }
 0x12d   :  { %4318 = vst [vmem:[#allocation3_spill] sm:$0xff] %v3024_v30  ;;  %v559_v36 = vmul.f32 %v3024_v30, %v3024_v30 }
 0x12e   :  { %v3030_v38 = vpop.f32.mrf.mxu0 }
 0x12f   :  { %4319 = vst [vmem:[#allocation4_spill] sm:$0xff] %v3030_v38  ;;  %v598_v41 = vpack.c.bf16 %v559_v36, %v558_v32  ;;  %v528_v55 = vmul.f32 %v3030_v38, %v3030_v38  ;;  %v853_v32 = vand.u32 2147483648, %v684_v27 }
 0x130   :  { %v685_v42 = vpop.f32.mrf.mxu1 }
 0x131   :  { %v2321_v43 = vpop.eup %2320  ;;  %v3033_v44 = vadd.f32 %v3017_v22, %v685_v42 }
 0x132   :  { %v844_v48 = vmul.f32 %v2321_v43, %v684_v27  ;;  %802 = vmatmul.bf16.gmra.mxu3 %v598_v41 }
 0x133   :  { %2322 = vrsqrt.f32 %v3033_v44  ;;  %vm862_vm2 = vcmp.eq.f32.partialorder %v3033_v44, inf  ;;  %vm864_vm3 = vcmp.eq.f32.partialorder %v3033_v44, 0.0 }
 0x134   :  { %v845_v51 = vmul.f32 %v2321_v43, %v844_v48  ;;  %v3036_v54 = vpop.f32.mrf.mxu2 }
 0x135   :  { %4320 = vst [vmem:[#allocation5_spill] sm:$0xff] %v3036_v54  ;;  %v763_v58 = vpop.f32.mrf.mxu3  ;;  %v560_v36 = vmul.f32 %v3036_v54, %v3036_v54 }
 0x136   :  { %v846_v60 = vmul.f32 0.5, %v845_v51  ;;  %v3041_v62 = vadd.f32 %v3017_v22, %v763_v58  ;;  %v3043_v63 = vpop.f32.mrf.mxu0 }
 0x137   :  { %4321 = vst [vmem:[#allocation6_spill] sm:$0xff] %v3043_v63  ;;  %v529_v2 = vmul.f32 %v3043_v63, %v3043_v63 }
 0x138   :  { %v847_v4 = vsub.f32 1.5, %v846_v60  ;;  %2324 = vrsqrt.f32 %v3041_v62  ;;  %v688_v8 = vpop.f32.mrf.mxu1  ;;  %vm1234_vm4 = vcmp.eq.f32.partialorder %v3041_v62, inf  ;;  %vm1236_vm5 = vcmp.eq.f32.partialorder %v3041_v62, 0.0 }
 0x139   :  { %v2323_v10 = vpop.eup %2322  ;;  %v3049_v13 = vadd.f32 %v3017_v22, %v688_v8  ;;  %v583_v14 = vpack.c.bf16 %v529_v2, %v528_v55 }
 0x13a   :  { %v848_v16 = vmul.f32 %v2321_v43, %v847_v4  ;;  %v856_v20 = vmul.f32 %v2323_v10, %v3033_v44 }
 0x13b   :  { %2326 = vrsqrt.f32 %v3049_v13  ;;  %727 = vmatmul.bf16.gmra.mxu1 %v583_v14  ;;  %vm874_vm6 = vcmp.eq.f32.partialorder %v3049_v13, inf  ;;  %vm876_vm7 = vcmp.eq.f32.partialorder %v3049_v13, 0.0 }
 0x13c   :  { %v849_v25 = vmul.f32 %v848_v16, %v684_v27  ;;  %v857_v26 = vmul.f32 %v2323_v10, %v856_v20  ;;  %v3053_v28 = vpop.f32.mrf.mxu2 }
 0x13d   :  { %4322 = vst [vmem:[#allocation7_spill] sm:$0xff] %v3053_v28  ;;  %v561_v41 = vmul.f32 %v3053_v28, %v3053_v28  ;;  %v765_v42 = vpop.f32.mrf.mxu3 }
 0x13e   :  { %v2325_v48 = vpop.eup %2324  ;;  %v851_v43 = vsel %vm850_vm0, %v684_v27, %v849_v25  ;;  %v858_v51 = vmul.f32 0.5, %v857_v26  ;;  %v3060_v55 = vadd.f32 %v3017_v22, %v765_v42  ;;  %v3062_v58 = vpop.f32.mrf.mxu0 }
 0x13f   :  { %4323 = vst [vmem:[#allocation8_spill] sm:$0xff] %v3062_v58  ;;  %v854_v60 = vsel %vm852_vm1, %v853_v32, %v851_v43  ;;  %v1228_v2 = vmul.f32 %v2325_v48, %v3041_v62  ;;  %v599_v4 = vpack.c.bf16 %v561_v41, %v560_v36 }
 0x140   :  { %v1611_v8 = vmul.f32 %v854_v60, %v2838_v34  ;;  %v859_v14 = vsub.f32 1.5, %v858_v51  ;;  %2328 = vrsqrt.f32 %v3060_v55  ;;  %v690_v16 = vpop.f32.mrf.mxu1  ;;  %v865_v34 = vand.u32 2147483648, %v3033_v44 }
 0x141   :  { %v2327_v20 = vpop.eup %2326  ;;  %v1229_v28 = vmul.f32 %v2325_v48, %v1228_v2  ;;  %v3068_v27 = vadd.f32 %v3017_v22, %v690_v16  ;;  %v1237_v60 = vand.u32 2147483648, %v3041_v62  ;;  %v530_v2 = vmul.f32 %v3062_v58, %v3062_v58 }
 0x142   :  { %v1675_v25 = vsub.f32 0.0, %v1611_v8  ;;  %v860_v26 = vmul.f32 %v2323_v10, %v859_v14  ;;  %v868_v32 = vmul.f32 %v2327_v20, %v3049_v13  ;;  %807 = vmatmul.bf16.gmra.mxu3 %v599_v4  ;;  %vm1246_vm8 = vcmp.eq.f32.partialorder %v3060_v55, inf }
 0x143   :  { %v1230_v36 = vmul.f32 0.5, %v1229_v28  ;;  %2330 = vrsqrt.f32 %v3068_v27  ;;  %vm1248_vm9 = vcmp.eq.f32.partialorder %v3060_v55, 0.0  ;;  %vm886_vm10 = vcmp.eq.f32.partialorder %v3068_v27, inf }
 0x144   :  { %v1739_v41 = vmul.f32 1.442695, %v1675_v25  ;;  %v861_v42 = vmul.f32 %v860_v26, %v3033_v44  ;;  %v869_v43 = vmul.f32 %v2327_v20, %v868_v32  ;;  %v3077_v51 = vpop.f32.mrf.mxu2  ;;  %vm888_vm11 = vcmp.eq.f32.partialorder %v3068_v27, 0.0 }
 0x145   :  { %v1231_v10 = vsub.f32 1.5, %v1230_v36  ;;  %v768_v4 = vpop.f32.mrf.mxu3 }
 0x146   :  { %v2329_v28 = vpop.eup %2328  ;;  %2332 = vpow2.f32 %v1739_v41  ;;  %v863_v8 = vsel %vm862_vm2, %v3033_v44, %v861_v42  ;;  %v870_v14 = vmul.f32 0.5, %v869_v43  ;;  %v3087_v16 = vadd.f32 %v3017_v22, %v768_v4  ;;  %v3089_v25 = vpop.f32.mrf.mxu0 }
 0x147   :  { %4324 = vst [vmem:[#allocation9_spill] sm:$0xff] %v3089_v25  ;;  %v866_v26 = vsel %vm864_vm3, %v865_v34, %v863_v8  ;;  %v1232_v32 = vmul.f32 %v2325_v48, %v1231_v10  ;;  %v1240_v36 = vmul.f32 %v2329_v28, %v3060_v55  ;;  %v531_v58 = vmul.f32 %v3089_v25, %v3089_v25 }
 0x148   :  { %v1612_v41 = vmul.f32 %v866_v26, %v2844_v37  ;;  %v871_v54 = vsub.f32 1.5, %v870_v14  ;;  %2334 = vrsqrt.f32 %v3087_v16  ;;  %v693_v42 = vpop.f32.mrf.mxu1  ;;  %v877_v44 = vand.u32 2147483648, %v3049_v13 }
 0x149   :  { %v2331_v43 = vpop.eup %2330  ;;  %v1233_v4 = vmul.f32 %v1232_v32, %v3041_v62  ;;  %v1241_v48 = vmul.f32 %v2329_v28, %v1240_v36  ;;  %v3104_v37 = vadd.f32 %v3017_v22, %v693_v42  ;;  %v584_v32 = vpack.c.bf16 %v531_v58, %v530_v2 }
 0x14a   :  { %v1676_v34 = vsub.f32 0.0, %v1612_v41  ;;  %v872_v10 = vmul.f32 %v2327_v20, %v871_v54  ;;  %v880_v8 = vmul.f32 %v2331_v43, %v3068_v27  ;;  %vm1258_vm12 = vcmp.eq.f32.partialorder %v3087_v16, inf }
 0x14b   :  { %v1235_v14 = vsel %vm1234_vm4, %v3041_v62, %v1233_v4  ;;  %v1242_v26 = vmul.f32 0.5, %v1241_v48  ;;  %2336 = vrsqrt.f32 %v3104_v37  ;;  %732 = vmatmul.bf16.gmra.mxu1 %v584_v32  ;;  %vm1260_vm13 = vcmp.eq.f32.partialorder %v3087_v16, 0.0 }
 0x14c   :  { %v2333_v25 = vpop.eup %2332  ;;  %v1741_v63 = vmul.f32 1.442695, %v1676_v34  ;;  %v1238_v36 = vsel %vm1236_vm5, %v1237_v60, %v1235_v14  ;;  %v873_v54 = vmul.f32 %v872_v10, %v3049_v13  ;;  %v881_v20 = vmul.f32 %v2331_v43, %v880_v8  ;;  %v3115_v4 = vpop.f32.mrf.mxu2 }
 0x14d   :  { %v1867_v41 = vadd.f32 1.0, %v2333_v25  ;;  %v1643_v42 = vmul.f32 %v1238_v36, %v2840_v35  ;;  %v1243_v30 = vsub.f32 1.5, %v1242_v26  ;;  %v770_v48 = vpop.f32.mrf.mxu3  ;;  %v1249_v34 = vand.u32 2147483648, %v3060_v55 }
 0x14e   :  { %v2335_v38 = vpop.eup %2334  ;;  %2338 = vpow2.f32 %v1741_v63  ;;  %v875_v62 = vsel %vm874_vm6, %v3049_v13, %v873_v54  ;;  %v882_v58 = vmul.f32 0.5, %v881_v20  ;;  %v3129_v32 = vpop.f32.mrf.mxu0  ;;  %v889_v54 = vand.u32 2147483648, %v3068_v27 }
 0x14f   :  { %2340 = vrcp.f32 %v1867_v41  ;;  %v1707_v60 = vsub.f32 0.0, %v1643_v42  ;;  %v878_v35 = vsel %vm876_vm7, %v877_v44, %v875_v62  ;;  %v1244_v2 = vmul.f32 %v2329_v28, %v1243_v30 }
 0x150   :  { %v1613_v25 = vmul.f32 %v878_v35, %v2860_v45  ;;  %v883_v10 = vsub.f32 1.5, %v882_v58  ;;  %v1252_v63 = vmul.f32 %v2335_v38, %v3087_v16  ;;  %v695_v8 = vpop.f32.mrf.mxu1  ;;  %v3132_v45 = vadd.f32 %v3017_v22, %v770_v48 }
 0x151   :  { %v1803_v14 = vmul.f32 1.442695, %v1707_v60  ;;  %v1245_v26 = vmul.f32 %v1244_v2, %v3060_v55  ;;  %v2337_v28 = vpop.eup %2336  ;;  %v3139_v20 = vadd.f32 %v3017_v22, %v695_v8  ;;  %vm898_vm14 = vcmp.eq.f32.partialorder %v3104_v37, inf }
 0x152   :  { %v1677_v13 = vsub.f32 0.0, %v1613_v25  ;;  %v884_v44 = vmul.f32 %v2331_v43, %v883_v10  ;;  %v1253_v30 = vmul.f32 %v2335_v38, %v1252_v63  ;;  %v892_v2 = vmul.f32 %v2337_v28, %v3104_v37 }
 0x153   :  { %2342 = vpow2.f32 %v1803_v14  ;;  %v1247_v36 = vsel %vm1246_vm8, %v3060_v55, %v1245_v26  ;;  %v563_v10 = vmul.f32 %v3115_v4, %v3115_v4  ;;  %vm900_vm15 = vcmp.eq.f32.partialorder %v3104_v37, 0.0 }
 0x154   :  { %v2339_v41 = vpop.eup %2338  ;;  %v1743_v42 = vmul.f32 1.442695, %v1677_v13  ;;  %v1250_v43 = vsel %vm1248_vm9, %v1249_v34, %v1247_v36  ;;  %v885_v62 = vmul.f32 %v884_v44, %v3068_v27  ;;  %v1254_v48 = vmul.f32 0.5, %v1253_v30  ;;  %v3157_v14 = vpop.f32.mrf.mxu2 }
 0x155   :  { %v2341_v58 = vpop.eup %2340  ;;  %v1868_v60 = vadd.f32 1.0, %v2339_v41  ;;  %v1644_v35 = vmul.f32 %v1250_v43, %v2848_v40  ;;  %2344 = vrsqrt.f32 %v3132_v45  ;;  %v773_v25 = vpop.f32.mrf.mxu3  ;;  %v893_v8 = vmul.f32 %v2337_v28, %v892_v2 }
 0x156   :  { %1995 = vst [vmem:[%s4309_s5] sm:$0xff] %v2341_v58  ;;  %2346 = vpow2.f32 %v1743_v42  ;;  %v887_v55 = vsel %vm886_vm10, %v3068_v27, %v885_v62  ;;  %v1255_v34 = vsub.f32 1.5, %v1254_v48  ;;  %v562_v13 = vmul.f32 %v3077_v51, %v3077_v51  ;;  %v3168_v58 = vpop.f32.mrf.mxu0 }
 0x157   :  { %2348 = vrcp.f32 %v1868_v60  ;;  %v1708_v40 = vsub.f32 0.0, %v1644_v35  ;;  %v890_v63 = vsel %vm888_vm11, %v889_v54, %v887_v55  ;;  %v894_v42 = vmul.f32 0.5, %v893_v8 }
 0x158   :  { %v1614_v26 = vmul.f32 %v890_v63, %v2866_v49  ;;  %v1256_v44 = vmul.f32 %v2335_v38, %v1255_v34  ;;  %v698_v30 = vpop.f32.mrf.mxu1  ;;  %2350 = vrsqrt.f32 %v3139_v20  ;;  %v1261_v49 = vand.u32 2147483648, %v3087_v16 }
 0x159   :  { %v2343_v36 = vpop.eup %2342  ;;  %v1805_v41 = vmul.f32 1.442695, %v1708_v40  ;;  %v895_v48 = vsub.f32 1.5, %v894_v42  ;;  %v600_v38 = vpack.c.bf16 %v563_v10, %v562_v13  ;;  %vm1270_vm0 = vcmp.eq.f32.partialorder %v3132_v45, inf }
 0x15a   :  { %v1899_v27 = vadd.f32 1.0, %v2343_v36  ;;  %v1678_v54 = vsub.f32 0.0, %v1614_v26  ;;  %v1257_v43 = vmul.f32 %v1256_v44, %v3087_v16  ;;  %v3182_v44 = vadd.f32 %v3017_v22, %v773_v25 }
 0x15b   :  { %v2345_v62 = vpop.eup %2344  ;;  %2352 = vpow2.f32 %v1805_v41  ;;  %v896_v8 = vmul.f32 %v2337_v28, %v895_v48  ;;  %812 = vmatmul.bf16.gmra.mxu3 %v600_v38  ;;  %v901_v28 = vand.u32 2147483648, %v3104_v37  ;;  %v3187_v41 = vadd.f32 %v3017_v22, %v698_v30 }
 0x15c   :  { %v2347_v60 = vpop.eup %2346  ;;  %2354 = vrcp.f32 %v1899_v27  ;;  %v1745_v35 = vmul.f32 1.442695, %v1678_v54  ;;  %v1259_v2 = vsel %vm1258_vm12, %v3087_v16, %v1257_v43  ;;  %v1264_v55 = vmul.f32 %v2345_v62, %v3132_v45  ;;  %v3199_v48 = vpop.f32.mrf.mxu2 }
 0x15d   :  { %v2349_v34 = vpop.eup %2348  ;;  %v1869_v40 = vadd.f32 1.0, %v2347_v60  ;;  %v1262_v63 = vsel %vm1260_vm13, %v1261_v49, %v1259_v2  ;;  %v775_v10 = vpop.f32.mrf.mxu3  ;;  %v897_v16 = vmul.f32 %v896_v8, %v3104_v37  ;;  %v532_v49 = vmul.f32 %v3129_v32, %v3129_v32 }
 0x15e   :  { %1996 = vst [vmem:[%s4309_s5 + $0x8] sm:$0xff] %v2349_v34  ;;  %2356 = vpow2.f32 %v1745_v35  ;;  %v1645_v26 = vmul.f32 %v1262_v63, %v2862_v47  ;;  %v1265_v13 = vmul.f32 %v2345_v62, %v1264_v55  ;;  %v2351_v36 = vpop.eup %2350  ;;  %v533_v30 = vmul.f32 %v3168_v58, %v3168_v58 }
 0x15f   :  { %2358 = vrcp.f32 %v1869_v40  ;;  %v904_v54 = vmul.f32 %v2351_v36, %v3139_v20  ;;  %v899_v25 = vsel %vm898_vm14, %v3104_v37, %v897_v16  ;;  %vm1272_vm1 = vcmp.eq.f32.partialorder %v3132_v45, 0.0 }
 0x160   :  { %v1709_v42 = vsub.f32 0.0, %v1645_v26  ;;  %v1266_v27 = vmul.f32 0.5, %v1265_v13  ;;  %2360 = vrsqrt.f32 %v3182_v44  ;;  %v700_v47 = vpop.f32.mrf.mxu1  ;;  %v902_v2 = vsel %vm900_vm15, %v901_v28, %v899_v25 }
 0x161   :  { %v2353_v43 = vpop.eup %2352  ;;  %v1615_v34 = vmul.f32 %v902_v2, %v2882_v57  ;;  %v905_v40 = vmul.f32 %v2351_v36, %v904_v54  ;;  %2362 = vrsqrt.f32 %v3187_v41  ;;  %v1273_v26 = vand.u32 2147483648, %v3132_v45 }
 0x162   :  { %v2355_v38 = vpop.eup %2354  ;;  %v1900_v60 = vadd.f32 1.0, %v2353_v43  ;;  %v1807_v35 = vmul.f32 1.442695, %v1709_v42  ;;  %v1267_v55 = vsub.f32 1.5, %v1266_v27  ;;  %vm910_vm2 = vcmp.eq.f32.partialorder %v3139_v20, inf  ;;  %v3211_v42 = vpop.f32.mrf.mxu0 }
 0x163   :  { %2027 = vst [vmem:[%s4309_s5 + $0x100] sm:$0xff] %v2355_v38  ;;  %v1679_v16 = vsub.f32 0.0, %v1615_v34  ;;  %v906_v28 = vmul.f32 0.5, %v905_v40  ;;  %v585_v54 = vpack.c.bf16 %v533_v30, %v532_v49  ;;  %v565_v43 = vmul.f32 %v3199_v48, %v3199_v48 }
 0x164   :  { %v2357_v63 = vpop.eup %2356  ;;  %2364 = vrcp.f32 %v1900_v60  ;;  %v1268_v8 = vmul.f32 %v2345_v62, %v1267_v55  ;;  %v3222_v25 = vadd.f32 %v3017_v22, %v775_v10  ;;  %vm912_vm3 = vcmp.eq.f32.partialorder %v3139_v20, 0.0 }
 0x165   :  { %v2359_v37 = vpop.eup %2358  ;;  %v1870_v13 = vadd.f32 1.0, %v2357_v63  ;;  %2366 = vpow2.f32 %v1807_v35  ;;  %v3213_v57 = vpop.f32.mrf.mxu3  ;;  %v1747_v38 = vmul.f32 1.442695, %v1679_v16  ;;  %v907_v60 = vsub.f32 1.5, %v906_v28  ;;  %737 = vmatmul.bf16.gmra.mxu1 %v585_v54 }
 0x166   :  { %v2361_v27 = vpop.eup %2360  ;;  %1997 = vst [vmem:[%s4309_s5 + $0x10] sm:$0xff] %v2359_v37  ;;  %v1269_v62 = vmul.f32 %v1268_v8, %v3132_v45  ;;  %v564_v49 = vmul.f32 %v3157_v14, %v3157_v14  ;;  %v913_v37 = vand.u32 2147483648, %v3139_v20  ;;  %vm1282_vm4 = vcmp.eq.f32.partialorder %v3182_v44, inf }
 0x167   :  { %2368 = vrcp.f32 %v1870_v13  ;;  %v1276_v35 = vmul.f32 %v2361_v27, %v3182_v44  ;;  %v2363_v10 = vpop.eup %2362  ;;  %v908_v34 = vmul.f32 %v2351_v36, %v907_v60  ;;  %v3245_v36 = vadd.f32 %v3017_v22, %v700_v47 }
 0x168   :  { %v1271_v2 = vsel %vm1270_vm0, %v3132_v45, %v1269_v62  ;;  %2370 = vrsqrt.f32 %v3222_v25  ;;  %v3232_v30 = vpop.f32.mrf.mxu1  ;;  %v916_v13 = vmul.f32 %v2363_v10, %v3187_v41  ;;  %v3247_v62 = vpop.f32.mrf.mxu2  ;;  %vm1284_vm5 = vcmp.eq.f32.partialorder %v3182_v44, 0.0 }
 0x169   :  { %2372 = vpow2.f32 %v1747_v38  ;;  %v1274_v55 = vsel %vm1272_vm1, %v1273_v26, %v1271_v2  ;;  %v1277_v40 = vmul.f32 %v2361_v27, %v1276_v35  ;;  %v909_v28 = vmul.f32 %v908_v34, %v3139_v20 }
 0x16a   :  { %v2365_v63 = vpop.eup %2364  ;;  %v1646_v8 = vmul.f32 %v1274_v55, %v2870_v52  ;;  %v601_v26 = vpack.c.bf16 %v565_v43, %v564_v49  ;;  %v917_v38 = vmul.f32 %v2363_v10, %v916_v13  ;;  %v1285_v55 = vand.u32 2147483648, %v3182_v44 }
 0x16b   :  { %v2367_v16 = vpop.eup %2366  ;;  %2028 = vst [vmem:[%s4309_s5 + $0x108] sm:$0xff] %v2365_v63  ;;  %v1278_v45 = vmul.f32 0.5, %v1277_v40  ;;  %v911_v35 = vsel %vm910_vm2, %v3139_v20, %v909_v28  ;;  %2374 = vrsqrt.f32 %v3245_v36  ;;  %vm922_vm6 = vcmp.eq.f32.partialorder %v3187_v41, inf  ;;  %v3265_v28 = vpop.f32.mrf.mxu0 }
 0x16c   :  { %v1901_v52 = vadd.f32 1.0, %v2367_v16  ;;  %v1710_v54 = vsub.f32 0.0, %v1646_v8  ;;  %817 = vmatmul.bf16.gmra.mxu3 %v601_v26  ;;  %v914_v34 = vsel %vm912_vm3, %v913_v37, %v911_v35  ;;  %v918_v40 = vmul.f32 0.5, %v917_v38 }
 0x16d   :  { %v2369_v60 = vpop.eup %2368  ;;  %v1279_v2 = vsub.f32 1.5, %v1278_v45  ;;  %v3255_v47 = vpop.f32.mrf.mxu3  ;;  %v1616_v8 = vmul.f32 %v914_v34, %v2888_v61  ;;  %vm924_vm7 = vcmp.eq.f32.partialorder %v3187_v41, 0.0  ;;  %v535_v38 = vmul.f32 %v3265_v28, %v3265_v28 }
 0x16e   :  { %v2371_v43 = vpop.eup %2370  ;;  %1998 = vst [vmem:[%s4309_s5 + $0x18] sm:$0xff] %v2369_v60  ;;  %2376 = vrcp.f32 %v1901_v52  ;;  %v1809_v49 = vmul.f32 1.442695, %v1710_v54  ;;  %v919_v26 = vsub.f32 1.5, %v918_v40  ;;  %v3271_v54 = vadd.f32 %v3017_v22, %v3213_v57 }
 0x16f   :  { %v2373_v63 = vpop.eup %2372  ;;  %v1280_v13 = vmul.f32 %v2361_v27, %v1279_v2  ;;  %v1288_v16 = vmul.f32 %v2371_v43, %v3222_v25  ;;  %v1680_v52 = vsub.f32 0.0, %v1616_v8  ;;  %v534_v27 = vmul.f32 %v3211_v42, %v3211_v42 }
 0x170   :  { %v1871_v45 = vadd.f32 1.0, %v2373_v63  ;;  %2378 = vpow2.f32 %v1809_v49  ;;  %v920_v61 = vmul.f32 %v2363_v10, %v919_v26  ;;  %v3277_v60 = vpop.f32.mrf.mxu1  ;;  %v3289_v8 = vadd.f32 %v3017_v22, %v3232_v30 }
 0x171   :  { %v1281_v20 = vmul.f32 %v1280_v13, %v3182_v44  ;;  %v1289_v37 = vmul.f32 %v2371_v43, %v1288_v16  ;;  %v2375_v35 = vpop.eup %2374  ;;  %v1749_v2 = vmul.f32 1.442695, %v1680_v52  ;;  %v925_v16 = vand.u32 2147483648, %v3187_v41 }
 0x172   :  { %2380 = vrcp.f32 %v1871_v45  ;;  %v921_v40 = vmul.f32 %v920_v61, %v3187_v41  ;;  %v928_v63 = vmul.f32 %v2375_v35, %v3245_v36  ;;  %vm1294_vm8 = vcmp.eq.f32.partialorder %v3222_v25, inf }
 0x173   :  { %v1283_v49 = vsel %vm1282_vm4, %v3182_v44, %v1281_v20  ;;  %v1290_v34 = vmul.f32 0.5, %v1289_v37  ;;  %2382 = vrsqrt.f32 %v3271_v54  ;;  %v3296_v44 = vpop.f32.mrf.mxu2  ;;  %v586_v20 = vpack.c.bf16 %v535_v38, %v534_v27  ;;  %v3314_v38 = vpop.f32.mrf.mxu0 }
 0x174   :  { %v2377_v57 = vpop.eup %2376  ;;  %v1286_v10 = vsel %vm1284_vm5, %v1285_v55, %v1283_v49  ;;  %2384 = vpow2.f32 %v1749_v2  ;;  %v923_v30 = vsel %vm922_vm6, %v3187_v41, %v921_v40  ;;  %v929_v52 = vmul.f32 %v2375_v35, %v928_v63 }
 0x175   :  { %2029 = vst [vmem:[%s4309_s5 + $0x110] sm:$0xff] %v2377_v57  ;;  %v1647_v13 = vmul.f32 %v1286_v10, %v2884_v59  ;;  %v1291_v45 = vsub.f32 1.5, %v1290_v34  ;;  %v3298_v55 = vpop.f32.mrf.mxu3  ;;  %v926_v59 = vsel %vm924_vm7, %v925_v16, %v923_v30  ;;  %vm1296_vm9 = vcmp.eq.f32.partialorder %v3222_v25, 0.0  ;;  %742 = vmatmul.bf16.gmra.mxu1 %v586_v20 }
 0x176   :  { %v2379_v26 = vpop.eup %2378  ;;  %v1617_v34 = vmul.f32 %v926_v59, %v2904_v5  ;;  %v930_v57 = vmul.f32 0.5, %v929_v52  ;;  %2386 = vrsqrt.f32 %v3289_v8  ;;  %v566_v63 = vmul.f32 %v3247_v62, %v3247_v62 }
 0x177   :  { %v1902_v37 = vadd.f32 1.0, %v2379_v26  ;;  %v1711_v61 = vsub.f32 0.0, %v1647_v13  ;;  %v1292_v2 = vmul.f32 %v2371_v43, %v1291_v45  ;;  %v1297_v43 = vand.u32 2147483648, %v3222_v25 }
 0x178   :  { %v2381_v49 = vpop.eup %2380  ;;  %v1681_v5 = vsub.f32 0.0, %v1617_v34  ;;  %v931_v40 = vsub.f32 1.5, %v930_v57  ;;  %v567_v26 = vmul.f32 %v3296_v44, %v3296_v44  ;;  %v3326_v30 = vadd.f32 %v3017_v22, %v3255_v47  ;;  %v3330_v59 = vpop.f32.mrf.mxu1 }
 0x179   :  { %v2383_v10 = vpop.eup %2382  ;;  %1999 = vst [vmem:[%s4309_s5 + $0x20] sm:$0xff] %v2381_v49  ;;  %2388 = vrcp.f32 %v1902_v37  ;;  %v1811_v27 = vmul.f32 1.442695, %v1711_v61  ;;  %v1293_v41 = vmul.f32 %v1292_v2, %v3222_v25  ;;  %vm934_vm10 = vcmp.eq.f32.partialorder %v3245_v36, inf }
 0x17a   :  { %v1300_v13 = vmul.f32 %v2383_v10, %v3271_v54  ;;  %v2385_v16 = vpop.eup %2384  ;;  %v1751_v20 = vmul.f32 1.442695, %v1681_v5  ;;  %v932_v61 = vmul.f32 %v2375_v35, %v931_v40  ;;  %v602_v34 = vpack.c.bf16 %v567_v26, %v566_v63 }
 0x17b   :  { %2390 = vpow2.f32 %v1811_v27  ;;  %v1295_v45 = vsel %vm1294_vm8, %v3222_v25, %v1293_v41  ;;  %v1872_v52 = vadd.f32 1.0, %v2385_v16  ;;  %v937_v47 = vand.u32 2147483648, %v3245_v36  ;;  %v3340_v5 = vpop.f32.mrf.mxu2 }
 0x17c   :  { %v1298_v37 = vsel %vm1296_vm9, %v1297_v43, %v1295_v45  ;;  %v1301_v49 = vmul.f32 %v2383_v10, %v1300_v13  ;;  %2392 = vrsqrt.f32 %v3326_v30  ;;  %v2387_v57 = vpop.eup %2386  ;;  %v933_v27 = vmul.f32 %v932_v61, %v3245_v36  ;;  %822 = vmatmul.bf16.gmra.mxu3 %v602_v34 }
 0x17d   :  { %v1648_v2 = vmul.f32 %v1298_v37, %v2892_v0  ;;  %2394 = vrcp.f32 %v1872_v52  ;;  %v3337_v41 = vpop.f32.mrf.mxu3  ;;  %v940_v0 = vmul.f32 %v2387_v57, %v3289_v8  ;;  %vm936_vm11 = vcmp.eq.f32.partialorder %v3245_v36, 0.0 }
 0x17e   :  { %2396 = vpow2.f32 %v1751_v20  ;;  %v1302_v43 = vmul.f32 0.5, %v1301_v49  ;;  %v935_v40 = vsel %vm934_vm10, %v3245_v36, %v933_v27  ;;  %vm1306_vm12 = vcmp.eq.f32.partialorder %v3271_v54, inf }
 0x17f   :  { %v2389_v25 = vpop.eup %2388  ;;  %v1712_v35 = vsub.f32 0.0, %v1648_v2  ;;  %v3350_v63 = vadd.f32 %v3017_v22, %v3277_v60  ;;  %v938_v45 = vsel %vm936_vm11, %v937_v47, %v935_v40  ;;  %v941_v52 = vmul.f32 %v2387_v57, %v940_v0  ;;  %v3356_v60 = vpop.f32.mrf.mxu0 }
 0x180   :  { %2030 = vst [vmem:[%s4309_s5 + $0x118] sm:$0xff] %v2389_v25  ;;  %v1303_v26 = vsub.f32 1.5, %v1302_v43  ;;  %v1618_v37 = vmul.f32 %v938_v45, %v2910_v9  ;;  %vm1308_vm13 = vcmp.eq.f32.partialorder %v3271_v54, 0.0  ;;  %v1309_v2 = vand.u32 2147483648, %v3271_v54  ;;  %v3372_v45 = vpop.f32.mrf.mxu1 }
 0x181   :  { %v2391_v13 = vpop.eup %2390  ;;  %v1813_v16 = vmul.f32 1.442695, %v1712_v35  ;;  %2398 = vrsqrt.f32 %v3350_v63  ;;  %v942_v49 = vmul.f32 0.5, %v941_v52  ;;  %vm946_vm14 = vcmp.eq.f32.partialorder %v3289_v8, inf }
 0x182   :  { %v1903_v20 = vadd.f32 1.0, %v2391_v13  ;;  %v2393_v61 = vpop.eup %2392  ;;  %v1304_v36 = vmul.f32 %v2383_v10, %v1303_v26  ;;  %v1682_v27 = vsub.f32 0.0, %v1618_v37  ;;  %v536_v35 = vmul.f32 %v3314_v38, %v3314_v38 }
 0x183   :  { %2400 = vpow2.f32 %v1813_v16  ;;  %v2395_v34 = vpop.eup %2394  ;;  %v1312_v47 = vmul.f32 %v2393_v61, %v3326_v30  ;;  %v943_v10 = vsub.f32 1.5, %v942_v49  ;;  %v3368_v43 = vadd.f32 %v3017_v22, %v3298_v55 }
 0x184   :  { %2402 = vrcp.f32 %v1903_v20  ;;  %v2397_v9 = vpop.eup %2396  ;;  %2000 = vst [vmem:[%s4309_s5 + $0x28] sm:$0xff] %v2395_v34  ;;  %v1305_v25 = vmul.f32 %v1304_v36, %v3271_v54  ;;  %v1753_v40 = vmul.f32 1.442695, %v1682_v27  ;;  %v537_v16 = vmul.f32 %v3356_v60, %v3356_v60 }
 0x185   :  { %v1873_v0 = vadd.f32 1.0, %v2397_v9  ;;  %v1313_v13 = vmul.f32 %v2393_v61, %v1312_v47  ;;  %v944_v52 = vmul.f32 %v2387_v57, %v943_v10  ;;  %vm948_vm15 = vcmp.eq.f32.partialorder %v3289_v8, 0.0  ;;  %v3382_v49 = vpop.f32.mrf.mxu3  ;;  %v3387_v9 = vpop.f32.mrf.mxu2 }
 0x186   :  { %v1307_v26 = vsel %vm1306_vm12, %v3271_v54, %v1305_v25  ;;  %2404 = vrsqrt.f32 %v3368_v43  ;;  %v949_v37 = vand.u32 2147483648, %v3289_v8  ;;  %4325 = vst [vmem:[#allocation10_spill] sm:$0xff] %v3387_v9  ;;  %vm1318_vm0 = vcmp.eq.f32.partialorder %v3326_v30, inf }
 0x187   :  { %v2399_v20 = vpop.eup %2398  ;;  %2406 = vrcp.f32 %v1873_v0  ;;  %v1310_v55 = vsel %vm1308_vm13, %v1309_v2, %v1307_v26  ;;  %v1314_v36 = vmul.f32 0.5, %v1313_v13  ;;  %v945_v57 = vmul.f32 %v944_v52, %v3289_v8 }
 0x188   :  { %2408 = vpow2.f32 %v1753_v40  ;;  %v1649_v27 = vmul.f32 %v1310_v55, %v2906_v7  ;;  %v952_v47 = vmul.f32 %v2399_v20, %v3350_v63  ;;  %v587_v54 = vpack.c.bf16 %v537_v16, %v536_v35 }
 0x189   :  { %v2401_v34 = vpop.eup %2400  ;;  %v1315_v0 = vsub.f32 1.5, %v1314_v36  ;;  %v947_v7 = vsel %vm946_vm14, %v3289_v8, %v945_v57  ;;  %v3398_v13 = vadd.f32 %v3017_v22, %v3330_v59  ;;  %v569_v35 = vmul.f32 %v3387_v9, %v3387_v9 }
 0x18a   :  { %v2403_v25 = vpop.eup %2402  ;;  %v1904_v10 = vadd.f32 1.0, %v2401_v34  ;;  %v1713_v2 = vsub.f32 0.0, %v1649_v27  ;;  %v953_v40 = vmul.f32 %v2399_v20, %v952_v47  ;;  %v950_v26 = vsel %vm948_vm15, %v949_v37, %v947_v7  ;;  %747 = vmatmul.bf16.gmra.mxu1 %v587_v54  ;;  %v3406_v27 = vpop.f32.mrf.mxu0 }
 0x18b   :  { %2031 = vst [vmem:[%s4309_s5 + $0x120] sm:$0xff] %v2403_v25  ;;  %v1316_v52 = vmul.f32 %v2393_v61, %v1315_v0  ;;  %v1619_v36 = vmul.f32 %v950_v26, %v2926_v17  ;;  %vm1320_vm1 = vcmp.eq.f32.partialorder %v3326_v30, 0.0  ;;  %v568_v8 = vmul.f32 %v3340_v5, %v3340_v5  ;;  %v713_v7 = vpop.f32.mrf.mxu1 }
 0x18c   :  { %2410 = vrcp.f32 %v1904_v10  ;;  %v2405_v16 = vpop.eup %2404  ;;  %v1815_v55 = vmul.f32 1.442695, %v1713_v2  ;;  %v954_v34 = vmul.f32 0.5, %v953_v40  ;;  %v1321_v47 = vand.u32 2147483648, %v3326_v30 }
 0x18d   :  { %2412 = vrsqrt.f32 %v3398_v13  ;;  %v2407_v59 = vpop.eup %2406  ;;  %v1317_v57 = vmul.f32 %v1316_v52, %v3326_v30  ;;  %v1324_v61 = vmul.f32 %v2405_v16, %v3368_v43  ;;  %v1683_v17 = vsub.f32 0.0, %v1619_v36 }
 0x18e   :  { %v2409_v37 = vpop.eup %2408  ;;  %2001 = vst [vmem:[%s4309_s5 + $0x30] sm:$0xff] %v2407_v59  ;;  %2414 = vpow2.f32 %v1815_v55  ;;  %v955_v25 = vsub.f32 1.5, %v954_v34  ;;  %v603_v2 = vpack.c.bf16 %v569_v35, %v568_v8  ;;  %v3422_v9 = vadd.f32 %v3017_v22, %v3337_v41  ;;  %v3425_v59 = vpop.f32.mrf.mxu3 }
 0x18f   :  { %v1874_v10 = vadd.f32 1.0, %v2409_v37  ;;  %v1319_v0 = vsel %vm1318_vm0, %v3326_v30, %v1317_v57  ;;  %v1325_v54 = vmul.f32 %v2405_v16, %v1324_v61  ;;  %v1755_v40 = vmul.f32 1.442695, %v1683_v17  ;;  %v3435_v57 = vpop.f32.mrf.mxu2 }
 0x190   :  { %v1322_v26 = vsel %vm1320_vm1, %v1321_v47, %v1319_v0  ;;  %v956_v52 = vmul.f32 %v2399_v20, %v955_v25  ;;  %827 = vmatmul.bf16.gmra.mxu3 %v603_v2  ;;  %vm958_vm2 = vcmp.eq.f32.partialorder %v3350_v63, inf  ;;  %v961_v41 = vand.u32 2147483648, %v3350_v63 }
 0x191   :  { %2416 = vrcp.f32 %v1874_v10  ;;  %v1650_v36 = vmul.f32 %v1322_v26, %v2914_v12  ;;  %v1326_v34 = vmul.f32 0.5, %v1325_v54  ;;  %vm960_vm3 = vcmp.eq.f32.partialorder %v3350_v63, 0.0 }
 0x192   :  { %v2411_v55 = vpop.eup %2410  ;;  %2418 = vpow2.f32 %v1755_v40  ;;  %v957_v30 = vmul.f32 %v956_v52, %v3350_v63  ;;  %vm1330_vm4 = vcmp.eq.f32.partialorder %v3368_v43, inf  ;;  %v3442_v17 = vadd.f32 %v3017_v22, %v3372_v45  ;;  %v3447_v40 = vpop.f32.mrf.mxu0 }
 0x193   :  { %v2413_v37 = vpop.eup %2412  ;;  %2032 = vst [vmem:[%s4309_s5 + $0x128] sm:$0xff] %v2411_v55  ;;  %v1714_v20 = vsub.f32 0.0, %v1650_v36  ;;  %v1327_v35 = vsub.f32 1.5, %v1326_v34  ;;  %2420 = vrsqrt.f32 %v3422_v9  ;;  %vm1332_vm5 = vcmp.eq.f32.partialorder %v3368_v43, 0.0  ;;  %v3459_v55 = vld [vmem:[%s4308_s3] ss:$0 sm:$0xff] }
 0x194   :  { %v964_v12 = vmul.f32 %v2413_v37, %v3398_v13  ;;  %v2415_v8 = vpop.eup %2414  ;;  %v959_v61 = vsel %vm958_vm2, %v3350_v63, %v957_v30  ;;  %2422 = vrsqrt.f32 %v3442_v17  ;;  %v1333_v22 = vand.u32 2147483648, %v3368_v43 }
 0x195   :  { %v1905_v47 = vadd.f32 1.0, %v2415_v8  ;;  %v1817_v25 = vmul.f32 1.442695, %v1714_v20  ;;  %v962_v10 = vsel %vm960_vm3, %v961_v41, %v959_v61  ;;  %v1328_v0 = vmul.f32 %v2405_v16, %v1327_v35 }
 0x196   :  { %v1620_v54 = vmul.f32 %v962_v10, %v2932_v21  ;;  %v965_v2 = vmul.f32 %v2413_v37, %v964_v12  ;;  %v538_v45 = vmul.f32 %v3406_v27, %v3406_v27  ;;  %v3463_v36 = vadd.f32 %v3459_v55, %v3382_v49  ;;  %v3473_v12 = vpop.f32.mrf.mxu1  ;;  %v3481_v10 = vpop.f32.mrf.mxu3 }
 0x197   :  { %v2417_v63 = vpop.eup %2416  ;;  %2424 = vrcp.f32 %v1905_v47  ;;  %v1329_v26 = vmul.f32 %v1328_v0, %v3368_v43  ;;  %v539_v20 = vmul.f32 %v3447_v40, %v3447_v40  ;;  %v3471_v35 = vadd.f32 %v3459_v55, %v713_v7 }
 0x198   :  { %v2419_v52 = vpop.eup %2418  ;;  %2002 = vst [vmem:[%s4309_s5 + $0x38] sm:$0xff] %v2417_v63  ;;  %2426 = vpow2.f32 %v1817_v25  ;;  %v1684_v21 = vsub.f32 0.0, %v1620_v54  ;;  %v966_v16 = vmul.f32 0.5, %v965_v2  ;;  %vm970_vm6 = vcmp.eq.f32.partialorder %v3398_v13, inf }
 0x199   :  { %v2421_v34 = vpop.eup %2420  ;;  %v1875_v30 = vadd.f32 1.0, %v2419_v52  ;;  %v1331_v41 = vsel %vm1330_vm4, %v3368_v43, %v1329_v26  ;;  %vm972_vm7 = vcmp.eq.f32.partialorder %v3398_v13, 0.0  ;;  %v973_v54 = vand.u32 2147483648, %v3398_v13 }
 0x19a   :  { %v1757_v8 = vmul.f32 1.442695, %v1684_v21  ;;  %v1334_v61 = vsel %vm1332_vm5, %v1333_v22, %v1331_v41  ;;  %v967_v49 = vsub.f32 1.5, %v966_v16  ;;  %v1336_v47 = vmul.f32 %v2421_v34, %v3422_v9  ;;  %v2423_v7 = vpop.eup %2422  ;;  %v3487_v22 = vpop.f32.mrf.mxu2 }
 0x19b   :  { %2428 = vrcp.f32 %v1875_v30  ;;  %v1651_v25 = vmul.f32 %v1334_v61, %v2928_v19  ;;  %vm1342_vm8 = vcmp.eq.f32.partialorder %v3422_v9, inf  ;;  %v976_v26 = vmul.f32 %v2423_v7, %v3442_v17 }
 0x19c   :  { %2430 = vpow2.f32 %v1757_v8  ;;  %v968_v0 = vmul.f32 %v2413_v37, %v967_v49  ;;  %v1337_v2 = vmul.f32 %v2421_v34, %v1336_v47  ;;  %v588_v19 = vpack.c.bf16 %v539_v20, %v538_v45 }
 0x19d   :  { %v2425_v43 = vpop.eup %2424  ;;  %v1715_v63 = vsub.f32 0.0, %v1651_v25  ;;  %2432 = vrsqrt.f32 %v3463_v36  ;;  %vm1344_vm9 = vcmp.eq.f32.partialorder %v3422_v9, 0.0  ;;  %v1345_v41 = vand.u32 2147483648, %v3422_v9 }
 0x19e   :  { %v2427_v52 = vpop.eup %2426  ;;  %2033 = vst [vmem:[%s4309_s5 + $0x130] sm:$0xff] %v2425_v43  ;;  %v969_v37 = vmul.f32 %v968_v0, %v3398_v13  ;;  %v1338_v21 = vmul.f32 0.5, %v1337_v2  ;;  %2434 = vrsqrt.f32 %v3471_v35  ;;  %v977_v8 = vmul.f32 %v2423_v7, %v976_v26  ;;  %752 = vmatmul.bf16.gmra.mxu1 %v588_v19  ;;  %v3509_v43 = vpop.f32.mrf.mxu0 }
 0x19f   :  { %v1906_v16 = vadd.f32 1.0, %v2427_v52  ;;  %v1819_v30 = vmul.f32 1.442695, %v1715_v63  ;;  %v570_v61 = vmul.f32 %v3435_v57, %v3435_v57  ;;  %v571_v49 = vmul.f32 %v3487_v22, %v3487_v22 }
 0x1a0   :  { %v971_v45 = vsel %vm970_vm6, %v3398_v13, %v969_v37  ;;  %v1339_v20 = vsub.f32 1.5, %v1338_v21  ;;  %v978_v0 = vmul.f32 0.5, %v977_v8  ;;  %v3507_v2 = vadd.f32 %v3459_v55, %v3425_v59  ;;  %v3517_v59 = vpop.f32.mrf.mxu1 }
 0x1a1   :  { %v2429_v47 = vpop.eup %2428  ;;  %2436 = vrcp.f32 %v1906_v16  ;;  %v974_v25 = vsel %vm972_vm7, %v973_v54, %v971_v45  ;;  %v604_v52 = vpack.c.bf16 %v571_v49, %v570_v61  ;;  %vm982_vm10 = vcmp.eq.f32.partialorder %v3442_v17, inf }
 0x1a2   :  { %v2431_v63 = vpop.eup %2430  ;;  %2003 = vst [vmem:[%s4309_s5 + $0x40] sm:$0xff] %v2429_v47  ;;  %2438 = vpow2.f32 %v1819_v30  ;;  %v1621_v26 = vmul.f32 %v974_v25, %v2948_v29  ;;  %v1340_v19 = vmul.f32 %v2421_v34, %v1339_v20  ;;  %v979_v54 = vsub.f32 1.5, %v978_v0  ;;  %v3524_v20 = vpop.f32.mrf.mxu3 }
 0x1a3   :  { %v2433_v37 = vpop.eup %2432  ;;  %v1876_v13 = vadd.f32 1.0, %v2431_v63  ;;  %2440 = vrsqrt.f32 %v3507_v2  ;;  %vm984_vm11 = vcmp.eq.f32.partialorder %v3442_v17, 0.0  ;;  %832 = vmatmul.bf16.gmra.mxu3 %v604_v52  ;;  %v985_v34 = vand.u32 2147483648, %v3442_v17 }
 0x1a4   :  { %v2435_v21 = vpop.eup %2434  ;;  %v1685_v16 = vsub.f32 0.0, %v1621_v26  ;;  %v1341_v8 = vmul.f32 %v1340_v19, %v3422_v9  ;;  %v1348_v30 = vmul.f32 %v2433_v37, %v3463_v36  ;;  %v980_v29 = vmul.f32 %v2423_v7, %v979_v54 }
 0x1a5   :  { %2442 = vrcp.f32 %v1876_v13  ;;  %v988_v45 = vmul.f32 %v2435_v21, %v3471_v35  ;;  %v1357_v25 = vand.u32 2147483648, %v3463_v36  ;;  %vm1354_vm12 = vcmp.eq.f32.partialorder %v3463_v36, inf }
 0x1a6   :  { %v1759_v61 = vmul.f32 1.442695, %v1685_v16  ;;  %v1343_v49 = vsel %vm1342_vm8, %v3422_v9, %v1341_v8  ;;  %v1349_v47 = vmul.f32 %v2433_v37, %v1348_v30  ;;  %v981_v7 = vmul.f32 %v980_v29, %v3442_v17  ;;  %v3544_v9 = vpop.f32.mrf.mxu2 }
 0x1a7   :  { %v2437_v0 = vpop.eup %2436  ;;  %v1346_v63 = vsel %vm1344_vm9, %v1345_v41, %v1343_v49  ;;  %v989_v26 = vmul.f32 %v2435_v21, %v988_v45  ;;  %v3536_v19 = vadd.f32 %v3459_v55, %v3473_v12  ;;  %vm1356_vm13 = vcmp.eq.f32.partialorder %v3463_v36, 0.0 }
 0x1a8   :  { %v2439_v52 = vpop.eup %2438  ;;  %2034 = vst [vmem:[%s4309_s5 + $0x138] sm:$0xff] %v2437_v0  ;;  %2444 = vpow2.f32 %v1759_v61  ;;  %v1652_v13 = vmul.f32 %v1346_v63, %v2936_v24  ;;  %v1350_v54 = vmul.f32 0.5, %v1349_v47  ;;  %vm994_vm14 = vcmp.eq.f32.partialorder %v3471_v35, inf  ;;  %v3555_v0 = vpop.f32.mrf.mxu0 }
 0x1a9   :  { %v2441_v41 = vpop.eup %2440  ;;  %v1907_v16 = vadd.f32 1.0, %v2439_v52  ;;  %v983_v12 = vsel %vm982_vm10, %v3442_v17, %v981_v7  ;;  %v990_v8 = vmul.f32 0.5, %v989_v26  ;;  %2446 = vrsqrt.f32 %v3536_v19 }
 0x1aa   :  { %v1716_v30 = vsub.f32 0.0, %v1652_v13  ;;  %v986_v24 = vsel %vm984_vm11, %v985_v34, %v983_v12  ;;  %v1351_v29 = vsub.f32 1.5, %v1350_v54  ;;  %v1360_v45 = vmul.f32 %v2441_v41, %v3507_v2  ;;  %v3567_v54 = vpop.f32.mrf.mxu1 }
 0x1ab   :  { %v2443_v61 = vpop.eup %2442  ;;  %2448 = vrcp.f32 %v1907_v16  ;;  %v1622_v49 = vmul.f32 %v986_v24, %v2954_v33  ;;  %v991_v47 = vsub.f32 1.5, %v990_v8  ;;  %vm996_vm15 = vcmp.eq.f32.partialorder %v3471_v35, 0.0 }
 0x1ac   :  { %2004 = vst [vmem:[%s4309_s5 + $0x48] sm:$0xff] %v2443_v61  ;;  %v1821_v63 = vmul.f32 1.442695, %v1716_v30  ;;  %v1352_v7 = vmul.f32 %v2433_v37, %v1351_v29  ;;  %v997_v17 = vand.u32 2147483648, %v3471_v35  ;;  %v1361_v34 = vmul.f32 %v2441_v41, %v1360_v45  ;;  %v3574_v45 = vpop.f32.mrf.mxu3 }
 0x1ad   :  { %v1686_v26 = vsub.f32 0.0, %v1622_v49  ;;  %v992_v52 = vmul.f32 %v2435_v21, %v991_v47  ;;  %v540_v13 = vmul.f32 %v3509_v43, %v3509_v43  ;;  %v3565_v33 = vadd.f32 %v3459_v55, %v3481_v10 }
 0x1ae   :  { %v2445_v16 = vpop.eup %2444  ;;  %2450 = vpow2.f32 %v1821_v63  ;;  %v1353_v12 = vmul.f32 %v1352_v7, %v3463_v36  ;;  %v1362_v8 = vmul.f32 0.5, %v1361_v34  ;;  %v541_v37 = vmul.f32 %v3555_v0, %v3555_v0 }
 0x1af   :  { %v2447_v30 = vpop.eup %2446  ;;  %v1877_v24 = vadd.f32 1.0, %v2445_v16  ;;  %v1761_v21 = vmul.f32 1.442695, %v1686_v26  ;;  %v993_v29 = vmul.f32 %v992_v52, %v3471_v35  ;;  %2452 = vrsqrt.f32 %v3565_v33  ;;  %v3593_v16 = vpop.f32.mrf.mxu2 }
 0x1b0   :  { %v1355_v10 = vsel %vm1354_vm12, %v3463_v36, %v1353_v12  ;;  %v1363_v61 = vsub.f32 1.5, %v1362_v8  ;;  %vm1366_vm0 = vcmp.eq.f32.partialorder %v3507_v2, inf  ;;  %v1000_v49 = vmul.f32 %v2447_v30, %v3536_v19 }
 0x1b1   :  { %v2449_v47 = vpop.eup %2448  ;;  %2454 = vrcp.f32 %v1877_v24  ;;  %v1358_v63 = vsel %vm1356_vm13, %v1357_v25, %v1355_v10  ;;  %v995_v7 = vsel %vm994_vm14, %v3471_v35, %v993_v29  ;;  %vm1368_vm1 = vcmp.eq.f32.partialorder %v3507_v2, 0.0 }
 0x1b2   :  { %2035 = vst [vmem:[%s4309_s5 + $0x140] sm:$0xff] %v2449_v47  ;;  %2456 = vpow2.f32 %v1761_v21  ;;  %v1653_v34 = vmul.f32 %v1358_v63, %v2950_v31  ;;  %v998_v26 = vsel %vm996_vm15, %v997_v17, %v995_v7  ;;  %v1364_v52 = vmul.f32 %v2441_v41, %v1363_v61 }
 0x1b3   :  { %v1623_v36 = vmul.f32 %v998_v26, %v2970_v46  ;;  %v1369_v25 = vand.u32 2147483648, %v3507_v2  ;;  %v1001_v12 = vmul.f32 %v2447_v30, %v1000_v49  ;;  %v589_v8 = vpack.c.bf16 %v541_v37, %v540_v13 }
 0x1b4   :  { %v2451_v24 = vpop.eup %2450  ;;  %v1717_v29 = vsub.f32 0.0, %v1653_v34  ;;  %v1365_v10 = vmul.f32 %v1364_v52, %v3507_v2  ;;  %v572_v21 = vmul.f32 %v3544_v9, %v3544_v9  ;;  %v3602_v31 = vadd.f32 %v3459_v55, %v3517_v59  ;;  %v723_v34 = vpop.f32.mrf.mxu1 }
 0x1b5   :  { %v2453_v35 = vpop.eup %2452  ;;  %v1908_v41 = vadd.f32 1.0, %v2451_v24  ;;  %v1687_v17 = vsub.f32 0.0, %v1623_v36  ;;  %v1002_v61 = vmul.f32 0.5, %v1001_v12  ;;  %757 = vmatmul.bf16.gmra.mxu1 %v589_v8  ;;  %v573_v46 = vmul.f32 %v3593_v16, %v3593_v16 }
 0x1b6   :  { %v1823_v13 = vmul.f32 1.442695, %v1717_v29  ;;  %v1367_v37 = vsel %vm1366_vm0, %v3507_v2, %v1365_v10  ;;  %v1372_v49 = vmul.f32 %v2453_v35, %v3565_v33  ;;  %2458 = vrsqrt.f32 %v3602_v31  ;;  %v3621_v2 = vpop.f32.mrf.mxu3 }
 0x1b7   :  { %v2455_v47 = vpop.eup %2454  ;;  %2460 = vrcp.f32 %v1908_v41  ;;  %v1763_v59 = vmul.f32 1.442695, %v1687_v17  ;;  %v1370_v63 = vsel %vm1368_vm1, %v1369_v25, %v1367_v37  ;;  %v1003_v7 = vsub.f32 1.5, %v1002_v61 }
 0x1b8   :  { %v2457_v26 = vpop.eup %2456  ;;  %2005 = vst [vmem:[%s4309_s5 + $0x50] sm:$0xff] %v2455_v47  ;;  %2462 = vpow2.f32 %v1823_v13  ;;  %v1654_v52 = vmul.f32 %v1370_v63, %v2958_v39  ;;  %v1373_v36 = vmul.f32 %v2453_v35, %v1372_v49  ;;  %v3619_v12 = vadd.f32 %v3459_v55, %v3524_v20 }
 0x1b9   :  { %v1878_v8 = vadd.f32 1.0, %v2457_v26  ;;  %2464 = vpow2.f32 %v1763_v59  ;;  %v1004_v24 = vmul.f32 %v2447_v30, %v1003_v7  ;;  %v605_v10 = vpack.c.bf16 %v573_v46, %v572_v21 }
 0x1ba   :  { %v1718_v25 = vsub.f32 0.0, %v1654_v52  ;;  %v1374_v29 = vmul.f32 0.5, %v1373_v36  ;;  %vm1006_vm2 = vcmp.eq.f32.partialorder %v3536_v19, inf  ;;  %v1009_v61 = vand.u32 2147483648, %v3536_v19 }
 0x1bb   :  { %2466 = vrcp.f32 %v1878_v8  ;;  %v1005_v41 = vmul.f32 %v1004_v24, %v3536_v19  ;;  %837 = vmatmul.bf16.gmra.mxu3 %v605_v10  ;;  %vm1008_vm3 = vcmp.eq.f32.partialorder %v3536_v19, 0.0  ;;  %v3632_v46 = vadd.f32 %v3459_v55, %v3567_v54 }
 0x1bc   :  { %v2459_v17 = vpop.eup %2458  ;;  %v1825_v39 = vmul.f32 1.442695, %v1718_v25  ;;  %v1375_v13 = vsub.f32 1.5, %v1374_v29  ;;  %2468 = vrsqrt.f32 %v3619_v12  ;;  %vm1378_vm4 = vcmp.eq.f32.partialorder %v3565_v33, inf  ;;  %v725_v25 = vpop.f32.mrf.mxu1 }
 0x1bd   :  { %v2461_v20 = vpop.eup %2460  ;;  %v1007_v30 = vsel %vm1006_vm2, %v3536_v19, %v1005_v41  ;;  %v1012_v21 = vmul.f32 %v2459_v17, %v3602_v31  ;;  %v3643_v54 = vadd.f32 %v3459_v55, %v3574_v45  ;;  %vm1380_vm5 = vcmp.eq.f32.partialorder %v3565_v33, 0.0 }
 0x1be   :  { %v2463_v37 = vpop.eup %2462  ;;  %2036 = vst [vmem:[%s4309_s5 + $0x148] sm:$0xff] %v2461_v20  ;;  %2470 = vpow2.f32 %v1825_v39  ;;  %v1010_v49 = vsel %vm1008_vm3, %v1009_v61, %v1007_v30  ;;  %v1376_v47 = vmul.f32 %v2453_v35, %v1375_v13  ;;  %v1381_v35 = vand.u32 2147483648, %v3565_v33  ;;  %v803_v13 = vpop.f32.mrf.mxu3 }
 0x1bf   :  { %v2465_v59 = vpop.eup %2464  ;;  %v1909_v63 = vadd.f32 1.0, %v2463_v37  ;;  %v1624_v7 = vmul.f32 %v1010_v49, %v2976_v53  ;;  %v1013_v26 = vmul.f32 %v2459_v17, %v1012_v21  ;;  %2472 = vrsqrt.f32 %v3632_v46 }
 0x1c0   :  { %v1879_v19 = vadd.f32 1.0, %v2465_v59  ;;  %v1377_v52 = vmul.f32 %v1376_v47, %v3565_v33  ;;  %v3652_v45 = vadd.f32 %v3459_v55, %v723_v34  ;;  %vm1018_vm6 = vcmp.eq.f32.partialorder %v3602_v31, inf }
 0x1c1   :  { %v2467_v36 = vpop.eup %2466  ;;  %2474 = vrcp.f32 %v1909_v63  ;;  %v1688_v8 = vsub.f32 0.0, %v1624_v7  ;;  %v1014_v24 = vmul.f32 0.5, %v1013_v26  ;;  %vm1020_vm7 = vcmp.eq.f32.partialorder %v3602_v31, 0.0 }
 0x1c2   :  { %v2469_v53 = vpop.eup %2468  ;;  %2006 = vst [vmem:[%s4309_s5 + $0x58] sm:$0xff] %v2467_v36  ;;  %2476 = vrcp.f32 %v1879_v19  ;;  %v1379_v29 = vsel %vm1378_vm4, %v3565_v33, %v1377_v52  ;;  %v1021_v47 = vand.u32 2147483648, %v3602_v31  ;;  %vm1390_vm8 = vcmp.eq.f32.partialorder %v3619_v12, inf }
 0x1c3   :  { %v1765_v10 = vmul.f32 1.442695, %v1688_v8  ;;  %v1382_v41 = vsel %vm1380_vm5, %v1381_v35, %v1379_v29  ;;  %v1015_v39 = vsub.f32 1.5, %v1014_v24  ;;  %v1384_v61 = vmul.f32 %v2469_v53, %v3619_v12 }
 0x1c4   :  { %v2471_v20 = vpop.eup %2470  ;;  %v1655_v30 = vmul.f32 %v1382_v41, %v2972_v50  ;;  %2478 = vrsqrt.f32 %v3643_v54  ;;  %vm1392_vm9 = vcmp.eq.f32.partialorder %v3619_v12, 0.0  ;;  %v3670_v52 = vadd.f32 %v3459_v55, %v3621_v2 }
 0x1c5   :  { %v2473_v21 = vpop.eup %2472  ;;  %v1910_v33 = vadd.f32 1.0, %v2471_v20  ;;  %2480 = vpow2.f32 %v1765_v10  ;;  %v1016_v34 = vmul.f32 %v2459_v17, %v1015_v39  ;;  %v1385_v37 = vmul.f32 %v2469_v53, %v1384_v61  ;;  %v728_v20 = vpop.f32.mrf.mxu1 }
 0x1c6   :  { %v1719_v49 = vsub.f32 0.0, %v1655_v30  ;;  %v1024_v59 = vmul.f32 %v2473_v21, %v3632_v46  ;;  %2482 = vrsqrt.f32 %v3652_v45  ;;  %v1393_v35 = vand.u32 2147483648, %v3619_v12 }
 0x1c7   :  { %v2475_v63 = vpop.eup %2474  ;;  %2484 = vrcp.f32 %v1910_v33  ;;  %v1017_v50 = vmul.f32 %v1016_v34, %v3602_v31  ;;  %v1386_v7 = vmul.f32 0.5, %v1385_v37  ;;  %vm1030_vm10 = vcmp.eq.f32.partialorder %v3632_v46, inf }
 0x1c8   :  { %v2477_v26 = vpop.eup %2476  ;;  %2037 = vst [vmem:[%s4309_s5 + $0x150] sm:$0xff] %v2475_v63  ;;  %v1827_v17 = vmul.f32 1.442695, %v1719_v49  ;;  %v1025_v19 = vmul.f32 %v2473_v21, %v1024_v59  ;;  %vm1032_vm11 = vcmp.eq.f32.partialorder %v3632_v46, 0.0  ;;  %v1033_v37 = vand.u32 2147483648, %v3632_v46 }
 0x1c9   :  { %2007 = vst [vmem:[%s4309_s5 + $0x60] sm:$0xff] %v2477_v26  ;;  %v1019_v36 = vsel %vm1018_vm6, %v3602_v31, %v1017_v50  ;;  %v1387_v8 = vsub.f32 1.5, %v1386_v7  ;;  %v3688_v31 = vadd.f32 %v3459_v55, %v725_v25  ;;  %vm1402_vm12 = vcmp.eq.f32.partialorder %v3643_v54, inf }
 0x1ca   :  { %v2479_v24 = vpop.eup %2478  ;;  %2486 = vpow2.f32 %v1827_v17  ;;  %v1022_v29 = vsel %vm1020_vm7, %v1021_v47, %v1019_v36  ;;  %v1026_v2 = vmul.f32 0.5, %v1025_v19  ;;  %v1405_v25 = vand.u32 2147483648, %v3643_v54 }
 0x1cb   :  { %v2481_v10 = vpop.eup %2480  ;;  %v1625_v41 = vmul.f32 %v1022_v29, %v2992_v1  ;;  %v1388_v39 = vmul.f32 %v2469_v53, %v1387_v8  ;;  %v1396_v61 = vmul.f32 %v2479_v24, %v3643_v54  ;;  %2488 = vrsqrt.f32 %v3670_v52  ;;  %v3692_v53 = vpop.f32.mrf.mxu3 }
 0x1cc   :  { %v2483_v30 = vpop.eup %2482  ;;  %v1880_v33 = vadd.f32 1.0, %v2481_v10  ;;  %v1027_v34 = vsub.f32 1.5, %v1026_v2  ;;  %v3700_v7 = vadd.f32 %v3459_v55, %v803_v13  ;;  %vm1404_vm13 = vcmp.eq.f32.partialorder %v3643_v54, 0.0 }
 0x1cd   :  { %v2485_v49 = vpop.eup %2484  ;;  %v1689_v47 = vsub.f32 0.0, %v1625_v41  ;;  %v1389_v59 = vmul.f32 %v1388_v39, %v3619_v12  ;;  %v1397_v63 = vmul.f32 %v2479_v24, %v1396_v61  ;;  %v1036_v1 = vmul.f32 %v2483_v30, %v3652_v45 }
 0x1ce   :  { %2038 = vst [vmem:[%s4309_s5 + $0x158] sm:$0xff] %v2485_v49  ;;  %2490 = vrcp.f32 %v1880_v33  ;;  %v1028_v50 = vmul.f32 %v2473_v21, %v1027_v34  ;;  %v3711_v13 = vadd.f32 %v3459_v55, %v728_v20  ;;  %vm1042_vm14 = vcmp.eq.f32.partialorder %v3652_v45, inf }
 0x1cf   :  { %v1767_v26 = vmul.f32 1.442695, %v1689_v47  ;;  %v1391_v17 = vsel %vm1390_vm8, %v3619_v12, %v1389_v59  ;;  %v1398_v19 = vmul.f32 0.5, %v1397_v63  ;;  %v1037_v36 = vmul.f32 %v2483_v30, %v1036_v1 }
 0x1d0   :  { %v2487_v8 = vpop.eup %2486  ;;  %v1394_v21 = vsel %vm1392_vm9, %v1393_v35, %v1391_v17  ;;  %v1029_v29 = vmul.f32 %v1028_v50, %v3632_v46  ;;  %2492 = vrsqrt.f32 %v3688_v31  ;;  %vm1044_vm15 = vcmp.eq.f32.partialorder %v3652_v45, 0.0 }
 0x1d1   :  { %v2489_v2 = vpop.eup %2488  ;;  %v1911_v10 = vadd.f32 1.0, %v2487_v8  ;;  %2494 = vpow2.f32 %v1767_v26  ;;  %v1656_v41 = vmul.f32 %v1394_v21, %v2980_v56  ;;  %v1399_v39 = vsub.f32 1.5, %v1398_v19 }
 0x1d2   :  { %v1031_v61 = vsel %vm1030_vm10, %v3632_v46, %v1029_v29  ;;  %v1038_v33 = vmul.f32 0.5, %v1037_v36  ;;  %v1408_v12 = vmul.f32 %v2489_v2, %v3670_v52  ;;  %2496 = vrsqrt.f32 %v3700_v7 }
 0x1d3   :  { %2498 = vrcp.f32 %v1911_v10  ;;  %v1720_v35 = vsub.f32 0.0, %v1656_v41  ;;  %v1034_v20 = vsel %vm1032_vm11, %v1033_v37, %v1031_v61  ;;  %v1400_v34 = vmul.f32 %v2479_v24, %v1399_v39  ;;  %v3729_v37 = vpop.f32.mrf.mxu1  ;;  %v3737_v8 = vpop.f32.mrf.mxu3 }
 0x1d4   :  { %v2491_v49 = vpop.eup %2490  ;;  %v1626_v47 = vmul.f32 %v1034_v20, %v2998_v6  ;;  %v1039_v56 = vsub.f32 1.5, %v1038_v33  ;;  %v1409_v59 = vmul.f32 %v2489_v2, %v1408_v12  ;;  %v1045_v46 = vand.u32 2147483648, %v3652_v45 }
 0x1d5   :  { %2008 = vst [vmem:[%s4309_s5 + $0x68] sm:$0xff] %v2491_v49  ;;  %v1829_v63 = vmul.f32 1.442695, %v1720_v35  ;;  %v1401_v1 = vmul.f32 %v1400_v34, %v3643_v54  ;;  %2500 = vrsqrt.f32 %v3711_v13  ;;  %vm1414_vm0 = vcmp.eq.f32.partialorder %v3670_v52, inf }
 0x1d6   :  { %v2493_v24 = vpop.eup %2492  ;;  %v1690_v50 = vsub.f32 0.0, %v1626_v47  ;;  %v1040_v6 = vmul.f32 %v2483_v30, %v1039_v56  ;;  %v1410_v26 = vmul.f32 0.5, %v1409_v59  ;;  %vm1416_vm1 = vcmp.eq.f32.partialorder %v3670_v52, 0.0 }
 0x1d7   :  { %v2495_v17 = vpop.eup %2494  ;;  %2502 = vpow2.f32 %v1829_v63  ;;  %v1403_v19 = vsel %vm1402_vm12, %v3643_v54, %v1401_v1  ;;  %v1048_v36 = vmul.f32 %v2493_v24, %v3688_v31  ;;  %v1417_v54 = vand.u32 2147483648, %v3670_v52 }
 0x1d8   :  { %v2497_v21 = vpop.eup %2496  ;;  %v1881_v29 = vadd.f32 1.0, %v2495_v17  ;;  %v1769_v10 = vmul.f32 1.442695, %v1690_v50  ;;  %v1406_v30 = vsel %vm1404_vm13, %v1405_v25, %v1403_v19  ;;  %v1041_v41 = vmul.f32 %v1040_v6, %v3652_v45 }
 0x1d9   :  { %v2499_v39 = vpop.eup %2498  ;;  %v1657_v61 = vmul.f32 %v1406_v30, %v2994_v3  ;;  %v1411_v33 = vsub.f32 1.5, %v1410_v26  ;;  %v1049_v12 = vmul.f32 %v2493_v24, %v1048_v36  ;;  %v1420_v35 = vmul.f32 %v2497_v21, %v3700_v7 }
 0x1da   :  { %2039 = vst [vmem:[%s4309_s5 + $0x160] sm:$0xff] %v2499_v39  ;;  %2504 = vrcp.f32 %v1881_v29  ;;  %v1043_v20 = vsel %vm1042_vm14, %v3652_v45, %v1041_v41  ;;  %vm1054_vm2 = vcmp.eq.f32.partialorder %v3688_v31, inf  ;;  %vm1056_vm3 = vcmp.eq.f32.partialorder %v3688_v31, 0.0 }
 0x1db   :  { %2506 = vpow2.f32 %v1769_v10  ;;  %v1721_v25 = vsub.f32 0.0, %v1657_v61  ;;  %v1046_v3 = vsel %vm1044_vm15, %v1045_v46, %v1043_v20  ;;  %v1412_v34 = vmul.f32 %v2489_v2, %v1411_v33  ;;  %v2501_v49 = vpop.eup %2500  ;;  %v3769_v29 = vpop.f32.mrf.mxu1 }
 0x1dc   :  { %v1627_v47 = vmul.f32 %v1046_v3, %v3008_v15  ;;  %v1050_v56 = vmul.f32 0.5, %v1049_v12  ;;  %v1057_v59 = vand.u32 2147483648, %v3688_v31  ;;  %v1421_v63 = vmul.f32 %v2497_v21, %v1420_v35  ;;  %v810_v35 = vpop.f32.mrf.mxu3 }
 0x1dd   :  { %v2503_v1 = vpop.eup %2502  ;;  %v1831_v50 = vmul.f32 1.442695, %v1721_v25  ;;  %v1413_v6 = vmul.f32 %v1412_v34, %v3670_v52  ;;  %v1060_v26 = vmul.f32 %v2501_v49, %v3711_v13  ;;  %v3762_v45 = vadd.f32 %v3459_v55, %v3692_v53 }
 0x1de   :  { %v1912_v2 = vadd.f32 1.0, %v2503_v1  ;;  %v1691_v46 = vsub.f32 0.0, %v1627_v47  ;;  %v1051_v17 = vsub.f32 1.5, %v1050_v56  ;;  %v1422_v15 = vmul.f32 0.5, %v1421_v63 }
 0x1df   :  { %vm1426_vm4 = vcmp.eq.f32.partialorder %v3700_v7, inf  ;;  %2508 = vpow2.f32 %v1831_v50  ;;  %v1415_v19 = vsel %vm1414_vm0, %v3670_v52, %v1413_v6  ;;  %vm1428_vm5 = vcmp.eq.f32.partialorder %v3700_v7, 0.0 }
 0x1e0   :  { %v1061_v36 = vmul.f32 %v2501_v49, %v1060_v26  ;;  %v2505_v10 = vpop.eup %2504  ;;  %2510 = vrcp.f32 %v1912_v2  ;;  %v1771_v53 = vmul.f32 1.442695, %v1691_v46  ;;  %v1418_v30 = vsel %vm1416_vm1, %v1417_v54, %v1415_v19 }
 0x1e1   :  { %v1052_v41 = vmul.f32 %v2493_v24, %v1051_v17  ;;  %v2507_v39 = vpop.eup %2506  ;;  %2009 = vst [vmem:[%s4309_s5 + $0x70] sm:$0xff] %v2505_v10  ;;  %v1658_v61 = vmul.f32 %v1418_v30, %v3002_v11  ;;  %v1423_v33 = vsub.f32 1.5, %v1422_v15  ;;  %2512 = vrsqrt.f32 %v3762_v45 }
 0x1e2   :  { %v1062_v12 = vmul.f32 0.5, %v1061_v36  ;;  %v1882_v20 = vadd.f32 1.0, %v2507_v39  ;;  %2514 = vpow2.f32 %v1771_v53  ;;  %v3781_v52 = vadd.f32 %v3459_v55, %v3729_v37 }
 0x1e3   :  { %v1053_v25 = vmul.f32 %v1052_v41, %v3688_v31  ;;  %v1722_v24 = vsub.f32 0.0, %v1658_v61  ;;  %v1424_v54 = vmul.f32 %v2497_v21, %v1423_v33  ;;  %v1429_v3 = vand.u32 2147483648, %v3700_v7  ;;  %v735_v53 = vpop.f32.mrf.mxu1 }
 0x1e4   :  { %v1063_v34 = vsub.f32 1.5, %v1062_v12  ;;  %2516 = vrcp.f32 %v1882_v20  ;;  %vm1066_vm6 = vcmp.eq.f32.partialorder %v3711_v13, inf  ;;  %vm1068_vm7 = vcmp.eq.f32.partialorder %v3711_v13, 0.0  ;;  %v813_v33 = vpop.f32.mrf.mxu3 }
 0x1e5   :  { %v1055_v11 = vsel %vm1054_vm2, %v3688_v31, %v1053_v25  ;;  %v2509_v47 = vpop.eup %2508  ;;  %v1833_v56 = vmul.f32 1.442695, %v1722_v24  ;;  %v1425_v63 = vmul.f32 %v1424_v54, %v3700_v7  ;;  %v1069_v26 = vand.u32 2147483648, %v3711_v13 }
 0x1e6   :  { %v1058_v37 = vsel %vm1056_vm3, %v1057_v59, %v1055_v11  ;;  %v1064_v21 = vmul.f32 %v2501_v49, %v1063_v34  ;;  %v2511_v1 = vpop.eup %2510  ;;  %v1913_v50 = vadd.f32 1.0, %v2509_v47  ;;  %2518 = vrsqrt.f32 %v3781_v52 }
 0x1e7   :  { %v1628_v6 = vmul.f32 %v1058_v37, %v3019_v23  ;;  %v2513_v2 = vpop.eup %2512  ;;  %2040 = vst [vmem:[%s4309_s5 + $0x168] sm:$0xff] %v2511_v1  ;;  %2520 = vpow2.f32 %v1833_v56  ;;  %v1427_v31 = vsel %vm1426_vm4, %v3700_v7, %v1425_v63  ;;  %v3804_v59 = vadd.f32 %v3459_v55, %v3737_v8 }
 0x1e8   :  { %v1065_v49 = vmul.f32 %v1064_v21, %v3711_v13  ;;  %v2515_v23 = vpop.eup %2514  ;;  %2522 = vrcp.f32 %v1913_v50  ;;  %v1430_v17 = vsel %vm1428_vm5, %v1429_v3, %v1427_v31  ;;  %v1432_v15 = vmul.f32 %v2513_v2, %v3762_v45 }
 0x1e9   :  { %v1692_v46 = vsub.f32 0.0, %v1628_v6  ;;  %v1883_v19 = vadd.f32 1.0, %v2515_v23  ;;  %v1659_v36 = vmul.f32 %v1430_v17, %v3010_v18  ;;  %2524 = vrsqrt.f32 %v3804_v59  ;;  %v4326_v18 = vld [vmem:[#allocation4_spill] sm:$0xff] }
 0x1ea   :  { %v1067_v10 = vsel %vm1066_vm6, %v3711_v13, %v1065_v49  ;;  %v2517_v8 = vpop.eup %2516  ;;  %v1433_v39 = vmul.f32 %v2513_v2, %v1432_v15  ;;  %v3822_v25 = vadd.f32 %v3459_v55, %v3769_v29  ;;  %v3827_v56 = vadd.f32 %v3459_v55, %v810_v35 }
 0x1eb   :  { %v1773_v30 = vmul.f32 1.442695, %v1692_v46  ;;  %v1070_v41 = vsel %vm1068_vm7, %v1069_v26, %v1067_v10  ;;  %2010 = vst [vmem:[%s4309_s5 + $0x78] sm:$0xff] %v2517_v8  ;;  %2526 = vrcp.f32 %v1883_v19  ;;  %v1723_v7 = vsub.f32 0.0, %v1659_v36  ;;  %v738_v15 = vpop.f32.mrf.mxu1 }
 0x1ec   :  { %v1629_v61 = vmul.f32 %v1070_v41, %v4326_v18  ;;  %v2519_v12 = vpop.eup %2518  ;;  %v1434_v20 = vmul.f32 0.5, %v1433_v39  ;;  %vm1438_vm8 = vcmp.eq.f32.partialorder %v3762_v45, inf  ;;  %vm1440_vm9 = vcmp.eq.f32.partialorder %v3762_v45, 0.0  ;;  %v815_v39 = vpop.f32.mrf.mxu3 }
 0x1ed   :  { %2528 = vpow2.f32 %v1773_v30  ;;  %v2521_v24 = vpop.eup %2520  ;;  %v1835_v13 = vmul.f32 1.442695, %v1723_v7  ;;  %v1072_v3 = vmul.f32 %v2519_v12, %v3781_v52  ;;  %v1441_v35 = vand.u32 2147483648, %v3762_v45 }
 0x1ee   :  { %v1693_v54 = vsub.f32 0.0, %v1629_v61  ;;  %v2523_v34 = vpop.eup %2522  ;;  %v1914_v11 = vadd.f32 1.0, %v2521_v24  ;;  %v1435_v47 = vsub.f32 1.5, %v1434_v20  ;;  %2530 = vrsqrt.f32 %v3822_v25  ;;  %v4327_v61 = vld [vmem:[#allocation3_spill] sm:$0xff] }
 0x1ef   :  { %v2525_v37 = vpop.eup %2524  ;;  %2041 = vst [vmem:[%s4309_s5 + $0x170] sm:$0xff] %v2523_v34  ;;  %2532 = vpow2.f32 %v1835_v13  ;;  %v1073_v63 = vmul.f32 %v2519_v12, %v1072_v3  ;;  %vm1078_vm10 = vcmp.eq.f32.partialorder %v3781_v52, inf  ;;  %vm1080_vm11 = vcmp.eq.f32.partialorder %v3781_v52, 0.0 }
 0x1f0   :  { %v1775_v29 = vmul.f32 1.442695, %v1693_v54  ;;  %2534 = vrcp.f32 %v1914_v11  ;;  %v1436_v21 = vmul.f32 %v2513_v2, %v1435_v47  ;;  %v1444_v1 = vmul.f32 %v2525_v37, %v3804_v59 }
 0x1f1   :  { %v2527_v50 = vpop.eup %2526  ;;  %v1074_v6 = vmul.f32 0.5, %v1073_v63  ;;  %v1081_v46 = vand.u32 2147483648, %v3781_v52  ;;  %v3845_v17 = vadd.f32 %v3459_v55, %v735_v53  ;;  %vm1450_vm12 = vcmp.eq.f32.partialorder %v3804_v59, inf }
 0x1f2   :  { %2536 = vpow2.f32 %v1775_v29  ;;  %2011 = vst [vmem:[%s4309_s5 + $0x80] sm:$0xff] %v2527_v50  ;;  %v1437_v31 = vmul.f32 %v1436_v21, %v3762_v45  ;;  %v1445_v2 = vmul.f32 %v2525_v37, %v1444_v1  ;;  %vm1452_vm13 = vcmp.eq.f32.partialorder %v3804_v59, 0.0 }
 0x1f3   :  { %v2529_v26 = vpop.eup %2528  ;;  %2538 = vrsqrt.f32 %v3827_v56  ;;  %v1075_v23 = vsub.f32 1.5, %v1074_v6  ;;  %v3863_v3 = vadd.f32 %v3459_v55, %v813_v33  ;;  %vm1090_vm14 = vcmp.eq.f32.partialorder %v3822_v25, inf }
 0x1f4   :  { %v1884_v49 = vadd.f32 1.0, %v2529_v26  ;;  %v2531_v19 = vpop.eup %2530  ;;  %v1439_v36 = vsel %vm1438_vm8, %v3762_v45, %v1437_v31  ;;  %v1446_v10 = vmul.f32 0.5, %v1445_v2  ;;  %v1453_v45 = vand.u32 2147483648, %v3804_v59  ;;  %v4328_v26 = vld [vmem:[#allocation6_spill] sm:$0xff] }
 0x1f5   :  { %v2533_v8 = vpop.eup %2532  ;;  %v1442_v30 = vsel %vm1440_vm9, %v1441_v35, %v1439_v36  ;;  %v1076_v41 = vmul.f32 %v2519_v12, %v1075_v23  ;;  %v1084_v53 = vmul.f32 %v2531_v19, %v3822_v25  ;;  %v3871_v50 = vadd.f32 %v3459_v55, %v738_v15 }
 0x1f6   :  { %2540 = vrcp.f32 %v1884_v49  ;;  %v2535_v7 = vpop.eup %2534  ;;  %v1915_v18 = vadd.f32 1.0, %v2533_v8  ;;  %v1660_v20 = vmul.f32 %v1442_v30, %v4327_v61  ;;  %v1447_v24 = vsub.f32 1.5, %v1446_v10  ;;  %v740_v8 = vpop.f32.mrf.mxu1 }
 0x1f7   :  { %2542 = vrsqrt.f32 %v3845_v17  ;;  %2042 = vst [vmem:[%s4309_s5 + $0x178] sm:$0xff] %v2535_v7  ;;  %v1077_v54 = vmul.f32 %v1076_v41, %v3781_v52  ;;  %v1085_v12 = vmul.f32 %v2531_v19, %v1084_v53  ;;  %vm1092_vm15 = vcmp.eq.f32.partialorder %v3822_v25, 0.0  ;;  %v4329_v41 = vld [vmem:[#allocation5_spill] sm:$0xff] }
 0x1f8   :  { %v2537_v13 = vpop.eup %2536  ;;  %2544 = vrcp.f32 %v1915_v18  ;;  %v1724_v47 = vsub.f32 0.0, %v1660_v20  ;;  %v1448_v29 = vmul.f32 %v2525_v37, %v1447_v24  ;;  %vm1462_vm0 = vcmp.eq.f32.partialorder %v3827_v56, inf  ;;  %v818_v24 = vpop.f32.mrf.mxu3 }
 0x1f9   :  { %v2539_v34 = vpop.eup %2538  ;;  %v1885_v11 = vadd.f32 1.0, %v2537_v13  ;;  %v1079_v63 = vsel %vm1078_vm10, %v3781_v52, %v1077_v54  ;;  %v1086_v21 = vmul.f32 0.5, %v1085_v12  ;;  %v1093_v52 = vand.u32 2147483648, %v3822_v25 }
 0x1fa   :  { %v1456_v1 = vmul.f32 %v2539_v34, %v3827_v56  ;;  %v1837_v33 = vmul.f32 1.442695, %v1724_v47  ;;  %v1082_v35 = vsel %vm1080_vm11, %v1081_v46, %v1079_v63  ;;  %v1449_v6 = vmul.f32 %v1448_v29, %v3804_v59 }
 0x1fb   :  { %2546 = vrcp.f32 %v1885_v11  ;;  %v1630_v31 = vmul.f32 %v1082_v35, %v4328_v26  ;;  %v1087_v2 = vsub.f32 1.5, %v1086_v21  ;;  %vm1464_vm1 = vcmp.eq.f32.partialorder %v3827_v56, 0.0 }
 0x1fc   :  { %v2541_v37 = vpop.eup %2540  ;;  %v1457_v49 = vmul.f32 %v2539_v34, %v1456_v1  ;;  %2548 = vrsqrt.f32 %v3863_v3  ;;  %v1451_v55 = vsel %vm1450_vm12, %v3804_v59, %v1449_v6  ;;  %vm1102_vm2 = vcmp.eq.f32.partialorder %v3845_v17, inf  ;;  %v4330_v6 = vld [vmem:[#allocation8_spill] sm:$0xff] }
 0x1fd   :  { %v2543_v23 = vpop.eup %2542  ;;  %2012 = vst [vmem:[%s4309_s5 + $0x88] sm:$0xff] %v2541_v37  ;;  %2550 = vpow2.f32 %v1837_v33  ;;  %v1694_v46 = vsub.f32 0.0, %v1630_v31  ;;  %v1454_v15 = vsel %vm1452_vm13, %v1453_v45, %v1451_v55  ;;  %v1088_v36 = vmul.f32 %v2531_v19, %v1087_v2  ;;  %v3899_v19 = vld [vmem:[%s4308_s3] ss:$0 sm:$0xff] }
 0x1fe   :  { %v1458_v10 = vmul.f32 0.5, %v1457_v49  ;;  %v2545_v30 = vpop.eup %2544  ;;  %v1661_v53 = vmul.f32 %v1454_v15, %v4329_v41  ;;  %v1096_v7 = vmul.f32 %v2543_v23, %v3845_v17  ;;  %2552 = vrsqrt.f32 %v3871_v50  ;;  %v4331_v41 = vld [vmem:[#allocation7_spill] sm:$0xff] }
 0x1ff   :  { %2043 = vst [vmem:[%s4309_s5 + $0x180] sm:$0xff] %v2545_v30  ;;  %v1777_v18 = vmul.f32 1.442695, %v1694_v46  ;;  %v1089_v59 = vmul.f32 %v1088_v36, %v3822_v25  ;;  %v3902_v20 = vadd.f32 %v3899_v19, %v815_v39  ;;  %v1465_v45 = vand.u32 2147483648, %v3827_v56 }
 0x200   :  { %v1459_v61 = vsub.f32 1.5, %v1458_v10  ;;  %v1725_v54 = vsub.f32 0.0, %v1661_v53  ;;  %v1097_v12 = vmul.f32 %v2543_v23, %v1096_v7  ;;  %vm1104_vm3 = vcmp.eq.f32.partialorder %v3845_v17, 0.0 }
 0x201   :  { %v2547_v13 = vpop.eup %2546  ;;  %2554 = vpow2.f32 %v1777_v18  ;;  %v1091_v47 = vsel %vm1090_vm14, %v3822_v25, %v1089_v59  ;;  %v1105_v2 = vand.u32 2147483648, %v3845_v17  ;;  %vm1474_vm4 = vcmp.eq.f32.partialorder %v3863_v3, inf  ;;  %v743_v18 = vpop.f32.mrf.mxu1 }
 0x202   :  { %v2549_v11 = vpop.eup %2548  ;;  %2013 = vst [vmem:[%s4309_s5 + $0x90] sm:$0xff] %v2547_v13  ;;  %v1460_v39 = vmul.f32 %v2539_v34, %v1459_v61  ;;  %v1839_v63 = vmul.f32 1.442695, %v1725_v54  ;;  %v1094_v21 = vsel %vm1092_vm15, %v1093_v52, %v1091_v47  ;;  %v1098_v1 = vmul.f32 0.5, %v1097_v12  ;;  %v3937_v47 = vpop.f32.mrf.mxu3 }
 0x203   :  { %v2551_v29 = vpop.eup %2550  ;;  %v1468_v33 = vmul.f32 %v2549_v11, %v3863_v3  ;;  %v1631_v37 = vmul.f32 %v1094_v21, %v4330_v6  ;;  %2556 = vrsqrt.f32 %v3902_v20  ;;  %vm1476_vm5 = vcmp.eq.f32.partialorder %v3863_v3, 0.0 }
 0x204   :  { %v1916_v35 = vadd.f32 1.0, %v2551_v29  ;;  %v1461_v26 = vmul.f32 %v1460_v39, %v3827_v56  ;;  %v2553_v34 = vpop.eup %2552  ;;  %2558 = vpow2.f32 %v1839_v63  ;;  %v1099_v31 = vsub.f32 1.5, %v1098_v1 }
 0x205   :  { %v1469_v49 = vmul.f32 %v2549_v11, %v1468_v33  ;;  %v1695_v25 = vsub.f32 0.0, %v1631_v37  ;;  %v1108_v52 = vmul.f32 %v2553_v34, %v3871_v50  ;;  %v3932_v54 = vadd.f32 %v3899_v19, %v740_v8 }
 0x206   :  { %2560 = vrcp.f32 %v1916_v35  ;;  %v1463_v55 = vsel %vm1462_vm0, %v3827_v56, %v1461_v26  ;;  %v1100_v15 = vmul.f32 %v2543_v23, %v1099_v31  ;;  %v3935_v12 = vadd.f32 %v3899_v19, %v818_v24  ;;  %v4332_v24 = vld [vmem:[#allocation9_spill] sm:$0xff] }
 0x207   :  { %v1466_v46 = vsel %vm1464_vm1, %v1465_v45, %v1463_v55  ;;  %v1470_v36 = vmul.f32 0.5, %v1469_v49  ;;  %v2555_v10 = vpop.eup %2554  ;;  %v1779_v30 = vmul.f32 1.442695, %v1695_v25  ;;  %v1109_v7 = vmul.f32 %v2553_v34, %v1108_v52 }
 0x208   :  { %v1662_v53 = vmul.f32 %v1466_v46, %v4331_v41  ;;  %v1886_v59 = vadd.f32 1.0, %v2555_v10  ;;  %v1101_v61 = vmul.f32 %v1100_v15, %v3845_v17  ;;  %vm1114_vm6 = vcmp.eq.f32.partialorder %v3871_v50, inf }
 0x209   :  { %v1471_v13 = vsub.f32 1.5, %v1470_v36  ;;  %v2557_v56 = vpop.eup %2556  ;;  %2562 = vpow2.f32 %v1779_v30  ;;  %v1110_v45 = vmul.f32 0.5, %v1109_v7  ;;  %v1117_v15 = vand.u32 2147483648, %v3871_v50  ;;  %v745_v7 = vpop.f32.mrf.mxu1 }
 0x20a   :  { %v1726_v23 = vsub.f32 0.0, %v1662_v53  ;;  %v2559_v39 = vpop.eup %2558  ;;  %2564 = vrcp.f32 %v1886_v59  ;;  %v1103_v29 = vsel %vm1102_vm2, %v3845_v17, %v1101_v61  ;;  %v1480_v21 = vmul.f32 %v2557_v56, %v3902_v20 }
 0x20b   :  { %v1472_v63 = vmul.f32 %v2549_v11, %v1471_v13  ;;  %v1917_v1 = vadd.f32 1.0, %v2559_v39  ;;  %v1106_v35 = vsel %vm1104_vm3, %v1105_v2, %v1103_v29  ;;  %v1111_v6 = vsub.f32 1.5, %v1110_v45  ;;  %v823_v29 = vpop.f32.mrf.mxu3 }
 0x20c   :  { %v2561_v8 = vpop.eup %2560  ;;  %v1841_v33 = vmul.f32 1.442695, %v1726_v23  ;;  %v1632_v37 = vmul.f32 %v1106_v35, %v4332_v24  ;;  %v1481_v31 = vmul.f32 %v2557_v56, %v1480_v21  ;;  %2566 = vrsqrt.f32 %v3932_v54 }
 0x20d   :  { %2044 = vst [vmem:[%s4309_s5 + $0x188] sm:$0xff] %v2561_v8  ;;  %v1473_v26 = vmul.f32 %v1472_v63, %v3863_v3  ;;  %2568 = vrcp.f32 %v1917_v1  ;;  %v1477_v11 = vand.u32 2147483648, %v3863_v3  ;;  %v1112_v49 = vmul.f32 %v2553_v34, %v1111_v6 }
 0x20e   :  { %2570 = vpow2.f32 %v1841_v33  ;;  %v1696_v17 = vsub.f32 0.0, %v1632_v37  ;;  %v1482_v25 = vmul.f32 0.5, %v1481_v31  ;;  %vm1116_vm7 = vcmp.eq.f32.partialorder %v3871_v50, 0.0 }
 0x20f   :  { %v1475_v2 = vsel %vm1474_vm4, %v3863_v3, %v1473_v26  ;;  %v2563_v55 = vpop.eup %2562  ;;  %v1113_v46 = vmul.f32 %v1112_v49, %v3871_v50  ;;  %2572 = vrsqrt.f32 %v3935_v12  ;;  %v3970_v53 = vadd.f32 %v3899_v19, %v743_v18 }
 0x210   :  { %v1478_v52 = vsel %vm1476_vm5, %v1477_v11, %v1475_v2  ;;  %v2565_v34 = vpop.eup %2564  ;;  %v1887_v36 = vadd.f32 1.0, %v2563_v55  ;;  %v1781_v10 = vmul.f32 1.442695, %v1696_v17  ;;  %v1483_v41 = vsub.f32 1.5, %v1482_v25 }
 0x211   :  { %v1663_v30 = vmul.f32 %v1478_v52, %v3077_v51  ;;  %2014 = vst [vmem:[%s4309_s5 + $0x98] sm:$0xff] %v2565_v34  ;;  %v1115_v3 = vsel %vm1114_vm6, %v3871_v50, %v1113_v46  ;;  %vm1486_vm8 = vcmp.eq.f32.partialorder %v3902_v20, inf  ;;  %vm1488_vm9 = vcmp.eq.f32.partialorder %v3902_v20, 0.0  ;;  %v748_v34 = vpop.f32.mrf.mxu1 }
 0x212   :  { %v2567_v59 = vpop.eup %2566  ;;  %2574 = vrcp.f32 %v1887_v36  ;;  %v1118_v13 = vsel %vm1116_vm7, %v1117_v15, %v1115_v3  ;;  %v1484_v51 = vmul.f32 %v2557_v56, %v1483_v41  ;;  %v1489_v8 = vand.u32 2147483648, %v3902_v20 }
 0x213   :  { %v1727_v61 = vsub.f32 0.0, %v1663_v30  ;;  %v2569_v23 = vpop.eup %2568  ;;  %2576 = vpow2.f32 %v1781_v10  ;;  %v1633_v45 = vmul.f32 %v1118_v13, %v3129_v32  ;;  %v1120_v39 = vmul.f32 %v2567_v59, %v3932_v54 }
 0x214   :  { %v2571_v63 = vpop.eup %2570  ;;  %2045 = vst [vmem:[%s4309_s5 + $0x190] sm:$0xff] %v2569_v23  ;;  %v1485_v18 = vmul.f32 %v1484_v51, %v3902_v20  ;;  %2578 = vrsqrt.f32 %v3970_v53  ;;  %v3986_v6 = vadd.f32 %v3899_v19, %v3937_v47  ;;  %vm1126_vm10 = vcmp.eq.f32.partialorder %v3932_v54, inf }
 0x215   :  { %v1843_v50 = vmul.f32 1.442695, %v1727_v61  ;;  %v2573_v56 = vpop.eup %2572  ;;  %v1918_v21 = vadd.f32 1.0, %v2571_v63  ;;  %v1697_v32 = vsub.f32 0.0, %v1633_v45  ;;  %v1121_v1 = vmul.f32 %v2567_v59, %v1120_v39 }
 0x216   :  { %v1487_v33 = vsel %vm1486_vm8, %v3902_v20, %v1485_v18  ;;  %v1492_v35 = vmul.f32 %v2573_v56, %v3935_v12  ;;  %vm1128_vm11 = vcmp.eq.f32.partialorder %v3932_v54, 0.0  ;;  %v1129_v47 = vand.u32 2147483648, %v3932_v54 }
 0x217   :  { %2580 = vpow2.f32 %v1843_v50  ;;  %v1783_v24 = vmul.f32 1.442695, %v1697_v32  ;;  %v1490_v37 = vsel %vm1488_vm9, %v1489_v8, %v1487_v33  ;;  %v1122_v26 = vmul.f32 0.5, %v1121_v1 }
 0x218   :  { %2582 = vrcp.f32 %v1918_v21  ;;  %v2575_v31 = vpop.eup %2574  ;;  %v1664_v11 = vmul.f32 %v1490_v37, %v3115_v4  ;;  %v1493_v49 = vmul.f32 %v2573_v56, %v1492_v35  ;;  %v3997_v52 = vadd.f32 %v3899_v19, %v745_v7 }
 0x219   :  { %2584 = vrsqrt.f32 %v3986_v6  ;;  %v2577_v17 = vpop.eup %2576  ;;  %2015 = vst [vmem:[%s4309_s5 + $0xa0] sm:$0xff] %v2575_v31  ;;  %v1123_v20 = vsub.f32 1.5, %v1122_v26  ;;  %vm1498_vm12 = vcmp.eq.f32.partialorder %v3935_v12, inf  ;;  %vm1500_vm13 = vcmp.eq.f32.partialorder %v3935_v12, 0.0 }
 0x21a   :  { %2586 = vpow2.f32 %v1783_v24  ;;  %v2579_v2 = vpop.eup %2578  ;;  %v1888_v25 = vadd.f32 1.0, %v2577_v17  ;;  %v1728_v55 = vsub.f32 0.0, %v1664_v11  ;;  %v1494_v4 = vmul.f32 0.5, %v1493_v49 }
 0x21b   :  { %v1124_v46 = vmul.f32 %v2567_v59, %v1123_v20  ;;  %v1132_v15 = vmul.f32 %v2579_v2, %v3970_v53  ;;  %v4003_v41 = vadd.f32 %v3899_v19, %v823_v29  ;;  %v825_v59 = vpop.f32.mrf.mxu3  ;;  %v1501_v45 = vand.u32 2147483648, %v3935_v12 }
 0x21c   :  { %2588 = vrcp.f32 %v1888_v25  ;;  %v1845_v10 = vmul.f32 1.442695, %v1728_v55  ;;  %v1495_v30 = vsub.f32 1.5, %v1494_v4  ;;  %v4012_v39 = vadd.f32 %v3899_v19, %v748_v34 }
 0x21d   :  { %v2581_v36 = vpop.eup %2580  ;;  %v1125_v7 = vmul.f32 %v1124_v46, %v3932_v54  ;;  %v1133_v13 = vmul.f32 %v2579_v2, %v1132_v15  ;;  %2590 = vrsqrt.f32 %v3997_v52  ;;  %vm1138_vm14 = vcmp.eq.f32.partialorder %v3970_v53, inf }
 0x21e   :  { %v2583_v3 = vpop.eup %2582  ;;  %v1919_v61 = vadd.f32 1.0, %v2581_v36  ;;  %2592 = vpow2.f32 %v1845_v10  ;;  %v1496_v23 = vmul.f32 %v2573_v56, %v1495_v30  ;;  %vm1140_vm15 = vcmp.eq.f32.partialorder %v3970_v53, 0.0  ;;  %v750_v30 = vpop.f32.mrf.mxu1 }
 0x21f   :  { %v2585_v51 = vpop.eup %2584  ;;  %2046 = vst [vmem:[%s4309_s5 + $0x198] sm:$0xff] %v2583_v3  ;;  %v1127_v63 = vsel %vm1126_vm10, %v3932_v54, %v1125_v7  ;;  %v1134_v50 = vmul.f32 0.5, %v1133_v13  ;;  %v1141_v54 = vand.u32 2147483648, %v3970_v53  ;;  %vm1510_vm0 = vcmp.eq.f32.partialorder %v3986_v6, inf }
 0x220   :  { %v2587_v29 = vpop.eup %2586  ;;  %2594 = vrcp.f32 %v1919_v61  ;;  %v1504_v18 = vmul.f32 %v2585_v51, %v3986_v6  ;;  %v1130_v32 = vsel %vm1128_vm11, %v1129_v47, %v1127_v63  ;;  %v1497_v56 = vmul.f32 %v1496_v23, %v3935_v12 }
 0x221   :  { %v1889_v21 = vadd.f32 1.0, %v2587_v29  ;;  %2596 = vrsqrt.f32 %v4003_v41  ;;  %v1634_v8 = vmul.f32 %v1130_v32, %v3168_v58  ;;  %v1135_v1 = vsub.f32 1.5, %v1134_v50 }
 0x222   :  { %v1505_v33 = vmul.f32 %v2585_v51, %v1504_v18  ;;  %v2589_v35 = vpop.eup %2588  ;;  %v1499_v24 = vsel %vm1498_vm12, %v3935_v12, %v1497_v56  ;;  %vm1512_vm1 = vcmp.eq.f32.partialorder %v3986_v6, 0.0  ;;  %v4056_v63 = vadd.f32 %v3899_v19, %v825_v59 }
 0x223   :  { %2598 = vrcp.f32 %v1889_v21  ;;  %v2591_v37 = vpop.eup %2590  ;;  %2016 = vst [vmem:[%s4309_s5 + $0xa8] sm:$0xff] %v2589_v35  ;;  %v1698_v58 = vsub.f32 0.0, %v1634_v8  ;;  %v1502_v26 = vsel %vm1500_vm13, %v1501_v45, %v1499_v24  ;;  %v1136_v31 = vmul.f32 %v2579_v2, %v1135_v1  ;;  %v828_v3 = vpop.f32.mrf.mxu3 }
 0x224   :  { %v1506_v11 = vmul.f32 0.5, %v1505_v33  ;;  %v2593_v49 = vpop.eup %2592  ;;  %v1665_v17 = vmul.f32 %v1502_v26, %v3157_v14  ;;  %v1144_v20 = vmul.f32 %v2591_v37, %v3997_v52  ;;  %2600 = vrsqrt.f32 %v4012_v39 }
 0x225   :  { %v1920_v25 = vadd.f32 1.0, %v2593_v49  ;;  %v1785_v55 = vmul.f32 1.442695, %v1698_v58  ;;  %v1137_v4 = vmul.f32 %v1136_v31, %v3970_v53  ;;  %v1513_v14 = vand.u32 2147483648, %v3986_v6 }
 0x226   :  { %v2595_v47 = vpop.eup %2594  ;;  %v1507_v46 = vsub.f32 1.5, %v1506_v11  ;;  %v1729_v12 = vsub.f32 0.0, %v1665_v17  ;;  %v1145_v2 = vmul.f32 %v2591_v37, %v1144_v20  ;;  %vm1150_vm2 = vcmp.eq.f32.partialorder %v3997_v52, inf }
 0x227   :  { %v2597_v15 = vpop.eup %2596  ;;  %2047 = vst [vmem:[%s4309_s5 + $0x1a0] sm:$0xff] %v2595_v47  ;;  %2602 = vrcp.f32 %v1920_v25  ;;  %v1139_v34 = vsel %vm1138_vm14, %v3970_v53, %v1137_v4  ;;  %v4060_v53 = vadd.f32 %v3899_v19, %v750_v30  ;;  %vm1152_vm3 = vcmp.eq.f32.partialorder %v3997_v52, 0.0  ;;  %v753_v4 = vpop.f32.mrf.mxu1 }
 0x228   :  { %v1508_v36 = vmul.f32 %v2585_v51, %v1507_v46  ;;  %v1516_v10 = vmul.f32 %v2597_v15, %v4003_v41  ;;  %2604 = vpow2.f32 %v1785_v55  ;;  %v1847_v7 = vmul.f32 1.442695, %v1729_v12 }
 0x229   :  { %v2599_v61 = vpop.eup %2598  ;;  %v1142_v13 = vsel %vm1140_vm15, %v1141_v54, %v1139_v34  ;;  %v1146_v23 = vmul.f32 0.5, %v1145_v2  ;;  %vm1522_vm4 = vcmp.eq.f32.partialorder %v4003_v41, inf  ;;  %vm1524_vm5 = vcmp.eq.f32.partialorder %v4003_v41, 0.0 }
 0x22a   :  { %2017 = vst [vmem:[%s4309_s5 + $0xb0] sm:$0xff] %v2599_v61  ;;  %v1635_v45 = vmul.f32 %v1142_v13, %v3211_v42  ;;  %v1509_v29 = vmul.f32 %v1508_v36, %v3986_v6  ;;  %v1517_v51 = vmul.f32 %v2597_v15, %v1516_v10  ;;  %v2601_v50 = vpop.eup %2600  ;;  %2606 = vpow2.f32 %v1847_v7 }
 0x22b   :  { %v1147_v18 = vsub.f32 1.5, %v1146_v23  ;;  %v1156_v56 = vmul.f32 %v2601_v50, %v4012_v39  ;;  %2608 = vrsqrt.f32 %v4056_v63  ;;  %v4083_v20 = vadd.f32 %v3899_v19, %v828_v3  ;;  %v830_v46 = vpop.f32.mrf.mxu3 }
 0x22c   :  { %v1699_v21 = vsub.f32 0.0, %v1635_v45  ;;  %v1511_v32 = vsel %vm1510_vm0, %v3986_v6, %v1509_v29  ;;  %v1518_v42 = vmul.f32 0.5, %v1517_v51  ;;  %v1153_v6 = vand.u32 2147483648, %v3997_v52 }
 0x22d   :  { %v1514_v59 = vsel %vm1512_vm1, %v1513_v14, %v1511_v32  ;;  %v1148_v8 = vmul.f32 %v2591_v37, %v1147_v18  ;;  %v2603_v1 = vpop.eup %2602  ;;  %v1157_v54 = vmul.f32 %v2601_v50, %v1156_v56  ;;  %2610 = vrsqrt.f32 %v4060_v53 }
 0x22e   :  { %v1787_v33 = vmul.f32 1.442695, %v1699_v21  ;;  %v1666_v35 = vmul.f32 %v1514_v59, %v3199_v48  ;;  %v1519_v24 = vsub.f32 1.5, %v1518_v42  ;;  %v2605_v58 = vpop.eup %2604  ;;  %2048 = vst [vmem:[%s4309_s5 + $0x1a8] sm:$0xff] %v2603_v1  ;;  %v1525_v2 = vand.u32 2147483648, %v4003_v41 }
 0x22f   :  { %v1149_v26 = vmul.f32 %v1148_v8, %v3997_v52  ;;  %v1890_v37 = vadd.f32 1.0, %v2605_v58  ;;  %v1158_v17 = vmul.f32 0.5, %v1157_v54  ;;  %vm1162_vm6 = vcmp.eq.f32.partialorder %v4012_v39, inf }
 0x230   :  { %2612 = vpow2.f32 %v1787_v33  ;;  %v1730_v31 = vsub.f32 0.0, %v1666_v35  ;;  %v1520_v11 = vmul.f32 %v2597_v15, %v1519_v24  ;;  %v2607_v48 = vpop.eup %2606  ;;  %vm1164_vm7 = vcmp.eq.f32.partialorder %v4012_v39, 0.0 }
 0x231   :  { %v1151_v49 = vsel %vm1150_vm2, %v3997_v52, %v1149_v26  ;;  %2614 = vrcp.f32 %v1890_v37  ;;  %v1921_v47 = vadd.f32 1.0, %v2607_v48  ;;  %v2609_v15 = vpop.eup %2608  ;;  %v1159_v34 = vsub.f32 1.5, %v1158_v17  ;;  %v755_v37 = vpop.f32.mrf.mxu1 }
 0x232   :  { %v1849_v25 = vmul.f32 1.442695, %v1730_v31  ;;  %v1154_v55 = vsel %vm1152_vm3, %v1153_v6, %v1151_v49  ;;  %v1521_v14 = vmul.f32 %v1520_v11, %v4003_v41  ;;  %v1528_v36 = vmul.f32 %v2609_v15, %v4056_v63 }
 0x233   :  { %v1636_v12 = vmul.f32 %v1154_v55, %v3265_v28  ;;  %2616 = vrcp.f32 %v1921_v47  ;;  %v2611_v10 = vpop.eup %2610  ;;  %v1160_v28 = vmul.f32 %v2601_v50, %v1159_v34  ;;  %v1165_v21 = vand.u32 2147483648, %v4012_v39  ;;  %v833_v31 = vpop.f32.mrf.mxu3 }
 0x234   :  { %2618 = vpow2.f32 %v1849_v25  ;;  %v1523_v30 = vsel %vm1522_vm4, %v4003_v41, %v1521_v14  ;;  %v1529_v7 = vmul.f32 %v2609_v15, %v1528_v36  ;;  %v1168_v13 = vmul.f32 %v2611_v10, %v4060_v53 }
 0x235   :  { %v1700_v52 = vsub.f32 0.0, %v1636_v12  ;;  %v1526_v61 = vsel %vm1524_vm5, %v1525_v2, %v1523_v30  ;;  %2620 = vrsqrt.f32 %v4083_v20  ;;  %v1161_v51 = vmul.f32 %v1160_v28, %v4012_v39 }
 0x236   :  { %v2613_v3 = vpop.eup %2612  ;;  %v1667_v29 = vmul.f32 %v1526_v61, %v3247_v62  ;;  %v1530_v32 = vmul.f32 0.5, %v1529_v7  ;;  %v1169_v50 = vmul.f32 %v2611_v10, %v1168_v13  ;;  %v4104_v42 = vadd.f32 %v3899_v19, %v753_v4 }
 0x237   :  { %v1891_v23 = vadd.f32 1.0, %v2613_v3  ;;  %v1789_v45 = vmul.f32 1.442695, %v1700_v52  ;;  %v2615_v18 = vpop.eup %2614  ;;  %v1163_v62 = vsel %vm1162_vm6, %v4012_v39, %v1161_v51  ;;  %vm1534_vm8 = vcmp.eq.f32.partialorder %v4056_v63, inf }
 0x238   :  { %2018 = vst [vmem:[%s4309_s5 + $0xb8] sm:$0xff] %v2615_v18  ;;  %v1731_v41 = vsub.f32 0.0, %v1667_v29  ;;  %v1166_v59 = vsel %vm1164_vm7, %v1165_v21, %v1163_v62  ;;  %v1531_v8 = vsub.f32 1.5, %v1530_v32  ;;  %v1170_v1 = vmul.f32 0.5, %v1169_v50 }
 0x239   :  { %2622 = vrcp.f32 %v1891_v23  ;;  %v2617_v56 = vpop.eup %2616  ;;  %v1637_v24 = vmul.f32 %v1166_v59, %v3314_v38  ;;  %v4121_v54 = vadd.f32 %v3899_v19, %v830_v46  ;;  %vm1536_vm9 = vcmp.eq.f32.partialorder %v4056_v63, 0.0  ;;  %v758_v50 = vpop.f32.mrf.mxu1 }
 0x23a   :  { %2624 = vpow2.f32 %v1789_v45  ;;  %v2619_v33 = vpop.eup %2618  ;;  %2049 = vst [vmem:[%s4309_s5 + $0x1b0] sm:$0xff] %v2617_v56  ;;  %v1851_v35 = vmul.f32 1.442695, %v1731_v41  ;;  %v1532_v6 = vmul.f32 %v2609_v15, %v1531_v8  ;;  %v1171_v39 = vsub.f32 1.5, %v1170_v1 }
 0x23b   :  { %2626 = vrsqrt.f32 %v4104_v42  ;;  %v2621_v58 = vpop.eup %2620  ;;  %v1922_v26 = vadd.f32 1.0, %v2619_v33  ;;  %v1701_v11 = vsub.f32 0.0, %v1637_v24  ;;  %v1537_v48 = vand.u32 2147483648, %v4056_v63  ;;  %v835_v41 = vpop.f32.mrf.mxu3 }
 0x23c   :  { %2628 = vpow2.f32 %v1851_v35  ;;  %v1540_v49 = vmul.f32 %v2621_v58, %v4083_v20  ;;  %v1533_v38 = vmul.f32 %v1532_v6, %v4056_v63  ;;  %v1172_v17 = vmul.f32 %v2611_v10, %v1171_v39 }
 0x23d   :  { %2630 = vrcp.f32 %v1922_v26  ;;  %vm1174_vm10 = vcmp.eq.f32.partialorder %v4060_v53, inf  ;;  %v1791_v25 = vmul.f32 1.442695, %v1701_v11  ;;  %vm1176_vm11 = vcmp.eq.f32.partialorder %v4060_v53, 0.0 }
 0x23e   :  { %v1541_v55 = vmul.f32 %v2621_v58, %v1540_v49  ;;  %2632 = vrsqrt.f32 %v4121_v54  ;;  %v1535_v46 = vsel %vm1534_vm8, %v4056_v63, %v1533_v38  ;;  %v1173_v15 = vmul.f32 %v1172_v17, %v4060_v53 }
 0x23f   :  { %v2623_v47 = vpop.eup %2622  ;;  %v1177_v12 = vand.u32 2147483648, %v4060_v53  ;;  %v4139_v14 = vadd.f32 %v3899_v19, %v755_v37  ;;  %2634 = vpow2.f32 %v1791_v25  ;;  %v1538_v36 = vsel %vm1536_vm9, %v1537_v48, %v1535_v46 }
 0x240   :  { %v2625_v4 = vpop.eup %2624  ;;  %2019 = vst [vmem:[%s4309_s5 + $0xc0] sm:$0xff] %v2623_v47  ;;  %v1542_v10 = vmul.f32 0.5, %v1541_v55  ;;  %v1668_v52 = vmul.f32 %v1538_v36, %v3296_v44  ;;  %v1175_v30 = vsel %vm1174_vm10, %v4060_v53, %v1173_v15  ;;  %vm1546_vm12 = vcmp.eq.f32.partialorder %v4083_v20, inf }
 0x241   :  { %v2627_v2 = vpop.eup %2626  ;;  %v1892_v34 = vadd.f32 1.0, %v2625_v4  ;;  %2636 = vrsqrt.f32 %v4139_v14  ;;  %v1178_v61 = vsel %vm1176_vm11, %v1177_v12, %v1175_v30  ;;  %v4157_v18 = vadd.f32 %v3899_v19, %v833_v31 }
 0x242   :  { %v1180_v28 = vmul.f32 %v2627_v2, %v4104_v42  ;;  %v2629_v3 = vpop.eup %2628  ;;  %v1543_v7 = vsub.f32 1.5, %v1542_v10  ;;  %v1732_v23 = vsub.f32 0.0, %v1668_v52  ;;  %v1638_v45 = vmul.f32 %v1178_v61, %v3356_v60  ;;  %v760_v61 = vpop.f32.mrf.mxu1 }
 0x243   :  { %2638 = vrcp.f32 %v1892_v34  ;;  %v2631_v13 = vpop.eup %2630  ;;  %v1923_v63 = vadd.f32 1.0, %v2629_v3  ;;  %v1549_v56 = vand.u32 2147483648, %v4083_v20  ;;  %vm1548_vm13 = vcmp.eq.f32.partialorder %v4083_v20, 0.0 }
 0x244   :  { %v1181_v44 = vmul.f32 %v2627_v2, %v1180_v28  ;;  %v2633_v29 = vpop.eup %2632  ;;  %2050 = vst [vmem:[%s4309_s5 + $0x1b8] sm:$0xff] %v2631_v13  ;;  %v1544_v51 = vmul.f32 %v2621_v58, %v1543_v7  ;;  %v1853_v53 = vmul.f32 1.442695, %v1732_v23  ;;  %v1702_v21 = vsub.f32 0.0, %v1638_v45  ;;  %v838_v7 = vpop.f32.mrf.mxu3 }
 0x245   :  { %2640 = vrcp.f32 %v1923_v63  ;;  %v2635_v62 = vpop.eup %2634  ;;  %v1552_v59 = vmul.f32 %v2633_v29, %v4121_v54  ;;  %vm1186_vm14 = vcmp.eq.f32.partialorder %v4104_v42, inf  ;;  %vm1188_vm15 = vcmp.eq.f32.partialorder %v4104_v42, 0.0 }
 0x246   :  { %v1182_v32 = vmul.f32 0.5, %v1181_v44  ;;  %v1545_v60 = vmul.f32 %v1544_v51, %v4083_v20  ;;  %2642 = vrsqrt.f32 %v4157_v18  ;;  %v1893_v1 = vadd.f32 1.0, %v2635_v62 }
 0x247   :  { %v2637_v8 = vpop.eup %2636  ;;  %2644 = vpow2.f32 %v1853_v53  ;;  %v1793_v33 = vmul.f32 1.442695, %v1702_v21  ;;  %v1553_v26 = vmul.f32 %v2633_v29, %v1552_v59  ;;  %v1189_v38 = vand.u32 2147483648, %v4104_v42 }
 0x248   :  { %v1183_v35 = vsub.f32 1.5, %v1182_v32  ;;  %v1547_v58 = vsel %vm1546_vm12, %v4083_v20, %v1545_v60  ;;  %v1192_v6 = vmul.f32 %v2637_v8, %v4139_v14  ;;  %2646 = vrcp.f32 %v1893_v1 }
 0x249   :  { %v2639_v24 = vpop.eup %2638  ;;  %v1550_v39 = vsel %vm1548_vm13, %v1549_v56, %v1547_v58  ;;  %2648 = vpow2.f32 %v1793_v33  ;;  %v1554_v11 = vmul.f32 0.5, %v1553_v26  ;;  %v4177_v17 = vadd.f32 %v3899_v19, %v758_v50 }
 0x24a   :  { %2020 = vst [vmem:[%s4309_s5 + $0xc8] sm:$0xff] %v2639_v24  ;;  %v1184_v37 = vmul.f32 %v2627_v2, %v1183_v35  ;;  %v1669_v31 = vmul.f32 %v1550_v39, %v3340_v5  ;;  %v1193_v48 = vmul.f32 %v2637_v8, %v1192_v6  ;;  %vm1558_vm0 = vcmp.eq.f32.partialorder %v4121_v54, inf }
 0x24b   :  { %v2641_v49 = vpop.eup %2640  ;;  %v1555_v55 = vsub.f32 1.5, %v1554_v11  ;;  %2650 = vrsqrt.f32 %v4177_v17  ;;  %v4189_v12 = vadd.f32 %v3899_v19, %v835_v41  ;;  %vm1560_vm1 = vcmp.eq.f32.partialorder %v4121_v54, 0.0  ;;  %v4333_v41 = vld [vmem:[#allocation10_spill] sm:$0xff] }
 0x24c   :  { %v1185_v20 = vmul.f32 %v1184_v37, %v4104_v42  ;;  %v2643_v47 = vpop.eup %2642  ;;  %2051 = vst [vmem:[%s4309_s5 + $0x1c0] sm:$0xff] %v2641_v49  ;;  %v1733_v25 = vsub.f32 0.0, %v1669_v31  ;;  %v1194_v5 = vmul.f32 0.5, %v1193_v48  ;;  %vm1198_vm2 = vcmp.eq.f32.partialorder %v4139_v14, inf }
 0x24d   :  { %v2645_v4 = vpop.eup %2644  ;;  %v1564_v15 = vmul.f32 %v2643_v47, %v4157_v18  ;;  %v1556_v10 = vmul.f32 %v2633_v29, %v1555_v55  ;;  %v4206_v51 = vadd.f32 %v3899_v19, %v760_v61  ;;  %v1201_v60 = vand.u32 2147483648, %v4139_v14 }
 0x24e   :  { %v1187_v46 = vsel %vm1186_vm14, %v4104_v42, %v1185_v20  ;;  %v1924_v2 = vadd.f32 1.0, %v2645_v4  ;;  %v1855_v34 = vmul.f32 1.442695, %v1733_v25  ;;  %v2647_v52 = vpop.eup %2646  ;;  %v1195_v28 = vsub.f32 1.5, %v1194_v5 }
 0x24f   :  { %v1190_v36 = vsel %vm1188_vm15, %v1189_v38, %v1187_v46  ;;  %v1565_v3 = vmul.f32 %v2643_v47, %v1564_v15  ;;  %v2649_v13 = vpop.eup %2648  ;;  %2021 = vst [vmem:[%s4309_s5 + $0xd0] sm:$0xff] %v2647_v52  ;;  %v1557_v63 = vmul.f32 %v1556_v10, %v4121_v54  ;;  %v1561_v42 = vand.u32 2147483648, %v4121_v54 }
 0x250   :  { %v1639_v30 = vmul.f32 %v1190_v36, %v3406_v27  ;;  %2652 = vrcp.f32 %v1924_v2  ;;  %v1894_v23 = vadd.f32 1.0, %v2649_v13  ;;  %v1196_v45 = vmul.f32 %v2637_v8, %v1195_v28 }
 0x251   :  { %2654 = vpow2.f32 %v1855_v34  ;;  %v1559_v44 = vsel %vm1558_vm0, %v4121_v54, %v1557_v63  ;;  %v1566_v29 = vmul.f32 0.5, %v1565_v3  ;;  %v2651_v53 = vpop.eup %2650  ;;  %vm1200_vm3 = vcmp.eq.f32.partialorder %v4139_v14, 0.0 }
 0x252   :  { %v1703_v27 = vsub.f32 0.0, %v1639_v30  ;;  %2656 = vrsqrt.f32 %v4189_v12  ;;  %v1562_v32 = vsel %vm1560_vm1, %v1561_v42, %v1559_v44  ;;  %v1197_v50 = vmul.f32 %v1196_v45, %v4139_v14 }
 0x253   :  { %2658 = vrcp.f32 %v1894_v23  ;;  %v1670_v62 = vmul.f32 %v1562_v32, %v4333_v41  ;;  %v1567_v56 = vsub.f32 1.5, %v1566_v29  ;;  %v1204_v59 = vmul.f32 %v2651_v53, %v4177_v17 }
 0x254   :  { %v1795_v21 = vmul.f32 1.442695, %v1703_v27  ;;  %v1199_v8 = vsel %vm1198_vm2, %v4139_v14, %v1197_v50  ;;  %v4219_v1 = vadd.f32 %v3899_v19, %v838_v7  ;;  %vm1570_vm4 = vcmp.eq.f32.partialorder %v4157_v18, inf }
 0x255   :  { %v1734_v33 = vsub.f32 0.0, %v1670_v62  ;;  %v1202_v35 = vsel %vm1200_vm3, %v1201_v60, %v1199_v8  ;;  %v1568_v24 = vmul.f32 %v2643_v47, %v1567_v56  ;;  %v1205_v58 = vmul.f32 %v2651_v53, %v1204_v59  ;;  %v840_v47 = vpop.f32.mrf.mxu3 }
 0x256   :  { %2660 = vpow2.f32 %v1795_v21  ;;  %v2653_v54 = vpop.eup %2652  ;;  %v1640_v6 = vmul.f32 %v1202_v35, %v3447_v40  ;;  %v1573_v20 = vand.u32 2147483648, %v4157_v18  ;;  %vm1572_vm5 = vcmp.eq.f32.partialorder %v4157_v18, 0.0 }
 0x257   :  { %v2655_v26 = vpop.eup %2654  ;;  %2052 = vst [vmem:[%s4309_s5 + $0x1c8] sm:$0xff] %v2653_v54  ;;  %2662 = vrsqrt.f32 %v4206_v51  ;;  %v1857_v37 = vmul.f32 1.442695, %v1734_v33  ;;  %v1569_v31 = vmul.f32 %v1568_v24, %v4157_v18  ;;  %v1206_v11 = vmul.f32 0.5, %v1205_v58 }
 0x258   :  { %v2657_v14 = vpop.eup %2656  ;;  %v1925_v39 = vadd.f32 1.0, %v2655_v26  ;;  %v1704_v49 = vsub.f32 0.0, %v1640_v6  ;;  %2664 = vrsqrt.f32 %v4219_v1  ;;  %v4238_v36 = vadd.f32 %v3899_v19, %v840_v47 }
 0x259   :  { %v2659_v48 = vpop.eup %2658  ;;  %v1576_v38 = vmul.f32 %v2657_v14, %v4189_v12  ;;  %v1571_v40 = vsel %vm1570_vm4, %v4157_v18, %v1569_v31  ;;  %v1207_v25 = vsub.f32 1.5, %v1206_v11  ;;  %vm1210_vm6 = vcmp.eq.f32.partialorder %v4177_v17, inf }
 0x25a   :  { %2022 = vst [vmem:[%s4309_s5 + $0xd8] sm:$0xff] %v2659_v48  ;;  %2666 = vrcp.f32 %v1925_v39  ;;  %v1797_v5 = vmul.f32 1.442695, %v1704_v49  ;;  %v1574_v4 = vsel %vm1572_vm5, %v1573_v20, %v1571_v40  ;;  %vm1212_vm7 = vcmp.eq.f32.partialorder %v4177_v17, 0.0 }
 0x25b   :  { %2668 = vpow2.f32 %v1857_v37  ;;  %v1577_v46 = vmul.f32 %v2657_v14, %v1576_v38  ;;  %v1671_v2 = vmul.f32 %v1574_v4, %v3435_v57  ;;  %v1208_v34 = vmul.f32 %v2651_v53, %v1207_v25 }
 0x25c   :  { %v2661_v55 = vpop.eup %2660  ;;  %2670 = vpow2.f32 %v1797_v5  ;;  %v1213_v57 = vand.u32 2147483648, %v4177_v17  ;;  %vm1582_vm8 = vcmp.eq.f32.partialorder %v4189_v12, inf  ;;  %vm1584_vm9 = vcmp.eq.f32.partialorder %v4189_v12, 0.0 }
 0x25d   :  { %v1895_v15 = vadd.f32 1.0, %v2661_v55  ;;  %v2663_v10 = vpop.eup %2662  ;;  %v1578_v52 = vmul.f32 0.5, %v1577_v46  ;;  %v1735_v18 = vsub.f32 0.0, %v1671_v2  ;;  %v1209_v30 = vmul.f32 %v1208_v34, %v4177_v17 }
 0x25e   :  { %v1216_v28 = vmul.f32 %v2663_v10, %v4206_v51  ;;  %v2665_v3 = vpop.eup %2664  ;;  %vm1222_vm10 = vcmp.eq.f32.partialorder %v4206_v51, inf  ;;  %v1225_v39 = vand.u32 2147483648, %v4206_v51  ;;  %vm1224_vm11 = vcmp.eq.f32.partialorder %v4206_v51, 0.0 }
 0x25f   :  { %2672 = vrcp.f32 %v1895_v15  ;;  %v1579_v61 = vsub.f32 1.5, %v1578_v52  ;;  %v1859_v7 = vmul.f32 1.442695, %v1735_v18  ;;  %v1211_v13 = vsel %vm1210_vm6, %v4177_v17, %v1209_v30 }
 0x260   :  { %2674 = vrsqrt.f32 %v4238_v36  ;;  %v2667_v19 = vpop.eup %2666  ;;  %v1217_v63 = vmul.f32 %v2663_v10, %v1216_v28  ;;  %v1588_v42 = vmul.f32 %v2665_v3, %v4219_v1  ;;  %v1214_v27 = vsel %vm1212_vm7, %v1213_v57, %v1211_v13 }
 0x261   :  { %v2669_v23 = vpop.eup %2668  ;;  %2053 = vst [vmem:[%s4309_s5 + $0x1d0] sm:$0xff] %v2667_v19  ;;  %v1580_v45 = vmul.f32 %v2657_v14, %v1579_v61  ;;  %2676 = vpow2.f32 %v1859_v7  ;;  %v1641_v29 = vmul.f32 %v1214_v27, %v3509_v43  ;;  %v1585_v17 = vand.u32 2147483648, %v4189_v12 }
 0x262   :  { %v1926_v44 = vadd.f32 1.0, %v2669_v23  ;;  %v1218_v53 = vmul.f32 0.5, %v1217_v63  ;;  %v2671_v21 = vpop.eup %2670  ;;  %v1589_v50 = vmul.f32 %v2665_v3, %v1588_v42  ;;  %vm1594_vm12 = vcmp.eq.f32.partialorder %v4219_v1, inf }
 0x263   :  { %v1581_v32 = vmul.f32 %v1580_v45, %v4189_v12  ;;  %v1896_v62 = vadd.f32 1.0, %v2671_v21  ;;  %v1705_v60 = vsub.f32 0.0, %v1641_v29  ;;  %v1597_v25 = vand.u32 2147483648, %v4219_v1 }
 0x264   :  { %2678 = vrcp.f32 %v1926_v44  ;;  %v1219_v56 = vsub.f32 1.5, %v1218_v53  ;;  %v1590_v8 = vmul.f32 0.5, %v1589_v50  ;;  %vm1596_vm13 = vcmp.eq.f32.partialorder %v4219_v1, 0.0 }
 0x265   :  { %v2673_v41 = vpop.eup %2672  ;;  %v1583_v43 = vsel %vm1582_vm8, %v4189_v12, %v1581_v32  ;;  %2680 = vrcp.f32 %v1896_v62  ;;  %v1799_v54 = vmul.f32 1.442695, %v1705_v60  ;;  %vm1606_vm14 = vcmp.eq.f32.partialorder %v4238_v36, inf }
 0x266   :  { %v2675_v59 = vpop.eup %2674  ;;  %2023 = vst [vmem:[%s4309_s5 + $0xe0] sm:$0xff] %v2673_v41  ;;  %v1586_v33 = vsel %vm1584_vm9, %v1585_v17, %v1583_v43  ;;  %v1220_v35 = vmul.f32 %v2663_v10, %v1219_v56  ;;  %v1591_v58 = vsub.f32 1.5, %v1590_v8  ;;  %vm1608_vm15 = vcmp.eq.f32.partialorder %v4238_v36, 0.0 }
 0x267   :  { %v1672_v24 = vmul.f32 %v1586_v33, %v3487_v22  ;;  %v1600_v26 = vmul.f32 %v2675_v59, %v4238_v36  ;;  %v2677_v6 = vpop.eup %2676  ;;  %2682 = vpow2.f32 %v1799_v54 }
 0x268   :  { %v1221_v14 = vmul.f32 %v1220_v35, %v4206_v51  ;;  %v1927_v37 = vadd.f32 1.0, %v2677_v6  ;;  %v1592_v31 = vmul.f32 %v2665_v3, %v1591_v58  ;;  %v1609_v3 = vand.u32 2147483648, %v4238_v36 }
 0x269   :  { %v1736_v12 = vsub.f32 0.0, %v1672_v24  ;;  %v1601_v11 = vmul.f32 %v2675_v59, %v1600_v26 }
 0x26a   :  { %v2679_v48 = vpop.eup %2678  ;;  %v1223_v49 = vsel %vm1222_vm10, %v4206_v51, %v1221_v14  ;;  %2684 = vrcp.f32 %v1927_v37  ;;  %v1593_v38 = vmul.f32 %v1592_v31, %v4219_v1 }
 0x26b   :  { %2054 = vst [vmem:[%s4309_s5 + $0x1d8] sm:$0xff] %v2679_v48  ;;  %v1861_v22 = vmul.f32 1.442695, %v1736_v12  ;;  %v1226_v20 = vsel %vm1224_vm11, %v1225_v39, %v1223_v49  ;;  %v2681_v47 = vpop.eup %2680  ;;  %v1602_v55 = vmul.f32 0.5, %v1601_v11 }
 0x26c   :  { %v1642_v40 = vmul.f32 %v1226_v20, %v3555_v0  ;;  %2024 = vst [vmem:[%s4309_s5 + $0xe8] sm:$0xff] %v2681_v47  ;;  %v1595_v51 = vsel %vm1594_vm12, %v4219_v1, %v1593_v38 }
 0x26d   :  { %2686 = vpow2.f32 %v1861_v22  ;;  %v2683_v5 = vpop.eup %2682  ;;  %v1598_v46 = vsel %vm1596_vm13, %v1597_v25, %v1595_v51  ;;  %v1603_v15 = vsub.f32 1.5, %v1602_v55 }
 0x26e   :  { %v1706_v4 = vsub.f32 0.0, %v1642_v40  ;;  %v1897_v2 = vadd.f32 1.0, %v2683_v5  ;;  %v1673_v0 = vmul.f32 %v1598_v46, %v3544_v9 }
 0x26f   :  { %v1604_v10 = vmul.f32 %v2675_v59, %v1603_v15 }
 0x270   :  { %v1801_v34 = vmul.f32 1.442695, %v1706_v4  ;;  %v2685_v52 = vpop.eup %2684  ;;  %2688 = vrcp.f32 %v1897_v2  ;;  %v1737_v18 = vsub.f32 0.0, %v1673_v0 }
 0x271   :  { %2055 = vst [vmem:[%s4309_s5 + $0x1e0] sm:$0xff] %v2685_v52  ;;  %v1605_v30 = vmul.f32 %v1604_v10, %v4238_v36 }
 0x272   :  { %2690 = vpow2.f32 %v1801_v34  ;;  %v1863_v28 = vmul.f32 1.442695, %v1737_v18 }
 0x273   :  { %v2687_v1 = vpop.eup %2686  ;;  %v1607_v9 = vsel %vm1606_vm14, %v4238_v36, %v1605_v30 }
 0x274   :  { %v1928_v57 = vadd.f32 1.0, %v2687_v1  ;;  %2692 = vpow2.f32 %v1863_v28  ;;  %v1610_v61 = vsel %vm1608_vm15, %v1609_v3, %v1607_v9 }
 0x275   :  { %v1674_v19 = vmul.f32 %v1610_v61, %v3593_v16 }
 0x276   :  { %2694 = vrcp.f32 %v1928_v57  ;;  %v2689_v7 = vpop.eup %2688 }
 0x277   :  { %2025 = vst [vmem:[%s4309_s5 + $0xf0] sm:$0xff] %v2689_v7  ;;  %v1738_v63 = vsub.f32 0.0, %v1674_v19 }
 0x278   :  { %v2691_v13 = vpop.eup %2690 }
 0x279   :  { %v1898_v42 = vadd.f32 1.0, %v2691_v13  ;;  %v1865_v23 = vmul.f32 1.442695, %v1738_v63 }
 0x27a   :  { %v2693_v27 = vpop.eup %2692 }
 0x27b   :  { %2696 = vrcp.f32 %v1898_v42  ;;  %v1929_v44 = vadd.f32 1.0, %v2693_v27 }
 0x27c   :  { %v2695_v45 = vpop.eup %2694  ;;  %2698 = vpow2.f32 %v1865_v23 }
 0x27d   :  { %2056 = vst [vmem:[%s4309_s5 + $0x1e8] sm:$0xff] %v2695_v45  ;;  %2700 = vrcp.f32 %v1929_v44 }
 0x281   :  { %v2697_v16 = vpop.eup %2696 }
 0x282   :  { %v2699_v36 = vpop.eup %2698  ;;  %2026 = vst [vmem:[%s4309_s5 + $0xf8] sm:$0xff] %v2697_v16 }
 0x283   :  { %v1930_v29 = vadd.f32 1.0, %v2699_v36  ;;  %v2701_v53 = vpop.eup %2700 }
 0x284   :  { %2057 = vst [vmem:[%s4309_s5 + $0x1f0] sm:$0xff] %v2701_v53 }
 0x285   :  { %2702 = vrcp.f32 %v1930_v29 }
 0x28b   :  { %v2703_v21 = vpop.eup %2702 }
 0x28c   :  { %2058 = vst [vmem:[%s4309_s5 + $0x1f8] sm:$0xff] %v2703_v21 }

</bundles_post_ra>
